<compile_context>
chip_gen: v7x
topology: tpu7x:2x2x1
jax: 0.10.0
libtpu: 0.0.40
codegen_flags: <defaults>
</compile_context>

<pallas_src>
import math

import jax
import jax.numpy as jnp
from jax import lax
from jax.experimental import pallas as pl
from jax.experimental.pallas import tpu as pltpu

_MB = 1024 * 1024


# ----------------------------- small helpers -----------------------------

def _softplus(x):
    return jnp.maximum(x, 0.0) + jnp.log1p(jnp.exp(-jnp.abs(x)))


def _round_tile(dim, pref, quantum):
    """Largest multiple of `quantum` <= pref that divides dim; else the full dim."""
    if dim <= pref:
        return dim
    t = (pref // quantum) * quantum
    while t >= quantum:
        if dim % t == 0:
            return t
        t -= quantum
    return dim


def _cparams(dim_sem, vmem_hint_bytes=0):
    """CompilerParams; only raise the scoped VMEM limit when the blocks need it."""
    kw = dict(dimension_semantics=dim_sem)
    if vmem_hint_bytes > 24 * _MB:
        kw["vmem_limit_bytes"] = int(min(vmem_hint_bytes * 1.5, 96 * _MB))
    return pltpu.CompilerParams(**kw)


def _composed_proj_weight(p):
    """Fuse dt_proj into x_proj: [dt_w @ x_proj_w[:R] ; x_proj_w[R:]] -> (K, d_inner+2N, d_inner)."""
    R = p['dt_projs_weight'].shape[-1]
    w_dt = jnp.einsum('kdr,krc->kdc', p['dt_projs_weight'], p['x_proj_weight'][:, :R, :])
    return jnp.concatenate([w_dt, p['x_proj_weight'][:, R:, :]], axis=1)


def _orientation_proj_weight(p, d_inner, N):
    """Per-orientation composed weight with the fwd/rev direction outputs concatenated.

    Returns (w_cat, d_pad): w_cat is (2, d_inner, 2*d_pad) where lanes [r*d_pad : r*d_pad+d_out]
    hold [dts ; Bs ; Cs] for rev=r of that orientation (zero padded to a 128-lane multiple).
    """
    w_comb = _composed_proj_weight(p)                       # (K, d_out, d_inner)
    d_out = d_inner + 2 * N
    d_pad = -(-d_out // 128) * 128
    w_t = jnp.transpose(w_comb, (0, 2, 1))                  # (K, d_inner, d_out)
    w_t = jnp.pad(w_t, ((0, 0), (0, 0), (0, d_pad - d_out)))
    w_cat = jnp.stack([jnp.concatenate([w_t[0], w_t[2]], axis=-1),   # orientation 0: dirs 0 / 2
                       jnp.concatenate([w_t[1], w_t[3]], axis=-1)],  # orientation 1: dirs 1 / 3
                      axis=0)                               # (2, d_inner, 2*d_pad)
    return w_cat, d_pad


# ----------------------------- in_proj: one matmul, two direct outputs -----------------------------

def _in_proj_kernel(a_ref, wx_ref, wz_ref, ox_ref, oz_ref, accx_ref, accz_ref):
    @pl.when(pl.program_id(1) == 0)
    def _():
        accx_ref[...] = jnp.zeros_like(accx_ref)
        accz_ref[...] = jnp.zeros_like(accz_ref)

    a = a_ref[...]
    accx_ref[...] += jnp.dot(a, wx_ref[...], preferred_element_type=jnp.float32)
    accz_ref[...] += jnp.dot(a, wz_ref[...], preferred_element_type=jnp.float32)

    @pl.when(pl.program_id(1) == pl.num_programs(1) - 1)
    def _():
        ox_ref[...] = accx_ref[...].astype(ox_ref.dtype)   # bf16 x-half (feeds bf16 conv)
        oz_ref[...] = accz_ref[...]                        # f32 z-half (gate path)


def pallas_in_proj(x2d, w_full, d_inner):
    M, Kd = x2d.shape
    wx = jnp.transpose(w_full[:d_inner]).astype(jnp.bfloat16)   # (Kd, d_inner)
    wz = jnp.transpose(w_full[d_inner:]).astype(jnp.bfloat16)   # (Kd, d_inner)
    tm = _round_tile(M, 256, 8)
    tk = _round_tile(Kd, 512, 128)
    hint = 2 * (tm * tk * 2 + 2 * tk * d_inner * 2 + tm * d_inner * (2 + 4)) + 2 * tm * d_inner * 4
    return pl.pallas_call(
        _in_proj_kernel,
        out_shape=(jax.ShapeDtypeStruct((M, d_inner), jnp.bfloat16),
                   jax.ShapeDtypeStruct((M, d_inner), jnp.float32)),
        grid=(M // tm, Kd // tk),
        in_specs=[pl.BlockSpec((tm, tk), lambda m, k: (m, k)),
                  pl.BlockSpec((tk, d_inner), lambda m, k: (k, 0)),
                  pl.BlockSpec((tk, d_inner), lambda m, k: (k, 0))],
        out_specs=(pl.BlockSpec((tm, d_inner), lambda m, k: (m, 0)),
                   pl.BlockSpec((tm, d_inner), lambda m, k: (m, 0))),
        scratch_shapes=[pltpu.VMEM((tm, d_inner), jnp.float32),
                        pltpu.VMEM((tm, d_inner), jnp.float32)],
        compiler_params=_cparams(("parallel", "arbitrary"), hint),
    )(x2d.astype(jnp.bfloat16), wx, wz)


# ----------------------------- depthwise 3x3 conv + SiLU (bf16 in, f32 out) -----------------------------

def _dwconv_silu_kernel(xp_ref, w_ref, b_ref, o_ref):
    Hh, Ww, Cc = o_ref.shape
    w = w_ref[...].astype(jnp.float32)
    acc = jnp.zeros((Hh, Ww, Cc), jnp.float32)
    for i in range(3):
        for j in range(3):
            acc = acc + xp_ref[i:i + Hh, j:j + Ww, :].astype(jnp.float32) * w[i:i + 1, j:j + 1, :]
    acc = acc + b_ref[...]
    o_ref[...] = acc * jax.nn.sigmoid(acc)


def pallas_dwconv_silu(x_nhwc_bf16, w_hwc_bf16, bias_f32):
    B, H, W, C = x_nhwc_bf16.shape
    xp = jnp.pad(x_nhwc_bf16, ((0, 0), (1, 1), (1, 1), (0, 0)))
    tc = _round_tile(C, 256, 128)
    hint = 2 * ((H + 2) * (W + 2) * tc * 2 + H * W * tc * 4) + 9 * tc * 2
    return pl.pallas_call(
        _dwconv_silu_kernel,
        out_shape=jax.ShapeDtypeStruct((B, H, W, C), jnp.float32),
        grid=(B, C // tc),
        in_specs=[
            pl.BlockSpec((None, H + 2, W + 2, tc), lambda b, c: (b, 0, 0, c)),
            pl.BlockSpec((3, 3, tc), lambda b, c: (0, 0, c)),
            pl.BlockSpec((1, 1, tc), lambda b, c: (0, 0, c)),
        ],
        out_specs=pl.BlockSpec((None, H, W, tc), lambda b, c: (b, 0, 0, c)),
        compiler_params=_cparams(("parallel", "parallel"), hint),
    )(xp, w_hwc_bf16, bias_f32.reshape(1, 1, C))


# ----------------------------- orientation projection (fused x_proj + dt_proj, fwd+rev concat) ---------

def _dir_proj_kernel(a_ref, w_ref, o_ref):
    o_ref[...] = jnp.dot(a_ref[...], w_ref[...], preferred_element_type=jnp.float32)


def pallas_dir_proj(xs_or2, w_cat):
    # xs_or2: (2, M, d_inner) f32;  w_cat: (2, d_inner, 2*d_pad) f32
    _, M, Din = xs_or2.shape
    _, _, Dout2 = w_cat.shape
    tm = _round_tile(M, 512, 8)
    hint = 2 * (tm * Din * 2 + Din * Dout2 * 2 + tm * Dout2 * 4)
    return pl.pallas_call(
        _dir_proj_kernel,
        out_shape=jax.ShapeDtypeStruct((2, M, Dout2), jnp.float32),
        grid=(2, M // tm),
        in_specs=[
            pl.BlockSpec((None, tm, Din), lambda o, m: (o, m, 0)),
            pl.BlockSpec((None, Din, Dout2), lambda o, m: (o, 0, 0)),
        ],
        out_specs=pl.BlockSpec((None, tm, Dout2), lambda o, m: (o, m, 0)),
        compiler_params=_cparams(("parallel", "parallel"), hint),
    )(xs_or2.astype(jnp.bfloat16), w_cat.astype(jnp.bfloat16))


# ----------------------------- selective scan (fwd + rev fused per orientation) -----------------------------

def _scan_kernel(u_ref, proj_ref, A_ref, D_ref, bias_ref, y_ref,
                 dA_scr, dBu_scr, xs_scr):
    # u_ref : (L, C)              proj_ref : (L, 2*d_pad)   (lanes [r*d_pad:...] = [dts|Bs|Cs] of rev=r)
    # A_ref : (2, N, C)           D_ref, bias_ref : (2, 1, C)
    # y_ref : (L, C)  (fwd + rev accumulated)      scratches : (T, N, C)
    L, Cd = u_ref.shape
    N = A_ref.shape[1]
    d_pad = proj_ref.shape[1] // 2
    T = dA_scr.shape[0]
    nchunks = L // T
    U = 4 if T % 4 == 0 else (2 if T % 2 == 0 else 1)

    for r in (0, 1):                      # r=0: forward direction, r=1: reverse direction (static)
        base = r * d_pad
        A = A_ref[r]                      # (N, C)   d_inner on lanes
        Dv = D_ref[r]                     # (1, C)
        bias = bias_ref[r]                # (1, C)

        def chunk_body(c, x, r=r, base=base, A=A, Dv=Dv, bias=bias):
            # contiguous data window for this logical chunk of the scan
            start = c * T if r == 0 else L - (c + 1) * T
            if T % 8 == 0:
                start = pl.multiple_of(start, T)

            u_c = u_ref[pl.ds(start, T), :]                              # (T, C)
            pr = proj_ref[pl.ds(start, T), pl.ds(base, d_pad)]           # (T, d_pad)
            dt_c = pr[:, :Cd]                                            # (T, C)
            B_c = pr[:, Cd:Cd + N]                                       # (T, N)
            C_c = pr[:, Cd + N:Cd + 2 * N]                               # (T, N)
            d_c = _softplus(dt_c + bias)                                 # (T, C)

            dA_scr[...] = jnp.exp(d_c[:, None, :] * A[None, :, :])       # (T, N, C)
            dBu_scr[...] = (d_c * u_c)[:, None, :] * B_c[:, :, None]     # (T, N, C)

            def step(si, x):
                for t in range(U):                                       # manual unroll
                    s = si * U + t
                    row = s if r == 0 else T - 1 - s                     # static direction
                    x = dA_scr[row] * x + dBu_scr[row]
                    xs_scr[row] = x
                return x

            x = lax.fori_loop(0, T // U, step, x)

            # vectorized readout over the chunk: y = sum_N(x * C) + u * D
            y_c = jnp.sum(xs_scr[...] * C_c[:, :, None], axis=1) + u_c * Dv
            if r == 0:
                y_ref[pl.ds(start, T), :] = y_c
            else:
                y_ref[pl.ds(start, T), :] += y_c                         # accumulate rev into fwd
            return x

        lax.fori_loop(0, nchunks, chunk_body, jnp.zeros((N, Cd), jnp.float32))


def pallas_selective_scan(xs_or, proj4, A_s, D_s, bias_s, *, chunk=32):
    # xs_or: (2, B, L, C) f32   proj4: (2, B, L, 2*d_pad) f32
    # A_s: (2, 2, N, C)   D_s, bias_s: (2, 2, 1, C)       (axis0 = orientation, axis1 = rev)
    _, Bb, L, Cd = xs_or.shape
    N = A_s.shape[2]
    Dp2 = proj4.shape[-1]
    T = chunk if (L % chunk == 0) else L
    scr_bytes = 3 * T * N * Cd * 4
    hint = 2 * (L * Cd * 4 + L * Dp2 * 4 + L * Cd * 4) + scr_bytes
    return pl.pallas_call(
        _scan_kernel,
        out_shape=jax.ShapeDtypeStruct((2, Bb, L, Cd), jnp.float32),
        grid=(Bb, 2),
        in_specs=[
            pl.BlockSpec((None, None, L, Cd), lambda b, o: (o, b, 0, 0)),
            pl.BlockSpec((None, None, L, Dp2), lambda b, o: (o, b, 0, 0)),
            pl.BlockSpec((None, 2, N, Cd), lambda b, o: (o, 0, 0, 0)),
            pl.BlockSpec((None, 2, 1, Cd), lambda b, o: (o, 0, 0, 0)),
            pl.BlockSpec((None, 2, 1, Cd), lambda b, o: (o, 0, 0, 0)),
        ],
        out_specs=pl.BlockSpec((None, None, L, Cd), lambda b, o: (o, b, 0, 0)),
        scratch_shapes=[
            pltpu.VMEM((T, N, Cd), jnp.float32),   # exp(delta*A) for one chunk
            pltpu.VMEM((T, N, Cd), jnp.float32),   # delta*B*u    for one chunk
            pltpu.VMEM((T, N, Cd), jnp.float32),   # chunk states for vectorized readout
        ],
        compiler_params=_cparams(("parallel", "parallel"), hint),
    )(xs_or, proj4, A_s, D_s, bias_s)


# ----------------------------- fused (y_hw + y_wh) + LayerNorm + SiLU(z) gate + out_proj -----------------------------

def _ln_gate_proj_kernel(yhw_ref, ywh_ref, z_ref, g_ref, b_ref, w_ref, o_ref):
    y = yhw_ref[...] + ywh_ref[...]
    mu = jnp.mean(y, axis=-1, keepdims=True)
    yc = y - mu
    var = jnp.mean(yc * yc, axis=-1, keepdims=True)
    ln = yc * lax.rsqrt(var + 1e-5) * g_ref[...] + b_ref[...]
    z = z_ref[...]
    gated = ln * (z * jax.nn.sigmoid(z))
    o_ref[...] = jnp.dot(gated.astype(jnp.bfloat16), w_ref[...],
                         preferred_element_type=jnp.float32)


def pallas_ln_gate_proj(y2, y_wh_t, z3, gamma, beta, w):
    # y2: (2, B, L, Di) scan output (index 0 = HW orientation); y_wh_t: (B, L, Di) WH folded back to HW
    _, Bb, L, Di = y2.shape
    Dm = w.shape[1]
    tl = _round_tile(L, 256, 8)
    hint = 2 * (3 * tl * Di * 4 + Di * Dm * 2 + tl * Dm * 4)
    return pl.pallas_call(
        _ln_gate_proj_kernel,
        out_shape=jax.ShapeDtypeStruct((Bb, L, Dm), jnp.float32),
        grid=(Bb, L // tl),
        in_specs=[
            pl.BlockSpec((None, None, tl, Di), lambda b, l: (0, b, l, 0)),
            pl.BlockSpec((None, tl, Di), lambda b, l: (b, l, 0)),
            pl.BlockSpec((None, tl, Di), lambda b, l: (b, l, 0)),
            pl.BlockSpec((1, Di), lambda b, l: (0, 0)),
            pl.BlockSpec((1, Di), lambda b, l: (0, 0)),
            pl.BlockSpec((Di, Dm), lambda b, l: (0, 0)),
        ],
        out_specs=pl.BlockSpec((None, tl, Dm), lambda b, l: (b, l, 0)),
        compiler_params=_cparams(("parallel", "parallel"), hint),
    )(y2, y_wh_t, z3, gamma.reshape(1, Di), beta.reshape(1, Di), w.astype(jnp.bfloat16))


# ----------------------------- SS2D forward -----------------------------

def ss2d_forward(x, p, *, chunk=32):
    B, H, W, Cm = x.shape                     # Cm = d_model
    d_inner = p['conv_b'].shape[0]
    N = p['A_logs'].shape[-1]
    K = 4
    L = H * W
    M = B * L

    # in_proj (Linear, bias=False) -> x-half (bf16) and z-half (f32) directly
    xin_bf, z = pallas_in_proj(x.reshape(M, Cm), p['in_proj_w'], d_inner)
    xin_bf = xin_bf.reshape(B, H, W, d_inner)

    # depthwise conv 3x3 + SiLU (bf16 activations/weights, f32 accumulate)
    xc = pallas_dwconv_silu(xin_bf, p['conv_w'].astype(jnp.bfloat16), p['conv_b'])

    # two scan orientations; reverse directions are handled inside the scan kernel
    x_hw = xc.reshape(B, L, d_inner)                                        # l = h*W + w
    x_wh = jnp.transpose(xc, (0, 2, 1, 3)).reshape(B, L, d_inner)           # l = w*H + h
    xs_or = jnp.stack([x_hw, x_wh], axis=0)                                 # (2, B, L, C) f32

    # fused x_proj + dt_proj; fwd/rev weights concatenated per orientation (one matmul each)
    w_cat, d_pad = _orientation_proj_weight(p, d_inner, N)                  # (2, d_inner, 2*d_pad)
    proj = pallas_dir_proj(xs_or.reshape(2, M, d_inner), w_cat)             # (2, M, 2*d_pad) f32
    proj = proj.reshape(2, B, L, 2 * d_pad)

    # per-(orientation, rev) scan parameters; original direction order k = 2*rev + orientation
    A_t = -jnp.exp(p['A_logs']).reshape(K, d_inner, N).transpose(0, 2, 1)   # (K, N, C)
    A_s = A_t.reshape(2, 2, N, d_inner).transpose(1, 0, 2, 3)               # (o, r, N, C)
    D_s = p['Ds'].reshape(2, 2, 1, d_inner).transpose(1, 0, 2, 3)           # (o, r, 1, C)
    bias_s = p['dt_projs_bias'].reshape(2, 2, 1, d_inner).transpose(1, 0, 2, 3)

    y2 = pallas_selective_scan(xs_or, proj, A_s, D_s, bias_s, chunk=chunk)  # (2, B, L, C)

    # fold the WH orientation back to HW raster order; merge + LN + gate + out_proj fused
    y_wh_t = jnp.transpose(y2[1].reshape(B, W, H, d_inner), (0, 2, 1, 3)).reshape(B, L, d_inner)
    out = pallas_ln_gate_proj(y2, y_wh_t, z.reshape(B, L, d_inner),
                              p['out_norm_g'], p['out_norm_b'], p['out_proj_w'].T)
    # dropout p=0 -> identity
    return out.reshape(B, H, W, Cm)


# ----------------------------- pure-JAX reference (mirrors kernel precision) -----------------------------

def ss2d_reference(x, p):
    B, H, W, Cm = x.shape
    d_inner = p['conv_b'].shape[0]
    N = p['A_logs'].shape[-1]
    K = 4
    L = H * W

    def mm(a, b):
        return jnp.dot(a.astype(jnp.bfloat16), b.astype(jnp.bfloat16),
                       preferred_element_type=jnp.float32)

    xz = mm(x.reshape(-1, Cm), p['in_proj_w'].T)
    xin = xz[:, :d_inner].astype(jnp.bfloat16).reshape(B, H, W, d_inner)   # bf16 x-half
    z = xz[:, d_inner:]

    w_c = p['conv_w'].astype(jnp.bfloat16).astype(jnp.float32)
    xp = jnp.pad(xin, ((0, 0), (1, 1), (1, 1), (0, 0))).astype(jnp.float32)
    acc = jnp.zeros((B, H, W, d_inner), jnp.float32)
    for i in range(3):
        for j in range(3):
            acc = acc + xp[:, i:i + H, j:j + W, :] * w_c[i, j]
    acc = acc + p['conv_b']
    xc = acc * jax.nn.sigmoid(acc)

    x_hw = xc.reshape(B, L, d_inner)
    x_wh = jnp.transpose(xc, (0, 2, 1, 3)).reshape(B, L, d_inner)
    xs = jnp.stack([x_hw, x_wh, jnp.flip(x_hw, axis=1), jnp.flip(x_wh, axis=1)], axis=1)

    w_comb = _composed_proj_weight(p)
    dbl = jnp.einsum('bkld,kcd->bklc', xs.astype(jnp.bfloat16),
                     w_comb.astype(jnp.bfloat16),
                     preferred_element_type=jnp.float32)
    dts = dbl[..., :d_inner]
    Bs = dbl[..., d_inner:d_inner + N]
    Cs = dbl[..., d_inner + N:]

    A = -jnp.exp(p['A_logs']).reshape(K, d_inner, N)
    delta = _softplus(dts + p['dt_projs_bias'].reshape(1, K, 1, d_inner))   # (B,K,L,D)
    u = xs
    dA = jnp.exp(delta[..., None] * A[None, :, None, :, :])                 # (B,K,L,D,N)
    dBu = (delta * u)[..., None] * Bs[..., None, :]                         # (B,K,L,D,N)

    def step(xst, inp):
        dA_l, dBu_l, C_l = inp
        xst = dA_l * xst + dBu_l
        yl = jnp.sum(xst * C_l[..., None, :], axis=-1)
        return xst, yl

    xst0 = jnp.zeros((B, K, d_inner, N), jnp.float32)
    _, ys = lax.scan(step, xst0, (jnp.moveaxis(dA, 2, 0), jnp.moveaxis(dBu, 2, 0),
                                  jnp.moveaxis(Cs, 2, 0)))
    y = jnp.moveaxis(ys, 0, 2) + u * p['Ds'].reshape(1, K, 1, d_inner)      # (B,K,L,D)

    y0 = y[:, 0]
    y2 = jnp.flip(y[:, 2], axis=1)
    y1 = jnp.transpose(y[:, 1].reshape(B, W, H, d_inner), (0, 2, 1, 3)).reshape(B, L, d_inner)
    y3 = jnp.transpose(jnp.flip(y[:, 3], axis=1).reshape(B, W, H, d_inner),
                       (0, 2, 1, 3)).reshape(B, L, d_inner)
    ysum = (y0 + y1 + y2 + y3).reshape(B * L, d_inner)

    mu = jnp.mean(ysum, axis=-1, keepdims=True)
    yc = ysum - mu
    var = jnp.mean(yc * yc, axis=-1, keepdims=True)
    ln = yc * lax.rsqrt(var + 1e-5) * p['out_norm_g'] + p['out_norm_b']
    gated = ln * (z * jax.nn.sigmoid(z))
    out = mm(gated, p['out_proj_w'].T)
    return out.reshape(B, H, W, Cm)


# ----------------------------- deterministic parameter init -----------------------------

def init_params(key, d_model, d_state=16, d_conv=3, expand=2.0):
    d_inner = int(expand * d_model)
    dt_rank = math.ceil(d_model / 16)
    K = 4
    ks = jax.random.split(key, 10)

    def rnd(k, shape, scale):
        return jax.random.normal(k, shape, jnp.float32) * scale

    p = {}
    p['in_proj_w'] = rnd(ks[0], (2 * d_inner, d_model), 1.0 / math.sqrt(d_model))
    p['conv_w'] = rnd(ks[1], (d_conv, d_conv, d_inner), 1.0 / 3.0)     # depthwise (kh, kw, c)
    p['conv_b'] = rnd(ks[2], (d_inner,), 0.1)
    p['x_proj_weight'] = rnd(ks[3], (K, dt_rank + 2 * d_state, d_inner), 1.0 / math.sqrt(d_inner))
    p['dt_projs_weight'] = rnd(ks[4], (K, d_inner, dt_rank), 1.0 / math.sqrt(dt_rank))
    p['dt_projs_bias'] = jax.random.uniform(ks[5], (K, d_inner), jnp.float32, -5.0, -2.0)
    A = jnp.arange(1, d_state + 1, dtype=jnp.float32)
    p['A_logs'] = jnp.log(jnp.broadcast_to(A[None, :], (K * d_inner, d_state)))
    p['Ds'] = jnp.ones((K * d_inner,), jnp.float32)
    p['out_norm_g'] = 1.0 + 0.1 * rnd(ks[6], (d_inner,), 1.0)
    p['out_norm_b'] = 0.1 * rnd(ks[7], (d_inner,), 1.0)
    p['out_proj_w'] = rnd(ks[8], (d_model, d_inner), 1.0 / math.sqrt(d_inner))
    return p


# ----------------------------- main -----------------------------

if __name__ == "__main__":
    key = jax.random.PRNGKey(0)
    kp, kx = jax.random.split(key)

    d_model = 32             # d_inner = 64, d_state = 16, dt_rank = 2
    B, H, W = 2, 8, 8
    params = init_params(kp, d_model)
    x = jax.random.normal(kx, (B, H, W, d_model), jnp.float32)

    out = jax.jit(ss2d_forward)(x, params)
    out = jax.block_until_ready(out)

    assert out.shape == (B, H, W, d_model), out.shape
    assert bool(jnp.all(jnp.isfinite(out)))

    # pure-JAX reference with matching (bf16 matmul / f32 scan) precision
    ref = jax.block_until_ready(jax.jit(ss2d_reference)(x, params))
    err = float(jnp.max(jnp.abs(out - ref)))
    scale = float(jnp.max(jnp.abs(ref))) + 1e-6
    assert err <= 2e-2 * scale + 1e-4, (err, scale)

    print("KERNEL_OK")
</pallas_src>

<mosaic_0001>
module attributes {stable_mosaic.version = 11 : i64} {
  func.func @_dwconv_silu_kernel(%arg0: i32, %arg1: i32, %arg2: memref<1x10x10x64xbf16, #tpu.memory_space<vmem>>, %arg3: memref<3x3x64xbf16, #tpu.memory_space<vmem>>, %arg4: memref<1x1x64xf32, #tpu.memory_space<vmem>>, %arg5: memref<1x8x8x64xf32, #tpu.memory_space<vmem>>) attributes {dimension_semantics = [#tpu.dimension_semantics<parallel>, #tpu.dimension_semantics<parallel>], iteration_bounds = array<i64: 2, 1>, scalar_prefetch = 0 : i64, scratch_operands = 0 : i64, tpu.core_type = #tpu.core_type<tc>, window_params = [{transform_indices = @transform_0, window_bounds = array<i64: 1, 10, 10, 64>}, {transform_indices = @transform_1, window_bounds = array<i64: 3, 3, 64>}, {transform_indices = @transform_2, window_bounds = array<i64: 1, 1, 64>}, {transform_indices = @transform_3, window_bounds = array<i64: 1, 8, 8, 64>}]} {
    %c0 = arith.constant 0 : index
    %c0_0 = arith.constant 0 : index
    %c0_1 = arith.constant 0 : index
    %0 = vector.load %arg3[%c0, %c0_0, %c0_1] : memref<3x3x64xbf16, #tpu.memory_space<vmem>>, vector<3x3x64xbf16>
    %1 = arith.extf %0 : vector<3x3x64xbf16> to vector<3x3x64xf32>
    %cst = arith.constant 0.000000e+00 : f32
    %2 = vector.broadcast %cst : f32 to vector<8x8x64xf32>
    %c0_2 = arith.constant 0 : index
    %c0_3 = arith.constant 0 : index
    %c0_4 = arith.constant 0 : index
    %c0_5 = arith.constant 0 : index
    %3 = vector.load %arg2[%c0_2, %c0_3, %c0_4, %c0_5] : memref<1x10x10x64xbf16, #tpu.memory_space<vmem>>, vector<1x8x8x64xbf16>
    %4 = vector.shape_cast %3 : vector<1x8x8x64xbf16> to vector<8x8x64xbf16>
    %5 = arith.extf %4 : vector<8x8x64xbf16> to vector<8x8x64xf32>
    %6 = vector.extract_strided_slice %1 {offsets = [0, 0, 0], sizes = [1, 1, 64], strides = [1, 1, 1]} : vector<3x3x64xf32> to vector<1x1x64xf32>
    %7 = vector.broadcast %6 : vector<1x1x64xf32> to vector<8x8x64xf32>
    %8 = arith.mulf %5, %7 : vector<8x8x64xf32>
    %9 = arith.addf %2, %8 : vector<8x8x64xf32>
    %c0_6 = arith.constant 0 : index
    %c0_7 = arith.constant 0 : index
    %c1 = arith.constant 1 : index
    %c0_8 = arith.constant 0 : index
    %10 = vector.load %arg2[%c0_6, %c0_7, %c1, %c0_8] : memref<1x10x10x64xbf16, #tpu.memory_space<vmem>>, vector<1x8x8x64xbf16>
    %11 = vector.shape_cast %10 : vector<1x8x8x64xbf16> to vector<8x8x64xbf16>
    %12 = arith.extf %11 : vector<8x8x64xbf16> to vector<8x8x64xf32>
    %13 = vector.extract_strided_slice %1 {offsets = [0, 1, 0], sizes = [1, 1, 64], strides = [1, 1, 1]} : vector<3x3x64xf32> to vector<1x1x64xf32>
    %14 = vector.broadcast %13 : vector<1x1x64xf32> to vector<8x8x64xf32>
    %15 = arith.mulf %12, %14 : vector<8x8x64xf32>
    %16 = arith.addf %9, %15 : vector<8x8x64xf32>
    %c0_9 = arith.constant 0 : index
    %c0_10 = arith.constant 0 : index
    %c2 = arith.constant 2 : index
    %c0_11 = arith.constant 0 : index
    %17 = vector.load %arg2[%c0_9, %c0_10, %c2, %c0_11] : memref<1x10x10x64xbf16, #tpu.memory_space<vmem>>, vector<1x8x8x64xbf16>
    %18 = vector.shape_cast %17 : vector<1x8x8x64xbf16> to vector<8x8x64xbf16>
    %19 = arith.extf %18 : vector<8x8x64xbf16> to vector<8x8x64xf32>
    %20 = vector.extract_strided_slice %1 {offsets = [0, 2, 0], sizes = [1, 1, 64], strides = [1, 1, 1]} : vector<3x3x64xf32> to vector<1x1x64xf32>
    %21 = vector.broadcast %20 : vector<1x1x64xf32> to vector<8x8x64xf32>
    %22 = arith.mulf %19, %21 : vector<8x8x64xf32>
    %23 = arith.addf %16, %22 : vector<8x8x64xf32>
    %c0_12 = arith.constant 0 : index
    %c1_13 = arith.constant 1 : index
    %c0_14 = arith.constant 0 : index
    %c0_15 = arith.constant 0 : index
    %24 = vector.load %arg2[%c0_12, %c1_13, %c0_14, %c0_15] : memref<1x10x10x64xbf16, #tpu.memory_space<vmem>>, vector<1x8x8x64xbf16>
    %25 = vector.shape_cast %24 : vector<1x8x8x64xbf16> to vector<8x8x64xbf16>
    %26 = arith.extf %25 : vector<8x8x64xbf16> to vector<8x8x64xf32>
    %27 = vector.extract_strided_slice %1 {offsets = [1, 0, 0], sizes = [1, 1, 64], strides = [1, 1, 1]} : vector<3x3x64xf32> to vector<1x1x64xf32>
    %28 = vector.broadcast %27 : vector<1x1x64xf32> to vector<8x8x64xf32>
    %29 = arith.mulf %26, %28 : vector<8x8x64xf32>
    %30 = arith.addf %23, %29 : vector<8x8x64xf32>
    %c0_16 = arith.constant 0 : index
    %c1_17 = arith.constant 1 : index
    %c1_18 = arith.constant 1 : index
    %c0_19 = arith.constant 0 : index
    %31 = vector.load %arg2[%c0_16, %c1_17, %c1_18, %c0_19] : memref<1x10x10x64xbf16, #tpu.memory_space<vmem>>, vector<1x8x8x64xbf16>
    %32 = vector.shape_cast %31 : vector<1x8x8x64xbf16> to vector<8x8x64xbf16>
    %33 = arith.extf %32 : vector<8x8x64xbf16> to vector<8x8x64xf32>
    %34 = vector.extract_strided_slice %1 {offsets = [1, 1, 0], sizes = [1, 1, 64], strides = [1, 1, 1]} : vector<3x3x64xf32> to vector<1x1x64xf32>
    %35 = vector.broadcast %34 : vector<1x1x64xf32> to vector<8x8x64xf32>
    %36 = arith.mulf %33, %35 : vector<8x8x64xf32>
    %37 = arith.addf %30, %36 : vector<8x8x64xf32>
    %c0_20 = arith.constant 0 : index
    %c1_21 = arith.constant 1 : index
    %c2_22 = arith.constant 2 : index
    %c0_23 = arith.constant 0 : index
    %38 = vector.load %arg2[%c0_20, %c1_21, %c2_22, %c0_23] : memref<1x10x10x64xbf16, #tpu.memory_space<vmem>>, vector<1x8x8x64xbf16>
    %39 = vector.shape_cast %38 : vector<1x8x8x64xbf16> to vector<8x8x64xbf16>
    %40 = arith.extf %39 : vector<8x8x64xbf16> to vector<8x8x64xf32>
    %41 = vector.extract_strided_slice %1 {offsets = [1, 2, 0], sizes = [1, 1, 64], strides = [1, 1, 1]} : vector<3x3x64xf32> to vector<1x1x64xf32>
    %42 = vector.broadcast %41 : vector<1x1x64xf32> to vector<8x8x64xf32>
    %43 = arith.mulf %40, %42 : vector<8x8x64xf32>
    %44 = arith.addf %37, %43 : vector<8x8x64xf32>
    %c0_24 = arith.constant 0 : index
    %c2_25 = arith.constant 2 : index
    %c0_26 = arith.constant 0 : index
    %c0_27 = arith.constant 0 : index
    %45 = vector.load %arg2[%c0_24, %c2_25, %c0_26, %c0_27] : memref<1x10x10x64xbf16, #tpu.memory_space<vmem>>, vector<1x8x8x64xbf16>
    %46 = vector.shape_cast %45 : vector<1x8x8x64xbf16> to vector<8x8x64xbf16>
    %47 = arith.extf %46 : vector<8x8x64xbf16> to vector<8x8x64xf32>
    %48 = vector.extract_strided_slice %1 {offsets = [2, 0, 0], sizes = [1, 1, 64], strides = [1, 1, 1]} : vector<3x3x64xf32> to vector<1x1x64xf32>
    %49 = vector.broadcast %48 : vector<1x1x64xf32> to vector<8x8x64xf32>
    %50 = arith.mulf %47, %49 : vector<8x8x64xf32>
    %51 = arith.addf %44, %50 : vector<8x8x64xf32>
    %c0_28 = arith.constant 0 : index
    %c2_29 = arith.constant 2 : index
    %c1_30 = arith.constant 1 : index
    %c0_31 = arith.constant 0 : index
    %52 = vector.load %arg2[%c0_28, %c2_29, %c1_30, %c0_31] : memref<1x10x10x64xbf16, #tpu.memory_space<vmem>>, vector<1x8x8x64xbf16>
    %53 = vector.shape_cast %52 : vector<1x8x8x64xbf16> to vector<8x8x64xbf16>
    %54 = arith.extf %53 : vector<8x8x64xbf16> to vector<8x8x64xf32>
    %55 = vector.extract_strided_slice %1 {offsets = [2, 1, 0], sizes = [1, 1, 64], strides = [1, 1, 1]} : vector<3x3x64xf32> to vector<1x1x64xf32>
    %56 = vector.broadcast %55 : vector<1x1x64xf32> to vector<8x8x64xf32>
    %57 = arith.mulf %54, %56 : vector<8x8x64xf32>
    %58 = arith.addf %51, %57 : vector<8x8x64xf32>
    %c0_32 = arith.constant 0 : index
    %c2_33 = arith.constant 2 : index
    %c2_34 = arith.constant 2 : index
    %c0_35 = arith.constant 0 : index
    %59 = vector.load %arg2[%c0_32, %c2_33, %c2_34, %c0_35] : memref<1x10x10x64xbf16, #tpu.memory_space<vmem>>, vector<1x8x8x64xbf16>
    %60 = vector.shape_cast %59 : vector<1x8x8x64xbf16> to vector<8x8x64xbf16>
    %61 = arith.extf %60 : vector<8x8x64xbf16> to vector<8x8x64xf32>
    %62 = vector.extract_strided_slice %1 {offsets = [2, 2, 0], sizes = [1, 1, 64], strides = [1, 1, 1]} : vector<3x3x64xf32> to vector<1x1x64xf32>
    %63 = vector.broadcast %62 : vector<1x1x64xf32> to vector<8x8x64xf32>
    %64 = arith.mulf %61, %63 : vector<8x8x64xf32>
    %65 = arith.addf %58, %64 : vector<8x8x64xf32>
    %c0_36 = arith.constant 0 : index
    %c0_37 = arith.constant 0 : index
    %c0_38 = arith.constant 0 : index
    %66 = vector.load %arg4[%c0_36, %c0_37, %c0_38] : memref<1x1x64xf32, #tpu.memory_space<vmem>>, vector<1x1x64xf32>
    %67 = vector.broadcast %66 : vector<1x1x64xf32> to vector<8x8x64xf32>
    %68 = arith.addf %65, %67 : vector<8x8x64xf32>
    %69 = arith.negf %68 : vector<8x8x64xf32>
    %70 = math.exp %69 : vector<8x8x64xf32>
    %cst_39 = arith.constant 1.000000e+00 : f32
    %71 = vector.broadcast %cst_39 : f32 to vector<8x8x64xf32>
    %72 = arith.addf %71, %70 : vector<8x8x64xf32>
    %73 = arith.divf %71, %72 : vector<8x8x64xf32>
    %74 = arith.mulf %68, %73 : vector<8x8x64xf32>
    %c0_40 = arith.constant 0 : index
    %c0_41 = arith.constant 0 : index
    %c0_42 = arith.constant 0 : index
    %c0_43 = arith.constant 0 : index
    %75 = vector.load %arg5[%c0_40, %c0_41, %c0_42, %c0_43] : memref<1x8x8x64xf32, #tpu.memory_space<vmem>>, vector<1x8x8x64xf32>
    %76 = vector.shape_cast %75 : vector<1x8x8x64xf32> to vector<8x8x64xf32>
    %77 = vector.shape_cast %74 : vector<8x8x64xf32> to vector<1x8x8x64xf32>
    tpu.vector_store %arg5[%c0_40, %c0_41, %c0_42, %c0_43], %77 {strides = array<i32>} : memref<1x8x8x64xf32, #tpu.memory_space<vmem>>, vector<1x8x8x64xf32>,
    return
  }
  func.func @transform_0(%arg0: i32, %arg1: i32) -> (i32, i32, i32, i32) {
    %c0_i32 = arith.constant 0 : i32
    %c0_i32_0 = arith.constant 0 : i32
    %c0_i32_1 = arith.constant 0 : i32
    return %arg0, %c0_i32, %c0_i32_0, %arg1 : i32, i32, i32, i32
  }
  func.func @transform_1(%arg0: i32, %arg1: i32) -> (i32, i32, i32) {
    %c0_i32 = arith.constant 0 : i32
    %c0_i32_0 = arith.constant 0 : i32
    %c0_i32_1 = arith.constant 0 : i32
    return %c0_i32, %c0_i32_0, %arg1 : i32, i32, i32
  }
  func.func @transform_2(%arg0: i32, %arg1: i32) -> (i32, i32, i32) {
    %c0_i32 = arith.constant 0 : i32
    %c0_i32_0 = arith.constant 0 : i32
    %c0_i32_1 = arith.constant 0 : i32
    return %c0_i32, %c0_i32_0, %arg1 : i32, i32, i32
  }
  func.func @transform_3(%arg0: i32, %arg1: i32) -> (i32, i32, i32, i32) {
    %c0_i32 = arith.constant 0 : i32
    %c0_i32_0 = arith.constant 0 : i32
    %c0_i32_1 = arith.constant 0 : i32
    return %arg0, %c0_i32, %c0_i32_0, %arg1 : i32, i32, i32, i32
  }
}

module attributes {stable_mosaic.version = 11 : i64} {
  func.func @_in_proj_kernel(%arg0: i32, %arg1: i32, %arg2: memref<128x32xbf16, #tpu.memory_space<vmem>>, %arg3: memref<32x64xbf16, #tpu.memory_space<vmem>>, %arg4: memref<32x64xbf16, #tpu.memory_space<vmem>>, %arg5: memref<128x64xbf16, #tpu.memory_space<vmem>>, %arg6: memref<128x64xf32, #tpu.memory_space<vmem>>, %arg7: memref<128x64xf32, #tpu.memory_space<vmem>>, %arg8: memref<128x64xf32, #tpu.memory_space<vmem>>) attributes {dimension_semantics = [#tpu.dimension_semantics<parallel>, #tpu.dimension_semantics<arbitrary>], iteration_bounds = array<i64: 1, 1>, scalar_prefetch = 0 : i64, scratch_operands = 2 : i64, tpu.core_type = #tpu.core_type<tc>, window_params = [{transform_indices = @transform_0, window_bounds = array<i64: 128, 32>}, {transform_indices = @transform_1, window_bounds = array<i64: 32, 64>}, {transform_indices = @transform_2, window_bounds = array<i64: 32, 64>}, {transform_indices = @transform_3, window_bounds = array<i64: 128, 64>}, {transform_indices = @transform_4, window_bounds = array<i64: 128, 64>}]} {
    %c0_i32 = arith.constant 0 : i32
    %0 = arith.cmpi eq, %arg1, %c0_i32 : i32
    %1 = arith.extui %0 : i1 to i32
    %c0_i32_0 = arith.constant 0 : i32
    %2 = arith.cmpi ne, %1, %c0_i32_0 : i32
    scf.if %2 {
      %cst_17 = arith.constant 0.000000e+00 : f32
      %17 = vector.broadcast %cst_17 : f32 to vector<128x64xf32>
      %c0_18 = arith.constant 0 : index
      %c0_19 = arith.constant 0 : index
      %18 = vector.load %arg7[%c0_18, %c0_19] : memref<128x64xf32, #tpu.memory_space<vmem>>, vector<128x64xf32>
      tpu.vector_store %arg7[%c0_18, %c0_19], %17 {strides = array<i32>} : memref<128x64xf32, #tpu.memory_space<vmem>>, vector<128x64xf32>,
      %cst_20 = arith.constant 0.000000e+00 : f32
      %19 = vector.broadcast %cst_20 : f32 to vector<128x64xf32>
      %c0_21 = arith.constant 0 : index
      %c0_22 = arith.constant 0 : index
      %20 = vector.load %arg8[%c0_21, %c0_22] : memref<128x64xf32, #tpu.memory_space<vmem>>, vector<128x64xf32>
      tpu.vector_store %arg8[%c0_21, %c0_22], %19 {strides = array<i32>} : memref<128x64xf32, #tpu.memory_space<vmem>>, vector<128x64xf32>,
    } else {
    }
    %c0 = arith.constant 0 : index
    %c0_1 = arith.constant 0 : index
    %3 = vector.load %arg2[%c0, %c0_1] : memref<128x32xbf16, #tpu.memory_space<vmem>>, vector<128x32xbf16>
    %c0_2 = arith.constant 0 : index
    %c0_3 = arith.constant 0 : index
    %4 = vector.load %arg7[%c0_2, %c0_3] : memref<128x64xf32, #tpu.memory_space<vmem>>, vector<128x64xf32>
    %c0_4 = arith.constant 0 : index
    %c0_5 = arith.constant 0 : index
    %5 = vector.load %arg3[%c0_4, %c0_5] : memref<32x64xbf16, #tpu.memory_space<vmem>>, vector<32x64xbf16>
    %cst = arith.constant dense<0.000000e+00> : vector<128x64xf32>
    %6 = tpu.matmul %3, %5, %cst {dimension_numbers = #tpu.dot_dimension_numbers<[1], [0], [0], [1], [0, 0, 1, 1], [], []>} : vector<128x32xbf16>, vector<32x64xbf16>, vector<128x64xf32> -> vector<128x64xf32>
    %7 = arith.addf %4, %6 : vector<128x64xf32>
    %c0_6 = arith.constant 0 : index
    %c0_7 = arith.constant 0 : index
    %8 = vector.load %arg7[%c0_6, %c0_7] : memref<128x64xf32, #tpu.memory_space<vmem>>, vector<128x64xf32>
    tpu.vector_store %arg7[%c0_6, %c0_7], %7 {strides = array<i32>} : memref<128x64xf32, #tpu.memory_space<vmem>>, vector<128x64xf32>,
    %c0_8 = arith.constant 0 : index
    %c0_9 = arith.constant 0 : index
    %9 = vector.load %arg8[%c0_8, %c0_9] : memref<128x64xf32, #tpu.memory_space<vmem>>, vector<128x64xf32>
    %c0_10 = arith.constant 0 : index
    %c0_11 = arith.constant 0 : index
    %10 = vector.load %arg4[%c0_10, %c0_11] : memref<32x64xbf16, #tpu.memory_space<vmem>>, vector<32x64xbf16>
    %cst_12 = arith.constant dense<0.000000e+00> : vector<128x64xf32>
    %11 = tpu.matmul %3, %10, %cst_12 {dimension_numbers = #tpu.dot_dimension_numbers<[1], [0], [0], [1], [0, 0, 1, 1], [], []>} : vector<128x32xbf16>, vector<32x64xbf16>, vector<128x64xf32> -> vector<128x64xf32>
    %12 = arith.addf %9, %11 : vector<128x64xf32>
    %c0_13 = arith.constant 0 : index
    %c0_14 = arith.constant 0 : index
    %13 = vector.load %arg8[%c0_13, %c0_14] : memref<128x64xf32, #tpu.memory_space<vmem>>, vector<128x64xf32>
    tpu.vector_store %arg8[%c0_13, %c0_14], %12 {strides = array<i32>} : memref<128x64xf32, #tpu.memory_space<vmem>>, vector<128x64xf32>,
    %c0_i32_15 = arith.constant 0 : i32
    %14 = arith.cmpi eq, %arg1, %c0_i32_15 : i32
    %15 = arith.extui %14 : i1 to i32
    %c0_i32_16 = arith.constant 0 : i32
    %16 = arith.cmpi ne, %15, %c0_i32_16 : i32
    scf.if %16 {
      %c0_17 = arith.constant 0 : index
      %c0_18 = arith.constant 0 : index
      %17 = vector.load %arg7[%c0_17, %c0_18] : memref<128x64xf32, #tpu.memory_space<vmem>>, vector<128x64xf32>
      %18 = arith.truncf %17 : vector<128x64xf32> to vector<128x64xbf16>
      %c0_19 = arith.constant 0 : index
      %c0_20 = arith.constant 0 : index
      %19 = vector.load %arg5[%c0_19, %c0_20] : memref<128x64xbf16, #tpu.memory_space<vmem>>, vector<128x64xbf16>
      tpu.vector_store %arg5[%c0_19, %c0_20], %18 {strides = array<i32>} : memref<128x64xbf16, #tpu.memory_space<vmem>>, vector<128x64xbf16>,
      %c0_21 = arith.constant 0 : index
      %c0_22 = arith.constant 0 : index
      %20 = vector.load %arg8[%c0_21, %c0_22] : memref<128x64xf32, #tpu.memory_space<vmem>>, vector<128x64xf32>
      %c0_23 = arith.constant 0 : index
      %c0_24 = arith.constant 0 : index
      %21 = vector.load %arg6[%c0_23, %c0_24] : memref<128x64xf32, #tpu.memory_space<vmem>>, vector<128x64xf32>
      tpu.vector_store %arg6[%c0_23, %c0_24], %20 {strides = array<i32>} : memref<128x64xf32, #tpu.memory_space<vmem>>, vector<128x64xf32>,
    } else {
    }
    return
  }
  func.func @transform_0(%arg0: i32, %arg1: i32) -> (i32, i32) {
    %c0_i32 = arith.constant 0 : i32
    return %arg0, %arg1 : i32, i32
  }
  func.func @transform_1(%arg0: i32, %arg1: i32) -> (i32, i32) {
    %c0_i32 = arith.constant 0 : i32
    %c0_i32_0 = arith.constant 0 : i32
    return %arg1, %c0_i32 : i32, i32
  }
  func.func @transform_2(%arg0: i32, %arg1: i32) -> (i32, i32) {
    %c0_i32 = arith.constant 0 : i32
    %c0_i32_0 = arith.constant 0 : i32
    return %arg1, %c0_i32 : i32, i32
  }
  func.func @transform_3(%arg0: i32, %arg1: i32) -> (i32, i32) {
    %c0_i32 = arith.constant 0 : i32
    %c0_i32_0 = arith.constant 0 : i32
    return %arg0, %c0_i32 : i32, i32
  }
  func.func @transform_4(%arg0: i32, %arg1: i32) -> (i32, i32) {
    %c0_i32 = arith.constant 0 : i32
    %c0_i32_0 = arith.constant 0 : i32
    return %arg0, %c0_i32 : i32, i32
  }
}

module attributes {stable_mosaic.version = 11 : i64} {
  func.func @_dir_proj_kernel(%arg0: i32, %arg1: i32, %arg2: memref<1x128x64xbf16, #tpu.memory_space<vmem>>, %arg3: memref<1x64x256xbf16, #tpu.memory_space<vmem>>, %arg4: memref<1x128x256xf32, #tpu.memory_space<vmem>>) attributes {dimension_semantics = [#tpu.dimension_semantics<parallel>, #tpu.dimension_semantics<parallel>], iteration_bounds = array<i64: 2, 1>, scalar_prefetch = 0 : i64, scratch_operands = 0 : i64, tpu.core_type = #tpu.core_type<tc>, window_params = [{transform_indices = @transform_0, window_bounds = array<i64: 1, 128, 64>}, {transform_indices = @transform_1, window_bounds = array<i64: 1, 64, 256>}, {transform_indices = @transform_2, window_bounds = array<i64: 1, 128, 256>}]} {
    %c0 = arith.constant 0 : index
    %c0_0 = arith.constant 0 : index
    %c0_1 = arith.constant 0 : index
    %0 = vector.load %arg2[%c0, %c0_0, %c0_1] : memref<1x128x64xbf16, #tpu.memory_space<vmem>>, vector<1x128x64xbf16>
    %1 = vector.shape_cast %0 : vector<1x128x64xbf16> to vector<128x64xbf16>
    %c0_2 = arith.constant 0 : index
    %c0_3 = arith.constant 0 : index
    %c0_4 = arith.constant 0 : index
    %2 = vector.load %arg3[%c0_2, %c0_3, %c0_4] : memref<1x64x256xbf16, #tpu.memory_space<vmem>>, vector<1x64x256xbf16>
    %3 = vector.shape_cast %2 : vector<1x64x256xbf16> to vector<64x256xbf16>
    %cst = arith.constant dense<0.000000e+00> : vector<128x256xf32>
    %4 = tpu.matmul %1, %3, %cst {dimension_numbers = #tpu.dot_dimension_numbers<[1], [0], [0], [1], [0, 0, 1, 1], [], []>} : vector<128x64xbf16>, vector<64x256xbf16>, vector<128x256xf32> -> vector<128x256xf32>
    %c0_5 = arith.constant 0 : index
    %c0_6 = arith.constant 0 : index
    %c0_7 = arith.constant 0 : index
    %5 = vector.load %arg4[%c0_5, %c0_6, %c0_7] : memref<1x128x256xf32, #tpu.memory_space<vmem>>, vector<1x128x256xf32>
    %6 = vector.shape_cast %5 : vector<1x128x256xf32> to vector<128x256xf32>
    %7 = vector.shape_cast %4 : vector<128x256xf32> to vector<1x128x256xf32>
    tpu.vector_store %arg4[%c0_5, %c0_6, %c0_7], %7 {strides = array<i32>} : memref<1x128x256xf32, #tpu.memory_space<vmem>>, vector<1x128x256xf32>,
    return
  }
  func.func @transform_0(%arg0: i32, %arg1: i32) -> (i32, i32, i32) {
    %c0_i32 = arith.constant 0 : i32
    %c0_i32_0 = arith.constant 0 : i32
    return %arg0, %arg1, %c0_i32 : i32, i32, i32
  }
  func.func @transform_1(%arg0: i32, %arg1: i32) -> (i32, i32, i32) {
    %c0_i32 = arith.constant 0 : i32
    %c0_i32_0 = arith.constant 0 : i32
    %c0_i32_1 = arith.constant 0 : i32
    return %arg0, %c0_i32, %c0_i32_0 : i32, i32, i32
  }
  func.func @transform_2(%arg0: i32, %arg1: i32) -> (i32, i32, i32) {
    %c0_i32 = arith.constant 0 : i32
    %c0_i32_0 = arith.constant 0 : i32
    return %arg0, %arg1, %c0_i32 : i32, i32, i32
  }
}

module attributes {stable_mosaic.version = 11 : i64} {
  func.func @_scan_kernel(%arg0: i32, %arg1: i32, %arg2: memref<1x1x64x64xf32, #tpu.memory_space<vmem>>, %arg3: memref<1x1x64x256xf32, #tpu.memory_space<vmem>>, %arg4: memref<1x2x16x64xf32, #tpu.memory_space<vmem>>, %arg5: memref<1x2x1x64xf32, #tpu.memory_space<vmem>>, %arg6: memref<1x2x1x64xf32, #tpu.memory_space<vmem>>, %arg7: memref<1x1x64x64xf32, #tpu.memory_space<vmem>>, %arg8: memref<32x16x64xf32, #tpu.memory_space<vmem>>, %arg9: memref<32x16x64xf32, #tpu.memory_space<vmem>>, %arg10: memref<32x16x64xf32, #tpu.memory_space<vmem>>) attributes {dimension_semantics = [#tpu.dimension_semantics<parallel>, #tpu.dimension_semantics<parallel>], iteration_bounds = array<i64: 2, 2>, scalar_prefetch = 0 : i64, scratch_operands = 3 : i64, tpu.core_type = #tpu.core_type<tc>, window_params = [{transform_indices = @transform_0, window_bounds = array<i64: 1, 1, 64, 64>}, {transform_indices = @transform_1, window_bounds = array<i64: 1, 1, 64, 256>}, {transform_indices = @transform_2, window_bounds = array<i64: 1, 2, 16, 64>}, {transform_indices = @transform_3, window_bounds = array<i64: 1, 2, 1, 64>}, {transform_indices = @transform_4, window_bounds = array<i64: 1, 2, 1, 64>}, {transform_indices = @transform_5, window_bounds = array<i64: 1, 1, 64, 64>}]} {
    %c0 = arith.constant 0 : index
    %c0_0 = arith.constant 0 : index
    %c0_1 = arith.constant 0 : index
    %c0_2 = arith.constant 0 : index
    %0 = vector.load %arg4[%c0, %c0_0, %c0_1, %c0_2] : memref<1x2x16x64xf32, #tpu.memory_space<vmem>>, vector<1x1x16x64xf32>
    %1 = vector.shape_cast %0 : vector<1x1x16x64xf32> to vector<16x64xf32>
    %c0_3 = arith.constant 0 : index
    %c0_4 = arith.constant 0 : index
    %c0_5 = arith.constant 0 : index
    %c0_6 = arith.constant 0 : index
    %2 = vector.load %arg5[%c0_3, %c0_4, %c0_5, %c0_6] : memref<1x2x1x64xf32, #tpu.memory_space<vmem>>, vector<1x1x1x64xf32>
    %3 = vector.shape_cast %2 : vector<1x1x1x64xf32> to vector<1x64xf32>
    %c0_7 = arith.constant 0 : index
    %c0_8 = arith.constant 0 : index
    %c0_9 = arith.constant 0 : index
    %c0_10 = arith.constant 0 : index
    %4 = vector.load %arg6[%c0_7, %c0_8, %c0_9, %c0_10] : memref<1x2x1x64xf32, #tpu.memory_space<vmem>>, vector<1x1x1x64xf32>
    %5 = vector.shape_cast %4 : vector<1x1x1x64xf32> to vector<1x64xf32>
    %cst = arith.constant 0.000000e+00 : f32
    %6 = vector.broadcast %cst : f32 to vector<16x64xf32>
    %c0_i32 = arith.constant 0 : i32
    %c2_i32 = arith.constant 2 : i32
    %7 = arith.addi %c0_i32, %c2_i32 : i32
    %c1_i32 = arith.constant 1 : i32
    %8 = scf.for %arg11 = %c0_i32 to %7 step %c1_i32 iter_args(%arg12 = %6) -> (vector<16x64xf32>)  : i32 {
      %c32_i32 = arith.constant 32 : i32
      %18 = arith.muli %arg11, %c32_i32 : i32
      %19 = tpu.assume_multiple %18, 32 : i32
      %c0_28 = arith.constant 0 : index
      %c0_29 = arith.constant 0 : index
      %20 = arith.index_cast %19 : i32 to index
      %c0_30 = arith.constant 0 : index
      %21 = vector.load %arg2[%c0_28, %c0_29, %20, %c0_30] : memref<1x1x64x64xf32, #tpu.memory_space<vmem>>, vector<1x1x32x64xf32>
      %22 = vector.shape_cast %21 : vector<1x1x32x64xf32> to vector<32x64xf32>
      %c0_31 = arith.constant 0 : index
      %c0_32 = arith.constant 0 : index
      %23 = arith.index_cast %19 : i32 to index
      %c0_33 = arith.constant 0 : index
      %24 = vector.load %arg3[%c0_31, %c0_32, %23, %c0_33] : memref<1x1x64x256xf32, #tpu.memory_space<vmem>>, vector<1x1x32x128xf32>
      %25 = vector.shape_cast %24 : vector<1x1x32x128xf32> to vector<32x128xf32>
      %26 = vector.extract_strided_slice %25 {offsets = [0, 0], sizes = [32, 64], strides = [1, 1]} : vector<32x128xf32> to vector<32x64xf32>
      %27 = vector.extract_strided_slice %25 {offsets = [0, 64], sizes = [32, 16], strides = [1, 1]} : vector<32x128xf32> to vector<32x16xf32>
      %28 = vector.extract_strided_slice %25 {offsets = [0, 80], sizes = [32, 16], strides = [1, 1]} : vector<32x128xf32> to vector<32x16xf32>
      %29 = vector.broadcast %5 : vector<1x64xf32> to vector<32x64xf32>
      %30 = arith.addf %26, %29 : vector<32x64xf32>
      %cst_34 = arith.constant 0.000000e+00 : f32
      %31 = vector.broadcast %cst_34 : f32 to vector<32x64xf32>
      %32 = arith.maximumf %30, %31 : vector<32x64xf32>
      %33 = math.absf %30 : vector<32x64xf32>
      %cst_35 = arith.constant 0.000000e+00 : f32
      %34 = vector.broadcast %cst_35 : f32 to vector<32x64xf32>
      %35 = arith.subf %34, %33 : vector<32x64xf32>
      %36 = math.exp %35 : vector<32x64xf32>
      %37 = math.log1p %36 : vector<32x64xf32>
      %38 = arith.addf %32, %37 : vector<32x64xf32>
      %39 = vector.shape_cast %38 : vector<32x64xf32> to vector<32x1x64xf32>
      %40 = vector.shape_cast %1 : vector<16x64xf32> to vector<1x16x64xf32>
      %41 = vector.broadcast %39 : vector<32x1x64xf32> to vector<32x16x64xf32>
      %42 = vector.broadcast %40 : vector<1x16x64xf32> to vector<32x16x64xf32>
      %43 = arith.mulf %41, %42 : vector<32x16x64xf32>
      %44 = math.exp %43 : vector<32x16x64xf32>
      %c0_36 = arith.constant 0 : index
      %c0_37 = arith.constant 0 : index
      %c0_38 = arith.constant 0 : index
      %45 = vector.load %arg8[%c0_36, %c0_37, %c0_38] : memref<32x16x64xf32, #tpu.memory_space<vmem>>, vector<32x16x64xf32>
      tpu.vector_store %arg8[%c0_36, %c0_37, %c0_38], %44 {strides = array<i32>} : memref<32x16x64xf32, #tpu.memory_space<vmem>>, vector<32x16x64xf32>,
      %46 = arith.mulf %38, %22 : vector<32x64xf32>
      %47 = vector.shape_cast %46 : vector<32x64xf32> to vector<32x1x64xf32>
      %48 = vector.shape_cast %27 : vector<32x16xf32> to vector<32x16x1xf32>
      %49 = vector.broadcast %47 : vector<32x1x64xf32> to vector<32x16x64xf32>
      %50 = vector.broadcast %48 : vector<32x16x1xf32> to vector<32x16x64xf32>
      %51 = arith.mulf %49, %50 : vector<32x16x64xf32>
      %c0_39 = arith.constant 0 : index
      %c0_40 = arith.constant 0 : index
      %c0_41 = arith.constant 0 : index
      %52 = vector.load %arg9[%c0_39, %c0_40, %c0_41] : memref<32x16x64xf32, #tpu.memory_space<vmem>>, vector<32x16x64xf32>
      tpu.vector_store %arg9[%c0_39, %c0_40, %c0_41], %51 {strides = array<i32>} : memref<32x16x64xf32, #tpu.memory_space<vmem>>, vector<32x16x64xf32>,
      %c0_i32_42 = arith.constant 0 : i32
      %c8_i32 = arith.constant 8 : i32
      %53 = arith.addi %c0_i32_42, %c8_i32 : i32
      %c1_i32_43 = arith.constant 1 : i32
      %54 = scf.for %arg13 = %c0_i32_42 to %53 step %c1_i32_43 iter_args(%arg14 = %arg12) -> (vector<16x64xf32>)  : i32 {
        %c4_i32 = arith.constant 4 : i32
        %67 = arith.muli %arg13, %c4_i32 : i32
        %c0_i32_52 = arith.constant 0 : i32
        %68 = arith.addi %67, %c0_i32_52 : i32
        %69 = arith.index_cast %68 : i32 to index
        %c0_53 = arith.constant 0 : index
        %c0_54 = arith.constant 0 : index
        %70 = vector.load %arg8[%69, %c0_53, %c0_54] : memref<32x16x64xf32, #tpu.memory_space<vmem>>, vector<1x16x64xf32>
        %71 = vector.shape_cast %70 : vector<1x16x64xf32> to vector<16x64xf32>
        %72 = arith.mulf %71, %arg14 : vector<16x64xf32>
        %73 = arith.index_cast %68 : i32 to index
        %c0_55 = arith.constant 0 : index
        %c0_56 = arith.constant 0 : index
        %74 = vector.load %arg9[%73, %c0_55, %c0_56] : memref<32x16x64xf32, #tpu.memory_space<vmem>>, vector<1x16x64xf32>
        %75 = vector.shape_cast %74 : vector<1x16x64xf32> to vector<16x64xf32>
        %76 = arith.addf %72, %75 : vector<16x64xf32>
        %77 = arith.index_cast %68 : i32 to index
        %c0_57 = arith.constant 0 : index
        %c0_58 = arith.constant 0 : index
        %78 = vector.load %arg10[%77, %c0_57, %c0_58] : memref<32x16x64xf32, #tpu.memory_space<vmem>>, vector<1x16x64xf32>
        %79 = vector.shape_cast %78 : vector<1x16x64xf32> to vector<16x64xf32>
        %80 = vector.shape_cast %76 : vector<16x64xf32> to vector<1x16x64xf32>
        tpu.vector_store %arg10[%77, %c0_57, %c0_58], %80 {strides = array<i32>} : memref<32x16x64xf32, #tpu.memory_space<vmem>>, vector<1x16x64xf32>,
        %c4_i32_59 = arith.constant 4 : i32
        %81 = arith.muli %arg13, %c4_i32_59 : i32
        %c1_i32_60 = arith.constant 1 : i32
        %82 = arith.addi %81, %c1_i32_60 : i32
        %83 = arith.index_cast %82 : i32 to index
        %c0_61 = arith.constant 0 : index
        %c0_62 = arith.constant 0 : index
        %84 = vector.load %arg8[%83, %c0_61, %c0_62] : memref<32x16x64xf32, #tpu.memory_space<vmem>>, vector<1x16x64xf32>
        %85 = vector.shape_cast %84 : vector<1x16x64xf32> to vector<16x64xf32>
        %86 = arith.mulf %85, %76 : vector<16x64xf32>
        %87 = arith.index_cast %82 : i32 to index
        %c0_63 = arith.constant 0 : index
        %c0_64 = arith.constant 0 : index
        %88 = vector.load %arg9[%87, %c0_63, %c0_64] : memref<32x16x64xf32, #tpu.memory_space<vmem>>, vector<1x16x64xf32>
        %89 = vector.shape_cast %88 : vector<1x16x64xf32> to vector<16x64xf32>
        %90 = arith.addf %86, %89 : vector<16x64xf32>
        %91 = arith.index_cast %82 : i32 to index
        %c0_65 = arith.constant 0 : index
        %c0_66 = arith.constant 0 : index
        %92 = vector.load %arg10[%91, %c0_65, %c0_66] : memref<32x16x64xf32, #tpu.memory_space<vmem>>, vector<1x16x64xf32>
        %93 = vector.shape_cast %92 : vector<1x16x64xf32> to vector<16x64xf32>
        %94 = vector.shape_cast %90 : vector<16x64xf32> to vector<1x16x64xf32>
        tpu.vector_store %arg10[%91, %c0_65, %c0_66], %94 {strides = array<i32>} : memref<32x16x64xf32, #tpu.memory_space<vmem>>, vector<1x16x64xf32>,
        %c4_i32_67 = arith.constant 4 : i32
        %95 = arith.muli %arg13, %c4_i32_67 : i32
        %c2_i32_68 = arith.constant 2 : i32
        %96 = arith.addi %95, %c2_i32_68 : i32
        %97 = arith.index_cast %96 : i32 to index
        %c0_69 = arith.constant 0 : index
        %c0_70 = arith.constant 0 : index
        %98 = vector.load %arg8[%97, %c0_69, %c0_70] : memref<32x16x64xf32, #tpu.memory_space<vmem>>, vector<1x16x64xf32>
        %99 = vector.shape_cast %98 : vector<1x16x64xf32> to vector<16x64xf32>
        %100 = arith.mulf %99, %90 : vector<16x64xf32>
        %101 = arith.index_cast %96 : i32 to index
        %c0_71 = arith.constant 0 : index
        %c0_72 = arith.constant 0 : index
        %102 = vector.load %arg9[%101, %c0_71, %c0_72] : memref<32x16x64xf32, #tpu.memory_space<vmem>>, vector<1x16x64xf32>
        %103 = vector.shape_cast %102 : vector<1x16x64xf32> to vector<16x64xf32>
        %104 = arith.addf %100, %103 : vector<16x64xf32>
        %105 = arith.index_cast %96 : i32 to index
        %c0_73 = arith.constant 0 : index
        %c0_74 = arith.constant 0 : index
        %106 = vector.load %arg10[%105, %c0_73, %c0_74] : memref<32x16x64xf32, #tpu.memory_space<vmem>>, vector<1x16x64xf32>
        %107 = vector.shape_cast %106 : vector<1x16x64xf32> to vector<16x64xf32>
        %108 = vector.shape_cast %104 : vector<16x64xf32> to vector<1x16x64xf32>
        tpu.vector_store %arg10[%105, %c0_73, %c0_74], %108 {strides = array<i32>} : memref<32x16x64xf32, #tpu.memory_space<vmem>>, vector<1x16x64xf32>,
        %c4_i32_75 = arith.constant 4 : i32
        %109 = arith.muli %arg13, %c4_i32_75 : i32
        %c3_i32 = arith.constant 3 : i32
        %110 = arith.addi %109, %c3_i32 : i32
        %111 = arith.index_cast %110 : i32 to index
        %c0_76 = arith.constant 0 : index
        %c0_77 = arith.constant 0 : index
        %112 = vector.load %arg8[%111, %c0_76, %c0_77] : memref<32x16x64xf32, #tpu.memory_space<vmem>>, vector<1x16x64xf32>
        %113 = vector.shape_cast %112 : vector<1x16x64xf32> to vector<16x64xf32>
        %114 = arith.mulf %113, %104 : vector<16x64xf32>
        %115 = arith.index_cast %110 : i32 to index
        %c0_78 = arith.constant 0 : index
        %c0_79 = arith.constant 0 : index
        %116 = vector.load %arg9[%115, %c0_78, %c0_79] : memref<32x16x64xf32, #tpu.memory_space<vmem>>, vector<1x16x64xf32>
        %117 = vector.shape_cast %116 : vector<1x16x64xf32> to vector<16x64xf32>
        %118 = arith.addf %114, %117 : vector<16x64xf32>
        %119 = arith.index_cast %110 : i32 to index
        %c0_80 = arith.constant 0 : index
        %c0_81 = arith.constant 0 : index
        %120 = vector.load %arg10[%119, %c0_80, %c0_81] : memref<32x16x64xf32, #tpu.memory_space<vmem>>, vector<1x16x64xf32>
        %121 = vector.shape_cast %120 : vector<1x16x64xf32> to vector<16x64xf32>
        %122 = vector.shape_cast %118 : vector<16x64xf32> to vector<1x16x64xf32>
        tpu.vector_store %arg10[%119, %c0_80, %c0_81], %122 {strides = array<i32>} : memref<32x16x64xf32, #tpu.memory_space<vmem>>, vector<1x16x64xf32>,
        scf.yield %118 : vector<16x64xf32>
      }
      %c8_i32_44 = arith.constant 8 : i32
      %c0_45 = arith.constant 0 : index
      %c0_46 = arith.constant 0 : index
      %c0_47 = arith.constant 0 : index
      %55 = vector.load %arg10[%c0_45, %c0_46, %c0_47] : memref<32x16x64xf32, #tpu.memory_space<vmem>>, vector<32x16x64xf32>
      %56 = vector.shape_cast %28 : vector<32x16xf32> to vector<32x16x1xf32>
      %57 = vector.broadcast %56 : vector<32x16x1xf32> to vector<32x16x64xf32>
      %58 = arith.mulf %55, %57 : vector<32x16x64xf32>
      %cst_48 = arith.constant dense<0.000000e+00> : vector<32x64xf32>
      %59 = vector.multi_reduction <add>, %58, %cst_48 [1] : vector<32x16x64xf32> to vector<32x64xf32>
      %60 = vector.broadcast %3 : vector<1x64xf32> to vector<32x64xf32>
      %61 = arith.mulf %22, %60 : vector<32x64xf32>
      %62 = arith.addf %59, %61 : vector<32x64xf32>
      %c0_49 = arith.constant 0 : index
      %c0_50 = arith.constant 0 : index
      %63 = arith.index_cast %19 : i32 to index
      %c0_51 = arith.constant 0 : index
      %64 = vector.load %arg7[%c0_49, %c0_50, %63, %c0_51] : memref<1x1x64x64xf32, #tpu.memory_space<vmem>>, vector<1x1x32x64xf32>
      %65 = vector.shape_cast %64 : vector<1x1x32x64xf32> to vector<32x64xf32>
      %66 = vector.shape_cast %62 : vector<32x64xf32> to vector<1x1x32x64xf32>
      tpu.vector_store %arg7[%c0_49, %c0_50, %63, %c0_51], %66 {strides = array<i32>} : memref<1x1x64x64xf32, #tpu.memory_space<vmem>>, vector<1x1x32x64xf32>,
      scf.yield %54 : vector<16x64xf32>
    }
    %c2_i32_11 = arith.constant 2 : i32
    %c0_12 = arith.constant 0 : index
    %c1 = arith.constant 1 : index
    %c0_13 = arith.constant 0 : index
    %c0_14 = arith.constant 0 : index
    %9 = vector.load %arg4[%c0_12, %c1, %c0_13, %c0_14] : memref<1x2x16x64xf32, #tpu.memory_space<vmem>>, vector<1x1x16x64xf32>
    %10 = vector.shape_cast %9 : vector<1x1x16x64xf32> to vector<16x64xf32>
    %c0_15 = arith.constant 0 : index
    %c1_16 = arith.constant 1 : index
    %c0_17 = arith.constant 0 : index
    %c0_18 = arith.constant 0 : index
    %11 = vector.load %arg5[%c0_15, %c1_16, %c0_17, %c0_18] : memref<1x2x1x64xf32, #tpu.memory_space<vmem>>, vector<1x1x1x64xf32>
    %12 = vector.shape_cast %11 : vector<1x1x1x64xf32> to vector<1x64xf32>
    %c0_19 = arith.constant 0 : index
    %c1_20 = arith.constant 1 : index
    %c0_21 = arith.constant 0 : index
    %c0_22 = arith.constant 0 : index
    %13 = vector.load %arg6[%c0_19, %c1_20, %c0_21, %c0_22] : memref<1x2x1x64xf32, #tpu.memory_space<vmem>>, vector<1x1x1x64xf32>
    %14 = vector.shape_cast %13 : vector<1x1x1x64xf32> to vector<1x64xf32>
    %cst_23 = arith.constant 0.000000e+00 : f32
    %15 = vector.broadcast %cst_23 : f32 to vector<16x64xf32>
    %c0_i32_24 = arith.constant 0 : i32
    %c2_i32_25 = arith.constant 2 : i32
    %16 = arith.addi %c0_i32_24, %c2_i32_25 : i32
    %c1_i32_26 = arith.constant 1 : i32
    %17 = scf.for %arg11 = %c0_i32_24 to %16 step %c1_i32_26 iter_args(%arg12 = %15) -> (vector<16x64xf32>)  : i32 {
      %c1_i32_28 = arith.constant 1 : i32
      %18 = arith.addi %arg11, %c1_i32_28 : i32
      %c32_i32 = arith.constant 32 : i32
      %19 = arith.muli %18, %c32_i32 : i32
      %c64_i32 = arith.constant 64 : i32
      %20 = arith.subi %c64_i32, %19 : i32
      %21 = tpu.assume_multiple %20, 32 : i32
      %c0_29 = arith.constant 0 : index
      %c0_30 = arith.constant 0 : index
      %22 = arith.index_cast %21 : i32 to index
      %c0_31 = arith.constant 0 : index
      %23 = vector.load %arg2[%c0_29, %c0_30, %22, %c0_31] : memref<1x1x64x64xf32, #tpu.memory_space<vmem>>, vector<1x1x32x64xf32>
      %24 = vector.shape_cast %23 : vector<1x1x32x64xf32> to vector<32x64xf32>
      %c0_32 = arith.constant 0 : index
      %c0_33 = arith.constant 0 : index
      %25 = arith.index_cast %21 : i32 to index
      %c128 = arith.constant 128 : index
      %26 = vector.load %arg3[%c0_32, %c0_33, %25, %c128] : memref<1x1x64x256xf32, #tpu.memory_space<vmem>>, vector<1x1x32x128xf32>
      %27 = vector.shape_cast %26 : vector<1x1x32x128xf32> to vector<32x128xf32>
      %28 = vector.extract_strided_slice %27 {offsets = [0, 0], sizes = [32, 64], strides = [1, 1]} : vector<32x128xf32> to vector<32x64xf32>
      %29 = vector.extract_strided_slice %27 {offsets = [0, 64], sizes = [32, 16], strides = [1, 1]} : vector<32x128xf32> to vector<32x16xf32>
      %30 = vector.extract_strided_slice %27 {offsets = [0, 80], sizes = [32, 16], strides = [1, 1]} : vector<32x128xf32> to vector<32x16xf32>
      %31 = vector.broadcast %14 : vector<1x64xf32> to vector<32x64xf32>
      %32 = arith.addf %28, %31 : vector<32x64xf32>
      %cst_34 = arith.constant 0.000000e+00 : f32
      %33 = vector.broadcast %cst_34 : f32 to vector<32x64xf32>
      %34 = arith.maximumf %32, %33 : vector<32x64xf32>
      %35 = math.absf %32 : vector<32x64xf32>
      %cst_35 = arith.constant 0.000000e+00 : f32
      %36 = vector.broadcast %cst_35 : f32 to vector<32x64xf32>
      %37 = arith.subf %36, %35 : vector<32x64xf32>
      %38 = math.exp %37 : vector<32x64xf32>
      %39 = math.log1p %38 : vector<32x64xf32>
      %40 = arith.addf %34, %39 : vector<32x64xf32>
      %41 = vector.shape_cast %40 : vector<32x64xf32> to vector<32x1x64xf32>
      %42 = vector.shape_cast %10 : vector<16x64xf32> to vector<1x16x64xf32>
      %43 = vector.broadcast %41 : vector<32x1x64xf32> to vector<32x16x64xf32>
      %44 = vector.broadcast %42 : vector<1x16x64xf32> to vector<32x16x64xf32>
      %45 = arith.mulf %43, %44 : vector<32x16x64xf32>
      %46 = math.exp %45 : vector<32x16x64xf32>
      %c0_36 = arith.constant 0 : index
      %c0_37 = arith.constant 0 : index
      %c0_38 = arith.constant 0 : index
      %47 = vector.load %arg8[%c0_36, %c0_37, %c0_38] : memref<32x16x64xf32, #tpu.memory_space<vmem>>, vector<32x16x64xf32>
      tpu.vector_store %arg8[%c0_36, %c0_37, %c0_38], %46 {strides = array<i32>} : memref<32x16x64xf32, #tpu.memory_space<vmem>>, vector<32x16x64xf32>,
      %48 = arith.mulf %40, %24 : vector<32x64xf32>
      %49 = vector.shape_cast %48 : vector<32x64xf32> to vector<32x1x64xf32>
      %50 = vector.shape_cast %29 : vector<32x16xf32> to vector<32x16x1xf32>
      %51 = vector.broadcast %49 : vector<32x1x64xf32> to vector<32x16x64xf32>
      %52 = vector.broadcast %50 : vector<32x16x1xf32> to vector<32x16x64xf32>
      %53 = arith.mulf %51, %52 : vector<32x16x64xf32>
      %c0_39 = arith.constant 0 : index
      %c0_40 = arith.constant 0 : index
      %c0_41 = arith.constant 0 : index
      %54 = vector.load %arg9[%c0_39, %c0_40, %c0_41] : memref<32x16x64xf32, #tpu.memory_space<vmem>>, vector<32x16x64xf32>
      tpu.vector_store %arg9[%c0_39, %c0_40, %c0_41], %53 {strides = array<i32>} : memref<32x16x64xf32, #tpu.memory_space<vmem>>, vector<32x16x64xf32>,
      %c0_i32_42 = arith.constant 0 : i32
      %c8_i32 = arith.constant 8 : i32
      %55 = arith.addi %c0_i32_42, %c8_i32 : i32
      %c1_i32_43 = arith.constant 1 : i32
      %56 = scf.for %arg13 = %c0_i32_42 to %55 step %c1_i32_43 iter_args(%arg14 = %arg12) -> (vector<16x64xf32>)  : i32 {
        %c4_i32 = arith.constant 4 : i32
        %73 = arith.muli %arg13, %c4_i32 : i32
        %c0_i32_55 = arith.constant 0 : i32
        %74 = arith.addi %73, %c0_i32_55 : i32
        %c31_i32 = arith.constant 31 : i32
        %75 = arith.subi %c31_i32, %74 : i32
        %76 = arith.index_cast %75 : i32 to index
        %c0_56 = arith.constant 0 : index
        %c0_57 = arith.constant 0 : index
        %77 = vector.load %arg8[%76, %c0_56, %c0_57] : memref<32x16x64xf32, #tpu.memory_space<vmem>>, vector<1x16x64xf32>
        %78 = vector.shape_cast %77 : vector<1x16x64xf32> to vector<16x64xf32>
        %79 = arith.mulf %78, %arg14 : vector<16x64xf32>
        %80 = arith.index_cast %75 : i32 to index
        %c0_58 = arith.constant 0 : index
        %c0_59 = arith.constant 0 : index
        %81 = vector.load %arg9[%80, %c0_58, %c0_59] : memref<32x16x64xf32, #tpu.memory_space<vmem>>, vector<1x16x64xf32>
        %82 = vector.shape_cast %81 : vector<1x16x64xf32> to vector<16x64xf32>
        %83 = arith.addf %79, %82 : vector<16x64xf32>
        %84 = arith.index_cast %75 : i32 to index
        %c0_60 = arith.constant 0 : index
        %c0_61 = arith.constant 0 : index
        %85 = vector.load %arg10[%84, %c0_60, %c0_61] : memref<32x16x64xf32, #tpu.memory_space<vmem>>, vector<1x16x64xf32>
        %86 = vector.shape_cast %85 : vector<1x16x64xf32> to vector<16x64xf32>
        %87 = vector.shape_cast %83 : vector<16x64xf32> to vector<1x16x64xf32>
        tpu.vector_store %arg10[%84, %c0_60, %c0_61], %87 {strides = array<i32>} : memref<32x16x64xf32, #tpu.memory_space<vmem>>, vector<1x16x64xf32>,
        %c4_i32_62 = arith.constant 4 : i32
        %88 = arith.muli %arg13, %c4_i32_62 : i32
        %c1_i32_63 = arith.constant 1 : i32
        %89 = arith.addi %88, %c1_i32_63 : i32
        %c31_i32_64 = arith.constant 31 : i32
        %90 = arith.subi %c31_i32_64, %89 : i32
        %91 = arith.index_cast %90 : i32 to index
        %c0_65 = arith.constant 0 : index
        %c0_66 = arith.constant 0 : index
        %92 = vector.load %arg8[%91, %c0_65, %c0_66] : memref<32x16x64xf32, #tpu.memory_space<vmem>>, vector<1x16x64xf32>
        %93 = vector.shape_cast %92 : vector<1x16x64xf32> to vector<16x64xf32>
        %94 = arith.mulf %93, %83 : vector<16x64xf32>
        %95 = arith.index_cast %90 : i32 to index
        %c0_67 = arith.constant 0 : index
        %c0_68 = arith.constant 0 : index
        %96 = vector.load %arg9[%95, %c0_67, %c0_68] : memref<32x16x64xf32, #tpu.memory_space<vmem>>, vector<1x16x64xf32>
        %97 = vector.shape_cast %96 : vector<1x16x64xf32> to vector<16x64xf32>
        %98 = arith.addf %94, %97 : vector<16x64xf32>
        %99 = arith.index_cast %90 : i32 to index
        %c0_69 = arith.constant 0 : index
        %c0_70 = arith.constant 0 : index
        %100 = vector.load %arg10[%99, %c0_69, %c0_70] : memref<32x16x64xf32, #tpu.memory_space<vmem>>, vector<1x16x64xf32>
        %101 = vector.shape_cast %100 : vector<1x16x64xf32> to vector<16x64xf32>
        %102 = vector.shape_cast %98 : vector<16x64xf32> to vector<1x16x64xf32>
        tpu.vector_store %arg10[%99, %c0_69, %c0_70], %102 {strides = array<i32>} : memref<32x16x64xf32, #tpu.memory_space<vmem>>, vector<1x16x64xf32>,
        %c4_i32_71 = arith.constant 4 : i32
        %103 = arith.muli %arg13, %c4_i32_71 : i32
        %c2_i32_72 = arith.constant 2 : i32
        %104 = arith.addi %103, %c2_i32_72 : i32
        %c31_i32_73 = arith.constant 31 : i32
        %105 = arith.subi %c31_i32_73, %104 : i32
        %106 = arith.index_cast %105 : i32 to index
        %c0_74 = arith.constant 0 : index
        %c0_75 = arith.constant 0 : index
        %107 = vector.load %arg8[%106, %c0_74, %c0_75] : memref<32x16x64xf32, #tpu.memory_space<vmem>>, vector<1x16x64xf32>
        %108 = vector.shape_cast %107 : vector<1x16x64xf32> to vector<16x64xf32>
        %109 = arith.mulf %108, %98 : vector<16x64xf32>
        %110 = arith.index_cast %105 : i32 to index
        %c0_76 = arith.constant 0 : index
        %c0_77 = arith.constant 0 : index
        %111 = vector.load %arg9[%110, %c0_76, %c0_77] : memref<32x16x64xf32, #tpu.memory_space<vmem>>, vector<1x16x64xf32>
        %112 = vector.shape_cast %111 : vector<1x16x64xf32> to vector<16x64xf32>
        %113 = arith.addf %109, %112 : vector<16x64xf32>
        %114 = arith.index_cast %105 : i32 to index
        %c0_78 = arith.constant 0 : index
        %c0_79 = arith.constant 0 : index
        %115 = vector.load %arg10[%114, %c0_78, %c0_79] : memref<32x16x64xf32, #tpu.memory_space<vmem>>, vector<1x16x64xf32>
        %116 = vector.shape_cast %115 : vector<1x16x64xf32> to vector<16x64xf32>
        %117 = vector.shape_cast %113 : vector<16x64xf32> to vector<1x16x64xf32>
        tpu.vector_store %arg10[%114, %c0_78, %c0_79], %117 {strides = array<i32>} : memref<32x16x64xf32, #tpu.memory_space<vmem>>, vector<1x16x64xf32>,
        %c4_i32_80 = arith.constant 4 : i32
        %118 = arith.muli %arg13, %c4_i32_80 : i32
        %c3_i32 = arith.constant 3 : i32
        %119 = arith.addi %118, %c3_i32 : i32
        %c31_i32_81 = arith.constant 31 : i32
        %120 = arith.subi %c31_i32_81, %119 : i32
        %121 = arith.index_cast %120 : i32 to index
        %c0_82 = arith.constant 0 : index
        %c0_83 = arith.constant 0 : index
        %122 = vector.load %arg8[%121, %c0_82, %c0_83] : memref<32x16x64xf32, #tpu.memory_space<vmem>>, vector<1x16x64xf32>
        %123 = vector.shape_cast %122 : vector<1x16x64xf32> to vector<16x64xf32>
        %124 = arith.mulf %123, %113 : vector<16x64xf32>
        %125 = arith.index_cast %120 : i32 to index
        %c0_84 = arith.constant 0 : index
        %c0_85 = arith.constant 0 : index
        %126 = vector.load %arg9[%125, %c0_84, %c0_85] : memref<32x16x64xf32, #tpu.memory_space<vmem>>, vector<1x16x64xf32>
        %127 = vector.shape_cast %126 : vector<1x16x64xf32> to vector<16x64xf32>
        %128 = arith.addf %124, %127 : vector<16x64xf32>
        %129 = arith.index_cast %120 : i32 to index
        %c0_86 = arith.constant 0 : index
        %c0_87 = arith.constant 0 : index
        %130 = vector.load %arg10[%129, %c0_86, %c0_87] : memref<32x16x64xf32, #tpu.memory_space<vmem>>, vector<1x16x64xf32>
        %131 = vector.shape_cast %130 : vector<1x16x64xf32> to vector<16x64xf32>
        %132 = vector.shape_cast %128 : vector<16x64xf32> to vector<1x16x64xf32>
        tpu.vector_store %arg10[%129, %c0_86, %c0_87], %132 {strides = array<i32>} : memref<32x16x64xf32, #tpu.memory_space<vmem>>, vector<1x16x64xf32>,
        scf.yield %128 : vector<16x64xf32>
      }
      %c8_i32_44 = arith.constant 8 : i32
      %c0_45 = arith.constant 0 : index
      %c0_46 = arith.constant 0 : index
      %c0_47 = arith.constant 0 : index
      %57 = vector.load %arg10[%c0_45, %c0_46, %c0_47] : memref<32x16x64xf32, #tpu.memory_space<vmem>>, vector<32x16x64xf32>
      %58 = vector.shape_cast %30 : vector<32x16xf32> to vector<32x16x1xf32>
      %59 = vector.broadcast %58 : vector<32x16x1xf32> to vector<32x16x64xf32>
      %60 = arith.mulf %57, %59 : vector<32x16x64xf32>
      %cst_48 = arith.constant dense<0.000000e+00> : vector<32x64xf32>
      %61 = vector.multi_reduction <add>, %60, %cst_48 [1] : vector<32x16x64xf32> to vector<32x64xf32>
      %62 = vector.broadcast %12 : vector<1x64xf32> to vector<32x64xf32>
      %63 = arith.mulf %24, %62 : vector<32x64xf32>
      %64 = arith.addf %61, %63 : vector<32x64xf32>
      %c0_49 = arith.constant 0 : index
      %c0_50 = arith.constant 0 : index
      %65 = arith.index_cast %21 : i32 to index
      %c0_51 = arith.constant 0 : index
      %66 = vector.load %arg7[%c0_49, %c0_50, %65, %c0_51] : memref<1x1x64x64xf32, #tpu.memory_space<vmem>>, vector<1x1x32x64xf32>
      %67 = vector.shape_cast %66 : vector<1x1x32x64xf32> to vector<32x64xf32>
      %68 = arith.addf %67, %64 : vector<32x64xf32>
      %c0_52 = arith.constant 0 : index
      %c0_53 = arith.constant 0 : index
      %69 = arith.index_cast %21 : i32 to index
      %c0_54 = arith.constant 0 : index
      %70 = vector.load %arg7[%c0_52, %c0_53, %69, %c0_54] : memref<1x1x64x64xf32, #tpu.memory_space<vmem>>, vector<1x1x32x64xf32>
      %71 = vector.shape_cast %70 : vector<1x1x32x64xf32> to vector<32x64xf32>
      %72 = vector.shape_cast %68 : vector<32x64xf32> to vector<1x1x32x64xf32>
      tpu.vector_store %arg7[%c0_52, %c0_53, %69, %c0_54], %72 {strides = array<i32>} : memref<1x1x64x64xf32, #tpu.memory_space<vmem>>, vector<1x1x32x64xf32>,
      scf.yield %56 : vector<16x64xf32>
    }
    %c2_i32_27 = arith.constant 2 : i32
    return
  }
  func.func @transform_0(%arg0: i32, %arg1: i32) -> (i32, i32, i32, i32) {
    %c0_i32 = arith.constant 0 : i32
    %c0_i32_0 = arith.constant 0 : i32
    %c0_i32_1 = arith.constant 0 : i32
    return %arg1, %arg0, %c0_i32, %c0_i32_0 : i32, i32, i32, i32
  }
  func.func @transform_1(%arg0: i32, %arg1: i32) -> (i32, i32, i32, i32) {
    %c0_i32 = arith.constant 0 : i32
    %c0_i32_0 = arith.constant 0 : i32
    %c0_i32_1 = arith.constant 0 : i32
    return %arg1, %arg0, %c0_i32, %c0_i32_0 : i32, i32, i32, i32
  }
  func.func @transform_2(%arg0: i32, %arg1: i32) -> (i32, i32, i32, i32) {
    %c0_i32 = arith.constant 0 : i32
    %c0_i32_0 = arith.constant 0 : i32
    %c0_i32_1 = arith.constant 0 : i32
    %c0_i32_2 = arith.constant 0 : i32
    return %arg1, %c0_i32, %c0_i32_0, %c0_i32_1 : i32, i32, i32, i32
  }
  func.func @transform_3(%arg0: i32, %arg1: i32) -> (i32, i32, i32, i32) {
    %c0_i32 = arith.constant 0 : i32
    %c0_i32_0 = arith.constant 0 : i32
    %c0_i32_1 = arith.constant 0 : i32
    %c0_i32_2 = arith.constant 0 : i32
    return %arg1, %c0_i32, %c0_i32_0, %c0_i32_1 : i32, i32, i32, i32
  }
  func.func @transform_4(%arg0: i32, %arg1: i32) -> (i32, i32, i32, i32) {
    %c0_i32 = arith.constant 0 : i32
    %c0_i32_0 = arith.constant 0 : i32
    %c0_i32_1 = arith.constant 0 : i32
    %c0_i32_2 = arith.constant 0 : i32
    return %arg1, %c0_i32, %c0_i32_0, %c0_i32_1 : i32, i32, i32, i32
  }
  func.func @transform_5(%arg0: i32, %arg1: i32) -> (i32, i32, i32, i32) {
    %c0_i32 = arith.constant 0 : i32
    %c0_i32_0 = arith.constant 0 : i32
    %c0_i32_1 = arith.constant 0 : i32
    return %arg1, %arg0, %c0_i32, %c0_i32_0 : i32, i32, i32, i32
  }
}

module attributes {stable_mosaic.version = 11 : i64} {
  func.func @_ln_gate_proj_kernel(%arg0: i32, %arg1: i32, %arg2: memref<1x1x64x64xf32, #tpu.memory_space<vmem>>, %arg3: memref<1x64x64xf32, #tpu.memory_space<vmem>>, %arg4: memref<1x64x64xf32, #tpu.memory_space<vmem>>, %arg5: memref<1x64xf32, #tpu.memory_space<vmem>>, %arg6: memref<1x64xf32, #tpu.memory_space<vmem>>, %arg7: memref<64x32xbf16, #tpu.memory_space<vmem>>, %arg8: memref<1x64x32xf32, #tpu.memory_space<vmem>>) attributes {dimension_semantics = [#tpu.dimension_semantics<parallel>, #tpu.dimension_semantics<parallel>], iteration_bounds = array<i64: 2, 1>, scalar_prefetch = 0 : i64, scratch_operands = 0 : i64, tpu.core_type = #tpu.core_type<tc>, window_params = [{transform_indices = @transform_0, window_bounds = array<i64: 1, 1, 64, 64>}, {transform_indices = @transform_1, window_bounds = array<i64: 1, 64, 64>}, {transform_indices = @transform_2, window_bounds = array<i64: 1, 64, 64>}, {pipeline_mode = #tpu.pipeline_mode<synchronous>, transform_indices = @transform_3, window_bounds = array<i64: 1, 64>}, {pipeline_mode = #tpu.pipeline_mode<synchronous>, transform_indices = @transform_4, window_bounds = array<i64: 1, 64>}, {pipeline_mode = #tpu.pipeline_mode<synchronous>, transform_indices = @transform_5, window_bounds = array<i64: 64, 32>}, {transform_indices = @transform_6, window_bounds = array<i64: 1, 64, 32>}]} {
    %c0 = arith.constant 0 : index
    %c0_0 = arith.constant 0 : index
    %c0_1 = arith.constant 0 : index
    %c0_2 = arith.constant 0 : index
    %0 = vector.load %arg2[%c0, %c0_0, %c0_1, %c0_2] : memref<1x1x64x64xf32, #tpu.memory_space<vmem>>, vector<1x1x64x64xf32>
    %1 = vector.shape_cast %0 : vector<1x1x64x64xf32> to vector<64x64xf32>
    %c0_3 = arith.constant 0 : index
    %c0_4 = arith.constant 0 : index
    %c0_5 = arith.constant 0 : index
    %2 = vector.load %arg3[%c0_3, %c0_4, %c0_5] : memref<1x64x64xf32, #tpu.memory_space<vmem>>, vector<1x64x64xf32>
    %3 = vector.shape_cast %2 : vector<1x64x64xf32> to vector<64x64xf32>
    %4 = arith.addf %1, %3 : vector<64x64xf32>
    %cst = arith.constant dense<0.000000e+00> : vector<64xf32>
    %5 = vector.multi_reduction <add>, %4, %cst [1] : vector<64x64xf32> to vector<64xf32>
    %6 = vector.shape_cast %5 : vector<64xf32> to vector<64x1xf32>
    %cst_6 = arith.constant 6.400000e+01 : f32
    %7 = vector.broadcast %cst_6 : f32 to vector<64x1xf32>
    %8 = arith.divf %6, %7 : vector<64x1xf32>
    %9 = vector.broadcast %8 : vector<64x1xf32> to vector<64x64xf32>
    %10 = arith.subf %4, %9 : vector<64x64xf32>
    %11 = arith.mulf %10, %10 : vector<64x64xf32>
    %cst_7 = arith.constant dense<0.000000e+00> : vector<64xf32>
    %12 = vector.multi_reduction <add>, %11, %cst_7 [1] : vector<64x64xf32> to vector<64xf32>
    %13 = vector.shape_cast %12 : vector<64xf32> to vector<64x1xf32>
    %cst_8 = arith.constant 6.400000e+01 : f32
    %14 = vector.broadcast %cst_8 : f32 to vector<64x1xf32>
    %15 = arith.divf %13, %14 : vector<64x1xf32>
    %cst_9 = arith.constant 9.99999974E-6 : f32
    %16 = vector.broadcast %cst_9 : f32 to vector<64x1xf32>
    %17 = arith.addf %15, %16 : vector<64x1xf32>
    %18 = math.rsqrt %17 : vector<64x1xf32>
    %19 = vector.broadcast %18 : vector<64x1xf32> to vector<64x64xf32>
    %20 = arith.mulf %10, %19 : vector<64x64xf32>
    %c0_10 = arith.constant 0 : index
    %c0_11 = arith.constant 0 : index
    %21 = vector.load %arg5[%c0_10, %c0_11] : memref<1x64xf32, #tpu.memory_space<vmem>>, vector<1x64xf32>
    %22 = vector.broadcast %21 : vector<1x64xf32> to vector<64x64xf32>
    %23 = arith.mulf %20, %22 : vector<64x64xf32>
    %c0_12 = arith.constant 0 : index
    %c0_13 = arith.constant 0 : index
    %24 = vector.load %arg6[%c0_12, %c0_13] : memref<1x64xf32, #tpu.memory_space<vmem>>, vector<1x64xf32>
    %25 = vector.broadcast %24 : vector<1x64xf32> to vector<64x64xf32>
    %26 = arith.addf %23, %25 : vector<64x64xf32>
    %c0_14 = arith.constant 0 : index
    %c0_15 = arith.constant 0 : index
    %c0_16 = arith.constant 0 : index
    %27 = vector.load %arg4[%c0_14, %c0_15, %c0_16] : memref<1x64x64xf32, #tpu.memory_space<vmem>>, vector<1x64x64xf32>
    %28 = vector.shape_cast %27 : vector<1x64x64xf32> to vector<64x64xf32>
    %29 = arith.negf %28 : vector<64x64xf32>
    %30 = math.exp %29 : vector<64x64xf32>
    %cst_17 = arith.constant 1.000000e+00 : f32
    %31 = vector.broadcast %cst_17 : f32 to vector<64x64xf32>
    %32 = arith.addf %31, %30 : vector<64x64xf32>
    %33 = arith.divf %31, %32 : vector<64x64xf32>
    %34 = arith.mulf %28, %33 : vector<64x64xf32>
    %35 = arith.mulf %26, %34 : vector<64x64xf32>
    %36 = arith.truncf %35 : vector<64x64xf32> to vector<64x64xbf16>
    %c0_18 = arith.constant 0 : index
    %c0_19 = arith.constant 0 : index
    %37 = vector.load %arg7[%c0_18, %c0_19] : memref<64x32xbf16, #tpu.memory_space<vmem>>, vector<64x32xbf16>
    %cst_20 = arith.constant dense<0.000000e+00> : vector<64x32xf32>
    %38 = tpu.matmul %36, %37, %cst_20 {dimension_numbers = #tpu.dot_dimension_numbers<[1], [0], [0], [1], [0, 0, 1, 1], [], []>} : vector<64x64xbf16>, vector<64x32xbf16>, vector<64x32xf32> -> vector<64x32xf32>
    %c0_21 = arith.constant 0 : index
    %c0_22 = arith.constant 0 : index
    %c0_23 = arith.constant 0 : index
    %39 = vector.load %arg8[%c0_21, %c0_22, %c0_23] : memref<1x64x32xf32, #tpu.memory_space<vmem>>, vector<1x64x32xf32>
    %40 = vector.shape_cast %39 : vector<1x64x32xf32> to vector<64x32xf32>
    %41 = vector.shape_cast %38 : vector<64x32xf32> to vector<1x64x32xf32>
    tpu.vector_store %arg8[%c0_21, %c0_22, %c0_23], %41 {strides = array<i32>} : memref<1x64x32xf32, #tpu.memory_space<vmem>>, vector<1x64x32xf32>,
    return
  }
  func.func @transform_0(%arg0: i32, %arg1: i32) -> (i32, i32, i32, i32) {
    %c0_i32 = arith.constant 0 : i32
    %c0_i32_0 = arith.constant 0 : i32
    %c0_i32_1 = arith.constant 0 : i32
    return %c0_i32, %arg0, %arg1, %c0_i32_0 : i32, i32, i32, i32
  }
  func.func @transform_1(%arg0: i32, %arg1: i32) -> (i32, i32, i32) {
    %c0_i32 = arith.constant 0 : i32
    %c0_i32_0 = arith.constant 0 : i32
    return %arg0, %arg1, %c0_i32 : i32, i32, i32
  }
  func.func @transform_2(%arg0: i32, %arg1: i32) -> (i32, i32, i32) {
    %c0_i32 = arith.constant 0 : i32
    %c0_i32_0 = arith.constant 0 : i32
    return %arg0, %arg1, %c0_i32 : i32, i32, i32
  }
  func.func @transform_3(%arg0: i32, %arg1: i32) -> (i32, i32) {
    %c0_i32 = arith.constant 0 : i32
    %c0_i32_0 = arith.constant 0 : i32
    %c0_i32_1 = arith.constant 0 : i32
    return %c0_i32, %c0_i32_0 : i32, i32
  }
  func.func @transform_4(%arg0: i32, %arg1: i32) -> (i32, i32) {
    %c0_i32 = arith.constant 0 : i32
    %c0_i32_0 = arith.constant 0 : i32
    %c0_i32_1 = arith.constant 0 : i32
    return %c0_i32, %c0_i32_0 : i32, i32
  }
  func.func @transform_5(%arg0: i32, %arg1: i32) -> (i32, i32) {
    %c0_i32 = arith.constant 0 : i32
    %c0_i32_0 = arith.constant 0 : i32
    %c0_i32_1 = arith.constant 0 : i32
    return %c0_i32, %c0_i32_0 : i32, i32
  }
  func.func @transform_6(%arg0: i32, %arg1: i32) -> (i32, i32, i32) {
    %c0_i32 = arith.constant 0 : i32
    %c0_i32_0 = arith.constant 0 : i32
    return %arg0, %arg1, %c0_i32 : i32, i32, i32
  }
}

</mosaic_0001>

<bundles_post_ra>
// kernel: ss2d_forward.7
= control target key start
LH: loop header
LB: loop body
LE: loop exit
PB: predicated region body
PF: predicated region fallthrough
CT: control target
= control target key end

     0   :  { %s718_s9 = smov 0   ;;  %s720_s10 = smov 0   ;;  %s810_s0 = inlined_call_operand.vmem [shape: bf16[2,128,64], index: 0, kind: input, shape index: {}]   ;;  %s811_s1 = inlined_call_operand.vmem [shape: bf16[2,64,256], index: 1, kind: input, shape index: {}]   ;;  %s812_s2 = inlined_call_operand.vmem [shape: f32[2,128,256], index: 2, kind: output, shape index: {}]  }
   0x1   :  { %s722_s11 = smov 0  }
   0x2 LB: > { %s24_s12 = sadd.s32 1, %s696_s10  ;;  %p589_p0 = scmp.ge.s32.totalorder %s700_s11, 1  ;;  %s700_s11 = sphi %s722_s11, %s12_s11   ;;  %s696_s10 = sphi %s720_s10, %s814_s10   ;;  %s692_s9 = sphi %s718_s9, %s813_s9  }
   0x3   : > { %p26_p1 = scmp.ge.s32.totalorder %s24_s12, 2  ;;  %p143_p2 = scmp.lt.s32.totalorder %s700_s11, 3 }
   0x5   : > { %s816_s12 = smov (%p26_p1, %s24_s12), 0  ;;  %p144_p3 = pnand %p589_p0, %p143_p2 }
   0x6   : > { %p180_p4 = scmp.lt.s32.totalorder (!%p144_p3), %s692_s9, 1  ;;  %v702_v0 = vmov (!%p144_p3), 0   ;;  %vm310_vm0 = vcmask (!%p144_p3), 523264  }
   0x7   : > { %147 = sbr.rel (%p144_p3) target bundleno = 274 (0x112), region = 28  ;;  %367 = vmatprep.mubr.bf16.mxu0 (!%p144_p3), %v702_v0  ;;  %407 = vmatprep.mubr.bf16.mxu1 (!%p144_p3), %v702_v0 }
   0xe   : > { %s818_s9 = smov (!%p180_p4, %s692_s9), 1 }
   0xf   : > { %s622_s13 = sshll.u32 %s818_s9, 6  ;;  %s624_s20 = sshll.u32 %s818_s9, 8 }
  0x10   : > { %s193_s16 = scalar_lea.vmem %s811_s1, %s622_s13  ;;  %s745_s19 = scalar_lea.vmem %s810_s0, %s622_s13 }
  0x11   : > { %v658_v1 = vld [vmem:[%s193_s16 + $0x4] ss:$8 sps:$4 sm:$0xff]   ;;  %v660_v2 = vld [vmem:[%s193_s16] ss:$8 sps:$4 sm:$0xff]   ;;  %v661_v3 = vld [vmem:[%s193_s16 + $0x14] ss:$8 sps:$4 sm:$0xff]   ;;  %s767_s23 = scalar_lea.vmem %s812_s2, %s624_s20 }
  0x12   : > { %335 = vmatprep.subr.bf16.mxu0 %v658_v1  ;;  %625 = vmatprep.subr.bf16.mxu1 %v658_v1  ;;  %v663_v4 = vld [vmem:[%s193_s16 + $0x10] ss:$8 sps:$4 sm:$0xff]   ;;  %v664_v5 = vld [vmem:[%s193_s16 + $0x24] ss:$8 sps:$4 sm:$0xff]   ;;  %v666_v6 = vld [vmem:[%s193_s16 + $0x20] ss:$8 sps:$4 sm:$0xff]  }
  0x13   : > { %336 = vmatpush1.bf16.msra.mxu0 %v660_v2  ;;  %629 = vmatpush1.bf16.msra.mxu1 %v660_v2  ;;  %v667_v7 = vld [vmem:[%s193_s16 + $0x34] ss:$8 sps:$4 sm:$0xff]   ;;  %v669_v8 = vld [vmem:[%s193_s16 + $0x30] ss:$8 sps:$4 sm:$0xff]   ;;  %v670_v9 = vld [vmem:[%s745_s19] sm:$0xff]  }
  0x14   : > { %337 = vmatprep.subr.bf16.mxu0 %v661_v3  ;;  %626 = vmatprep.subr.bf16.mxu1 %v661_v3  ;;  %v671_v10 = vld [vmem:[%s745_s19 + $0x20] sm:$0xff]   ;;  %v672_v11 = vld [vmem:[%s745_s19 + $0x8] sm:$0xff]   ;;  %v674_v13 = vld [vmem:[%s745_s19 + $0x10] sm:$0xff]  }
  0x15   : > { %v673_v12 = vld [vmem:[%s745_s19 + $0x28] sm:$0xff]   ;;  %v675_v14 = vld [vmem:[%s745_s19 + $0x30] sm:$0xff]   ;;  %v676_v15 = vld [vmem:[%s745_s19 + $0x18] sm:$0xff]  }
  0x16   : > { %v677_v16 = vld [vmem:[%s745_s19 + $0x38] sm:$0xff]  }
  0x17   : > { %338 = vmatpush1.bf16.msra.mxu0 %v663_v4  ;;  %630 = vmatpush1.bf16.msra.mxu1 %v663_v4 }
  0x18   : > { %339 = vmatprep.subr.bf16.mxu0 %v664_v5  ;;  %627 = vmatprep.subr.bf16.mxu1 %v664_v5 }
  0x1b   : > { %340 = vmatpush1.bf16.msra.mxu0 %v666_v6  ;;  %631 = vmatpush1.bf16.msra.mxu1 %v666_v6 }
  0x1c   : > { %341 = vmatprep.subr.bf16.mxu0 %v667_v7  ;;  %628 = vmatprep.subr.bf16.mxu1 %v667_v7 }
  0x1f   : > { %342 = vmatpush1.bf16.msra.mxu0 %v669_v8  ;;  %632 = vmatpush1.bf16.msra.mxu1 %v669_v8 }
  0x22   : > { %612 = vmatmul.mubr.msk.bf16.vlgmr.msra.gmra.mrb[0].mxu0 %vm310_vm0, %v670_v9  ;;  %616 = vmatmul.mubr.msk.bf16.vlgmr.msra.gmra.mrb[0].mxu1 %vm310_vm0, %v671_v10 }
  0x23   : > { %377 = vmatprep.mubr.bf16.mxu0 %v702_v0  ;;  %417 = vmatprep.mubr.bf16.mxu1 %v702_v0 }
  0x2a   : > { %613 = vmatmul.mubr.msk.bf16.gmra.mrb[4].mxu0 %vm310_vm0, %v672_v11  ;;  %617 = vmatmul.mubr.msk.bf16.gmra.mrb[4].mxu1 %vm310_vm0, %v673_v12 }
  0x2b   : > { %387 = vmatprep.mubr.bf16.mxu0 %v702_v0  ;;  %427 = vmatprep.mubr.bf16.mxu1 %v702_v0 }
  0x32   : > { %614 = vmatmul.mubr.msk.bf16.gmra.mrb[8].mxu0 %vm310_vm0, %v674_v13  ;;  %618 = vmatmul.mubr.msk.bf16.gmra.mrb[8].mxu1 %vm310_vm0, %v675_v14 }
  0x33   : > { %397 = vmatprep.mubr.bf16.mxu0 %v702_v0  ;;  %437 = vmatprep.mubr.bf16.mxu1 %v702_v0 }
  0x3a   : > { %615 = vmatmul.mubr.msk.bf16.gmra.mrb[12].mxu0 %vm310_vm0, %v676_v15  ;;  %619 = vmatmul.mubr.msk.bf16.gmra.mrb[12].mxu1 %vm310_vm0, %v677_v16 }
  0xf5   : > { %v369_v17 = vpop.f32.mrb[0].mxu0  ;;  %v409_v18 = vpop.f32.mrb[0].mxu1 }
  0xf6   : > { %448 = vst [vmem:[%s767_s23] sm:$0xff] %v369_v17  ;;  %464 = vst [vmem:[%s767_s23 + $0x80] sm:$0xff] %v409_v18  ;;  %v371_v19 = vpop.f32.mrb[1].mxu0  ;;  %v411_v20 = vpop.f32.mrb[1].mxu1 }
  0xf7   : > { %449 = vst [vmem:[%s767_s23 + $0x8] sm:$0xff] %v371_v19  ;;  %465 = vst [vmem:[%s767_s23 + $0x88] sm:$0xff] %v411_v20  ;;  %v373_v21 = vpop.f32.mrb[2].mxu0  ;;  %v413_v22 = vpop.f32.mrb[2].mxu1 }
  0xf8   : > { %450 = vst [vmem:[%s767_s23 + $0x10] sm:$0xff] %v373_v21  ;;  %466 = vst [vmem:[%s767_s23 + $0x90] sm:$0xff] %v413_v22  ;;  %v375_v23 = vpop.f32.mrb[3].mxu0  ;;  %v415_v24 = vpop.f32.mrb[3].mxu1 }
  0xf9   : > { %451 = vst [vmem:[%s767_s23 + $0x18] sm:$0xff] %v375_v23  ;;  %467 = vst [vmem:[%s767_s23 + $0x98] sm:$0xff] %v415_v24 }
  0xfd   : > { %v379_v25 = vpop.f32.mrb[4].mxu0  ;;  %v419_v26 = vpop.f32.mrb[4].mxu1 }
  0xfe   : > { %452 = vst [vmem:[%s767_s23 + $0x20] sm:$0xff] %v379_v25  ;;  %468 = vst [vmem:[%s767_s23 + $0xa0] sm:$0xff] %v419_v26  ;;  %v381_v27 = vpop.f32.mrb[5].mxu0  ;;  %v421_v28 = vpop.f32.mrb[5].mxu1 }
  0xff   : > { %453 = vst [vmem:[%s767_s23 + $0x28] sm:$0xff] %v381_v27  ;;  %469 = vst [vmem:[%s767_s23 + $0xa8] sm:$0xff] %v421_v28  ;;  %v383_v29 = vpop.f32.mrb[6].mxu0  ;;  %v423_v30 = vpop.f32.mrb[6].mxu1 }
 0x100   : > { %454 = vst [vmem:[%s767_s23 + $0x30] sm:$0xff] %v383_v29  ;;  %470 = vst [vmem:[%s767_s23 + $0xb0] sm:$0xff] %v423_v30  ;;  %v385_v31 = vpop.f32.mrb[7].mxu0  ;;  %v425_v32 = vpop.f32.mrb[7].mxu1 }
 0x101   : > { %455 = vst [vmem:[%s767_s23 + $0x38] sm:$0xff] %v385_v31  ;;  %471 = vst [vmem:[%s767_s23 + $0xb8] sm:$0xff] %v425_v32 }
 0x105   : > { %v389_v33 = vpop.f32.mrb[8].mxu0  ;;  %v429_v34 = vpop.f32.mrb[8].mxu1 }
 0x106   : > { %456 = vst [vmem:[%s767_s23 + $0x40] sm:$0xff] %v389_v33  ;;  %472 = vst [vmem:[%s767_s23 + $0xc0] sm:$0xff] %v429_v34  ;;  %v391_v35 = vpop.f32.mrb[9].mxu0  ;;  %v431_v36 = vpop.f32.mrb[9].mxu1 }
 0x107   : > { %457 = vst [vmem:[%s767_s23 + $0x48] sm:$0xff] %v391_v35  ;;  %473 = vst [vmem:[%s767_s23 + $0xc8] sm:$0xff] %v431_v36  ;;  %v393_v37 = vpop.f32.mrb[10].mxu0  ;;  %v433_v38 = vpop.f32.mrb[10].mxu1 }
 0x108   : > { %458 = vst [vmem:[%s767_s23 + $0x50] sm:$0xff] %v393_v37  ;;  %474 = vst [vmem:[%s767_s23 + $0xd0] sm:$0xff] %v433_v38  ;;  %v395_v39 = vpop.f32.mrb[11].mxu0  ;;  %v435_v40 = vpop.f32.mrb[11].mxu1 }
 0x109   : > { %459 = vst [vmem:[%s767_s23 + $0x58] sm:$0xff] %v395_v39  ;;  %475 = vst [vmem:[%s767_s23 + $0xd8] sm:$0xff] %v435_v40 }
 0x10d   : > { %v399_v41 = vpop.f32.mrb[12].mxu0  ;;  %v439_v42 = vpop.f32.mrb[12].mxu1 }
 0x10e   : > { %460 = vst [vmem:[%s767_s23 + $0x60] sm:$0xff] %v399_v41  ;;  %476 = vst [vmem:[%s767_s23 + $0xe0] sm:$0xff] %v439_v42  ;;  %v401_v43 = vpop.f32.mrb[13].mxu0  ;;  %v441_v44 = vpop.f32.mrb[13].mxu1 }
 0x10f   : > { %461 = vst [vmem:[%s767_s23 + $0x68] sm:$0xff] %v401_v43  ;;  %477 = vst [vmem:[%s767_s23 + $0xe8] sm:$0xff] %v441_v44  ;;  %v403_v45 = vpop.f32.mrb[14].mxu0  ;;  %v443_v46 = vpop.f32.mrb[14].mxu1 }
 0x110   : > { %462 = vst [vmem:[%s767_s23 + $0x70] sm:$0xff] %v403_v45  ;;  %478 = vst [vmem:[%s767_s23 + $0xf0] sm:$0xff] %v443_v46  ;;  %v405_v47 = vpop.f32.mrb[15].mxu0  ;;  %v445_v48 = vpop.f32.mrb[15].mxu1 }
 0x111   : > { %463 = vst [vmem:[%s767_s23 + $0x78] sm:$0xff] %v405_v47  ;;  %479 = vst [vmem:[%s767_s23 + $0xf8] sm:$0xff] %v445_v48 }
 0x112 PF: > { %s12_s11 = sadd.s32 1, %s700_s11   ;;  %s813_s9 = smov %s696_s10 }
 0x113   : > { %p9_p5 = scmp.ge.s32.totalorder %s12_s11, 4   ;;  %s814_s10 = smov %s816_s12 }
 0x115   :  { %11 = sbr.rel (!%p9_p5) target bundleno = 2 (0x2), region = 61 }

// kernel: ss2d_forward.6
= control target key start
LH: loop header
LB: loop body
LE: loop exit
PB: predicated region body
PF: predicated region fallthrough
CT: control target
= control target key end

     0   :  { %s1265_s12 = smov 0   ;;  %s1267_s13 = smov 0   ;;  %s1808_s0 = inlined_call_operand.vmem [shape: bf16[2,10,10,64], index: 0, kind: input, shape index: {}]   ;;  %s1809_s1 = inlined_call_operand.vmem [shape: bf16[3,3,64], index: 1, kind: input, shape index: {}]   ;;  %s1810_s2 = inlined_call_operand.vmem [shape: f32[1,1,64], index: 2, kind: input, shape index: {}]   ;;  %s1811_s3 = inlined_call_operand.vmem [shape: f32[2,8,8,64], index: 3, kind: output, shape index: {}]  }
   0x1   :  { %s1269_s14 = smov 0  }
   0x2 LB: > { %s25_s15 = sadd.s32 1, %s1239_s13  ;;  %p1100_p0 = scmp.ge.s32.totalorder %s1243_s14, 1  ;;  %s1243_s14 = sphi %s1269_s14, %s13_s14   ;;  %s1239_s13 = sphi %s1267_s13, %s1813_s13   ;;  %s1235_s12 = sphi %s1265_s12, %s1812_s12  }
   0x3   : > { %p27_p1 = scmp.ge.s32.totalorder %s25_s15, 2  ;;  %p173_p2 = scmp.lt.s32.totalorder %s1243_s14, 3 }
   0x5   : > { %s1815_s15 = smov (%p27_p1, %s25_s15), 0  ;;  %p174_p3 = pnand %p1100_p0, %p173_p2 }
   0x6   : > { %p210_p4 = scmp.lt.s32.totalorder (!%p174_p3), %s1235_s12, 1  ;;  %v233_v0 = vld [vmem:[%s1809_s1] sm:$0x3] (!%p174_p3)  ;;  %v255_v1 = vlaneseq (!%p174_p3)  ;;  %v234_v2 = vld [vmem:[%s1809_s1 + $0x2] sm:$0x3] (!%p174_p3)  ;;  %vm327_vm0 = vcmask (!%p174_p3), 1046528  }
   0x7   : > { %177 = sbr.rel (%p174_p3) target bundleno = 157 (0x9d), region = 32  ;;  %v235_v3 = vld [vmem:[%s1809_s1 + $0x4] sm:$0x3] (!%p174_p3)  ;;  %v236_v5 = vunpack.c.l.bf16 (!%p174_p3), %v233_v0  ;;  %v237_v6 = vunpack.c.l.bf16 (!%p174_p3), %v234_v2  ;;  %vm420_vm1 = vcmask (!%p174_p3), 1045504   ;;  %vm974_vm2 = vcmask (!%p174_p3), 523264  }
   0x8   : > { %v256_v4 = vshrl.u32 (!%p174_p3), %v255_v1, 7  ;;  %v1297_v10 = vunpack.c.l.bf16 (!%p174_p3), %v235_v3 }
   0xa   : > { %v257_v7 = vsub.s32 (!%p174_p3), 0, %v256_v4  ;;  %v293_v8 = vsub.s32 (!%p174_p3), 1, %v256_v4  ;;  %v1295_v9 = vsub.s32 (!%p174_p3), 2, %v256_v4 }
   0xc   : > { %v1311_v14 = vrot.slane (!%p174_p3), %v236_v5, %v257_v7  ;;  %v294_v17 = vrot.slane (!%p174_p3), %v236_v5, %v293_v8  ;;  %v1320_v18 = vrot.slane (!%p174_p3), %v236_v5, %v1295_v9  ;;  %v1322_v19 = vrot.slane (!%p174_p3), %v237_v6, %v257_v7 }
   0xd   : > { %v1324_v20 = vrot.slane (!%p174_p3), %v237_v6, %v293_v8  ;;  %v1336_v25 = vrot.slane (!%p174_p3), %v237_v6, %v1295_v9  ;;  %v1339_v26 = vrot.slane (!%p174_p3), %v1297_v10, %v257_v7  ;;  %v1342_v27 = vrot.slane (!%p174_p3), %v1297_v10, %v293_v8 }
   0xe   : > { %s1817_s12 = smov (!%p210_p4, %s1235_s12), 1 }
   0xf   : > { %s1164_s22 = smul.u32 80, %s1817_s12  ;;  %s1163_s28 = sshll.u32 %s1817_s12, 6 }
  0x10   : > { %s232_s4 = scalar_lea.vmem %s1811_s3, %s1163_s28 }
  0x11   : > { %s1302_s25 = scalar_lea.vmem %s1808_s0, %s1164_s22 }
  0x12   : > { %v239_v11 = vld [vmem:[%s1302_s25] ss:$8 sps:$4 sm:$0xff]   ;;  %v1306_v12 = vld [vmem:[%s1302_s25 + $0x10] ss:$8 sps:$4 sm:$0xff]   ;;  %v1317_v16 = vld [vmem:[%s1302_s25 + $0x4] sm:$0x1] }
  0x13   : > { %v1309_v13 = vld [vmem:[%s1302_s25 + $0x20] ss:$8 sps:$4 sm:$0xff]   ;;  %v1314_v15 = vld [vmem:[%s1302_s25 + $0x30] ss:$8 sps:$4 sm:$0xff]   ;;  %v247_v21 = vunpack.c.l.bf16 %v239_v11  ;;  %v1327_v22 = vld [vmem:[%s1302_s25 + $0xc] sm:$0x1]  ;;  %v248_v28 = vunpack.c.h.bf16 %v239_v11  ;;  %v249_v29 = vunpack.c.l.bf16 %v1306_v12  ;;  %v250_v30 = vunpack.c.h.bf16 %v1306_v12 }
  0x14   : > { %v1330_v23 = vld [vmem:[%s1302_s25 + $0x14] sm:$0x1]  ;;  %v1333_v24 = vld [vmem:[%s1302_s25 + $0x1c] sm:$0x1]  ;;  %v251_v31 = vunpack.c.l.bf16 %v1309_v13  ;;  %v1348_v32 = vld [vmem:[%s1302_s25 + $0x24] sm:$0x1]  ;;  %v252_v35 = vunpack.c.h.bf16 %v1309_v13  ;;  %v253_v36 = vunpack.c.l.bf16 %v1314_v15  ;;  %v254_v37 = vunpack.c.h.bf16 %v1314_v15 }
  0x15   : > { %v1351_v33 = vld [vmem:[%s1302_s25 + $0x2c] sm:$0x1]  ;;  %v1354_v34 = vld [vmem:[%s1302_s25 + $0x34] sm:$0x1]  ;;  %v1360_v38 = vmul.f32 %v1311_v14, %v247_v21  ;;  %v1363_v39 = vld [vmem:[%s1302_s25 + $0x3c] sm:$0x1]  ;;  %v283_v40 = vunpack.c.l.bf16 %v1317_v16  ;;  %v284_v41 = vunpack.c.l.bf16 %v1327_v22  ;;  %v285_v42 = vunpack.c.l.bf16 %v1330_v23 }
  0x16   : > { %v286_v43 = vunpack.c.l.bf16 %v1333_v24  ;;  %v260_v44 = vmul.f32 %v1311_v14, %v248_v28  ;;  %v287_v45 = vunpack.c.l.bf16 %v1348_v32  ;;  %v288_v46 = vunpack.c.l.bf16 %v1351_v33 }
  0x17   : > { %v289_v47 = vunpack.c.l.bf16 %v1354_v34  ;;  %v295_v48 = vmul.f32 %v294_v17, %v247_v21  ;;  %v296_v49 = vmul.f32 %v294_v17, %v283_v40  ;;  %v297_v50 = vmul.f32 %v294_v17, %v248_v28 }
  0x18   : > { %v298_v51 = vmul.f32 %v294_v17, %v284_v41  ;;  %v261_v52 = vmul.f32 %v1311_v14, %v249_v29  ;;  %v290_v53 = vunpack.c.l.bf16 %v1363_v39  ;;  %v299_v54 = vmul.f32 %v294_v17, %v249_v29 }
  0x19   : > { %v300_v55 = vmul.f32 %v294_v17, %v285_v42  ;;  %v301_v56 = vmul.f32 %v294_v17, %v250_v30  ;;  %v302_v57 = vmul.f32 %v294_v17, %v286_v43  ;;  %v303_v58 = vmul.f32 %v294_v17, %v251_v31 }
  0x1a   : > { %v304_v59 = vmul.f32 %v294_v17, %v287_v45  ;;  %v305_v60 = vmul.f32 %v294_v17, %v252_v35  ;;  %v306_v61 = vmul.f32 %v294_v17, %v288_v46  ;;  %v307_v62 = vmul.f32 %v294_v17, %v253_v36 }
  0x1b   : > { %v308_v63 = vmul.f32 %v294_v17, %v289_v47  ;;  %v328_v0 = vrot.slane %v295_v48, 1  ;;  %v329_v1 = vrot.slane %v296_v49, 1  ;;  %v331_v2 = vrot.slane %v297_v50, 1 }
  0x1c   : > { %v332_v3 = vrot.slane %v298_v51, 1  ;;  %v309_v4 = vmul.f32 %v294_v17, %v254_v37  ;;  %v310_v5 = vmul.f32 %v294_v17, %v290_v53  ;;  %v334_v6 = vrot.slane %v299_v54, 1  ;;  %v368_v51 = vld [vmem:[%s1302_s25] sm:$0xe]  ;;  %v369_v54 = vld [vmem:[%s1302_s25 + $0x8] sm:$0xe] }
  0x1d   : > { %v335_v7 = vrot.slane %v300_v55, 1  ;;  %v337_v8 = vrot.slane %v301_v56, 1  ;;  %v338_v11 = vrot.slane %v302_v57, 1  ;;  %v340_v12 = vrot.slane %v303_v58, 1  ;;  %v370_v57 = vld [vmem:[%s1302_s25 + $0x10] sm:$0xe] }
  0x1e   : > { %v341_v13 = vrot.slane %v304_v59, 1  ;;  %v1392_v15 = vmul.f32 %v1311_v14, %v250_v30  ;;  %v1395_v21 = vmul.f32 %v1311_v14, %v251_v31  ;;  %v343_v28 = vrot.slane %v305_v60, 1  ;;  %v371_v58 = vld [vmem:[%s1302_s25 + $0x18] sm:$0xe]  ;;  %v372_v59 = vld [vmem:[%s1302_s25 + $0x20] sm:$0xe] }
  0x1f   : > { %v344_v29 = vrot.slane %v306_v61, 1  ;;  %v330_v17 = vsel %vm327_vm0, %v328_v0, %v329_v1  ;;  %v333_v48 = vsel %vm327_vm0, %v331_v2, %v332_v3  ;;  %v346_v49 = vrot.slane %v307_v62, 1  ;;  %v374_v0 = vld [vmem:[%s1302_s25 + $0x30] sm:$0xe] }
  0x20   : > { %v347_v50 = vrot.slane %v308_v63, 1  ;;  %v1402_v55 = vmul.f32 %v1311_v14, %v252_v35  ;;  %v1405_v30 = vmul.f32 %v1311_v14, %v253_v36  ;;  %v1408_v31 = vmul.f32 %v1311_v14, %v254_v37  ;;  %v373_v35 = vld [vmem:[%s1302_s25 + $0x28] sm:$0xe]  ;;  %v375_v37 = vld [vmem:[%s1302_s25 + $0x38] sm:$0xe] }
  0x21   : > { %v336_v56 = vsel %vm327_vm0, %v334_v6, %v335_v7  ;;  %v339_v60 = vsel %vm327_vm0, %v337_v8, %v338_v11  ;;  %v342_v61 = vsel %vm327_vm0, %v340_v12, %v341_v13  ;;  %v349_v62 = vrot.slane %v309_v4, 1 }
  0x22   : > { %v350_v63 = vrot.slane %v310_v5, 1  ;;  %v345_v1 = vsel %vm327_vm0, %v343_v28, %v344_v29  ;;  %v1420_v36 = vadd.f32 %v330_v17, %v1360_v38  ;;  %v1422_v14 = vadd.f32 %v333_v48, %v260_v44 }
  0x23   : > { %v376_v2 = vunpack.c.l.bf16 %v368_v51  ;;  %v348_v3 = vsel %vm327_vm0, %v346_v49, %v347_v50  ;;  %v377_v6 = vunpack.c.l.bf16 %v369_v54  ;;  %v378_v7 = vunpack.c.l.bf16 %v370_v57 }
  0x24   : > { %v379_v8 = vunpack.c.l.bf16 %v371_v58  ;;  %v1426_v11 = vadd.f32 %v336_v56, %v261_v52  ;;  %v380_v4 = vunpack.c.l.bf16 %v372_v59  ;;  %v381_v5 = vunpack.c.l.bf16 %v373_v35 }
  0x25   : > { %v382_v12 = vunpack.c.l.bf16 %v374_v0  ;;  %v351_v13 = vsel %vm327_vm0, %v349_v62, %v350_v63  ;;  %v383_v28 = vunpack.c.l.bf16 %v375_v37  ;;  %v388_v38 = vmul.f32 %v1320_v18, %v376_v2  ;;  %v1104_v0 = vld [vmem:[%s1302_s25 + $0x8] ss:$8 sps:$4 sm:$0xff]  }
  0x26   : > { %v389_v44 = vmul.f32 %v1320_v18, %v283_v40  ;;  %v390_v29 = vmul.f32 %v1320_v18, %v377_v6  ;;  %v391_v17 = vmul.f32 %v1320_v18, %v284_v41  ;;  %v392_v52 = vmul.f32 %v1320_v18, %v378_v7 }
  0x27   : > { %v393_v48 = vmul.f32 %v1320_v18, %v285_v42  ;;  %v394_v49 = vmul.f32 %v1320_v18, %v379_v8  ;;  %v395_v16 = vmul.f32 %v1320_v18, %v286_v43  ;;  %v396_v40 = vmul.f32 %v1320_v18, %v380_v4  ;;  %v1108_v4 = vld [vmem:[%s1302_s25 + $0x28] ss:$8 sps:$4 sm:$0xff]  }
  0x28   : > { %v397_v22 = vmul.f32 %v1320_v18, %v287_v45  ;;  %v398_v41 = vmul.f32 %v1320_v18, %v381_v5  ;;  %v399_v23 = vmul.f32 %v1320_v18, %v288_v46  ;;  %v400_v42 = vmul.f32 %v1320_v18, %v382_v12  ;;  %v1475_v5 = vld [vmem:[%s1302_s25 + $0x38] ss:$8 sps:$4 sm:$0xff]  }
  0x29   : > { %v401_v24 = vmul.f32 %v1320_v18, %v289_v47  ;;  %v402_v43 = vmul.f32 %v1320_v18, %v383_v28  ;;  %v403_v32 = vmul.f32 %v1320_v18, %v290_v53  ;;  %v421_v50 = vrot.slane %v388_v38, 2 }
  0x2a   : > { %v422_v45 = vrot.slane %v389_v44, 2  ;;  %v424_v51 = vrot.slane %v390_v29, 2  ;;  %v425_v54 = vrot.slane %v391_v17, 2  ;;  %v427_v33 = vrot.slane %v392_v52, 2 }
  0x2b   : > { %v428_v56 = vrot.slane %v393_v48, 2  ;;  %v430_v46 = vrot.slane %v394_v49, 2  ;;  %v431_v57 = vrot.slane %v395_v16, 2  ;;  %v433_v58 = vrot.slane %v396_v40, 2  ;;  %v1487_v16 = vld [vmem:[%s1302_s25 + $0xc] sm:$0x1] }
  0x2c   : > { %v434_v34 = vrot.slane %v397_v22, 2  ;;  %v363_v47 = vadd.f32 %v339_v60, %v1392_v15  ;;  %v364_v59 = vadd.f32 %v342_v61, %v1395_v21  ;;  %v436_v62 = vrot.slane %v398_v41, 2  ;;  %v1106_v15 = vld [vmem:[%s1302_s25 + $0x18] ss:$8 sps:$4 sm:$0xff]  }
  0x2d   : > { %v437_v39 = vrot.slane %v399_v23, 2  ;;  %v423_v18 = vsel %vm420_vm1, %v421_v50, %v422_v45  ;;  %v439_v53 = vrot.slane %v400_v42, 2  ;;  %v440_v63 = vrot.slane %v401_v24, 2  ;;  %v1495_v42 = vld [vmem:[%s1302_s25 + $0x14] sm:$0x1] }
  0x2e   : > { %v442_v35 = vrot.slane %v402_v43, 2  ;;  %v365_v37 = vadd.f32 %v345_v1, %v1402_v55  ;;  %v366_v2 = vadd.f32 %v348_v3, %v1405_v30  ;;  %v367_v6 = vadd.f32 %v351_v13, %v1408_v31  ;;  %v1507_v45 = vld [vmem:[%s1302_s25 + $0x2c] sm:$0x1] }
  0x2f   : > { %v443_v7 = vrot.slane %v403_v32, 2  ;;  %v426_v21 = vsel %vm420_vm1, %v424_v51, %v425_v54  ;;  %v429_v60 = vsel %vm420_vm1, %v427_v33, %v428_v56  ;;  %v432_v61 = vsel %vm420_vm1, %v430_v46, %v431_v57  ;;  %v1510_v51 = vld [vmem:[%s1302_s25 + $0x34] sm:$0x1]  ;;  %v1513_v54 = vld [vmem:[%s1302_s25 + $0x3c] sm:$0x1] }
  0x30   : > { %v435_v8 = vsel %vm420_vm1, %v433_v58, %v434_v34  ;;  %v438_v12 = vsel %vm420_vm1, %v436_v62, %v437_v39  ;;  %v441_v55 = vsel %vm420_vm1, %v439_v53, %v440_v63  ;;  %v453_v30 = vadd.f32 %v423_v18, %v1420_v36  ;;  %v1521_v58 = vld [vmem:[%s1302_s25 + $0x44] sm:$0x1] }
  0x31   : > { %v470_v31 = vunpack.c.l.bf16 %v1104_v0  ;;  %v444_v1 = vsel %vm420_vm1, %v442_v35, %v443_v7  ;;  %v471_v3 = vunpack.c.h.bf16 %v1104_v0  ;;  %v472_v13 = vunpack.c.l.bf16 %v1106_v15 }
  0x32   : > { %v473_v28 = vunpack.c.h.bf16 %v1106_v15  ;;  %v474_v38 = vunpack.c.l.bf16 %v1108_v4  ;;  %v475_v44 = vunpack.c.h.bf16 %v1108_v4  ;;  %v476_v29 = vunpack.c.l.bf16 %v1475_v5 }
  0x33   : > { %v477_v17 = vunpack.c.h.bf16 %v1475_v5  ;;  %v454_v52 = vadd.f32 %v426_v21, %v1422_v14  ;;  %v455_v36 = vadd.f32 %v429_v60, %v1426_v11  ;;  %v456_v48 = vadd.f32 %v432_v61, %v363_v47  ;;  %v1498_v14 = vld [vmem:[%s1302_s25 + $0x1c] sm:$0x1]  ;;  %v1501_v11 = vld [vmem:[%s1302_s25 + $0x24] sm:$0x1] }
  0x34   : > { %v482_v49 = vmul.f32 %v1322_v19, %v470_v31  ;;  %v457_v40 = vadd.f32 %v435_v8, %v364_v59  ;;  %v1489_v22 = vadd.f32 %v438_v12, %v365_v37  ;;  %v1491_v41 = vadd.f32 %v441_v55, %v366_v2 }
  0x35   : > { %v483_v23 = vmul.f32 %v1322_v19, %v471_v3  ;;  %v460_v24 = vadd.f32 %v444_v1, %v367_v6  ;;  %v484_v43 = vmul.f32 %v1322_v19, %v472_v13  ;;  %v485_v32 = vmul.f32 %v1322_v19, %v473_v28 }
  0x36   : > { %v486_v50 = vmul.f32 %v1322_v19, %v474_v38  ;;  %v487_v33 = vmul.f32 %v1322_v19, %v475_v44  ;;  %v488_v56 = vmul.f32 %v1322_v19, %v476_v29  ;;  %v489_v46 = vmul.f32 %v1322_v19, %v477_v17 }
  0x37   : > { %v1518_v57 = vadd.f32 %v482_v49, %v453_v30  ;;  %v506_v34 = vunpack.c.l.bf16 %v1487_v16  ;;  %v507_v47 = vunpack.c.l.bf16 %v1495_v42  ;;  %v508_v59 = vunpack.c.l.bf16 %v1498_v14 }
  0x38   : > { %v509_v62 = vunpack.c.l.bf16 %v1501_v11  ;;  %v491_v39 = vadd.f32 %v483_v23, %v454_v52  ;;  %v510_v18 = vunpack.c.l.bf16 %v1507_v45  ;;  %v511_v53 = vunpack.c.l.bf16 %v1510_v51 }
  0x39   : > { %v512_v63 = vunpack.c.l.bf16 %v1513_v54  ;;  %v518_v19 = vmul.f32 %v1324_v20, %v470_v31  ;;  %v519_v35 = vmul.f32 %v1324_v20, %v506_v34  ;;  %v520_v0 = vmul.f32 %v1324_v20, %v471_v3 }
  0x3a   : > { %v521_v37 = vmul.f32 %v1324_v20, %v507_v47  ;;  %v492_v2 = vadd.f32 %v484_v43, %v455_v36  ;;  %v513_v6 = vunpack.c.l.bf16 %v1521_v58  ;;  %v522_v7 = vmul.f32 %v1324_v20, %v472_v13 }
  0x3b   : > { %v523_v15 = vmul.f32 %v1324_v20, %v508_v59  ;;  %v524_v21 = vmul.f32 %v1324_v20, %v473_v28  ;;  %v525_v60 = vmul.f32 %v1324_v20, %v509_v62  ;;  %v526_v61 = vmul.f32 %v1324_v20, %v474_v38 }
  0x3c   : > { %v527_v8 = vmul.f32 %v1324_v20, %v510_v18  ;;  %v528_v4 = vmul.f32 %v1324_v20, %v475_v44  ;;  %v529_v5 = vmul.f32 %v1324_v20, %v511_v53  ;;  %v530_v12 = vmul.f32 %v1324_v20, %v476_v29 }
  0x3d   : > { %v531_v55 = vmul.f32 %v1324_v20, %v512_v63  ;;  %v550_v30 = vrot.slane %v518_v19, 1  ;;  %v551_v31 = vrot.slane %v519_v35, 1  ;;  %v553_v1 = vrot.slane %v520_v0, 1 }
  0x3e   : > { %v554_v3 = vrot.slane %v521_v37, 1  ;;  %v532_v13 = vmul.f32 %v1324_v20, %v477_v17  ;;  %v533_v28 = vmul.f32 %v1324_v20, %v513_v6  ;;  %v556_v38 = vrot.slane %v522_v7, 1  ;;  %v1120_v7 = vld [vmem:[%s1302_s25 + $0x8] sm:$0xe] }
  0x3f   : > { %v557_v44 = vrot.slane %v523_v15, 1  ;;  %v559_v52 = vrot.slane %v524_v21, 1  ;;  %v560_v29 = vrot.slane %v525_v60, 1  ;;  %v562_v36 = vrot.slane %v526_v61, 1  ;;  %v1121_v15 = vld [vmem:[%s1302_s25 + $0x10] sm:$0xe] }
  0x40   : > { %v563_v49 = vrot.slane %v527_v8, 1  ;;  %v1563_v23 = vadd.f32 %v485_v32, %v456_v48  ;;  %v1565_v43 = vadd.f32 %v486_v50, %v457_v40  ;;  %v565_v17 = vrot.slane %v528_v4, 1  ;;  %v1122_v50 = vld [vmem:[%s1302_s25 + $0x18] sm:$0xe]  ;;  %v1123_v60 = vld [vmem:[%s1302_s25 + $0x20] sm:$0xe] }
  0x41   : > { %v566_v19 = vrot.slane %v529_v5, 1  ;;  %v552_v35 = vsel %vm327_vm0, %v550_v30, %v551_v31  ;;  %v555_v20 = vsel %vm327_vm0, %v553_v1, %v554_v3  ;;  %v568_v0 = vrot.slane %v530_v12, 1  ;;  %v1124_v61 = vld [vmem:[%s1302_s25 + $0x28] sm:$0xe] }
  0x42   : > { %v569_v37 = vrot.slane %v531_v55, 1  ;;  %v1572_v21 = vadd.f32 %v487_v33, %v1489_v22  ;;  %v1575_v48 = vadd.f32 %v488_v56, %v1491_v41  ;;  %v1577_v40 = vadd.f32 %v489_v46, %v460_v24  ;;  %v1125_v55 = vld [vmem:[%s1302_s25 + $0x30] sm:$0xe]  ;;  %v1126_v22 = vld [vmem:[%s1302_s25 + $0x38] sm:$0xe] }
  0x43   : > { %v558_v32 = vsel %vm327_vm0, %v556_v38, %v557_v44  ;;  %v561_v8 = vsel %vm327_vm0, %v559_v52, %v560_v29  ;;  %v564_v4 = vsel %vm327_vm0, %v562_v36, %v563_v49  ;;  %v571_v5 = vrot.slane %v532_v13, 1  ;;  %v1127_v56 = vld [vmem:[%s1302_s25 + $0x40] sm:$0xe] }
  0x44   : > { %v572_v12 = vrot.slane %v533_v28, 1  ;;  %v567_v33 = vsel %vm327_vm0, %v565_v17, %v566_v19  ;;  %v1589_v41 = vadd.f32 %v552_v35, %v1518_v57  ;;  %v1591_v24 = vadd.f32 %v555_v20, %v491_v39 }
  0x45   : > { %v598_v46 = vunpack.c.l.bf16 %v1120_v7  ;;  %v570_v30 = vsel %vm327_vm0, %v568_v0, %v569_v37  ;;  %v599_v31 = vunpack.c.l.bf16 %v1121_v15  ;;  %v600_v1 = vunpack.c.l.bf16 %v1122_v50 }
  0x46   : > { %v601_v3 = vunpack.c.l.bf16 %v1123_v60  ;;  %v1595_v38 = vadd.f32 %v558_v32, %v492_v2  ;;  %v602_v13 = vunpack.c.l.bf16 %v1124_v61  ;;  %v603_v28 = vunpack.c.l.bf16 %v1125_v55 }
  0x47   : > { %v604_v44 = vunpack.c.l.bf16 %v1126_v22  ;;  %v573_v52 = vsel %vm327_vm0, %v571_v5, %v572_v12  ;;  %v605_v29 = vunpack.c.l.bf16 %v1127_v56  ;;  %v610_v57 = vmul.f32 %v1336_v25, %v598_v46  ;;  %v1128_v5 = vld [vmem:[%s1302_s25 + $0x10] ss:$8 sps:$4 sm:$0xff]  }
  0x48   : > { %v611_v39 = vmul.f32 %v1336_v25, %v506_v34  ;;  %v612_v36 = vmul.f32 %v1336_v25, %v599_v31  ;;  %v613_v49 = vmul.f32 %v1336_v25, %v507_v47  ;;  %v614_v2 = vmul.f32 %v1336_v25, %v600_v1  ;;  %v1132_v31 = vld [vmem:[%s1302_s25 + $0x30] ss:$8 sps:$4 sm:$0xff]   ;;  %v1134_v1 = vld [vmem:[%s1302_s25 + $0x40] ss:$8 sps:$4 sm:$0xff]  }
  0x49   : > { %v615_v17 = vmul.f32 %v1336_v25, %v508_v59  ;;  %v616_v19 = vmul.f32 %v1336_v25, %v601_v3  ;;  %v617_v16 = vmul.f32 %v1336_v25, %v509_v62  ;;  %v618_v34 = vmul.f32 %v1336_v25, %v602_v13 }
  0x4a   : > { %v619_v42 = vmul.f32 %v1336_v25, %v510_v18  ;;  %v620_v47 = vmul.f32 %v1336_v25, %v603_v28  ;;  %v621_v14 = vmul.f32 %v1336_v25, %v511_v53  ;;  %v622_v59 = vmul.f32 %v1336_v25, %v604_v44 }
  0x4b   : > { %v623_v11 = vmul.f32 %v1336_v25, %v512_v63  ;;  %v624_v62 = vmul.f32 %v1336_v25, %v605_v29  ;;  %v625_v45 = vmul.f32 %v1336_v25, %v513_v6  ;;  %v642_v35 = vrot.slane %v610_v57, 2 }
  0x4c   : > { %v643_v18 = vrot.slane %v611_v39, 2  ;;  %v645_v20 = vrot.slane %v612_v36, 2  ;;  %v646_v0 = vrot.slane %v613_v49, 2  ;;  %v648_v51 = vrot.slane %v614_v2, 2  ;;  %v1652_v2 = vld [vmem:[%s1302_s25 + $0x14] sm:$0x1] }
  0x4d   : > { %v649_v37 = vrot.slane %v615_v17, 2  ;;  %v651_v53 = vrot.slane %v616_v19, 2  ;;  %v652_v7 = vrot.slane %v617_v16, 2  ;;  %v654_v15 = vrot.slane %v618_v34, 2 }
  0x4e   : > { %v655_v54 = vrot.slane %v619_v42, 2  ;;  %v585_v63 = vadd.f32 %v561_v8, %v1563_v23  ;;  %v586_v32 = vadd.f32 %v564_v4, %v1565_v43  ;;  %v657_v50 = vrot.slane %v620_v47, 2  ;;  %v1130_v23 = vld [vmem:[%s1302_s25 + $0x20] ss:$8 sps:$4 sm:$0xff]   ;;  %v1665_v42 = vld [vmem:[%s1302_s25 + $0x24] sm:$0x1] }
  0x4f   : > { %v658_v58 = vrot.slane %v621_v14, 2  ;;  %v644_v25 = vsel %vm420_vm1, %v642_v35, %v643_v18  ;;  %v660_v6 = vrot.slane %v622_v59, 2  ;;  %v661_v60 = vrot.slane %v623_v11, 2  ;;  %v1682_v35 = vld [vmem:[%s1302_s25 + $0x44] sm:$0x1] }
  0x50   : > { %v663_v61 = vrot.slane %v624_v62, 2  ;;  %v587_v12 = vadd.f32 %v567_v33, %v1572_v21  ;;  %v588_v55 = vadd.f32 %v570_v30, %v1575_v48  ;;  %v589_v22 = vadd.f32 %v573_v52, %v1577_v40  ;;  %v1676_v62 = vld [vmem:[%s1302_s25 + $0x34] sm:$0x1] }
  0x51   : > { %v664_v56 = vrot.slane %v625_v45, 2  ;;  %v647_v43 = vsel %vm420_vm1, %v645_v20, %v646_v0  ;;  %v650_v8 = vsel %vm420_vm1, %v648_v51, %v649_v37  ;;  %v653_v4 = vsel %vm420_vm1, %v651_v53, %v652_v7  ;;  %v1679_v45 = vld [vmem:[%s1302_s25 + $0x3c] sm:$0x1]  ;;  %v1688_v37 = vld [vmem:[%s1302_s25 + $0x4c] sm:$0x1] }
  0x52   : > { %v656_v46 = vsel %vm420_vm1, %v654_v15, %v655_v54  ;;  %v659_v3 = vsel %vm420_vm1, %v657_v50, %v658_v58  ;;  %v662_v21 = vsel %vm420_vm1, %v660_v6, %v661_v60  ;;  %v674_v48 = vadd.f32 %v644_v25, %v1589_v41 }
  0x53   : > { %v691_v40 = vunpack.c.l.bf16 %v1128_v5  ;;  %v665_v33 = vsel %vm420_vm1, %v663_v61, %v664_v56  ;;  %v692_v30 = vunpack.c.h.bf16 %v1128_v5  ;;  %v693_v13 = vunpack.c.l.bf16 %v1130_v23 }
  0x54   : > { %v694_v28 = vunpack.c.h.bf16 %v1130_v23  ;;  %v695_v44 = vunpack.c.l.bf16 %v1132_v31  ;;  %v696_v52 = vunpack.c.h.bf16 %v1132_v31  ;;  %v697_v29 = vunpack.c.l.bf16 %v1134_v1 }
  0x55   : > { %v698_v57 = vunpack.c.h.bf16 %v1134_v1  ;;  %v675_v39 = vadd.f32 %v647_v43, %v1591_v24  ;;  %v676_v36 = vadd.f32 %v650_v8, %v1595_v38  ;;  %v677_v41 = vadd.f32 %v653_v4, %v585_v63  ;;  %v1662_v24 = vld [vmem:[%s1302_s25 + $0x1c] sm:$0x1]  ;;  %v1668_v38 = vld [vmem:[%s1302_s25 + $0x2c] sm:$0x1] }
  0x56   : > { %v703_v49 = vmul.f32 %v1339_v26, %v691_v40  ;;  %v1654_v17 = vadd.f32 %v656_v46, %v586_v32  ;;  %v1656_v19 = vadd.f32 %v659_v3, %v587_v12  ;;  %v1658_v16 = vadd.f32 %v662_v21, %v588_v55 }
  0x57   : > { %v704_v34 = vmul.f32 %v1339_v26, %v692_v30  ;;  %v1670_v47 = vadd.f32 %v665_v33, %v589_v22  ;;  %v705_v14 = vmul.f32 %v1339_v26, %v693_v13  ;;  %v706_v59 = vmul.f32 %v1339_v26, %v694_v28 }
  0x58   : > { %v707_v11 = vmul.f32 %v1339_v26, %v695_v44  ;;  %v708_v18 = vmul.f32 %v1339_v26, %v696_v52  ;;  %v709_v20 = vmul.f32 %v1339_v26, %v697_v29  ;;  %v710_v0 = vmul.f32 %v1339_v26, %v698_v57 }
  0x59   : > { %v711_v51 = vadd.f32 %v703_v49, %v674_v48  ;;  %v727_v53 = vunpack.c.l.bf16 %v1652_v2  ;;  %v728_v7 = vunpack.c.l.bf16 %v1662_v24  ;;  %v729_v15 = vunpack.c.l.bf16 %v1665_v42 }
  0x5a   : > { %v730_v54 = vunpack.c.l.bf16 %v1668_v38  ;;  %v712_v63 = vadd.f32 %v704_v34, %v675_v39  ;;  %v731_v32 = vunpack.c.l.bf16 %v1676_v62  ;;  %v732_v50 = vunpack.c.l.bf16 %v1679_v45 }
  0x5b   : > { %v733_v58 = vunpack.c.l.bf16 %v1682_v35  ;;  %v739_v26 = vmul.f32 %v1342_v27, %v691_v40  ;;  %v740_v25 = vmul.f32 %v1342_v27, %v727_v53  ;;  %v741_v6 = vmul.f32 %v1342_v27, %v692_v30 }
  0x5c   : > { %v742_v60 = vmul.f32 %v1342_v27, %v728_v7  ;;  %v734_v61 = vunpack.c.l.bf16 %v1688_v37  ;;  %v743_v5 = vmul.f32 %v1342_v27, %v693_v13  ;;  %v744_v12 = vmul.f32 %v1342_v27, %v729_v15 }
  0x5d   : > { %v745_v55 = vmul.f32 %v1342_v27, %v694_v28  ;;  %v746_v22 = vmul.f32 %v1342_v27, %v730_v54  ;;  %v747_v56 = vmul.f32 %v1342_v27, %v695_v44  ;;  %v748_v23 = vmul.f32 %v1342_v27, %v731_v32 }
  0x5e   : > { %v749_v43 = vmul.f32 %v1342_v27, %v696_v52  ;;  %v750_v8 = vmul.f32 %v1342_v27, %v732_v50  ;;  %v751_v4 = vmul.f32 %v1342_v27, %v697_v29  ;;  %v752_v46 = vmul.f32 %v1342_v27, %v733_v58 }
  0x5f   : > { %v753_v31 = vmul.f32 %v1342_v27, %v698_v57  ;;  %v771_v1 = vrot.slane %v739_v26, 1  ;;  %v772_v3 = vrot.slane %v740_v25, 1  ;;  %v774_v21 = vrot.slane %v741_v6, 1 }
  0x60   : > { %v775_v48 = vrot.slane %v742_v60, 1  ;;  %v713_v40 = vadd.f32 %v705_v14, %v676_v36  ;;  %v754_v33 = vmul.f32 %v1342_v27, %v734_v61  ;;  %v777_v30 = vrot.slane %v743_v5, 1  ;;  %v1145_v5 = vld [vmem:[%s1302_s25 + $0x18] sm:$0xe] }
  0x61   : > { %v778_v13 = vrot.slane %v744_v12, 1  ;;  %v780_v28 = vrot.slane %v745_v55, 1  ;;  %v781_v44 = vrot.slane %v746_v22, 1  ;;  %v783_v52 = vrot.slane %v747_v56, 1 }
  0x62   : > { %v784_v29 = vrot.slane %v748_v23, 1  ;;  %v714_v39 = vadd.f32 %v706_v59, %v677_v41  ;;  %v773_v57 = vsel %vm327_vm0, %v771_v1, %v772_v3  ;;  %v786_v49 = vrot.slane %v749_v43, 1  ;;  %v1144_v59 = vld [vmem:[%s1302_s25 + $0x10] sm:$0xe] }
  0x63   : > { %v787_v34 = vrot.slane %v750_v8, 1  ;;  %v776_v36 = vsel %vm327_vm0, %v774_v21, %v775_v48  ;;  %v789_v14 = vrot.slane %v751_v4, 1  ;;  %v790_v26 = vrot.slane %v752_v46, 1  ;;  %v1148_v8 = vld [vmem:[%s1302_s25 + $0x30] sm:$0xe] }
  0x64   : > { %v792_v27 = vrot.slane %v753_v31, 1  ;;  %v715_v25 = vadd.f32 %v707_v11, %v1654_v17  ;;  %v716_v6 = vadd.f32 %v708_v18, %v1656_v19  ;;  %v779_v60 = vsel %vm327_vm0, %v777_v30, %v778_v13  ;;  %v1146_v17 = vld [vmem:[%s1302_s25 + $0x20] sm:$0xe]  ;;  %v1147_v11 = vld [vmem:[%s1302_s25 + $0x28] sm:$0xe] }
  0x65   : > { %v793_v41 = vrot.slane %v754_v33, 1  ;;  %v717_v12 = vadd.f32 %v709_v20, %v1658_v16  ;;  %v718_v55 = vadd.f32 %v710_v0, %v1670_v47  ;;  %v782_v22 = vsel %vm327_vm0, %v780_v28, %v781_v44  ;;  %v1149_v4 = vld [vmem:[%s1302_s25 + $0x38] sm:$0xe]  ;;  %v1150_v16 = vld [vmem:[%s1302_s25 + $0x40] sm:$0xe] }
  0x66   : > { %v785_v56 = vsel %vm327_vm0, %v783_v52, %v784_v29  ;;  %v788_v19 = vsel %vm327_vm0, %v786_v49, %v787_v34  ;;  %v791_v18 = vsel %vm327_vm0, %v789_v14, %v790_v26  ;;  %v803_v23 = vadd.f32 %v773_v57, %v711_v51  ;;  %v1151_v20 = vld [vmem:[%s1302_s25 + $0x48] sm:$0xe] }
  0x67   : > { %v804_v43 = vadd.f32 %v776_v36, %v712_v63  ;;  %v794_v46 = vsel %vm327_vm0, %v792_v27, %v793_v41  ;;  %v805_v31 = vadd.f32 %v779_v60, %v713_v40  ;;  %v819_v47 = vunpack.c.l.bf16 %v1144_v59 }
  0x68   : > { %v820_v0 = vunpack.c.l.bf16 %v1145_v5  ;;  %v806_v1 = vadd.f32 %v782_v22, %v714_v39  ;;  %v807_v3 = vadd.f32 %v785_v56, %v715_v25  ;;  %v821_v21 = vunpack.c.l.bf16 %v1146_v17  ;;  %v1152_v22 = vld [vmem:[%s1810_s2] ss:$0 sm:$0xff] }
  0x69   : > { %v822_v48 = vunpack.c.l.bf16 %v1147_v11  ;;  %v808_v33 = vadd.f32 %v788_v19, %v716_v6  ;;  %v823_v30 = vunpack.c.l.bf16 %v1148_v8  ;;  %v824_v13 = vunpack.c.l.bf16 %v1149_v4 }
  0x6a   : > { %v830_v51 = vrot.slane %v1297_v10, %v1295_v9  ;;  %v809_v63 = vadd.f32 %v791_v18, %v717_v12  ;;  %v810_v28 = vadd.f32 %v794_v46, %v718_v55  ;;  %v825_v44 = vunpack.c.l.bf16 %v1150_v16 }
  0x6b   : > { %v826_v52 = vunpack.c.l.bf16 %v1151_v20 }
  0x6c   : > { %v831_v29 = vmul.f32 %v830_v51, %v819_v47  ;;  %v832_v40 = vmul.f32 %v830_v51, %v727_v53  ;;  %v833_v57 = vmul.f32 %v830_v51, %v820_v0  ;;  %v834_v39 = vmul.f32 %v830_v51, %v728_v7 }
  0x6d   : > { %v835_v49 = vmul.f32 %v830_v51, %v821_v21  ;;  %v836_v34 = vmul.f32 %v830_v51, %v729_v15  ;;  %v837_v36 = vmul.f32 %v830_v51, %v822_v48  ;;  %v838_v9 = vmul.f32 %v830_v51, %v730_v54 }
  0x6e   : > { %v839_v10 = vmul.f32 %v830_v51, %v823_v30  ;;  %v840_v14 = vmul.f32 %v830_v51, %v731_v32  ;;  %v841_v26 = vmul.f32 %v830_v51, %v824_v13  ;;  %v842_v2 = vmul.f32 %v830_v51, %v732_v50 }
  0x6f   : > { %v843_v53 = vmul.f32 %v830_v51, %v825_v44  ;;  %v844_v24 = vmul.f32 %v830_v51, %v733_v58  ;;  %v845_v7 = vmul.f32 %v830_v51, %v826_v52  ;;  %v846_v42 = vmul.f32 %v830_v51, %v734_v61 }
  0x70   : > { %v863_v15 = vrot.slane %v831_v29, 2  ;;  %v864_v27 = vrot.slane %v832_v40, 2  ;;  %v866_v38 = vrot.slane %v833_v57, 2  ;;  %v867_v54 = vrot.slane %v834_v39, 2 }
  0x71   : > { %v869_v25 = vrot.slane %v835_v49, 2  ;;  %v870_v6 = vrot.slane %v836_v34, 2  ;;  %v872_v62 = vrot.slane %v837_v36, 2  ;;  %v873_v32 = vrot.slane %v838_v9, 2 }
  0x72   : > { %v865_v60 = vsel %vm420_vm1, %v863_v15, %v864_v27  ;;  %v868_v45 = vsel %vm420_vm1, %v866_v38, %v867_v54  ;;  %v875_v50 = vrot.slane %v839_v10, 2  ;;  %v876_v41 = vrot.slane %v840_v14, 2 }
  0x73   : > { %v871_v35 = vsel %vm420_vm1, %v869_v25, %v870_v6  ;;  %v874_v58 = vsel %vm420_vm1, %v872_v62, %v873_v32  ;;  %v878_v37 = vrot.slane %v841_v26, 2  ;;  %v879_v61 = vrot.slane %v842_v2, 2 }
  0x74   : > { %v877_v59 = vsel %vm420_vm1, %v875_v50, %v876_v41  ;;  %v881_v5 = vrot.slane %v843_v53, 2  ;;  %v882_v12 = vrot.slane %v844_v24, 2  ;;  %v884_v55 = vrot.slane %v845_v7, 2 }
  0x75   : > { %v880_v56 = vsel %vm420_vm1, %v878_v37, %v879_v61  ;;  %v885_v17 = vrot.slane %v846_v42, 2  ;;  %v895_v11 = vadd.f32 %v865_v60, %v803_v23  ;;  %v896_v19 = vadd.f32 %v868_v45, %v804_v43 }
  0x76   : > { %v883_v18 = vsel %vm420_vm1, %v881_v5, %v882_v12  ;;  %v897_v8 = vadd.f32 %v871_v35, %v805_v31  ;;  %v898_v4 = vadd.f32 %v874_v58, %v806_v1  ;;  %v899_v46 = vadd.f32 %v877_v59, %v807_v3 }
  0x77   : > { %v886_v16 = vsel %vm420_vm1, %v884_v55, %v885_v17  ;;  %v900_v20 = vadd.f32 %v880_v56, %v808_v33  ;;  %v901_v47 = vadd.f32 %v883_v18, %v809_v63  ;;  %v910_v0 = vadd.f32 %v1152_v22, %v895_v11 }
  0x78   : > { %v902_v21 = vadd.f32 %v886_v16, %v810_v28  ;;  %v911_v48 = vadd.f32 %v1152_v22, %v896_v19  ;;  %v912_v30 = vadd.f32 %v1152_v22, %v897_v8  ;;  %v913_v13 = vadd.f32 %v1152_v22, %v898_v4 }
  0x79   : > { %v914_v51 = vadd.f32 %v1152_v22, %v899_v46  ;;  %v915_v44 = vadd.f32 %v1152_v22, %v900_v20  ;;  %v1779_v52 = vadd.f32 %v1152_v22, %v901_v47  ;;  %v1153_v23 = vmul.f32 -1.442695, %v910_v0 }
  0x7a   : > { %v1781_v43 = vadd.f32 %v1152_v22, %v902_v21  ;;  %v1154_v29 = vmul.f32 -1.442695, %v911_v48  ;;  %v1155_v31 = vmul.f32 -1.442695, %v912_v30  ;;  %v1156_v1 = vmul.f32 -1.442695, %v913_v13 }
  0x7b   : > { %1189 = vpow2.f32 %v1153_v23  ;;  %v1157_v3 = vmul.f32 -1.442695, %v914_v51  ;;  %v1158_v33 = vmul.f32 -1.442695, %v915_v44  ;;  %v1159_v63 = vmul.f32 -1.442695, %v1779_v52 }
  0x7c   : > { %1191 = vpow2.f32 %v1154_v29  ;;  %v1160_v28 = vmul.f32 -1.442695, %v1781_v43 }
  0x7d   : > { %1193 = vpow2.f32 %v1155_v31 }
  0x7e   : > { %1195 = vpow2.f32 %v1156_v1 }
  0x7f   : > { %1197 = vpow2.f32 %v1157_v3 }
  0x80   : > { %1199 = vpow2.f32 %v1158_v33 }
  0x81   : > { %1201 = vpow2.f32 %v1159_v63 }
  0x82   : > { %1203 = vpow2.f32 %v1160_v28 }
  0x85   : > { %v1190_v40 = vpop.eup %1189 }
  0x86   : > { %v1192_v57 = vpop.eup %1191  ;;  %v942_v39 = vadd.f32 1.0, %v1190_v40 }
  0x87   : > { %v1194_v49 = vpop.eup %1193  ;;  %v943_v34 = vadd.f32 1.0, %v1192_v57 }
  0x88   : > { %v1196_v36 = vpop.eup %1195  ;;  %v944_v9 = vadd.f32 1.0, %v1194_v49  ;;  %1205 = vrcp.f32 %v942_v39 }
  0x89   : > { %v1198_v10 = vpop.eup %1197  ;;  %v945_v14 = vadd.f32 1.0, %v1196_v36  ;;  %1207 = vrcp.f32 %v943_v34 }
  0x8a   : > { %v1200_v26 = vpop.eup %1199  ;;  %v946_v2 = vadd.f32 1.0, %v1198_v10  ;;  %1209 = vrcp.f32 %v944_v9 }
  0x8b   : > { %v1202_v53 = vpop.eup %1201  ;;  %v947_v24 = vadd.f32 1.0, %v1200_v26  ;;  %1211 = vrcp.f32 %v945_v14 }
  0x8c   : > { %v1204_v7 = vpop.eup %1203  ;;  %v948_v42 = vadd.f32 1.0, %v1202_v53  ;;  %1213 = vrcp.f32 %v946_v2 }
  0x8d   : > { %v949_v15 = vadd.f32 1.0, %v1204_v7  ;;  %1215 = vrcp.f32 %v947_v24 }
  0x8e   : > { %1217 = vrcp.f32 %v948_v42 }
  0x8f   : > { %1219 = vrcp.f32 %v949_v15 }
  0x92   : > { %v1206_v27 = vpop.eup %1205 }
  0x93   : > { %v1208_v38 = vpop.eup %1207  ;;  %v966_v54 = vmul.f32 %v1206_v27, %v910_v0 }
  0x94   : > { %v1210_v25 = vpop.eup %1209  ;;  %v967_v6 = vmul.f32 %v1208_v38, %v911_v48 }
  0x95   : > { %v1212_v62 = vpop.eup %1211  ;;  %v968_v32 = vmul.f32 %v1210_v25, %v912_v30  ;;  %975 = vst.msk [vmem:[%s232_s4] sm:$0xff] %vm974_vm2, %v966_v54 }
  0x96   : > { %v1214_v60 = vpop.eup %1213  ;;  %v969_v45 = vmul.f32 %v1212_v62, %v913_v13  ;;  %976 = vst.msk [vmem:[%s232_s4 + $0x8] sm:$0xff] %vm974_vm2, %v967_v6 }
  0x97   : > { %v1216_v50 = vpop.eup %1215  ;;  %v970_v41 = vmul.f32 %v1214_v60, %v914_v51  ;;  %977 = vst.msk [vmem:[%s232_s4 + $0x10] sm:$0xff] %vm974_vm2, %v968_v32 }
  0x98   : > { %v1218_v35 = vpop.eup %1217  ;;  %v971_v58 = vmul.f32 %v1216_v50, %v915_v44  ;;  %978 = vst.msk [vmem:[%s232_s4 + $0x18] sm:$0xff] %vm974_vm2, %v969_v45 }
  0x99   : > { %v1220_v37 = vpop.eup %1219  ;;  %v972_v61 = vmul.f32 %v1218_v35, %v1779_v52  ;;  %979 = vst.msk [vmem:[%s232_s4 + $0x20] sm:$0xff] %vm974_vm2, %v970_v41 }
  0x9a   : > { %v973_v59 = vmul.f32 %v1220_v37, %v1781_v43  ;;  %980 = vst.msk [vmem:[%s232_s4 + $0x28] sm:$0xff] %vm974_vm2, %v971_v58 }
  0x9b   : > { %981 = vst.msk [vmem:[%s232_s4 + $0x30] sm:$0xff] %vm974_vm2, %v972_v61 }
  0x9c   : > { %982 = vst.msk [vmem:[%s232_s4 + $0x38] sm:$0xff] %vm974_vm2, %v973_v59 }
  0x9d PF: > { %s13_s14 = sadd.s32 1, %s1243_s14   ;;  %s1812_s12 = smov %s1239_s13 }
  0x9e   : > { %p10_p5 = scmp.ge.s32.totalorder %s13_s14, 4   ;;  %s1813_s13 = smov %s1815_s15 }
  0xa0   :  { %12 = sbr.rel (!%p10_p5) target bundleno = 2 (0x2), region = 70 }

// kernel: ss2d_forward.5
= control target key start
LH: loop header
LB: loop body
LE: loop exit
PB: predicated region body
PF: predicated region fallthrough
CT: control target
= control target key end

     0   :  { %vm21_vm0 = vcmask 523264   ;;  %v731_v1 = vmov 0.0   ;;  %vm142_vm1 = vcmask 261120   ;;  %vm541_vm2 = vcmask 519168   ;;  %s1001_s1 = inlined_call_operand.vmem [shape: bf16[32,64], index: 1, kind: input, shape index: {}]   ;;  %s1002_s2 = inlined_call_operand.vmem [shape: bf16[32,64], index: 2, kind: input, shape index: {}]   ;;  %s1003_s0 = inlined_call_operand.vmem [shape: bf16[128,32], index: 0, kind: input, shape index: {}]   ;;  %s1004_s4 = inlined_call_operand.vmem [shape: f32[128,64], index: 4, kind: output, shape index: {1}]   ;;  %s1005_s3 = inlined_call_operand.vmem [shape: bf16[128,64], index: 3, kind: output, shape index: {0}]  }
   0x1   :  { %v719_v0 = vld [vmem:[%s1001_s1] sm:$0xff]   ;;  %24 = vst.msk [vmem:[#allocation2 + $0x10] sm:$0xff] %vm21_vm0, %v731_v1  ;;  %22 = vst.msk [vmem:[#allocation2] sm:$0xff] %vm21_vm0, %v731_v1  ;;  %v721_v3 = vld [vmem:[%s1001_s1 + $0x8] sm:$0xff]  }
   0x2   :  { %23 = vst.msk [vmem:[#allocation2 + $0x8] sm:$0xff] %vm21_vm0, %v731_v1  ;;  %25 = vst.msk [vmem:[#allocation2 + $0x18] sm:$0xff] %vm21_vm0, %v731_v1  ;;  %v720_v2 = vld [vmem:[%s1002_s2] sm:$0xff]   ;;  %678 = vmatprep.subr.bf16.mxu0 %v719_v0  ;;  %v722_v4 = vld [vmem:[%s1002_s2 + $0x8] sm:$0xff]  }
   0x3   :  { %26 = vst.msk [vmem:[#allocation2 + $0x20] sm:$0xff] %vm21_vm0, %v731_v1  ;;  %27 = vst.msk [vmem:[#allocation2 + $0x28] sm:$0xff] %vm21_vm0, %v731_v1  ;;  %698 = vmatprep.subr.bf16.mxu1 %v720_v2  ;;  %679 = vmatpush3.bf16.msra.mxu0 %v719_v0  ;;  %v723_v5 = vld [vmem:[%s1003_s0] sm:$0xff]   ;;  %v724_v6 = vld [vmem:[%s1003_s0 + $0x8] sm:$0xff]  }
   0x4   :  { %28 = vst.msk [vmem:[#allocation2 + $0x30] sm:$0xff] %vm21_vm0, %v731_v1  ;;  %29 = vst.msk [vmem:[#allocation2 + $0x38] sm:$0xff] %vm21_vm0, %v731_v1  ;;  %699 = vmatpush3.bf16.msra.mxu1 %v720_v2  ;;  %680 = vmatprep.subr.bf16.mxu0 %v721_v3  ;;  %v725_v7 = vld [vmem:[%s1003_s0 + $0x10] sm:$0xff]   ;;  %v726_v8 = vld [vmem:[%s1003_s0 + $0x18] sm:$0xff]  }
   0x5   :  { %30 = vst.msk [vmem:[#allocation2 + $0x40] sm:$0xff] %vm21_vm0, %v731_v1  ;;  %31 = vst.msk [vmem:[#allocation2 + $0x48] sm:$0xff] %vm21_vm0, %v731_v1  ;;  %700 = vmatprep.subr.bf16.mxu1 %v722_v4  ;;  %682 = vmatprep.mubr.msk.bf16.mxu0 %vm142_vm1, %v723_v5  ;;  %v727_v9 = vld [vmem:[%s1003_s0 + $0x20] sm:$0xff]   ;;  %v728_v10 = vld [vmem:[%s1003_s0 + $0x28] sm:$0xff]  }
   0x6   :  { %32 = vst.msk [vmem:[#allocation2 + $0x50] sm:$0xff] %vm21_vm0, %v731_v1  ;;  %33 = vst.msk [vmem:[#allocation2 + $0x58] sm:$0xff] %vm21_vm0, %v731_v1  ;;  %702 = vmatprep.mubr.msk.bf16.mxu1 %vm142_vm1, %v723_v5  ;;  %v729_v11 = vld [vmem:[%s1003_s0 + $0x30] sm:$0xff]   ;;  %v730_v12 = vld [vmem:[%s1003_s0 + $0x38] sm:$0xff]  }
   0x7   :  { %34 = vst.msk [vmem:[#allocation2 + $0x60] sm:$0xff] %vm21_vm0, %v731_v1  ;;  %35 = vst.msk [vmem:[#allocation2 + $0x68] sm:$0xff] %vm21_vm0, %v731_v1  ;;  %681 = vmatpush3.bf16.msra.mxu0 %v721_v3 }
   0x8   :  { %36 = vst.msk [vmem:[#allocation2 + $0x70] sm:$0xff] %vm21_vm0, %v731_v1  ;;  %37 = vst.msk [vmem:[#allocation2 + $0x78] sm:$0xff] %vm21_vm0, %v731_v1  ;;  %701 = vmatpush3.bf16.msra.mxu1 %v722_v4  ;;  %v72_v13 = vld [vmem:[#allocation2 + $0x10] sm:$0xff]  ;;  %v70_v15 = vld [vmem:[#allocation2] sm:$0xff] }
   0x9   :  { %38 = vst.msk [vmem:[#allocation3] sm:$0xff] %vm21_vm0, %v731_v1  ;;  %39 = vst.msk [vmem:[#allocation3 + $0x8] sm:$0xff] %vm21_vm0, %v731_v1  ;;  %v73_v18 = vld [vmem:[#allocation2 + $0x18] sm:$0xff]  ;;  %v71_v23 = vld [vmem:[#allocation2 + $0x8] sm:$0xff] }
   0xa   :  { %40 = vst.msk [vmem:[#allocation3 + $0x10] sm:$0xff] %vm21_vm0, %v731_v1  ;;  %41 = vst.msk [vmem:[#allocation3 + $0x18] sm:$0xff] %vm21_vm0, %v731_v1  ;;  %683 = vmatmul.mubr.msk.bf16.vlgmr.msra.gmra.mrb[0].mxu0 %vm142_vm1, %v724_v6  ;;  %v74_v39 = vld [vmem:[#allocation2 + $0x20] sm:$0xff]  ;;  %v75_v47 = vld [vmem:[#allocation2 + $0x28] sm:$0xff] }
   0xb   :  { %42 = vst.msk [vmem:[#allocation3 + $0x20] sm:$0xff] %vm21_vm0, %v731_v1  ;;  %43 = vst.msk [vmem:[#allocation3 + $0x28] sm:$0xff] %vm21_vm0, %v731_v1  ;;  %703 = vmatmul.mubr.msk.bf16.vlgmr.msra.gmra.mrb[0].mxu1 %vm142_vm1, %v724_v6  ;;  %686 = vmatprep.mubr.msk.bf16.mxu0 %vm142_vm1, %v725_v7  ;;  %v76_v37 = vld [vmem:[#allocation2 + $0x30] sm:$0xff]  ;;  %v77_v42 = vld [vmem:[#allocation2 + $0x38] sm:$0xff] }
   0xc   :  { %44 = vst.msk [vmem:[#allocation3 + $0x30] sm:$0xff] %vm21_vm0, %v731_v1  ;;  %45 = vst.msk [vmem:[#allocation3 + $0x38] sm:$0xff] %vm21_vm0, %v731_v1  ;;  %706 = vmatprep.mubr.msk.bf16.mxu1 %vm142_vm1, %v725_v7 }
   0xd   :  { %46 = vst.msk [vmem:[#allocation3 + $0x40] sm:$0xff] %vm21_vm0, %v731_v1  ;;  %47 = vst.msk [vmem:[#allocation3 + $0x48] sm:$0xff] %vm21_vm0, %v731_v1 }
   0xe   :  { %48 = vst.msk [vmem:[#allocation3 + $0x50] sm:$0xff] %vm21_vm0, %v731_v1  ;;  %49 = vst.msk [vmem:[#allocation3 + $0x58] sm:$0xff] %vm21_vm0, %v731_v1 }
   0xf   :  { %50 = vst.msk [vmem:[#allocation3 + $0x60] sm:$0xff] %vm21_vm0, %v731_v1  ;;  %51 = vst.msk [vmem:[#allocation3 + $0x68] sm:$0xff] %vm21_vm0, %v731_v1 }
  0x10   :  { %52 = vst.msk [vmem:[#allocation3 + $0x70] sm:$0xff] %vm21_vm0, %v731_v1  ;;  %53 = vst.msk [vmem:[#allocation3 + $0x78] sm:$0xff] %vm21_vm0, %v731_v1  ;;  %v297_v17 = vld [vmem:[#allocation3] sm:$0xff]  ;;  %v298_v28 = vld [vmem:[#allocation3 + $0x8] sm:$0xff] }
  0x11   :  { %v299_v14 = vld [vmem:[#allocation3 + $0x10] sm:$0xff]  ;;  %v300_v22 = vld [vmem:[#allocation3 + $0x18] sm:$0xff] }
  0x12   :  { %687 = vmatmul.mubr.msk.bf16.gmra.mrb[4].mxu0 %vm142_vm1, %v726_v8  ;;  %v301_v41 = vld [vmem:[#allocation3 + $0x20] sm:$0xff]  ;;  %v302_v53 = vld [vmem:[#allocation3 + $0x28] sm:$0xff] }
  0x13   :  { %707 = vmatmul.mubr.msk.bf16.gmra.mrb[4].mxu1 %vm142_vm1, %v726_v8  ;;  %690 = vmatprep.mubr.msk.bf16.mxu0 %vm142_vm1, %v727_v9  ;;  %v303_v38 = vld [vmem:[#allocation3 + $0x30] sm:$0xff]  ;;  %v304_v46 = vld [vmem:[#allocation3 + $0x38] sm:$0xff] }
  0x14   :  { %710 = vmatprep.mubr.msk.bf16.mxu1 %vm142_vm1, %v727_v9  ;;  %v80_v9 = vld [vmem:[#allocation2 + $0x50] sm:$0xff] }
  0x1a   :  { %691 = vmatmul.mubr.msk.bf16.gmra.mrb[8].mxu0 %vm142_vm1, %v728_v10 }
  0x1b   :  { %711 = vmatmul.mubr.msk.bf16.gmra.mrb[8].mxu1 %vm142_vm1, %v728_v10  ;;  %694 = vmatprep.mubr.msk.bf16.mxu0 %vm142_vm1, %v729_v11  ;;  %v307_v10 = vld [vmem:[#allocation3 + $0x50] sm:$0xff] }
  0x1c   :  { %714 = vmatprep.mubr.msk.bf16.mxu1 %vm142_vm1, %v729_v11  ;;  %v78_v11 = vld [vmem:[#allocation2 + $0x40] sm:$0xff] }
  0x22   :  { %695 = vmatmul.mubr.msk.bf16.gmra.mrb[12].mxu0 %vm142_vm1, %v730_v12 }
  0x23   :  { %715 = vmatmul.mubr.msk.bf16.gmra.mrb[12].mxu1 %vm142_vm1, %v730_v12 }
  0xdd   :  { %v684_v16 = vpop.f32.mrb[0].mxu0 }
  0xde   :  { %v266_v19 = vadd.f32 %v684_v16, %v72_v13  ;;  %v704_v20 = vpop.f32.mrb[0].mxu1  ;;  %v201_v21 = vpop.f32.mrb[1].mxu0  ;;  %v305_v13 = vld [vmem:[#allocation3 + $0x40] sm:$0xff] }
  0xdf   :  { %v428_v24 = vadd.f32 %v704_v20, %v299_v14  ;;  %v264_v25 = vadd.f32 %v201_v21, %v70_v15  ;;  %v363_v26 = vpop.f32.mrb[1].mxu1  ;;  %v685_v27 = vpop.f32.mrb[2].mxu0  ;;  %v81_v14 = vld [vmem:[#allocation2 + $0x58] sm:$0xff] }
  0xe0   :  { %283 = vst.msk [vmem:[#allocation2 + $0x10] sm:$0xff] %vm21_vm0, %v266_v19  ;;  %v426_v29 = vadd.f32 %v363_v26, %v297_v17  ;;  %v267_v30 = vadd.f32 %v685_v27, %v73_v18  ;;  %v705_v31 = vpop.f32.mrb[2].mxu1  ;;  %v204_v32 = vpop.f32.mrb[3].mxu0  ;;  %v308_v18 = vld [vmem:[#allocation3 + $0x58] sm:$0xff]  ;;  %v79_v19 = vld [vmem:[#allocation2 + $0x48] sm:$0xff] }
  0xe1   :  { %444 = vst.msk [vmem:[#allocation3 + $0x10] sm:$0xff] %vm21_vm0, %v428_v24  ;;  %281 = vst.msk [vmem:[#allocation2] sm:$0xff] %vm21_vm0, %v264_v25  ;;  %v429_v33 = vadd.f32 %v705_v31, %v300_v22  ;;  %v265_v34 = vadd.f32 %v204_v32, %v71_v23  ;;  %v366_v35 = vpop.f32.mrb[3].mxu1  ;;  %v306_v25 = vld [vmem:[#allocation3 + $0x48] sm:$0xff] }
  0xe2   :  { %442 = vst.msk [vmem:[#allocation3] sm:$0xff] %vm21_vm0, %v426_v29  ;;  %284 = vst.msk [vmem:[#allocation2 + $0x18] sm:$0xff] %vm21_vm0, %v267_v30  ;;  %v427_v36 = vadd.f32 %v366_v35, %v298_v28 }
  0xe3   :  { %445 = vst.msk [vmem:[#allocation3 + $0x18] sm:$0xff] %vm21_vm0, %v429_v33  ;;  %282 = vst.msk [vmem:[#allocation2 + $0x8] sm:$0xff] %vm21_vm0, %v265_v34 }
  0xe4   :  { %443 = vst.msk [vmem:[#allocation3 + $0x8] sm:$0xff] %vm21_vm0, %v427_v36 }
  0xe5   :  { %v688_v40 = vpop.f32.mrb[4].mxu0 }
  0xe6   :  { %v270_v43 = vadd.f32 %v688_v40, %v76_v37  ;;  %v708_v44 = vpop.f32.mrb[4].mxu1  ;;  %v217_v45 = vpop.f32.mrb[5].mxu0 }
  0xe7   :  { %v463_v48 = vld [vmem:[#allocation2 + $0x10] sm:$0xff]  ;;  %v432_v49 = vadd.f32 %v708_v44, %v303_v38  ;;  %v268_v50 = vadd.f32 %v217_v45, %v74_v39  ;;  %v379_v51 = vpop.f32.mrb[5].mxu1  ;;  %v689_v52 = vpop.f32.mrb[6].mxu0 }
  0xe8   :  { %v644_v54 = vpack.c.bf16 %v463_v48, %v463_v48  ;;  %v560_v55 = vld [vmem:[#allocation3 + $0x10] sm:$0xff]  ;;  %v461_v56 = vld [vmem:[#allocation2] sm:$0xff]  ;;  %287 = vst.msk [vmem:[#allocation2 + $0x30] sm:$0xff] %vm21_vm0, %v270_v43  ;;  %v430_v57 = vadd.f32 %v379_v51, %v301_v41  ;;  %v271_v58 = vadd.f32 %v689_v52, %v77_v42  ;;  %v709_v59 = vpop.f32.mrb[6].mxu1  ;;  %v220_v60 = vpop.f32.mrb[7].mxu0 }
  0xe9   :  { %576 = vst.msk [vmem:[%s1004_s4 + $0x10] sm:$0xff] %vm21_vm0, %v560_v55  ;;  %v642_v61 = vpack.c.bf16 %v461_v56, %v461_v56  ;;  %v558_v62 = vld [vmem:[#allocation3] sm:$0xff]  ;;  %v464_v63 = vld [vmem:[#allocation2 + $0x18] sm:$0xff]  ;;  %448 = vst.msk [vmem:[#allocation3 + $0x30] sm:$0xff] %vm21_vm0, %v432_v49  ;;  %v433_v0 = vadd.f32 %v709_v59, %v304_v46  ;;  %v269_v1 = vadd.f32 %v220_v60, %v75_v47  ;;  %v382_v2 = vpop.f32.mrb[7].mxu1 }
  0xea   :  { %285 = vst.msk [vmem:[#allocation2 + $0x20] sm:$0xff] %vm21_vm0, %v268_v50  ;;  %574 = vst.msk [vmem:[%s1004_s4] sm:$0xff] %vm21_vm0, %v558_v62  ;;  %v645_v3 = vpack.c.bf16 %v464_v63, %v464_v63  ;;  %v561_v4 = vld [vmem:[#allocation3 + $0x18] sm:$0xff]  ;;  %v462_v5 = vld [vmem:[#allocation2 + $0x8] sm:$0xff]  ;;  %v431_v6 = vadd.f32 %v382_v2, %v302_v53 }
  0xeb   :  { %544 = vst.msk [vmem:[%s1005_s3 + $0x8] sm:$0xf] %vm541_vm2, %v644_v54  ;;  %542 = vst.msk [vmem:[%s1005_s3] sm:$0xf] %vm541_vm2, %v642_v61  ;;  %v643_v7 = vpack.c.bf16 %v462_v5, %v462_v5  ;;  %v559_v8 = vld [vmem:[#allocation3 + $0x8] sm:$0xff]  ;;  %v84_v45 = vld [vmem:[#allocation2 + $0x70] sm:$0xff] }
  0xec   :  { %446 = vst.msk [vmem:[#allocation3 + $0x20] sm:$0xff] %vm21_vm0, %v430_v57  ;;  %288 = vst.msk [vmem:[#allocation2 + $0x38] sm:$0xff] %vm21_vm0, %v271_v58  ;;  %v311_v46 = vld [vmem:[#allocation3 + $0x70] sm:$0xff]  ;;  %v82_v47 = vld [vmem:[#allocation2 + $0x60] sm:$0xff] }
  0xed   :  { %577 = vst.msk [vmem:[%s1004_s4 + $0x18] sm:$0xff] %vm21_vm0, %v561_v4  ;;  %449 = vst.msk [vmem:[#allocation3 + $0x38] sm:$0xff] %vm21_vm0, %v433_v0  ;;  %v692_v12 = vpop.f32.mrb[8].mxu0  ;;  %v309_v49 = vld [vmem:[#allocation3 + $0x60] sm:$0xff]  ;;  %v85_v50 = vld [vmem:[#allocation2 + $0x78] sm:$0xff] }
  0xee   :  { %286 = vst.msk [vmem:[#allocation2 + $0x28] sm:$0xff] %vm21_vm0, %v269_v1  ;;  %575 = vst.msk [vmem:[%s1004_s4 + $0x8] sm:$0xff] %vm21_vm0, %v559_v8  ;;  %v274_v15 = vadd.f32 %v692_v12, %v80_v9  ;;  %v712_v16 = vpop.f32.mrb[8].mxu1  ;;  %v233_v17 = vpop.f32.mrb[9].mxu0  ;;  %v312_v54 = vld [vmem:[#allocation3 + $0x78] sm:$0xff]  ;;  %v83_v55 = vld [vmem:[#allocation2 + $0x68] sm:$0xff] }
  0xef   :  { %545 = vst.msk [vmem:[%s1005_s3 + $0xc] sm:$0xf] %vm541_vm2, %v645_v3  ;;  %543 = vst.msk [vmem:[%s1005_s3 + $0x4] sm:$0xf] %vm541_vm2, %v643_v7  ;;  %v467_v20 = vld [vmem:[#allocation2 + $0x30] sm:$0xff]  ;;  %v436_v21 = vadd.f32 %v712_v16, %v307_v10  ;;  %v272_v22 = vadd.f32 %v233_v17, %v78_v11  ;;  %v395_v23 = vpop.f32.mrb[9].mxu1 }
  0xf0   :  { %447 = vst.msk [vmem:[#allocation3 + $0x28] sm:$0xff] %vm21_vm0, %v431_v6  ;;  %v693_v24 = vpop.f32.mrb[10].mxu0  ;;  %v648_v26 = vpack.c.bf16 %v467_v20, %v467_v20  ;;  %v564_v27 = vld [vmem:[#allocation3 + $0x30] sm:$0xff]  ;;  %291 = vst.msk [vmem:[#allocation2 + $0x50] sm:$0xff] %vm21_vm0, %v274_v15  ;;  %v434_v29 = vadd.f32 %v395_v23, %v305_v13  ;;  %v713_v31 = vpop.f32.mrb[10].mxu1  ;;  %v310_v61 = vld [vmem:[#allocation3 + $0x68] sm:$0xff] }
  0xf1   :  { %v465_v28 = vld [vmem:[#allocation2 + $0x20] sm:$0xff]  ;;  %v275_v30 = vadd.f32 %v693_v24, %v81_v14  ;;  %v236_v32 = vpop.f32.mrb[11].mxu0  ;;  %580 = vst.msk [vmem:[%s1004_s4 + $0x30] sm:$0xff] %vm21_vm0, %v564_v27  ;;  %452 = vst.msk [vmem:[#allocation3 + $0x50] sm:$0xff] %vm21_vm0, %v436_v21  ;;  %v437_v36 = vadd.f32 %v713_v31, %v308_v18  ;;  %v398_v38 = vpop.f32.mrb[11].mxu1 }
  0xf2   :  { %v646_v33 = vpack.c.bf16 %v465_v28, %v465_v28  ;;  %289 = vst.msk [vmem:[#allocation2 + $0x40] sm:$0xff] %vm21_vm0, %v272_v22  ;;  %v273_v37 = vadd.f32 %v236_v32, %v79_v19  ;;  %450 = vst.msk [vmem:[#allocation3 + $0x40] sm:$0xff] %vm21_vm0, %v434_v29  ;;  %v435_v42 = vadd.f32 %v398_v38, %v306_v25 }
  0xf3   :  { %v562_v34 = vld [vmem:[#allocation3 + $0x20] sm:$0xff]  ;;  %v468_v35 = vld [vmem:[#allocation2 + $0x38] sm:$0xff]  ;;  %548 = vst.msk [vmem:[%s1005_s3 + $0x18] sm:$0xf] %vm541_vm2, %v648_v26 }
  0xf4   :  { %578 = vst.msk [vmem:[%s1004_s4 + $0x20] sm:$0xff] %vm21_vm0, %v562_v34  ;;  %v649_v39 = vpack.c.bf16 %v468_v35, %v468_v35  ;;  %v565_v40 = vld [vmem:[#allocation3 + $0x38] sm:$0xff]  ;;  %292 = vst.msk [vmem:[#allocation2 + $0x58] sm:$0xff] %vm21_vm0, %v275_v30 }
  0xf5   :  { %v466_v41 = vld [vmem:[#allocation2 + $0x28] sm:$0xff]  ;;  %546 = vst.msk [vmem:[%s1005_s3 + $0x10] sm:$0xf] %vm541_vm2, %v646_v33  ;;  %v696_v48 = vpop.f32.mrb[12].mxu0 }
  0xf6   :  { %581 = vst.msk [vmem:[%s1004_s4 + $0x38] sm:$0xff] %vm21_vm0, %v565_v40  ;;  %v647_v43 = vpack.c.bf16 %v466_v41, %v466_v41  ;;  %453 = vst.msk [vmem:[#allocation3 + $0x58] sm:$0xff] %vm21_vm0, %v437_v36  ;;  %v278_v51 = vadd.f32 %v696_v48, %v84_v45  ;;  %v716_v52 = vpop.f32.mrb[12].mxu1  ;;  %v249_v53 = vpop.f32.mrb[13].mxu0 }
  0xf7   :  { %v563_v44 = vld [vmem:[#allocation3 + $0x28] sm:$0xff]  ;;  %290 = vst.msk [vmem:[#allocation2 + $0x48] sm:$0xff] %vm21_vm0, %v273_v37  ;;  %451 = vst.msk [vmem:[#allocation3 + $0x48] sm:$0xff] %vm21_vm0, %v435_v42  ;;  %v471_v56 = vld [vmem:[#allocation2 + $0x50] sm:$0xff]  ;;  %v440_v57 = vadd.f32 %v716_v52, %v311_v46  ;;  %v276_v58 = vadd.f32 %v249_v53, %v82_v47  ;;  %v411_v59 = vpop.f32.mrb[13].mxu1  ;;  %v697_v60 = vpop.f32.mrb[14].mxu0 }
  0xf8   :  { %549 = vst.msk [vmem:[%s1005_s3 + $0x1c] sm:$0xf] %vm541_vm2, %v649_v39  ;;  %547 = vst.msk [vmem:[%s1005_s3 + $0x14] sm:$0xf] %vm541_vm2, %v647_v43  ;;  %v652_v62 = vpack.c.bf16 %v471_v56, %v471_v56  ;;  %v568_v63 = vld [vmem:[#allocation3 + $0x50] sm:$0xff]  ;;  %v438_v1 = vadd.f32 %v411_v59, %v309_v49  ;;  %v279_v2 = vadd.f32 %v697_v60, %v85_v50  ;;  %v717_v3 = vpop.f32.mrb[14].mxu1 }
  0xf9   :  { %579 = vst.msk [vmem:[%s1004_s4 + $0x28] sm:$0xff] %vm21_vm0, %v563_v44  ;;  %v469_v0 = vld [vmem:[#allocation2 + $0x40] sm:$0xff]  ;;  %295 = vst.msk [vmem:[#allocation2 + $0x70] sm:$0xff] %vm21_vm0, %v278_v51  ;;  %v252_v4 = vpop.f32.mrb[15].mxu0  ;;  %v441_v8 = vadd.f32 %v717_v3, %v312_v54  ;;  %v414_v10 = vpop.f32.mrb[15].mxu1 }
  0xfa   :  { %584 = vst.msk [vmem:[%s1004_s4 + $0x50] sm:$0xff] %vm21_vm0, %v568_v63  ;;  %v650_v5 = vpack.c.bf16 %v469_v0, %v469_v0  ;;  %v566_v6 = vld [vmem:[#allocation3 + $0x40] sm:$0xff]  ;;  %456 = vst.msk [vmem:[#allocation3 + $0x70] sm:$0xff] %vm21_vm0, %v440_v57  ;;  %v277_v9 = vadd.f32 %v252_v4, %v83_v55  ;;  %v439_v14 = vadd.f32 %v414_v10, %v310_v61 }
  0xfb   :  { %v472_v7 = vld [vmem:[#allocation2 + $0x58] sm:$0xff]  ;;  %293 = vst.msk [vmem:[#allocation2 + $0x60] sm:$0xff] %vm21_vm0, %v276_v58  ;;  %582 = vst.msk [vmem:[%s1004_s4 + $0x40] sm:$0xff] %vm21_vm0, %v566_v6 }
  0xfc   :  { %552 = vst.msk [vmem:[%s1005_s3 + $0x28] sm:$0xf] %vm541_vm2, %v652_v62  ;;  %v653_v11 = vpack.c.bf16 %v472_v7, %v472_v7  ;;  %550 = vst.msk [vmem:[%s1005_s3 + $0x20] sm:$0xf] %vm541_vm2, %v650_v5 }
  0xfd   :  { %v569_v12 = vld [vmem:[#allocation3 + $0x58] sm:$0xff]  ;;  %454 = vst.msk [vmem:[#allocation3 + $0x60] sm:$0xff] %vm21_vm0, %v438_v1  ;;  %296 = vst.msk [vmem:[#allocation2 + $0x78] sm:$0xff] %vm21_vm0, %v279_v2 }
  0xfe   :  { %v470_v13 = vld [vmem:[#allocation2 + $0x48] sm:$0xff]  ;;  %585 = vst.msk [vmem:[%s1004_s4 + $0x58] sm:$0xff] %vm21_vm0, %v569_v12  ;;  %457 = vst.msk [vmem:[#allocation3 + $0x78] sm:$0xff] %vm21_vm0, %v441_v8 }
  0xff   :  { %v651_v15 = vpack.c.bf16 %v470_v13, %v470_v13  ;;  %v567_v16 = vld [vmem:[#allocation3 + $0x48] sm:$0xff]  ;;  %294 = vst.msk [vmem:[#allocation2 + $0x68] sm:$0xff] %vm21_vm0, %v277_v9  ;;  %455 = vst.msk [vmem:[#allocation3 + $0x68] sm:$0xff] %vm21_vm0, %v439_v14 }
 0x100   :  { %553 = vst.msk [vmem:[%s1005_s3 + $0x2c] sm:$0xf] %vm541_vm2, %v653_v11  ;;  %v475_v17 = vld [vmem:[#allocation2 + $0x70] sm:$0xff] }
 0x101   :  { %583 = vst.msk [vmem:[%s1004_s4 + $0x48] sm:$0xff] %vm21_vm0, %v567_v16  ;;  %v656_v18 = vpack.c.bf16 %v475_v17, %v475_v17  ;;  %v572_v19 = vld [vmem:[#allocation3 + $0x70] sm:$0xff] }
 0x102   :  { %551 = vst.msk [vmem:[%s1005_s3 + $0x24] sm:$0xf] %vm541_vm2, %v651_v15  ;;  %v473_v20 = vld [vmem:[#allocation2 + $0x60] sm:$0xff] }
 0x103   :  { %588 = vst.msk [vmem:[%s1004_s4 + $0x70] sm:$0xff] %vm21_vm0, %v572_v19  ;;  %v654_v21 = vpack.c.bf16 %v473_v20, %v473_v20 }
 0x104   :  { %v570_v22 = vld [vmem:[#allocation3 + $0x60] sm:$0xff]  ;;  %v476_v23 = vld [vmem:[#allocation2 + $0x78] sm:$0xff]  ;;  %556 = vst.msk [vmem:[%s1005_s3 + $0x38] sm:$0xf] %vm541_vm2, %v656_v18 }
 0x105   :  { %586 = vst.msk [vmem:[%s1004_s4 + $0x60] sm:$0xff] %vm21_vm0, %v570_v22  ;;  %v657_v24 = vpack.c.bf16 %v476_v23, %v476_v23  ;;  %v573_v25 = vld [vmem:[#allocation3 + $0x78] sm:$0xff] }
 0x106   :  { %v474_v26 = vld [vmem:[#allocation2 + $0x68] sm:$0xff]  ;;  %554 = vst.msk [vmem:[%s1005_s3 + $0x30] sm:$0xf] %vm541_vm2, %v654_v21 }
 0x107   :  { %589 = vst.msk [vmem:[%s1004_s4 + $0x78] sm:$0xff] %vm21_vm0, %v573_v25  ;;  %v655_v27 = vpack.c.bf16 %v474_v26, %v474_v26  ;;  %v571_v28 = vld [vmem:[#allocation3 + $0x68] sm:$0xff] }
 0x108   :  { %557 = vst.msk [vmem:[%s1005_s3 + $0x3c] sm:$0xf] %vm541_vm2, %v657_v24 }
 0x109   :  { %587 = vst.msk [vmem:[%s1004_s4 + $0x68] sm:$0xff] %vm21_vm0, %v571_v28 }
 0x10a   :  { %555 = vst.msk [vmem:[%s1005_s3 + $0x34] sm:$0xf] %vm541_vm2, %v655_v27 }

// kernel: ss2d_forward.9
= control target key start
LH: loop header
LB: loop body
LE: loop exit
PB: predicated region body
PF: predicated region fallthrough
CT: control target
= control target key end

     0   :  { %11 = vsyncpa [#allocation3], 0  ;;  %s1391_s0 = inlined_call_operand.vmem [shape: f32[2,2,64,64], index: 0, kind: input, shape index: {}]   ;;  %s1392_s1 = inlined_call_operand.vmem [shape: f32[2,64,64], index: 1, kind: input, shape index: {}]   ;;  %s1393_s2 = inlined_call_operand.vmem [shape: f32[2,64,64], index: 2, kind: input, shape index: {}]   ;;  %s1394_s3 = inlined_call_operand.vmem [shape: f32[1,64], index: 3, kind: input, shape index: {}]   ;;  %s1395_s4 = inlined_call_operand.vmem [shape: f32[1,64], index: 4, kind: input, shape index: {}]   ;;  %s1396_s5 = inlined_call_operand.vmem [shape: bf16[64,32], index: 5, kind: input, shape index: {}]   ;;  %s1397_s6 = inlined_call_operand.hbm [shape: f32[2,64,32], index: 6, kind: output, shape index: {}]  }
   0x1   :  { %13 = vsyncpa [#allocation3 + $0x1], 0  ;;  %s1137_s21 = smov 0   ;;  %s1139_s22 = smov 0  }
   0x2   :  { %s1141_s23 = smov 0   ;;  %s1143_s24 = smov 0  }
   0x3   :  { %s1145_s25 = smov 0   ;;  %s1147_s26 = smov 0  }
   0x4 LB: > { %s839_s27 = sadd.s32 4294967295, %s1097_s26   ;;  %s840_s28 = sadd.s32 4294967294, %s1097_s26   ;;  %s1097_s26 = sphi %s1147_s26, %s19_s26   ;;  %s1093_s25 = sphi %s1145_s25, %s1404_s25   ;;  %s1089_s24 = sphi %s1143_s24, %s1403_s24   ;;  %s1085_s23 = sphi %s1141_s23, %s1402_s23   ;;  %s1081_s22 = sphi %s1139_s22, %s1401_s22   ;;  %s1077_s21 = sphi %s1137_s21, %s1400_s21  }
   0x5   : > { %s31_s29 = sadd.s32 1, %s1093_s25  ;;  %s187_s30 = sadd.s32 1, %s1085_s23 }
   0x6   : > { %p33_p0 = scmp.ge.s32.totalorder %s31_s29, 2  ;;  %p197_p1 = scmp.ne.s32.totalorder %s1085_s23, %s1081_s22 }
   0x7   : > { %p198_p2 = scmp.eq.s32.totalorder %s839_s27, 1  ;;  %p203_p3 = scmp.ne.s32.totalorder %s1081_s22, %s1077_s21 }
   0x8   : > { %s1406_s29 = smov (%p33_p0, %s31_s29), 0  ;;  %p204_p5 = scmp.eq.s32.totalorder %s840_s28, 1 }
   0x9   : > { %p1177_p4 = por %p198_p2, %p197_p1  ;;  %s182_s8 = ssub.s32 %s1093_s25, %s1406_s29 }
   0xa   : > { %p843_p6 = scmp.ge.s32.totalorder %s1097_s26, 1  ;;  %p185_p7 = scmp.eq.s32.totalorder %s182_s8, 0 }
   0xb   : > { %p1184_p8 = por %p204_p5, %p203_p3  ;;  %p270_p9 = scmp.lt.s32.totalorder %s1097_s26, 3 }
   0xc   : > { %s1190_s10 = scalar_select %p185_p7, %s1085_s23, %s187_s30  }
   0xd   : > { %p271_p10 = pnand %p843_p6, %p270_p9 }
   0xe   : > { %p323_p11 = scmp.lt.s32.totalorder (!%p271_p10), %s1089_s24, 1  ;;  %vm378_vm0 = vcmask (!%p271_p10), 523264   ;;  %s319_s20 = sand.u32 (!%p271_p10), 1, %s1081_s22   ;;  %vm699_vm1 = vcmask (!%p271_p10), 261120  }
   0xf   : > { %274 = sbr.rel (%p271_p10) target bundleno = 593 (0x251), region = 44  ;;  %s844_s27 = sshll.u32 (!%p271_p10), %s319_s20, 6 }
  0x10   : > { %s321_s28 = scalar_lea.vmem (!%p271_p10), [#allocation2], %s844_s27  ;;  %s877_s30 = sshll.u32 (!%p271_p10), %s1089_s24, 10 }
  0x11   : > { %s724_s8 = sshll.u32 (!%p271_p10), %s321_s28, 4  ;;  %s1338_s14 = scalar_lea.hbm (!%p271_p10), %s1397_s6, %s877_s30  ;;  %s1340_s8 = int_to_ptr.vmem [resolvable:$true] %s724_s8 }
  0x16   : > { %s324_s11 = scalar_select %p323_p11, %s1089_s24, 1 }
  0x17   : > { %s1345_s24 = scalar_lea.sflag [#allocation3], %s319_s20 }
  0x18   : > { %s1194_s12 = sshll.u32 %s324_s11, 6 }
  0x19   : > { %s330_s15 = scalar_lea.vmem %s1391_s0, %s1194_s12  ;;  %s340_s18 = scalar_lea.vmem %s1392_s1, %s1194_s12 }
  0x1a   : > { %v354_v0 = vld [vmem:[%s330_s15] sm:$0xff]  ;;  %v355_v5 = vld [vmem:[%s330_s15 + $0x8] sm:$0xff]  ;;  %v356_v11 = vld [vmem:[%s330_s15 + $0x10] sm:$0xff]  ;;  %s350_s16 = scalar_lea.vmem %s1393_s2, %s1194_s12 }
  0x1b   : > { %v362_v1 = vld [vmem:[%s340_s18] sm:$0xff]  ;;  %v363_v6 = vld [vmem:[%s340_s18 + $0x8] sm:$0xff]  ;;  %v364_v14 = vld [vmem:[%s340_s18 + $0x10] sm:$0xff] }
  0x1c   : > { %v358_v2 = vld [vmem:[%s330_s15 + $0x20] sm:$0xff]  ;;  %v370_v3 = vadd.f32 %v362_v1, %v354_v0  ;;  %v371_v8 = vadd.f32 %v363_v6, %v355_v5  ;;  %v359_v9 = vld [vmem:[%s330_s15 + $0x28] sm:$0xff]  ;;  %v357_v15 = vld [vmem:[%s330_s15 + $0x18] sm:$0xff]  ;;  %v372_v19 = vadd.f32 %v364_v14, %v356_v11 }
  0x1d   : > { %v366_v4 = vld [vmem:[%s340_s18 + $0x20] sm:$0xff]  ;;  %v367_v10 = vld [vmem:[%s340_s18 + $0x28] sm:$0xff]  ;;  %v365_v16 = vld [vmem:[%s340_s18 + $0x18] sm:$0xff] }
  0x1e   : > { %v374_v7 = vadd.f32 %v366_v4, %v358_v2  ;;  %v379_v12 = vsel %vm378_vm0, %v370_v3, 0.0  ;;  %v375_v13 = vadd.f32 %v367_v10, %v359_v9  ;;  %v382_v18 = vsel %vm378_vm0, %v371_v8, 0.0  ;;  %v360_v22 = vld [vmem:[%s330_s15 + $0x30] sm:$0xff]  ;;  %v361_v24 = vld [vmem:[%s330_s15 + $0x38] sm:$0xff]  ;;  %v968_v9 = vld [vmem:[%s1396_s5 + $0x8] sm:$0xff]   ;;  %s1019_s15 = scalar_lea.vmem %s1340_s8, 1024 }
  0x1f   : > { %380 = vadd.xlane.f32.xlu0 %v379_v12  ;;  %v373_v21 = vadd.f32 %v365_v16, %v357_v15  ;;  %v368_v23 = vld [vmem:[%s340_s18 + $0x30] sm:$0xff]  ;;  %v369_v25 = vld [vmem:[%s340_s18 + $0x38] sm:$0xff]  ;;  %v385_v26 = vsel %vm378_vm0, %v372_v19, 0.0  ;;  %v1268_v12 = vld [vmem:[%s350_s16] sm:$0xff]  ;;  %p1020_p12 = scmp.ne.s32.totalorder %s1340_s8, %s1019_s15 }
  0x20   : > { %v391_v17 = vsel %vm378_vm0, %v374_v7, 0.0  ;;  %v394_v20 = vsel %vm378_vm0, %v375_v13, 0.0  ;;  %v376_v27 = vadd.f32 %v368_v23, %v360_v22  ;;  %v377_v29 = vadd.f32 %v369_v25, %v361_v24  ;;  %v969_v10 = vld [vmem:[%s1396_s5 + $0x10] sm:$0xff]   ;;  %v970_v11 = vld [vmem:[%s1396_s5 + $0x18] sm:$0xff]   ;;  %v1274_v16 = vld [vmem:[%s350_s16 + $0x20] sm:$0xff] }
  0x21   : > { %392 = vadd.xlane.f32.xlu1 %v391_v17  ;;  %v388_v28 = vsel %vm378_vm0, %v373_v21, 0.0  ;;  %v853_v14 = vmul.f32 -1.442695, %v1268_v12  ;;  %v1276_v17 = vld [vmem:[%s350_s16 + $0x28] sm:$0xff]  ;;  %v1286_v24 = vld [vmem:[%s350_s16 + $0x30] sm:$0xff]  ;;  %v1288_v25 = vld [vmem:[%s350_s16 + $0x38] sm:$0xff]  ;;  %p1021_p13 = pnand %p1020_p12, %p1177_p4 }
  0x22   : > { %v397_v30 = vsel %vm378_vm0, %v376_v27, 0.0  ;;  %v400_v31 = vsel %vm378_vm0, %v377_v29, 0.0 }
  0x23   : > { %383 = vadd.xlane.f32.xlu0 %v382_v18  ;;  %971 = vpow2.f32 %v853_v14  ;;  %v857_v18 = vmul.f32 -1.442695, %v1274_v16  ;;  %p1022_p0 = pneg %p1021_p13 }
  0x25   : > { %395 = vadd.xlane.f32.xlu1 %v394_v20  ;;  %v1280_v20 = vld [vmem:[%s350_s16 + $0x10] sm:$0xff] }
  0x26   : > { %v855_v22 = vmul.f32 -1.442695, %v1280_v20 }
  0x27   : > { %386 = vadd.xlane.f32.xlu0 %v385_v26  ;;  %v859_v26 = vmul.f32 -1.442695, %v1286_v24 }
  0x29   : > { %389 = vadd.xlane.f32.xlu1 %v388_v28 }
  0x2b   : > { %398 = vadd.xlane.f32.xlu0 %v397_v30 }
  0x2d   : > { %401 = vadd.xlane.f32.xlu1 %v400_v31  ;;  %v972_v28 = vpop.eup %971 }
  0xac   : > { %v381_v32 = vpop.xlane.xlu0 %380 }
  0xad   : > { %v404_v33 = vmul.f32 0.015625, %v381_v32 }
  0xae   : > { %v393_v34 = vpop.xlane.xlu1 %392 }
  0xaf   : > { %v408_v35 = vmul.f32 0.015625, %v393_v34  ;;  %v1212_v36 = vsub.f32 %v370_v3, %v404_v33  ;;  %v546_v33 = vadd.f32 1.0, %v972_v28 }
  0xb0   : > { %v384_v38 = vpop.xlane.xlu0 %383 }
  0xb1   : > { %v1214_v37 = vsub.f32 %v374_v7, %v408_v35  ;;  %v405_v39 = vmul.f32 0.015625, %v384_v38  ;;  %v420_v41 = vmul.f32 %v1212_v36, %v1212_v36 }
  0xb2   : > { %v396_v40 = vpop.xlane.xlu1 %395 }
  0xb3   : > { %v409_v42 = vmul.f32 0.015625, %v396_v40  ;;  %v424_v43 = vmul.f32 %v1214_v37, %v1214_v37  ;;  %v1220_v44 = vsub.f32 %v371_v8, %v405_v39  ;;  %v428_v45 = vsel %vm378_vm0, %v420_v41, 0.0  ;;  %v967_v8 = vld [vmem:[%s1396_s5] sm:$0xff]  }
  0xb4   : > { %429 = vadd.xlane.f32.xlu0 %v428_v45  ;;  %v387_v47 = vpop.xlane.xlu0 %386  ;;  %886 = vmatprep.subr.bf16.mxu0 %v967_v8 }
  0xb5   : > { %v1223_v46 = vsub.f32 %v375_v13, %v409_v42  ;;  %v406_v48 = vmul.f32 0.015625, %v387_v47  ;;  %v440_v50 = vsel %vm378_vm0, %v424_v43, 0.0  ;;  %v421_v51 = vmul.f32 %v1220_v44, %v1220_v44  ;;  %902 = vmatprep.subr.bf16.mxu1 %v967_v8  ;;  %887 = vmatpush3.bf16.msra.mxu0 %v967_v8  ;;  %v1270_v13 = vld [vmem:[%s350_s16 + $0x8] sm:$0xff] }
  0xb6   : > { %v390_v49 = vpop.xlane.xlu1 %389  ;;  %906 = vmatpush3.bf16.msra.mxu1 %v967_v8  ;;  %888 = vmatprep.subr.bf16.mxu0 %v968_v9  ;;  %v854_v15 = vmul.f32 -1.442695, %v1270_v13 }
  0xb7   : > { %v407_v52 = vmul.f32 0.015625, %v390_v49  ;;  %v425_v53 = vmul.f32 %v1223_v46, %v1223_v46  ;;  %v1230_v54 = vsub.f32 %v372_v19, %v406_v48  ;;  %v431_v55 = vsel %vm378_vm0, %v421_v51, 0.0  ;;  %903 = vmatprep.subr.bf16.mxu1 %v968_v9 }
  0xb8   : > { %441 = vadd.xlane.f32.xlu0 %v440_v50  ;;  %432 = vadd.xlane.f32.xlu1 %v431_v55  ;;  %v399_v57 = vpop.xlane.xlu0 %398  ;;  %973 = vpow2.f32 %v854_v15  ;;  %v858_v19 = vmul.f32 -1.442695, %v1276_v17 }
  0xb9   : > { %v1233_v56 = vsub.f32 %v373_v21, %v407_v52  ;;  %v410_v58 = vmul.f32 0.015625, %v399_v57  ;;  %v443_v60 = vsel %vm378_vm0, %v425_v53, 0.0  ;;  %v422_v61 = vmul.f32 %v1230_v54, %v1230_v54  ;;  %889 = vmatpush3.bf16.msra.mxu0 %v968_v9  ;;  %v1282_v21 = vld [vmem:[%s350_s16 + $0x18] sm:$0xff]  ;;  %s1099_s16 = smov [#allocation2]  }
  0xba   : > { %v402_v59 = vpop.xlane.xlu1 %401  ;;  %907 = vmatpush3.bf16.msra.mxu1 %v968_v9  ;;  %890 = vmatprep.subr.bf16.mxu0 %v969_v10  ;;  %975 = vpow2.f32 %v857_v18  ;;  %v856_v23 = vmul.f32 -1.442695, %v1282_v21  ;;  %s1023_s12 = sshll.u32 %s1099_s16, 4  ;;  %s1024_s12 = int_to_ptr.vmem [resolvable:$false] %s1023_s12 }
  0xbb   : > { %v411_v62 = vmul.f32 0.015625, %v402_v59  ;;  %v423_v63 = vmul.f32 %v1233_v56, %v1233_v56  ;;  %v1240_v0 = vsub.f32 %v376_v27, %v410_v58  ;;  %v434_v1 = vsel %vm378_vm0, %v422_v61, 0.0  ;;  %904 = vmatprep.subr.bf16.mxu1 %v969_v10  ;;  %s1025_s17 = scalar_lea.vmem %s1024_s12, 2048  ;;  %p1026_p1 = scmp.lt.s32.totalorder %s1340_s8, %s1024_s12 }
  0xbc   : > { %444 = vadd.xlane.f32.xlu1 %v443_v60  ;;  %435 = vadd.xlane.f32.xlu0 %v434_v1  ;;  %977 = vpow2.f32 %v858_v19  ;;  %v860_v27 = vmul.f32 -1.442695, %v1288_v25  ;;  %p1027_p2 = scmp.lt.s32.totalorder %s1025_s17, %s1019_s15 }
  0xbd   : > { %v1243_v2 = vsub.f32 %v377_v29, %v411_v62  ;;  %v437_v3 = vsel %vm378_vm0, %v423_v63, 0.0  ;;  %v426_v4 = vmul.f32 %v1240_v0, %v1240_v0  ;;  %891 = vmatpush3.bf16.msra.mxu0 %v969_v10  ;;  %979 = vpow2.f32 %v855_v22 }
  0xbe   : > { %908 = vmatpush3.bf16.msra.mxu1 %v969_v10  ;;  %892 = vmatprep.subr.bf16.mxu0 %v970_v11  ;;  %981 = vpow2.f32 %v856_v23  ;;  %p1028_p3 = por %p1027_p2, %p1026_p1 }
  0xbf   : > { %v427_v5 = vmul.f32 %v1243_v2, %v1243_v2  ;;  %v446_v6 = vsel %vm378_vm0, %v426_v4, 0.0  ;;  %905 = vmatprep.subr.bf16.mxu1 %v970_v11  ;;  %983 = vpow2.f32 %v859_v26 }
  0xc0   : > { %438 = vadd.xlane.f32.xlu1 %v437_v3  ;;  %447 = vadd.xlane.f32.xlu0 %v446_v6  ;;  %985 = vpow2.f32 %v860_v27  ;;  %v852_v27 = vld [vmem:[%s1395_s4] ss:$0 sm:$0xff]  ;;  %p1029_p5 = pnand %p1028_p3, %p1022_p0 }
  0xc1   : > { %v449_v7 = vsel %vm378_vm0, %v427_v5, 0.0  ;;  %893 = vmatpush3.bf16.msra.mxu0 %v970_v11  ;;  %v1295_v5 = vld [vmem:[%s1394_s3] ss:$0 sm:$0xff] }
  0xc2   : > { %909 = vmatpush3.bf16.msra.mxu1 %v970_v11  ;;  %v974_v30 = vpop.eup %973 }
  0xc3   : > { %v547_v39 = vadd.f32 1.0, %v974_v30 }
  0xc4   : > { %450 = vadd.xlane.f32.xlu1 %v449_v7  ;;  %v976_v34 = vpop.eup %975 }
  0xc5   : > { %v550_v47 = vadd.f32 1.0, %v976_v34 }
  0xc6   : > { %v978_v40 = vpop.eup %977 }
  0xc7   : > { %v980_v48 = vpop.eup %979  ;;  %v551_v51 = vadd.f32 1.0, %v978_v40 }
  0xc8   : > { %v982_v52 = vpop.eup %981  ;;  %v548_v59 = vadd.f32 1.0, %v980_v48 }
  0xc9   : > { %v984_v60 = vpop.eup %983  ;;  %v549_v63 = vadd.f32 1.0, %v982_v52 }
  0xca   : > { %v986_v1 = vpop.eup %985  ;;  %v552_v9 = vadd.f32 1.0, %v984_v60 }
  0xcb   : > { %v553_v14 = vadd.f32 1.0, %v986_v1 }
 0x141   : > { %v430_v29 = vpop.xlane.xlu0 %429 }
 0x142   : > { %v452_v31 = vmul.f32 0.015625, %v430_v29 }
 0x144   : > { %v460_v32 = vadd.f32 1e-05, %v452_v31 }
 0x145   : > { %v433_v35 = vpop.xlane.xlu1 %432  ;;  %v442_v38 = vpop.xlane.xlu0 %441 }
 0x146   : > { %987 = vrsqrt.f32 %v460_v32  ;;  %v453_v41 = vmul.f32 0.015625, %v433_v35  ;;  %v456_v42 = vmul.f32 0.015625, %v442_v38 }
 0x147   : > { %989 = vrcp.f32 %v546_v33 }
 0x148   : > { %v461_v43 = vadd.f32 1e-05, %v453_v41  ;;  %v464_v45 = vadd.f32 1e-05, %v456_v42  ;;  %991 = vrcp.f32 %v547_v39 }
 0x149   : > { %v445_v49 = vpop.xlane.xlu1 %444  ;;  %v436_v50 = vpop.xlane.xlu0 %435 }
 0x14a   : > { %993 = vrsqrt.f32 %v461_v43  ;;  %v457_v53 = vmul.f32 0.015625, %v445_v49  ;;  %v454_v55 = vmul.f32 0.015625, %v436_v50 }
 0x14b   : > { %995 = vrsqrt.f32 %v464_v45 }
 0x14c   : > { %v465_v57 = vadd.f32 1e-05, %v457_v53  ;;  %v462_v58 = vadd.f32 1e-05, %v454_v55  ;;  %997 = vrcp.f32 %v550_v47 }
 0x14d   : > { %v439_v61 = vpop.xlane.xlu1 %438  ;;  %v448_v62 = vpop.xlane.xlu0 %447  ;;  %999 = vrcp.f32 %v551_v51 }
 0x14e   : > { %1001 = vrsqrt.f32 %v465_v57  ;;  %v455_v3 = vmul.f32 0.015625, %v439_v61  ;;  %v458_v4 = vmul.f32 0.015625, %v448_v62 }
 0x14f   : > { %1003 = vrsqrt.f32 %v462_v58 }
 0x150   : > { %v988_v6 = vpop.eup %987  ;;  %v463_v7 = vadd.f32 1e-05, %v455_v3  ;;  %v466_v8 = vadd.f32 1e-05, %v458_v4  ;;  %1005 = vrcp.f32 %v548_v59 }
 0x151   : > { %v451_v10 = vpop.xlane.xlu1 %450  ;;  %v476_v11 = vmul.f32 %v988_v6, %v1212_v36  ;;  %1007 = vrcp.f32 %v549_v63  ;;  %v990_v15 = vpop.eup %989 }
 0x152   : > { %1009 = vrsqrt.f32 %v463_v7  ;;  %v459_v18 = vmul.f32 0.015625, %v451_v10  ;;  %v992_v19 = vpop.eup %991  ;;  %v570_v34 = vmul.f32 %v990_v15, %v1268_v12 }
 0x153   : > { %1011 = vrsqrt.f32 %v466_v8  ;;  %v491_v22 = vmul.f32 %v1295_v5, %v476_v11  ;;  %v571_v35 = vmul.f32 %v992_v19, %v1270_v13 }
 0x154   : > { %v994_v23 = vpop.eup %993  ;;  %v467_v26 = vadd.f32 1e-05, %v459_v18  ;;  %1013 = vrcp.f32 %v552_v9 }
 0x155   : > { %v996_v28 = vpop.eup %995  ;;  %v477_v29 = vmul.f32 %v994_v23, %v1220_v44  ;;  %1015 = vrcp.f32 %v553_v14  ;;  %v506_v33 = vadd.f32 %v852_v27, %v491_v22 }
 0x156   : > { %v998_v36 = vpop.eup %997  ;;  %1017 = vrsqrt.f32 %v467_v26  ;;  %v480_v30 = vmul.f32 %v996_v28, %v1214_v37 }
 0x157   : > { %v1000_v31 = vpop.eup %999  ;;  %v492_v32 = vmul.f32 %v1295_v5, %v477_v29  ;;  %v574_v37 = vmul.f32 %v998_v36, %v1274_v16  ;;  %v578_v48 = vmul.f32 %v570_v34, %v506_v33 }
 0x158   : > { %v1002_v38 = vpop.eup %1001  ;;  %v495_v39 = vmul.f32 %v1295_v5, %v480_v30  ;;  %v575_v45 = vmul.f32 %v1000_v31, %v1276_v17 }
 0x159   : > { %v1004_v40 = vpop.eup %1003  ;;  %v507_v41 = vadd.f32 %v852_v27, %v492_v32  ;;  %v481_v44 = vmul.f32 %v1002_v38, %v1223_v46 }
 0x15a   : > { %v1006_v42 = vpop.eup %1005  ;;  %v478_v43 = vmul.f32 %v1004_v40, %v1230_v54  ;;  %v510_v13 = vadd.f32 %v852_v27, %v495_v39 }
 0x15b   : > { %v1008_v47 = vpop.eup %1007  ;;  %v579_v49 = vmul.f32 %v571_v35, %v507_v41  ;;  %v496_v12 = vmul.f32 %v1295_v5, %v481_v44  ;;  %v572_v16 = vmul.f32 %v1006_v42, %v1280_v20 }
 0x15c   : > { %v1010_v50 = vpop.eup %1009  ;;  %v493_v51 = vmul.f32 %v1295_v5, %v478_v43  ;;  %v573_v17 = vmul.f32 %v1008_v47, %v1282_v21  ;;  %v582_v59 = vmul.f32 %v574_v37, %v510_v13 }
 0x15d   : > { %v1012_v52 = vpop.eup %1011  ;;  %v479_v53 = vmul.f32 %v1010_v50, %v1233_v56  ;;  %v586_v46 = vpack.c.bf16 %v579_v49, %v578_v48  ;;  %v511_v55 = vadd.f32 %v852_v27, %v496_v12 }
 0x15e   : > { %v1014_v57 = vpop.eup %1013  ;;  %v482_v54 = vmul.f32 %v1012_v52, %v1240_v0  ;;  %v508_v62 = vadd.f32 %v852_v27, %v493_v51 }
 0x15f   : > { %v1016_v58 = vpop.eup %1015  ;;  %894 = vmatprep.mubr.msk.bf16.mxu0 %vm378_vm0, %v586_v46  ;;  %v583_v60 = vmul.f32 %v575_v45, %v511_v55  ;;  %v494_v61 = vmul.f32 %v1295_v5, %v479_v53  ;;  %v576_v20 = vmul.f32 %v1014_v57, %v1286_v24 }
 0x160   : > { %v1018_v63 = vpop.eup %1017  ;;  %v497_v56 = vmul.f32 %v1295_v5, %v482_v54  ;;  %v577_v21 = vmul.f32 %v1016_v58, %v1288_v25  ;;  %v580_v4 = vmul.f32 %v572_v16, %v508_v62 }
 0x161   : > { %v483_v1 = vmul.f32 %v1018_v63, %v1243_v2  ;;  %v588_v3 = vpack.c.bf16 %v583_v60, %v582_v59  ;;  %v509_v0 = vadd.f32 %v852_v27, %v494_v61 }
 0x162   : > { %v512_v8 = vadd.f32 %v852_v27, %v497_v56 }
 0x163   : > { %898 = vmatprep.mubr.msk.bf16.mxu1 %vm378_vm0, %v588_v3  ;;  %v581_v6 = vmul.f32 %v573_v17, %v509_v0  ;;  %v498_v7 = vmul.f32 %v1295_v5, %v483_v1 }
 0x164   : > { %v584_v2 = vmul.f32 %v576_v20, %v512_v8 }
 0x165   : > { %v587_v9 = vpack.c.bf16 %v581_v6, %v580_v4  ;;  %v513_v10 = vadd.f32 %v852_v27, %v498_v7 }
 0x167   : > { %895 = vmatmul.mubr.msk.bf16.vlgmr.msra.gmra.mrb[0].mxu0 %vm378_vm0, %v587_v9  ;;  %v585_v11 = vmul.f32 %v577_v21, %v513_v10 }
 0x169   : > { %v589_v14 = vpack.c.bf16 %v585_v11, %v584_v2 }
 0x16b   : > { %899 = vmatmul.mubr.msk.bf16.vlgmr.msra.gmra.mrb[0].mxu1 %vm378_vm0, %v589_v14 }
 0x23a   : > { %v896_v24 = vpop.f32.mrb[0].mxu0 }
 0x23b   : > { %702 = vst.msk [vmem:[%s321_s28 + $0x10] sm:$0xff] %vm699_vm1, %v896_v24  ;;  %v668_v25 = vpop.f32.mrb[1].mxu0 }
 0x23c   : > { %700 = vst.msk [vmem:[%s321_s28] sm:$0xff] %vm699_vm1, %v668_v25  ;;  %v897_v5 = vpop.f32.mrb[2].mxu0 }
 0x23d   : > { %703 = vst.msk [vmem:[%s321_s28 + $0x18] sm:$0xff] %vm699_vm1, %v897_v5  ;;  %v671_v15 = vpop.f32.mrb[3].mxu0 }
 0x23e   : > { %701 = vst.msk [vmem:[%s321_s28 + $0x8] sm:$0xff] %vm699_vm1, %v671_v15  ;;  %v900_v18 = vpop.f32.mrb[0].mxu1 }
 0x23f   : > { %706 = vst.msk [vmem:[%s321_s28 + $0x30] sm:$0xff] %vm699_vm1, %v900_v18  ;;  %v684_v19 = vpop.f32.mrb[1].mxu1 }
 0x240   : > { %704 = vst.msk [vmem:[%s321_s28 + $0x20] sm:$0xff] %vm699_vm1, %v684_v19  ;;  %v901_v22 = vpop.f32.mrb[2].mxu1 }
 0x241   : > { %707 = vst.msk [vmem:[%s321_s28 + $0x38] sm:$0xff] %vm699_vm1, %v901_v22  ;;  %v687_v23 = vpop.f32.mrb[3].mxu1 }
 0x242   : > { %705 = vst.msk [vmem:[%s321_s28 + $0x28] sm:$0xff] %vm699_vm1, %v687_v23 }
 0x243   : > { %1032 = shalt.err (!%p1029_p5)
}
 0x244   : > { %s1033_s18 = scalar_lea.hbm %s1338_s14, 1024  ;;  %s1037_s27 = scalar_lea.hbm %s1397_s6, 2048 }
 0x245   : > { %p1034_p6 = scmp.ne.s32.totalorder %s1338_s14, %s1033_s18  ;;  %p1038_p10 = scmp.lt.u32.totalorder %s1338_s14, %s1397_s6 }
 0x246   : > { %p1039_p11 = scmp.lt.u32.totalorder %s1037_s27, %s1033_s18  ;;  %p1041_p13 = scmp.lt.u32.totalorder %s1033_s18, %s1338_s14 }
 0x247   : > { %p1035_p7 = pnand %p1034_p6, %p1177_p4 }
 0x248   : > { %p1040_p12 = por %p1039_p11, %p1038_p10 }
 0x249   : > { %p1036_p9 = pneg %p1035_p7 }
 0x24a   : > { %p1042_p0 = por %p1041_p13, %p1040_p12 }
 0x24c   : > { %p1043_p1 = pnand %p1042_p0, %p1036_p9 }
 0x24e   : > { %1046 = shalt.err (!%p1043_p1)
}
 0x24f   : > { %s1100_s11 = smov 128   ;;  %s1101_s13 = smov 8  }
 0x250   : > { %910 = dma.vmem_to_hbm [thread:$0]  (%p1177_p4), %s1340_s8, 1024, %s1338_s14, %s1345_s24, %s1100_s11, %s1100_s11, %s1101_s13  }
 0x251 PF: > { %p916_p2 = scmp.ge.s32.totalorder %s1097_s26, 2  ;;  %s739_s15 = sand.u32 1, %s1077_s21  }
 0x252   : > { %s740_s16 = scalar_lea.sflag [#allocation3], %s739_s15 }
 0x253   : > { %p913_p3 = pnand %p916_p2, %p1184_p8 }
 0x255   : > { %1072 = dma.done.wait (!%p913_p3), %s740_s16, 1024  }
 0x256   : > { %1074 = vsyncadd (!%p913_p3), %s740_s16, 4294966272  ;;  %s19_s26 = sadd.s32 1, %s1097_s26   ;;  %s1400_s21 = smov %s1081_s22 }
 0x257   : > { %p16_p5 = scmp.ge.s32.totalorder %s19_s26, 4   ;;  %s1401_s22 = smov %s1085_s23 }
 0x258   : > { %s1402_s23 = smov %s1190_s10  ;;  %s1403_s24 = smov %s1093_s25 }
 0x259   : > { %s1404_s25 = smov %s1406_s29  ;;  %18 = sbr.rel (!%p16_p5) target bundleno = 4 (0x4), region = 85 }
 0x260   :  { %745 = vsyncpa [#allocation3], 1 }
 0x261   :  { %747 = vsyncpa [#allocation3 + $0x1], 1 }

// kernel: ss2d_forward.8
= control target key start
LH: loop header
LB: loop body
LE: loop exit
PB: predicated region body
PF: predicated region fallthrough
CT: control target
= control target key end

     0   :  { %s6399_s18 = smov 0   ;;  %s6401_s19 = smov 0   ;;  %s8430_s0 = inlined_call_operand.vmem [shape: f32[2,2,64,64], index: 0, kind: input, shape index: {}]   ;;  %s8431_s1 = inlined_call_operand.vmem [shape: f32[2,2,64,256], index: 1, kind: input, shape index: {}]   ;;  %s8432_s2 = inlined_call_operand.vmem [shape: f32[2,2,16,64], index: 2, kind: input, shape index: {}]   ;;  %s8433_s3 = inlined_call_operand.vmem [shape: f32[2,2,1,64], index: 3, kind: input, shape index: {}]   ;;  %s8434_s4 = inlined_call_operand.vmem [shape: f32[2,2,1,64], index: 4, kind: input, shape index: {}]   ;;  %s8435_s5 = inlined_call_operand.vmem [shape: f32[2,2,64,64], index: 5, kind: output, shape index: {}]  }
   0x1   :  { %s6403_s20 = smov 0   ;;  %s6405_s21 = smov 0  }
   0x2   :  { %s6407_s22 = smov 0  }
   0x3 LB: > { %s24_s23 = sadd.s32 1, %s6310_s20  ;;  %s27_s24 = sadd.s32 1, %s6314_s21  ;;  %s6318_s22 = sphi %s6407_s22, %s15_s22   ;;  %s6314_s21 = sphi %s6405_s21, %s8571_s21   ;;  %s6310_s20 = sphi %s6403_s20, %s8570_s20   ;;  %s6306_s19 = sphi %s6401_s19, %s8569_s19   ;;  %s6302_s18 = sphi %s6399_s18, %s8568_s18  }
   0x4   : > { %p25_p0 = scmp.ge.s32.totalorder %s24_s23, 2  ;;  %p5719_p1 = scmp.ge.s32.totalorder %s6318_s22, 1 }
   0x5   : > { %p251_p2 = scmp.lt.s32.totalorder %s6318_s22, 5 }
   0x6   : > { %s8573_s23 = smov (%p25_p0, %s24_s23), 0  ;;  %s8575_s24 = smov (!%p25_p0, %s27_s24), %s6314_s21 }
   0x7   : > { %p252_p3 = pnand %p5719_p1, %p251_p2  ;;  %p29_p4 = scmp.ge.s32.totalorder %s8575_s24, 2 }
   0x9   : > { %s8577_s24 = smov (%p29_p4, %s8575_s24), 0  ;;  %255 = sbr.rel (%p252_p3) target bundleno = 1073 (0x431), region = 40 }
  0x10   : > { %p309_p5 = scmp.lt.s32.totalorder %s6302_s18, 1  ;;  %p311_p6 = scmp.lt.s32.totalorder %s6306_s19, 1  ;;  %v6471_v4 = vmov 0.0   ;;  %v6473_v5 = vmov 0.0  }
  0x11   : > { %s6475_s8 = smov 0  }
  0x12   : > { %s8579_s18 = smov (!%p309_p5, %s6302_s18), 1  ;;  %s8581_s19 = smov (!%p311_p6, %s6306_s19), 1 }
  0x13   : > { %s5721_s25 = sshll.u32 %s8579_s18, 4  ;;  %s5724_s26 = sshll.u32 %s8579_s18, 5 }
  0x14   : > { %s5720_s27 = sshll.u32 %s8581_s19, 3  ;;  %s5723_s28 = sshll.u32 %s8581_s19, 4 }
  0x15   : > { %s315_s29 = sadd.s32 %s5721_s25, %s5720_s27  ;;  %s324_s30 = sadd.s32 %s5724_s26, %s5723_s28 }
  0x16   : > { %s5722_s6 = sshll.u32 %s315_s29, 3  ;;  %s5725_s7 = sshll.u32 %s324_s30, 3 }
  0x17   : > { %s6432_s10 = scalar_lea.vmem %s8430_s0, %s5722_s6  ;;  %s6437_s13 = scalar_lea.vmem %s8431_s1, %s5725_s7 }
  0x18   : > { %s6442_s16 = scalar_lea.vmem %s8432_s2, %s5724_s26  ;;  %s5728_s17 = sshll.u32 %s8579_s18, 1 }
  0x19   : > { %s6447_s27 = scalar_lea.vmem %s8433_s3, %s5728_s17  ;;  %s6452_s30 = scalar_lea.vmem %s8434_s4, %s5728_s17  ;;  %v6455_v0 = vld [vmem:[%s6442_s16] sm:$0xff]  ;;  %v6458_v1 = vld [vmem:[%s6442_s16 + $0x8] sm:$0xff] }
  0x1a   : > { %s6463_s18 = scalar_lea.vmem %s8435_s5, %s5722_s6  ;;  %v6466_v2 = vld [vmem:[%s6447_s27] ss:$0 sm:$0xff] }
  0x1b   : > { %8493 = vst [vmem:[#allocation5_spill] sm:$0xff] %v6466_v2  ;;  %v6469_v3 = vld [vmem:[%s6452_s30] ss:$0 sm:$0xff] }
  0x1c   : > { %8494 = vst [vmem:[#allocation6_spill] sm:$0xff] %v6469_v3 }
  0x1d LB: >> { %v454_v6 = vlaneseq  ;;  %s6487_s6 = sshll.u32 %s6330_s8, 5  ;;  %v6368_v52 = vmov 1966171168   ;;  %vm998_vm2 = vcmask 523264   ;;  %s7132_s15 = smov 0   ;;  %v6322_v4 = vphi %v6471_v4, %v7156_v4   ;;  %s6330_s8 = sphi %s6475_s8, %s358_s8   ;;  %v6326_v5 = vphi %v6473_v5, %v7154_v5  }
  0x1e   : >> { %s367_s9 = sshra.s32 %s6487_s6, 3  ;;  %v452_v53 = vunpack.c.l.s4 %v6368_v52  ;;  %s6818_s14 = scalar_lea.vmem %s6432_s10, %s6487_s6 }
  0x1f   : >> { %v6489_v7 = vshrl.u32 %v454_v6, 7  ;;  %s5793_s11 = sshll.u32 %s367_s9, 4 }
  0x20   : >> { %s6499_s12 = scalar_lea.vmem %s6437_s13, %s5793_s11  ;;  %v453_v58 = vunpack.c.0.s8 %v452_v53 }
  0x21   : >> { %v6493_v8 = vsub.s32 0, %v6489_v7  ;;  %v6496_v9 = vsub.s32 1, %v6489_v7  ;;  %v372_v10 = vld [vmem:[%s6499_s12] sm:$0xff]  ;;  %v6511_v13 = vsub.s32 2, %v6489_v7  ;;  %v6514_v14 = vsub.s32 3, %v6489_v7  ;;  %v6523_v17 = vld [vmem:[%s6499_s12 + $0x30] sm:$0xff] }
  0x22   : >> { %v6517_v15 = vsub.s32 4, %v6489_v7  ;;  %v6520_v16 = vsub.s32 5, %v6489_v7  ;;  %v6531_v19 = vsub.s32 6, %v6489_v7  ;;  %v6534_v20 = vsub.s32 7, %v6489_v7  ;;  %v6541_v22 = vld [vmem:[%s6499_s12 + $0x10] sm:$0xff]  ;;  %v6592_v40 = vld [vmem:[%s6499_s12 + $0x20] sm:$0xff] }
  0x23   : >> { %v8495_v3 = vld [vmem:[#allocation6_spill] sm:$0xff]  ;;  %8496 = vst [vmem:[#allocation7_spill] sm:$0xff] %v6496_v9  ;;  %v6503_v11 = vrot.slane %v372_v10, %v6496_v9  ;;  %v6506_v12 = vrot.slane %v372_v10, %v6493_v8  ;;  %8497 = vst [vmem:[#allocation8_spill] sm:$0xff] %v6511_v13  ;;  %v6528_v18 = vrot.slane %v372_v10, %v6511_v13 }
  0x24   : >> { %8498 = vst [vmem:[#allocation9_spill] sm:$0xff] %v6514_v14  ;;  %8499 = vst [vmem:[#allocation10_spill] sm:$0xff] %v6517_v15  ;;  %v6538_v21 = vrot.slane %v6523_v17, %v6496_v9  ;;  %v6545_v23 = vrot.slane %v6523_v17, %v6511_v13  ;;  %v6549_v24 = vrot.slane %v6523_v17, %v6514_v14 }
  0x25   : >> { %1285 = vbcast.lane.b32.xlu1 %v6503_v11, 320  ;;  %1273 = vbcast.lane.b32.xlu0 %v6506_v12, 320  ;;  %8500 = vst [vmem:[#allocation11_spill] sm:$0xff] %v6520_v16  ;;  %8501 = vst [vmem:[#allocation12_spill] sm:$0xff] %v6531_v19  ;;  %v6553_v25 = vrot.slane %v6523_v17, %v6517_v15  ;;  %v6556_v26 = vadd.f32 %v8495_v3, %v372_v10 }
  0x26   : >> { %8502 = vst [vmem:[#allocation13_spill] sm:$0xff] %v6534_v20  ;;  %v6560_v27 = vrot.slane %v6523_v17, %v6520_v16  ;;  %v6564_v28 = vrot.slane %v6523_v17, %v6531_v19  ;;  %v6568_v29 = vrot.slane %v6523_v17, %v6534_v20  ;;  %v6572_v30 = vadd.f32 %v8495_v3, %v6541_v22 }
  0x27   : >> { %v390_v31 = vand.u32 2147483647, %v6556_v26  ;;  %v6578_v32 = vrot.slane %v372_v10, %v6514_v14  ;;  %v6584_v37 = vrot.slane %v372_v10, %v6517_v15  ;;  %v6589_v39 = vrot.slane %v372_v10, %v6520_v16 }
  0x28   : >> { %8503 = vst [vmem:[#allocation14_spill] sm:$0xff] %v6568_v29  ;;  %v391_v33 = vand.u32 2147483647, %v6572_v30  ;;  %v6597_v41 = vrot.slane %v372_v10, %v6531_v19  ;;  %v6601_v42 = vadd.f32 %v8495_v3, %v6592_v40  ;;  %v6606_v45 = vrot.slane %v372_v10, %v6534_v20 }
  0x29   : >> { %1289 = vbcast.lane.b32.xlu1 %v6503_v11, 328  ;;  %1277 = vbcast.lane.b32.xlu0 %v6506_v12, 328  ;;  %v394_v34 = vsub.f32 0.0, %v390_v31  ;;  %v6613_v50 = vrot.slane %v6541_v22, %v6493_v8  ;;  %v6619_v55 = vrot.slane %v6541_v22, %v6496_v9  ;;  %v6625_v62 = vrot.slane %v6541_v22, %v6511_v13 }
  0x2a   : >> { %v395_v35 = vsub.f32 0.0, %v391_v33  ;;  %v392_v47 = vand.u32 2147483647, %v6601_v42  ;;  %v386_v63 = vmax.f32 %v6556_v26, 0.0  ;;  %v6629_v33 = vsub.s32 %v453_v58, %v6489_v7 }
  0x2b   : >> { %v398_v36 = vmul.f32 1.442695, %v394_v34  ;;  %v6635_v34 = vrot.slane %v6541_v22, %v6514_v14  ;;  %v6645_v7 = vrot.slane %v6541_v22, %v6517_v15 }
  0x2c   : >> { %v400_v38 = vmul.f32 1.442695, %v395_v35  ;;  %v396_v51 = vsub.f32 0.0, %v392_v47 }
  0x2d   : >> { %1301 = vbcast.lane.b32.xlu1 %v6528_v18, 328  ;;  %1297 = vbcast.lane.b32.xlu0 %v6528_v18, 320  ;;  %5944 = vpow2.f32 %v398_v36  ;;  %8504 = vst [vmem:[#allocation15_spill] sm:$0xff] %v6645_v7 }
  0x2e   : >> { %5946 = vpow2.f32 %v400_v38  ;;  %v402_v57 = vmul.f32 1.442695, %v396_v51 }
  0x31   : >> { %1313 = vbcast.lane.b32.xlu1 %v6578_v32, 328  ;;  %1309 = vbcast.lane.b32.xlu0 %v6578_v32, 320 }
  0x35   : >> { %1325 = vbcast.lane.b32.xlu1 %v6584_v37, 328  ;;  %1321 = vbcast.lane.b32.xlu0 %v6584_v37, 320 }
  0x37   : >> { %v5945_v43 = vpop.eup %5944 }
  0x38   : >> { %v5947_v44 = vpop.eup %5946  ;;  %v406_v46 = vadd.f32 1.0, %v5945_v43  ;;  %v409_v48 = vmul.f32 -0.5, %v5945_v43  ;;  %v412_v56 = vand.u32 2147483647, %v5945_v43 }
  0x39   : >> { %1337 = vbcast.lane.b32.xlu1 %v6589_v39, 328  ;;  %1333 = vbcast.lane.b32.xlu0 %v6589_v39, 320  ;;  %v415_v49 = vadd.f32 1.0, %v5947_v44  ;;  %v418_v60 = vmul.f32 -0.5, %v5947_v44  ;;  %v421_v26 = vand.u32 2147483647, %v5947_v44 }
  0x3a   : >> { %5948 = vlog2.f32 %v406_v46  ;;  %v410_v54 = vadd.f32 1.0, %v409_v48  ;;  %vm413_vm0 = vcmp.lt.f32.partialorder %v412_v56, 0.0004427343 }
  0x3b   : >> { %5950 = vlog2.f32 %v415_v49  ;;  %v419_v31 = vadd.f32 1.0, %v418_v60  ;;  %vm6651_vm1 = vcmp.lt.f32.partialorder %v421_v26, 0.0004427343  ;;  %v6665_v60 = vrot.slane %v6541_v22, %v6520_v16 }
  0x3c   : >> { %v411_v59 = vmul.f32 %v5945_v43, %v410_v54  ;;  %5952 = vpow2.f32 %v402_v57 }
  0x3d   : >> { %1349 = vbcast.lane.b32.xlu1 %v6597_v41, 328  ;;  %1345 = vbcast.lane.b32.xlu0 %v6597_v41, 320  ;;  %v420_v46 = vmul.f32 %v5947_v44, %v419_v31  ;;  %8507 = vst [vmem:[#allocation16_spill] sm:$0xff] %v6665_v60 }
  0x41   : >> { %1361 = vbcast.lane.b32.xlu1 %v6606_v45, 328  ;;  %1357 = vbcast.lane.b32.xlu0 %v6606_v45, 320 }
  0x44   : >> { %v5949_v61 = vpop.eup %5948 }
  0x45   : >> { %1373 = vbcast.lane.b32.xlu1 %v6613_v50, 328  ;;  %1369 = vbcast.lane.b32.xlu0 %v6613_v50, 320  ;;  %v408_v6 = vmul.f32 0.6931472, %v5949_v61  ;;  %v5951_v36 = vpop.eup %5950 }
  0x46   : >> { %v417_v51 = vmul.f32 0.6931472, %v5951_v36  ;;  %v6655_v53 = vpop.eup %5952  ;;  %v6675_v36 = vrot.slane %v6541_v22, %v6531_v19 }
  0x47   : >> { %v414_v10 = vsel %vm413_vm0, %v411_v59, %v408_v6  ;;  %v387_v59 = vmax.f32 %v6572_v30, 0.0  ;;  %v424_v30 = vadd.f32 1.0, %v6655_v53 }
  0x48   : >> { %v6637_v35 = vadd.f32 %v414_v10, %v386_v63  ;;  %v423_v63 = vsel %vm6651_vm1, %v420_v46, %v417_v51  ;;  %8508 = vst [vmem:[#allocation17_spill] sm:$0xff] %v6675_v36 }
  0x49   : >> { %1385 = vbcast.lane.b32.xlu1 %v6619_v55, 328  ;;  %1381 = vbcast.lane.b32.xlu0 %v6619_v55, 320  ;;  %5954 = vlog2.f32 %v424_v30 }
  0x4a   : >> { %v450_v38 = vcombine.high %v6637_v35, %v6637_v35  ;;  %v457_v43 = vrot.slane %v6637_v35, %v6629_v33 }
  0x4c   : >> { %v464_v47 = vrot.slane %v450_v38, %v6629_v33  ;;  %v465_v48 = vcombine.high %v457_v43, %v457_v43  ;;  %v473_v49 = vrot.slane %v457_v43, %v6629_v33 }
  0x4d   : >> { %1397 = vbcast.lane.b32.xlu1 %v6625_v62, 328  ;;  %1393 = vbcast.lane.b32.xlu0 %v6625_v62, 320 }
  0x4e   : >> { %v466_v54 = vcombine.high %v464_v47, %v464_v47  ;;  %v487_v56 = vrot.slane %v465_v48, %v6629_v33  ;;  %v495_v44 = vcombine.high %v473_v49, %v473_v49  ;;  %v480_v57 = vrot.slane %v464_v47, %v6629_v33 }
  0x4f   : >> { %v649_v58 = vrot.slane %v473_v49, %v6493_v8  ;;  %v6681_v48 = vadd.f32 %v423_v63, %v387_v59 }
  0x50   : >> { %v497_v61 = vcombine.high %v487_v56, %v487_v56  ;;  %v653_v6 = vrot.slane %v487_v56, %v6493_v8  ;;  %v657_v10 = vrot.slane %v495_v44, %v6493_v8  ;;  %v494_v26 = vrot.slane %v466_v54, %v6629_v33 }
  0x51   : >> { %1409 = vbcast.lane.b32.xlu1 %v6635_v34, 328  ;;  %1405 = vbcast.lane.b32.xlu0 %v6635_v34, 320  ;;  %v806_v31 = vmul.f32 %v649_v58, %v6455_v0  ;;  %v496_v43 = vcombine.high %v480_v57, %v480_v57  ;;  %v807_v47 = vmul.f32 %v649_v58, %v6458_v1 }
  0x52   : >> { %v661_v38 = vrot.slane %v497_v61, %v6493_v8  ;;  %v808_v46 = vmul.f32 %v653_v6, %v6455_v0  ;;  %v665_v49 = vrot.slane %v480_v57, %v6493_v8  ;;  %v809_v51 = vmul.f32 %v653_v6, %v6458_v1 }
  0x53   : >> { %v810_v52 = vmul.f32 %v657_v10, %v6455_v0  ;;  %v870_v54 = vmul.f32 1.442695, %v806_v31  ;;  %v6690_v56 = vrot.slane %v6541_v22, %v6534_v20  ;;  %v811_v44 = vmul.f32 %v657_v10, %v6458_v1 }
  0x54   : >> { %v498_v58 = vcombine.high %v494_v26, %v494_v26  ;;  %v669_v59 = vrot.slane %v494_v26, %v6493_v8  ;;  %v812_v61 = vmul.f32 %v661_v38, %v6455_v0  ;;  %v499_v57 = vcombine.high %v6681_v48, %v6681_v48 }
  0x55   : >> { %1421 = vbcast.lane.b32.xlu1 %v6645_v7, 328  ;;  %1417 = vbcast.lane.b32.xlu0 %v6645_v7, 320  ;;  %8509 = vst [vmem:[#allocation18_spill] sm:$0xff] %v6690_v56  ;;  %v813_v63 = vmul.f32 %v661_v38, %v6458_v1  ;;  %5956 = vpow2.f32 %v870_v54  ;;  %v872_v6 = vmul.f32 1.442695, %v807_v47  ;;  %v673_v22 = vrot.slane %v496_v43, %v6493_v8 }
  0x56   : >> { %v874_v31 = vmul.f32 1.442695, %v808_v46  ;;  %v814_v10 = vmul.f32 %v665_v49, %v6455_v0  ;;  %v876_v30 = vmul.f32 1.442695, %v809_v51  ;;  %v878_v26 = vmul.f32 1.442695, %v810_v52 }
  0x57   : >> { %v815_v2 = vmul.f32 %v665_v49, %v6458_v1  ;;  %5958 = vpow2.f32 %v872_v6  ;;  %v506_v38 = vrot.slane %v6681_v48, %v6629_v33  ;;  %v677_v47 = vrot.slane %v498_v58, %v6493_v8 }
  0x58   : >> { %v816_v46 = vmul.f32 %v669_v59, %v6455_v0  ;;  %5960 = vpow2.f32 %v874_v31  ;;  %v882_v54 = vmul.f32 1.442695, %v812_v61  ;;  %v6709_v43 = vrot.slane %v6592_v40, %v6493_v8 }
  0x59   : >> { %1433 = vbcast.lane.b32.xlu1 %v6665_v60, 328  ;;  %1429 = vbcast.lane.b32.xlu0 %v6665_v60, 320  ;;  %v880_v60 = vmul.f32 1.442695, %v811_v44  ;;  %v817_v51 = vmul.f32 %v669_v59, %v6458_v1  ;;  %5962 = vpow2.f32 %v876_v30  ;;  %v884_v52 = vmul.f32 1.442695, %v813_v63  ;;  %v5955_v30 = vpop.eup %5954 }
  0x5a   : >> { %8510 = vst [vmem:[#allocation19_spill] sm:$0xff] %v6709_v43  ;;  %v818_v49 = vmul.f32 %v673_v22, %v6455_v0  ;;  %5964 = vpow2.f32 %v878_v26  ;;  %v886_v44 = vmul.f32 1.442695, %v814_v10  ;;  %v513_v58 = vrot.slane %v499_v57, %v6629_v33 }
  0x5b   : >> { %v819_v61 = vmul.f32 %v673_v22, %v6458_v1  ;;  %5966 = vpow2.f32 %v880_v60  ;;  %v888_v6 = vmul.f32 1.442695, %v815_v2  ;;  %v514_v31 = vcombine.high %v506_v38, %v506_v38 }
  0x5c   : >> { %5968 = vpow2.f32 %v882_v54  ;;  %v890_v59 = vmul.f32 1.442695, %v816_v46  ;;  %v522_v63 = vrot.slane %v506_v38, %v6629_v33  ;;  %v892_v26 = vmul.f32 1.442695, %v817_v51 }
  0x5d   : >> { %1445 = vbcast.lane.b32.xlu1 %v6675_v36, 328  ;;  %1441 = vbcast.lane.b32.xlu0 %v6675_v36, 320  ;;  %v820_v36 = vmul.f32 %v677_v47, %v6455_v0  ;;  %5970 = vpow2.f32 %v884_v52  ;;  %v6724_v2 = vrot.slane %v6592_v40, %v6496_v9  ;;  %v894_v60 = vmul.f32 1.442695, %v818_v49 }
  0x5e   : >> { %5972 = vpow2.f32 %v886_v44  ;;  %v427_v57 = vmul.f32 -0.5, %v6655_v53  ;;  %v896_v10 = vmul.f32 1.442695, %v819_v61  ;;  %v536_v38 = vrot.slane %v514_v31, %v6629_v33 }
  0x5f   : >> { %v5957_v22 = vpop.eup %5956  ;;  %5974 = vpow2.f32 %v888_v6  ;;  %v898_v46 = vmul.f32 1.442695, %v820_v36  ;;  %v515_v54 = vcombine.high %v513_v58, %v513_v58  ;;  %v6731_v52 = vrot.slane %v6592_v40, %v6511_v13 }
  0x60   : >> { %5976 = vpow2.f32 %v890_v59  ;;  %999 = vst.msk [vmem:[#allocation2] sm:$0xff] %vm998_vm2, %v5957_v22  ;;  %v546_v44 = vcombine.high %v536_v38, %v536_v38  ;;  %v681_v36 = vrot.slane %v522_v63, %v6493_v8  ;;  %v685_v61 = vrot.slane %v536_v38, %v6493_v8 }
  0x61   : >> { %1457 = vbcast.lane.b32.xlu1 %v6690_v56, 328  ;;  %1453 = vbcast.lane.b32.xlu0 %v6690_v56, 320  ;;  %v821_v56 = vmul.f32 %v677_v47, %v6458_v1  ;;  %v544_v47 = vcombine.high %v522_v63, %v522_v63  ;;  %v5959_v51 = vpop.eup %5958  ;;  %5978 = vpow2.f32 %v892_v26  ;;  %v428_v6 = vadd.f32 1.0, %v427_v57 }
  0x62   : >> { %v5961_v9 = vpop.eup %5960  ;;  %5980 = vpow2.f32 %v894_v60  ;;  %1000 = vst.msk [vmem:[#allocation2 + $0x8] sm:$0xff] %vm998_vm2, %v5959_v51  ;;  %v430_v26 = vand.u32 2147483647, %v6655_v53  ;;  %v6744_v60 = vrot.slane %v6592_v40, %v6514_v14  ;;  %v543_v63 = vrot.slane %v515_v54, %v6629_v33 }
  0x63   : >> { %v900_v49 = vmul.f32 1.442695, %v821_v56  ;;  %v5963_v31 = vpop.eup %5962  ;;  %5982 = vpow2.f32 %v896_v10  ;;  %1001 = vst.msk [vmem:[#allocation2 + $0x10] sm:$0xff] %vm998_vm2, %v5961_v9  ;;  %v529_v56 = vrot.slane %v513_v58, %v6629_v33  ;;  %v689_v59 = vrot.slane %v544_v47, %v6493_v8 }
  0x64   : >> { %v5965_v22 = vpop.eup %5964  ;;  %5984 = vpow2.f32 %v898_v46  ;;  %1002 = vst.msk [vmem:[#allocation2 + $0x18] sm:$0xff] %vm998_vm2, %v5963_v31  ;;  %v693_v9 = vrot.slane %v546_v44, %v6493_v8  ;;  %v822_v58 = vmul.f32 %v681_v36, %v6455_v0  ;;  %v823_v10 = vmul.f32 %v681_v36, %v6458_v1 }
  0x65   : >> { %1469 = vbcast.lane.b32.xlu1 %v6709_v43, 328  ;;  %1465 = vbcast.lane.b32.xlu0 %v6709_v43, 320  ;;  %v5967_v57 = vpop.eup %5966  ;;  %5986 = vpow2.f32 %v900_v49  ;;  %1003 = vst.msk [vmem:[#allocation2 + $0x20] sm:$0xff] %vm998_vm2, %v5965_v22  ;;  %v824_v47 = vmul.f32 %v685_v61, %v6455_v0  ;;  %v825_v46 = vmul.f32 %v685_v61, %v6458_v1  ;;  %v426_v54 = vmul.f32 0.6931472, %v5955_v30 }
  0x66   : >> { %v5969_v38 = vpop.eup %5968  ;;  %1004 = vst.msk [vmem:[#allocation2 + $0x28] sm:$0xff] %vm998_vm2, %v5967_v57  ;;  %v429_v51 = vmul.f32 %v6655_v53, %v428_v6  ;;  %v545_v44 = vcombine.high %v529_v56, %v529_v56  ;;  %v697_v36 = vrot.slane %v529_v56, %v6493_v8  ;;  %v826_v31 = vmul.f32 %v689_v59, %v6455_v0 }
  0x67   : >> { %v5971_v49 = vpop.eup %5970  ;;  %1005 = vst.msk [vmem:[#allocation2 + $0x30] sm:$0xff] %vm998_vm2, %v5969_v38  ;;  %vm6761_vm3 = vcmp.lt.f32.partialorder %v430_v26, 0.0004427343  ;;  %v6767_v14 = vrot.slane %v6592_v40, %v6517_v15  ;;  %v547_v53 = vcombine.high %v543_v63, %v543_v63  ;;  %v827_v30 = vmul.f32 %v689_v59, %v6458_v1 }
  0x68   : >> { %v5973_v57 = vpop.eup %5972  ;;  %1006 = vst.msk [vmem:[#allocation2 + $0x38] sm:$0xff] %vm998_vm2, %v5971_v49  ;;  %v388_v61 = vmax.f32 %v6601_v42, 0.0  ;;  %v701_v56 = vrot.slane %v543_v63, %v6493_v8  ;;  %v828_v26 = vmul.f32 %v693_v9, %v6455_v0  ;;  %v902_v38 = vmul.f32 1.442695, %v822_v58 }
  0x69   : >> { %1481 = vbcast.lane.b32.xlu1 %v6724_v2, 328  ;;  %1477 = vbcast.lane.b32.xlu0 %v6724_v2, 320  ;;  %v5975_v6 = vpop.eup %5974  ;;  %1007 = vst.msk [vmem:[#allocation2 + $0x40] sm:$0xff] %vm998_vm2, %v5973_v57  ;;  %v904_v13 = vmul.f32 1.442695, %v823_v10  ;;  %v829_v59 = vmul.f32 %v693_v9, %v6458_v1  ;;  %v432_v57 = vsel %vm6761_vm3, %v429_v51, %v426_v54 }
  0x6a   : >> { %v5977_v7 = vpop.eup %5976  ;;  %1008 = vst.msk [vmem:[#allocation2 + $0x48] sm:$0xff] %vm998_vm2, %v5975_v6  ;;  %v906_v49 = vmul.f32 1.442695, %v824_v47  ;;  %v908_v42 = vmul.f32 1.442695, %v825_v46  ;;  %v705_v63 = vrot.slane %v545_v44, %v6493_v8  ;;  %v830_v58 = vmul.f32 %v697_v36, %v6455_v0 }
  0x6b   : >> { %v5979_v15 = vpop.eup %5978  ;;  %1009 = vst.msk [vmem:[#allocation2 + $0x50] sm:$0xff] %vm998_vm2, %v5977_v7  ;;  %5988 = vpow2.f32 %v902_v38  ;;  %v910_v10 = vmul.f32 1.442695, %v826_v31  ;;  %v6786_v6 = vrot.slane %v6592_v40, %v6520_v16  ;;  %v831_v9 = vmul.f32 %v697_v36, %v6458_v1 }
  0x6c   : >> { %v5981_v43 = vpop.eup %5980  ;;  %1010 = vst.msk [vmem:[#allocation2 + $0x58] sm:$0xff] %vm998_vm2, %v5979_v15  ;;  %5990 = vpow2.f32 %v904_v13  ;;  %v912_v47 = vmul.f32 1.442695, %v827_v30  ;;  %v709_v7 = vrot.slane %v547_v53, %v6493_v8  ;;  %v832_v54 = vmul.f32 %v701_v56, %v6455_v0 }
  0x6d   : >> { %1493 = vbcast.lane.b32.xlu1 %v6731_v52, 328  ;;  %1489 = vbcast.lane.b32.xlu0 %v6731_v52, 320  ;;  %v5983_v46 = vpop.eup %5982  ;;  %1011 = vst.msk [vmem:[#allocation2 + $0x60] sm:$0xff] %vm998_vm2, %v5981_v43  ;;  %5992 = vpow2.f32 %v906_v49  ;;  %v914_v51 = vmul.f32 1.442695, %v828_v26  ;;  %v833_v15 = vmul.f32 %v701_v56, %v6458_v1  ;;  %v6797_v36 = vadd.f32 %v432_v57, %v388_v61 }
  0x6e   : >> { %v5985_v44 = vpop.eup %5984  ;;  %1012 = vst.msk [vmem:[#allocation2 + $0x68] sm:$0xff] %vm998_vm2, %v5983_v46  ;;  %5994 = vpow2.f32 %v908_v42  ;;  %v916_v13 = vmul.f32 1.442695, %v829_v59  ;;  %v834_v31 = vmul.f32 %v705_v63, %v6455_v0  ;;  %v918_v22 = vmul.f32 1.442695, %v830_v58 }
  0x6f   : >> { %v5987_v43 = vpop.eup %5986  ;;  %1013 = vst.msk [vmem:[#allocation2 + $0x70] sm:$0xff] %vm998_vm2, %v5985_v44  ;;  %5996 = vpow2.f32 %v910_v10  ;;  %v835_v53 = vmul.f32 %v705_v63, %v6458_v1  ;;  %v920_v30 = vmul.f32 1.442695, %v831_v9  ;;  %v548_v56 = vcombine.high %v6797_v36, %v6797_v36 }
  0x70   : >> { %1014 = vst.msk [vmem:[#allocation2 + $0x78] sm:$0xff] %vm998_vm2, %v5987_v43  ;;  %5998 = vpow2.f32 %v912_v47  ;;  %v6807_v61 = vrot.slane %v6592_v40, %v6531_v19  ;;  %v836_v26 = vmul.f32 %v709_v7, %v6455_v0  ;;  %v922_v38 = vmul.f32 1.442695, %v832_v54 }
  0x71   : >> { %1505 = vbcast.lane.b32.xlu1 %v6744_v60, 328  ;;  %1501 = vbcast.lane.b32.xlu0 %v6744_v60, 320  ;;  %6000 = vpow2.f32 %v914_v51  ;;  %v837_v59 = vmul.f32 %v709_v7, %v6458_v1  ;;  %v924_v49 = vmul.f32 1.442695, %v833_v15  ;;  %v555_v42 = vrot.slane %v6797_v36, %v6629_v33 }
  0x72   : >> { %6002 = vpow2.f32 %v916_v13  ;;  %v926_v57 = vmul.f32 1.442695, %v834_v31  ;;  %v562_v63 = vrot.slane %v548_v56, %v6629_v33  ;;  %v928_v58 = vmul.f32 1.442695, %v835_v53  ;;  %v6831_v31 = vld [vmem:[%s6818_s14] sm:$0xff] }
  0x73   : >> { %6004 = vpow2.f32 %v918_v22  ;;  %v563_v10 = vcombine.high %v555_v42, %v555_v42  ;;  %v930_v47 = vmul.f32 1.442695, %v836_v26  ;;  %v571_v46 = vrot.slane %v555_v42, %v6629_v33  ;;  %8514 = vst [vmem:[#allocation21_spill] sm:$0xff] %v6831_v31 }
  0x74   : >> { %6006 = vpow2.f32 %v920_v30  ;;  %v6825_v54 = vrot.slane %v6592_v40, %v6534_v20  ;;  %v932_v51 = vmul.f32 1.442695, %v837_v59  ;;  %v564_v15 = vcombine.high %v562_v63, %v562_v63 }
  0x75   : >> { %1517 = vbcast.lane.b32.xlu1 %v6767_v14, 328  ;;  %1513 = vbcast.lane.b32.xlu0 %v6767_v14, 320  ;;  %v5989_v9 = vpop.eup %5988  ;;  %6008 = vpow2.f32 %v922_v38  ;;  %v585_v13 = vrot.slane %v563_v10, %v6629_v33  ;;  %v593_v22 = vcombine.high %v571_v46, %v571_v46  ;;  %v713_v40 = vrot.slane %v571_v46, %v6493_v8 }
  0x76   : >> { %v5991_v7 = vpop.eup %5990  ;;  %8513 = vst [vmem:[#allocation20_spill] sm:$0xff] %v6825_v54  ;;  %6010 = vpow2.f32 %v924_v49  ;;  %1015 = vst.msk [vmem:[#allocation2 + $0x80] sm:$0xff] %vm998_vm2, %v5989_v9  ;;  %v578_v30 = vrot.slane %v562_v63, %v6629_v33  ;;  %v6841_v38 = vrot.slane %v6523_v17, %v6493_v8  ;;  %v592_v63 = vrot.slane %v564_v15, %v6629_v33 }
  0x77   : >> { %v5993_v44 = vpop.eup %5992  ;;  %6012 = vpow2.f32 %v926_v57  ;;  %1016 = vst.msk [vmem:[#allocation2 + $0x88] sm:$0xff] %vm998_vm2, %v5991_v7  ;;  %v595_v56 = vcombine.high %v585_v13, %v585_v13  ;;  %v717_v59 = vrot.slane %v585_v13, %v6493_v8  ;;  %v721_v49 = vrot.slane %v593_v22, %v6493_v8 }
  0x78   : >> { %v5995_v43 = vpop.eup %5994  ;;  %6014 = vpow2.f32 %v928_v58  ;;  %1017 = vst.msk [vmem:[#allocation2 + $0x90] sm:$0xff] %vm998_vm2, %v5993_v44  ;;  %v6848_v57 = vmul.f32 %v6637_v35, %v6831_v31  ;;  %v838_v9 = vmul.f32 %v713_v40, %v6455_v0  ;;  %v594_v35 = vcombine.high %v578_v30, %v578_v30 }
  0x79   : >> { %1529 = vbcast.lane.b32.xlu1 %v6786_v6, 328  ;;  %1525 = vbcast.lane.b32.xlu0 %v6786_v6, 320  ;;  %v5997_v53 = vpop.eup %5996  ;;  %6016 = vpow2.f32 %v930_v47  ;;  %1018 = vst.msk [vmem:[#allocation2 + $0x98] sm:$0xff] %vm998_vm2, %v5995_v43  ;;  %v725_v58 = vrot.slane %v595_v56, %v6493_v8  ;;  %v839_v47 = vmul.f32 %v713_v40, %v6458_v1 }
  0x7a   : >> { %v5999_v26 = vpop.eup %5998  ;;  %6018 = vpow2.f32 %v932_v51  ;;  %1019 = vst.msk [vmem:[#allocation2 + $0xa0] sm:$0xff] %vm998_vm2, %v5997_v53  ;;  %v840_v46 = vmul.f32 %v717_v59, %v6455_v0  ;;  %v729_v51 = vrot.slane %v578_v30, %v6493_v8  ;;  %v841_v44 = vmul.f32 %v717_v59, %v6458_v1 }
  0x7b   : >> { %v6001_v42 = vpop.eup %6000  ;;  %1020 = vst.msk [vmem:[#allocation2 + $0xa8] sm:$0xff] %vm998_vm2, %v5999_v26  ;;  %v842_v15 = vmul.f32 %v721_v49, %v6455_v0  ;;  %v843_v43 = vmul.f32 %v721_v49, %v6458_v1  ;;  %v934_v22 = vmul.f32 1.442695, %v838_v9  ;;  %v6867_v40 = vadd.f32 %v8495_v3, %v6523_v17 }
  0x7c   : >> { %v6003_v10 = vpop.eup %6002  ;;  %1021 = vst.msk [vmem:[#allocation2 + $0xb0] sm:$0xff] %vm998_vm2, %v6001_v42  ;;  %v1078_v30 = vrot.slane %v6848_v57, %v6629_v33  ;;  %v596_v56 = vcombine.high %v592_v63, %v592_v63  ;;  %v733_v26 = vrot.slane %v592_v63, %v6493_v8  ;;  %v844_v59 = vmul.f32 %v725_v58, %v6455_v0 }
  0x7d   : >> { %1541 = vbcast.lane.b32.xlu1 %v6807_v61, 328  ;;  %1537 = vbcast.lane.b32.xlu0 %v6807_v61, 320  ;;  %v6005_v7 = vpop.eup %6004  ;;  %1022 = vst.msk [vmem:[#allocation2 + $0xb8] sm:$0xff] %vm998_vm2, %v6003_v10  ;;  %v845_v49 = vmul.f32 %v725_v58, %v6458_v1  ;;  %6020 = vpow2.f32 %v934_v22  ;;  %v936_v10 = vmul.f32 1.442695, %v839_v47  ;;  %v847_v58 = vmul.f32 %v729_v51, %v6458_v1 }
  0x7e   : >> { %v6007_v13 = vpop.eup %6006  ;;  %1023 = vst.msk [vmem:[#allocation2 + $0xc0] sm:$0xff] %vm998_vm2, %v6005_v7  ;;  %v938_v17 = vmul.f32 1.442695, %v840_v46  ;;  %v737_v7 = vrot.slane %v594_v35, %v6493_v8  ;;  %v940_v3 = vmul.f32 1.442695, %v841_v44  ;;  %v741_v35 = vrot.slane %v596_v56, %v6493_v8 }
  0x7f   : >> { %v6009_v53 = vpop.eup %6008  ;;  %1024 = vst.msk [vmem:[#allocation2 + $0xc8] sm:$0xff] %vm998_vm2, %v6007_v13  ;;  %v846_v13 = vmul.f32 %v729_v51, %v6455_v0  ;;  %v942_v20 = vmul.f32 1.442695, %v842_v15  ;;  %6022 = vpow2.f32 %v936_v10  ;;  %v944_v47 = vmul.f32 1.442695, %v843_v43 }
  0x80   : >> { %v6011_v42 = vpop.eup %6010  ;;  %1025 = vst.msk [vmem:[#allocation2 + $0xd0] sm:$0xff] %vm998_vm2, %v6009_v53  ;;  %v848_v22 = vmul.f32 %v733_v26, %v6455_v0  ;;  %6024 = vpow2.f32 %v938_v17  ;;  %v946_v44 = vmul.f32 1.442695, %v844_v59  ;;  %v849_v53 = vmul.f32 %v733_v26, %v6458_v1 }
  0x81   : >> { %1553 = vbcast.lane.b32.xlu1 %v6825_v54, 328  ;;  %1549 = vbcast.lane.b32.xlu0 %v6825_v54, 320  ;;  %v6013_v9 = vpop.eup %6012  ;;  %1026 = vst.msk [vmem:[#allocation2 + $0xd8] sm:$0xff] %vm998_vm2, %v6011_v42  ;;  %6026 = vpow2.f32 %v940_v3  ;;  %v948_v42 = vmul.f32 1.442695, %v845_v49  ;;  %v1086_v10 = vcombine.high %v1078_v30, %v1078_v30  ;;  %v850_v43 = vmul.f32 %v737_v7, %v6455_v0 }
  0x82   : >> { %v6015_v63 = vpop.eup %6014  ;;  %1027 = vst.msk [vmem:[#allocation2 + $0xe0] sm:$0xff] %vm998_vm2, %v6013_v9  ;;  %v393_v51 = vand.u32 2147483647, %v6867_v40  ;;  %6028 = vpow2.f32 %v942_v20  ;;  %v950_v56 = vmul.f32 1.442695, %v846_v13  ;;  %v851_v59 = vmul.f32 %v737_v7, %v6458_v1 }
  0x83   : >> { %v6017_v46 = vpop.eup %6016  ;;  %1028 = vst.msk [vmem:[#allocation2 + $0xe8] sm:$0xff] %vm998_vm2, %v6015_v63  ;;  %6030 = vpow2.f32 %v944_v47  ;;  %v952_v17 = vmul.f32 1.442695, %v847_v58  ;;  %v852_v3 = vmul.f32 %v741_v35, %v6455_v0  ;;  %v954_v26 = vmul.f32 1.442695, %v848_v22 }
  0x84   : >> { %v6019_v15 = vpop.eup %6018  ;;  %1029 = vst.msk [vmem:[#allocation2 + $0xf0] sm:$0xff] %vm998_vm2, %v6017_v46  ;;  %6032 = vpow2.f32 %v946_v44  ;;  %v853_v49 = vmul.f32 %v741_v35, %v6458_v1  ;;  %v956_v9 = vmul.f32 1.442695, %v849_v53  ;;  %v397_v63 = vsub.f32 0.0, %v393_v51 }
  0x85   : >> { %1565 = vbcast.lane.b32.xlu1 %v6841_v38, 328  ;;  %1561 = vbcast.lane.b32.xlu0 %v6841_v38, 320  ;;  %1030 = vst.msk [vmem:[#allocation2 + $0xf8] sm:$0xff] %vm998_vm2, %v6019_v15  ;;  %6034 = vpow2.f32 %v948_v42  ;;  %v6897_v20 = vrot.slane %v1086_v10, %v6629_v33  ;;  %v1094_v13 = vrot.slane %v1078_v30, %v6629_v33  ;;  %v958_v46 = vmul.f32 1.442695, %v850_v43 }
  0x86   : >> { %6036 = vpow2.f32 %v950_v56  ;;  %v960_v7 = vmul.f32 1.442695, %v851_v59  ;;  %v962_v58 = vmul.f32 1.442695, %v852_v3  ;;  %v964_v35 = vmul.f32 1.442695, %v853_v49 }
  0x87   : >> { %v6021_v15 = vpop.eup %6020  ;;  %6038 = vpow2.f32 %v952_v17  ;;  %v1658_v30 = vrot.slane %v6897_v20, %v6493_v8  ;;  %v1654_v44 = vrot.slane %v1094_v13, %v6493_v8  ;;  %v404_v53 = vmul.f32 1.442695, %v397_v63 }
  0x88   : >> { %6040 = vpow2.f32 %v954_v26  ;;  %1031 = vst.msk [vmem:[#allocation2 + $0x100] sm:$0xff] %vm998_vm2, %v6021_v15  ;;  %v1071_v59 = vcombine.high %v6848_v57, %v6848_v57  ;;  %v1116_v49 = vcombine.high %v1094_v13, %v1094_v13 }
  0x89   : >> { %1577 = vbcast.lane.b32.xlu1 %v6538_v21, 328  ;;  %1573 = vbcast.lane.b32.xlu0 %v6538_v21, 320  ;;  %v6023_v47 = vpop.eup %6022  ;;  %6042 = vpow2.f32 %v956_v9 }
  0x8a   : >> { %v6025_v22 = vpop.eup %6024  ;;  %6044 = vpow2.f32 %v958_v46  ;;  %1032 = vst.msk [vmem:[#allocation2 + $0x108] sm:$0xff] %vm998_vm2, %v6023_v47  ;;  %v1085_v15 = vrot.slane %v1071_v59, %v6629_v33 }
  0x8b   : >> { %v6027_v42 = vpop.eup %6026  ;;  %6046 = vpow2.f32 %v960_v7  ;;  %1033 = vst.msk [vmem:[#allocation2 + $0x110] sm:$0xff] %vm998_vm2, %v6025_v22  ;;  %v1118_v22 = vcombine.high %v6897_v20, %v6897_v20 }
  0x8c   : >> { %v6029_v51 = vpop.eup %6028  ;;  %6048 = vpow2.f32 %v962_v58  ;;  %1034 = vst.msk [vmem:[#allocation2 + $0x118] sm:$0xff] %vm998_vm2, %v6027_v42  ;;  %v1101_v20 = vrot.slane %v1085_v15, %v6629_v33 }
  0x8d   : >> { %1589 = vbcast.lane.b32.xlu1 %v6545_v23, 328  ;;  %1585 = vbcast.lane.b32.xlu0 %v6545_v23, 320  ;;  %v6031_v10 = vpop.eup %6030  ;;  %6050 = vpow2.f32 %v964_v35  ;;  %1035 = vst.msk [vmem:[#allocation2 + $0x120] sm:$0xff] %vm998_vm2, %v6029_v51  ;;  %v1662_v35 = vrot.slane %v1116_v49, %v6493_v8  ;;  %v1666_v59 = vrot.slane %v1118_v22, %v6493_v8 }
  0x8e   : >> { %v6033_v17 = vpop.eup %6032  ;;  %1036 = vst.msk [vmem:[#allocation2 + $0x128] sm:$0xff] %vm998_vm2, %v6031_v10  ;;  %6052 = vpow2.f32 %v404_v53 }
  0x8f   : >> { %v6035_v9 = vpop.eup %6034  ;;  %1037 = vst.msk [vmem:[#allocation2 + $0x130] sm:$0xff] %vm998_vm2, %v6033_v17  ;;  %v1087_v17 = vcombine.high %v1085_v15, %v1085_v15 }
  0x90   : >> { %v6037_v63 = vpop.eup %6036  ;;  %1038 = vst.msk [vmem:[#allocation2 + $0x138] sm:$0xff] %vm998_vm2, %v6035_v9 }
  0x91   : >> { %1601 = vbcast.lane.b32.xlu1 %v6549_v24, 328  ;;  %1597 = vbcast.lane.b32.xlu0 %v6549_v24, 320  ;;  %v6039_v57 = vpop.eup %6038  ;;  %1039 = vst.msk [vmem:[#allocation2 + $0x140] sm:$0xff] %vm998_vm2, %v6037_v63  ;;  %v1115_v15 = vrot.slane %v1087_v17, %v6629_v33 }
  0x92   : >> { %v6041_v7 = vpop.eup %6040  ;;  %1040 = vst.msk [vmem:[#allocation2 + $0x148] sm:$0xff] %vm998_vm2, %v6039_v57 }
  0x93   : >> { %v6043_v53 = vpop.eup %6042  ;;  %1041 = vst.msk [vmem:[#allocation2 + $0x150] sm:$0xff] %vm998_vm2, %v6041_v7  ;;  %v6946_v7 = vld [vmem:[%s6818_s14 + $0x8] sm:$0xff] }
  0x94   : >> { %v6045_v42 = vpop.eup %6044  ;;  %1042 = vst.msk [vmem:[#allocation2 + $0x158] sm:$0xff] %vm998_vm2, %v6043_v53  ;;  %8515 = vst [vmem:[#allocation22_spill] sm:$0xff] %v6946_v7  ;;  %v1064_v22 = vmul.f32 %v6681_v48, %v6946_v7 }
  0x95   : >> { %1613 = vbcast.lane.b32.xlu1 %v6553_v25, 328  ;;  %1609 = vbcast.lane.b32.xlu0 %v6553_v25, 320  ;;  %1043 = vst.msk [vmem:[#allocation2 + $0x160] sm:$0xff] %vm998_vm2, %v6045_v42 }
  0x97   : >> { %v1286_v43 = vpop.permute.xlu1 %1285  ;;  %v1274_v56 = vpop.permute.xlu0 %1273 }
  0x98   : >> { %v1813_v3 = vmul.f32 %v1658_v30, %v1286_v43  ;;  %v1811_v26 = vmul.f32 %v1654_v44, %v1274_v56 }
  0x99   : >> { %1625 = vbcast.lane.b32.xlu1 %v6560_v27, 328  ;;  %1621 = vbcast.lane.b32.xlu0 %v6560_v27, 320 }
  0x9a   : >> { %1877 = vst.msk [vmem:[#allocation3 + $0x10] sm:$0xff] %vm998_vm2, %v1813_v3  ;;  %1875 = vst.msk [vmem:[#allocation3] sm:$0xff] %vm998_vm2, %v1811_v26 }
  0x9b   : >> { %v1290_v46 = vpop.permute.xlu1 %1289  ;;  %v1278_v13 = vpop.permute.xlu0 %1277 }
  0x9c   : >> { %v1814_v58 = vmul.f32 %v1658_v30, %v1290_v46  ;;  %v1812_v47 = vmul.f32 %v1654_v44, %v1278_v13  ;;  %v6047_v30 = vpop.eup %6046  ;;  %v1670_v13 = vrot.slane %v1101_v20, %v6493_v8 }
  0x9d   : >> { %1637 = vbcast.lane.b32.xlu1 %v6564_v28, 328  ;;  %1633 = vbcast.lane.b32.xlu0 %v6564_v28, 320  ;;  %v6049_v10 = vpop.eup %6048  ;;  %1044 = vst.msk [vmem:[#allocation2 + $0x168] sm:$0xff] %vm998_vm2, %v6047_v30  ;;  %v1674_v30 = vrot.slane %v1115_v15, %v6493_v8 }
  0x9e   : >> { %1878 = vst.msk [vmem:[#allocation3 + $0x18] sm:$0xff] %vm998_vm2, %v1814_v58  ;;  %1876 = vst.msk [vmem:[#allocation3 + $0x8] sm:$0xff] %vm998_vm2, %v1812_v47  ;;  %v6051_v3 = vpop.eup %6050 }
  0x9f   : >> { %v1302_v44 = vpop.permute.xlu1 %1301  ;;  %v1298_v51 = vpop.permute.xlu0 %1297  ;;  %1045 = vst.msk [vmem:[#allocation2 + $0x170] sm:$0xff] %vm998_vm2, %v6049_v10  ;;  %1046 = vst.msk [vmem:[#allocation2 + $0x178] sm:$0xff] %vm998_vm2, %v6051_v3 }
  0xa0   : >> { %v1816_v43 = vmul.f32 %v1662_v35, %v1302_v44  ;;  %v1815_v56 = vmul.f32 %v1662_v35, %v1298_v51  ;;  %v6053_v26 = vpop.eup %6052  ;;  %v1117_v44 = vcombine.high %v1101_v20, %v1101_v20  ;;  %v1119_v51 = vcombine.high %v1115_v15, %v1115_v15 }
  0xa1   : >> { %1649 = vbcast.lane.b32.xlu1 %v6568_v29, 328  ;;  %1645 = vbcast.lane.b32.xlu0 %v6568_v29, 320  ;;  %v433_v63 = vadd.f32 1.0, %v6053_v26  ;;  %v436_v58 = vmul.f32 -0.5, %v6053_v26  ;;  %v439_v17 = vand.u32 2147483647, %v6053_v26  ;;  %v1120_v15 = vcombine.high %v1064_v22, %v1064_v22 }
  0xa2   : >> { %1880 = vst.msk [vmem:[#allocation3 + $0x28] sm:$0xff] %vm998_vm2, %v1816_v43  ;;  %1879 = vst.msk [vmem:[#allocation3 + $0x20] sm:$0xff] %vm998_vm2, %v1815_v56  ;;  %v1678_v48 = vrot.slane %v1117_v44, %v6493_v8  ;;  %v1682_v20 = vrot.slane %v1119_v51, %v6493_v8 }
  0xa3   : >> { %v1314_v49 = vpop.permute.xlu1 %1313  ;;  %v1310_v9 = vpop.permute.xlu0 %1309  ;;  %6054 = vlog2.f32 %v433_v63  ;;  %v437_v10 = vadd.f32 1.0, %v436_v58  ;;  %v389_v58 = vmax.f32 %v6867_v40, 0.0  ;;  %vm440_vm4 = vcmp.lt.f32.partialorder %v439_v17, 0.0004427343 }
  0xa4   : >> { %v1818_v57 = vmul.f32 %v1666_v59, %v1314_v49  ;;  %v1817_v46 = vmul.f32 %v1666_v59, %v1310_v9  ;;  %v1127_v59 = vrot.slane %v1064_v22, %v6629_v33  ;;  %v1134_v51 = vrot.slane %v1120_v15, %v6629_v33 }
  0xa5   : >> { %v438_v9 = vmul.f32 %v6053_v26, %v437_v10 }
  0xa6   : >> { %1882 = vst.msk [vmem:[#allocation3 + $0x38] sm:$0xff] %vm998_vm2, %v1818_v57  ;;  %1881 = vst.msk [vmem:[#allocation3 + $0x30] sm:$0xff] %vm998_vm2, %v1817_v46 }
  0xa7   : >> { %v1326_v47 = vpop.permute.xlu1 %1325  ;;  %v1322_v35 = vpop.permute.xlu0 %1321 }
  0xa8   : >> { %v1820_v53 = vmul.f32 %v1670_v13, %v1326_v47  ;;  %v1819_v42 = vmul.f32 %v1670_v13, %v1322_v35  ;;  %v1143_v13 = vrot.slane %v1127_v59, %v6629_v33 }
  0xaa   : >> { %1884 = vst.msk [vmem:[#allocation3 + $0x48] sm:$0xff] %vm998_vm2, %v1820_v53  ;;  %1883 = vst.msk [vmem:[#allocation3 + $0x40] sm:$0xff] %vm998_vm2, %v1819_v42  ;;  %v1135_v53 = vcombine.high %v1127_v59, %v1127_v59  ;;  %v1686_v40 = vrot.slane %v1143_v13, %v6493_v8 }
  0xab   : >> { %v1338_v43 = vpop.permute.xlu1 %1337  ;;  %v1334_v56 = vpop.permute.xlu0 %1333 }
  0xac   : >> { %v1822_v3 = vmul.f32 %v1674_v30, %v1338_v43  ;;  %v1821_v49 = vmul.f32 %v1674_v30, %v1334_v56  ;;  %v1157_v56 = vrot.slane %v1135_v53, %v6629_v33 }
  0xad   : >> { %v6055_v63 = vpop.eup %6054 }
  0xae   : >> { %1886 = vst.msk [vmem:[#allocation3 + $0x58] sm:$0xff] %vm998_vm2, %v1822_v3  ;;  %1885 = vst.msk [vmem:[#allocation3 + $0x50] sm:$0xff] %vm998_vm2, %v1821_v49  ;;  %v435_v42 = vmul.f32 0.6931472, %v6055_v63  ;;  %v1690_v15 = vrot.slane %v1157_v56, %v6493_v8 }
  0xaf   : >> { %v1350_v57 = vpop.permute.xlu1 %1349  ;;  %v1346_v46 = vpop.permute.xlu0 %1345 }
  0xb0   : >> { %v1824_v47 = vmul.f32 %v1678_v48, %v1350_v57  ;;  %v1823_v35 = vmul.f32 %v1678_v48, %v1346_v46  ;;  %v441_v30 = vsel %vm440_vm4, %v438_v9, %v435_v42  ;;  %v1165_v48 = vcombine.high %v1143_v13, %v1143_v13 }
  0xb1   : >> { %v6965_v10 = vadd.f32 %v441_v30, %v389_v58  ;;  %v6979_v58 = vrot.slane %v1134_v51, %v6629_v33 }
  0xb2   : >> { %1888 = vst.msk [vmem:[#allocation3 + $0x68] sm:$0xff] %vm998_vm2, %v1824_v47  ;;  %1887 = vst.msk [vmem:[#allocation3 + $0x60] sm:$0xff] %vm998_vm2, %v1823_v35  ;;  %v1136_v47 = vcombine.high %v1134_v51, %v1134_v51 }
  0xb3   : >> { %v1362_v44 = vpop.permute.xlu1 %1361  ;;  %v1358_v26 = vpop.permute.xlu0 %1357  ;;  %v597_v59 = vcombine.high %v6965_v10, %v6965_v10  ;;  %v604_v17 = vrot.slane %v6965_v10, %v6629_v33 }
  0xb4   : >> { %v1826_v43 = vmul.f32 %v1682_v20, %v1362_v44  ;;  %v1825_v22 = vmul.f32 %v1682_v20, %v1358_v26 }
  0xb5   : >> { %v611_v9 = vrot.slane %v597_v59, %v6629_v33  ;;  %v612_v20 = vcombine.high %v604_v17, %v604_v17  ;;  %v620_v63 = vrot.slane %v604_v17, %v6629_v33  ;;  %v1167_v17 = vcombine.high %v1157_v56, %v1157_v56 }
  0xb6   : >> { %1890 = vst.msk [vmem:[#allocation3 + $0x78] sm:$0xff] %vm998_vm2, %v1826_v43  ;;  %1889 = vst.msk [vmem:[#allocation3 + $0x70] sm:$0xff] %vm998_vm2, %v1825_v22  ;;  %v1694_v43 = vrot.slane %v1165_v48, %v6493_v8  ;;  %v1166_v48 = vcombine.high %v6979_v58, %v6979_v58 }
  0xb7   : >> { %v1374_v3 = vpop.permute.xlu1 %1373  ;;  %v1370_v49 = vpop.permute.xlu0 %1369  ;;  %v613_v35 = vcombine.high %v611_v9, %v611_v9  ;;  %v634_v53 = vrot.slane %v612_v20, %v6629_v33  ;;  %v642_v42 = vcombine.high %v620_v63, %v620_v63  ;;  %v627_v13 = vrot.slane %v611_v9, %v6629_v33 }
  0xb8   : >> { %v1828_v57 = vmul.f32 %v1686_v40, %v1374_v3  ;;  %v1827_v46 = vmul.f32 %v1686_v40, %v1370_v49  ;;  %v745_v30 = vrot.slane %v620_v63, %v6493_v8  ;;  %v1702_v49 = vrot.slane %v6979_v58, %v6493_v8 }
  0xb9   : >> { %v644_v22 = vcombine.high %v634_v53, %v634_v53  ;;  %v749_v40 = vrot.slane %v634_v53, %v6493_v8  ;;  %v753_v3 = vrot.slane %v642_v42, %v6493_v8  ;;  %v6992_v20 = vrot.slane %v1136_v47, %v6629_v33 }
  0xba   : >> { %1892 = vst.msk [vmem:[#allocation3 + $0x88] sm:$0xff] %vm998_vm2, %v1828_v57  ;;  %1891 = vst.msk [vmem:[#allocation3 + $0x80] sm:$0xff] %vm998_vm2, %v1827_v46  ;;  %v641_v9 = vrot.slane %v613_v35, %v6629_v33  ;;  %v643_v63 = vcombine.high %v627_v13, %v627_v13  ;;  %v854_v57 = vmul.f32 %v745_v30, %v6455_v0 }
  0xbb   : >> { %v1386_v44 = vpop.permute.xlu1 %1385  ;;  %v1382_v26 = vpop.permute.xlu0 %1381  ;;  %v757_v56 = vrot.slane %v644_v22, %v6493_v8  ;;  %v761_v47 = vrot.slane %v627_v13, %v6493_v8  ;;  %v855_v53 = vmul.f32 %v745_v30, %v6458_v1  ;;  %v856_v35 = vmul.f32 %v749_v40, %v6455_v0  ;;  %v7014_v30 = vld [vmem:[%s6818_s14 + $0x10] sm:$0xff] }
  0xbc   : >> { %v1830_v51 = vmul.f32 %v1690_v15, %v1386_v44  ;;  %v1829_v59 = vmul.f32 %v1690_v15, %v1382_v26  ;;  %v857_v42 = vmul.f32 %v749_v40, %v6458_v1  ;;  %v1698_v58 = vrot.slane %v1167_v17, %v6493_v8 }
  0xbd   : >> { %v1706_v22 = vrot.slane %v6992_v20, %v6493_v8  ;;  %v765_v19 = vrot.slane %v641_v9, %v6493_v8  ;;  %v859_v13 = vmul.f32 %v753_v3, %v6458_v1  ;;  %v860_v40 = vmul.f32 %v757_v56, %v6455_v0 }
  0xbe   : >> { %1894 = vst.msk [vmem:[#allocation3 + $0x98] sm:$0xff] %vm998_vm2, %v1830_v51  ;;  %1893 = vst.msk [vmem:[#allocation3 + $0x90] sm:$0xff] %vm998_vm2, %v1829_v59  ;;  %v858_v51 = vmul.f32 %v753_v3, %v6455_v0  ;;  %v645_v59 = vcombine.high %v641_v9, %v641_v9  ;;  %v861_v17 = vmul.f32 %v757_v56, %v6458_v1  ;;  %v968_v9 = vmul.f32 1.442695, %v855_v53 }
  0xbf   : >> { %v1398_v46 = vpop.permute.xlu1 %1397  ;;  %v1394_v15 = vpop.permute.xlu0 %1393  ;;  %v862_v7 = vmul.f32 %v761_v47, %v6455_v0  ;;  %v970_v31 = vmul.f32 1.442695, %v856_v35  ;;  %v972_v3 = vmul.f32 1.442695, %v857_v42  ;;  %v7022_v54 = vmul.f32 %v6797_v36, %v7014_v30 }
  0xc0   : >> { %v1832_v44 = vmul.f32 %v1694_v43, %v1398_v46  ;;  %v1831_v26 = vmul.f32 %v1694_v43, %v1394_v15  ;;  %v769_v43 = vrot.slane %v643_v63, %v6493_v8  ;;  %v966_v46 = vmul.f32 1.442695, %v854_v57 }
  0xc1   : >> { %v863_v63 = vmul.f32 %v761_v47, %v6458_v1  ;;  %v976_v56 = vmul.f32 1.442695, %v859_v13  ;;  %v773_v57 = vrot.slane %v645_v59, %v6493_v8  ;;  %v864_v53 = vmul.f32 %v765_v19, %v6455_v0 }
  0xc2   : >> { %1896 = vst.msk [vmem:[#allocation3 + $0xa8] sm:$0xff] %vm998_vm2, %v1832_v44  ;;  %1895 = vst.msk [vmem:[#allocation3 + $0xa0] sm:$0xff] %vm998_vm2, %v1831_v26  ;;  %6056 = vpow2.f32 %v966_v46  ;;  %v974_v26 = vmul.f32 1.442695, %v858_v51  ;;  %v866_v36 = vmul.f32 %v769_v43, %v6455_v0  ;;  %v980_v47 = vmul.f32 1.442695, %v861_v17 }
  0xc3   : >> { %v1410_v15 = vpop.permute.xlu1 %1409  ;;  %v1406_v16 = vpop.permute.xlu0 %1405  ;;  %6058 = vpow2.f32 %v968_v9  ;;  %v1710_v46 = vrot.slane %v1166_v48, %v6493_v8  ;;  %v867_v59 = vmul.f32 %v769_v43, %v6458_v1  ;;  %v869_v48 = vmul.f32 %v773_v57, %v6458_v1 }
  0xc4   : >> { %v1834_v29 = vmul.f32 %v1698_v58, %v1410_v15  ;;  %v1833_v44 = vmul.f32 %v1698_v58, %v1406_v16  ;;  %6060 = vpow2.f32 %v970_v31  ;;  %v978_v16 = vmul.f32 1.442695, %v860_v40 }
  0xc5   : >> { %v865_v58 = vmul.f32 %v765_v19, %v6458_v1  ;;  %6062 = vpow2.f32 %v972_v3  ;;  %v984_v15 = vmul.f32 1.442695, %v863_v63  ;;  %v1168_v19 = vcombine.high %v6992_v20, %v6992_v20 }
  0xc6   : >> { %1898 = vst.msk [vmem:[#allocation3 + $0xb8] sm:$0xff] %vm998_vm2, %v1834_v29  ;;  %1897 = vst.msk [vmem:[#allocation3 + $0xb0] sm:$0xff] %vm998_vm2, %v1833_v44  ;;  %6064 = vpow2.f32 %v974_v26  ;;  %v982_v29 = vmul.f32 1.442695, %v862_v7  ;;  %v868_v31 = vmul.f32 %v773_v57, %v6455_v0  ;;  %v986_v40 = vmul.f32 1.442695, %v864_v53 }
  0xc7   : >> { %v1422_v35 = vpop.permute.xlu1 %1421  ;;  %v1418_v42 = vpop.permute.xlu0 %1417  ;;  %6066 = vpow2.f32 %v976_v56  ;;  %v1176_v7 = vrot.slane %v7022_v54, %v6629_v33  ;;  %v988_v43 = vmul.f32 1.442695, %v865_v58  ;;  %v990_v44 = vmul.f32 1.442695, %v866_v36 }
  0xc8   : >> { %v1836_v51 = vmul.f32 %v1702_v49, %v1422_v35  ;;  %v1835_v13 = vmul.f32 %v1702_v49, %v1418_v42  ;;  %6068 = vpow2.f32 %v978_v16  ;;  %v992_v26 = vmul.f32 1.442695, %v867_v59 }
  0xc9   : >> { %6070 = vpow2.f32 %v980_v47  ;;  %v994_v63 = vmul.f32 1.442695, %v868_v31  ;;  %v1714_v57 = vrot.slane %v1168_v19, %v6493_v8  ;;  %v1192_v35 = vrot.slane %v1176_v7, %v6629_v33 }
  0xca   : >> { %1900 = vst.msk [vmem:[#allocation3 + $0xc8] sm:$0xff] %vm998_vm2, %v1836_v51  ;;  %1899 = vst.msk [vmem:[#allocation3 + $0xc0] sm:$0xff] %vm998_vm2, %v1835_v13  ;;  %6072 = vpow2.f32 %v982_v29  ;;  %v1184_v47 = vcombine.high %v1176_v7, %v1176_v7 }
  0xcb   : >> { %v1434_v49 = vpop.permute.xlu1 %1433  ;;  %v1430_v17 = vpop.permute.xlu0 %1429  ;;  %6074 = vpow2.f32 %v984_v15 }
  0xcc   : >> { %v1838_v9 = vmul.f32 %v1706_v22, %v1434_v49  ;;  %v1837_v3 = vmul.f32 %v1706_v22, %v1430_v17  ;;  %v6057_v20 = vpop.eup %6056  ;;  %6076 = vpow2.f32 %v986_v40  ;;  %v996_v22 = vmul.f32 1.442695, %v869_v48 }
  0xcd   : >> { %v6059_v56 = vpop.eup %6058  ;;  %6078 = vpow2.f32 %v988_v43  ;;  %1047 = vst.msk [vmem:[#allocation2 + $0x180] sm:$0xff] %vm998_vm2, %v6057_v20  ;;  %v1718_v40 = vrot.slane %v1192_v35, %v6493_v8  ;;  %v1206_v49 = vrot.slane %v1184_v47, %v6629_v33 }
  0xce   : >> { %1902 = vst.msk [vmem:[#allocation3 + $0xd8] sm:$0xff] %vm998_vm2, %v1838_v9  ;;  %1901 = vst.msk [vmem:[#allocation3 + $0xd0] sm:$0xff] %vm998_vm2, %v1837_v3  ;;  %v6061_v42 = vpop.eup %6060  ;;  %6080 = vpow2.f32 %v990_v44  ;;  %v1169_v3 = vcombine.high %v7022_v54, %v7022_v54 }
  0xcf   : >> { %v1446_v53 = vpop.permute.xlu1 %1445  ;;  %v1442_v16 = vpop.permute.xlu0 %1441  ;;  %1048 = vst.msk [vmem:[#allocation2 + $0x188] sm:$0xff] %vm998_vm2, %v6059_v56  ;;  %6082 = vpow2.f32 %v992_v26  ;;  %1049 = vst.msk [vmem:[#allocation2 + $0x190] sm:$0xff] %vm998_vm2, %v6061_v42  ;;  %v1214_v56 = vcombine.high %v1192_v35, %v1192_v35 }
  0xd0   : >> { %v1840_v58 = vmul.f32 %v1710_v46, %v1446_v53  ;;  %v1839_v36 = vmul.f32 %v1710_v46, %v1442_v16  ;;  %v6063_v51 = vpop.eup %6062  ;;  %6084 = vpow2.f32 %v994_v63  ;;  %v1722_v63 = vrot.slane %v1206_v49, %v6493_v8 }
  0xd1   : >> { %v6065_v13 = vpop.eup %6064  ;;  %1050 = vst.msk [vmem:[#allocation2 + $0x198] sm:$0xff] %vm998_vm2, %v6063_v51  ;;  %6086 = vpow2.f32 %v996_v22  ;;  %v1183_v42 = vrot.slane %v1169_v3, %v6629_v33  ;;  %v1726_v47 = vrot.slane %v1214_v56, %v6493_v8  ;;  %v1216_v51 = vcombine.high %v1206_v49, %v1206_v49  ;;  %v7083_v3 = vld [vmem:[%s6818_s14 + $0x18] sm:$0xff] }
  0xd2   : >> { %1904 = vst.msk [vmem:[#allocation3 + $0xe8] sm:$0xff] %vm998_vm2, %v1840_v58  ;;  %1903 = vst.msk [vmem:[#allocation3 + $0xe0] sm:$0xff] %vm998_vm2, %v1839_v36  ;;  %v6067_v29 = vpop.eup %6066 }
  0xd3   : >> { %v1458_v59 = vpop.permute.xlu1 %1457  ;;  %v1454_v15 = vpop.permute.xlu0 %1453  ;;  %1051 = vst.msk [vmem:[#allocation2 + $0x1a0] sm:$0xff] %vm998_vm2, %v6065_v13  ;;  %1052 = vst.msk [vmem:[#allocation2 + $0x1a8] sm:$0xff] %vm998_vm2, %v6067_v29 }
  0xd4   : >> { %v6069_v46 = vpop.eup %6068  ;;  %v1842_v19 = vmul.f32 %v1714_v57, %v1458_v59  ;;  %v1841_v31 = vmul.f32 %v1714_v57, %v1454_v15  ;;  %v1199_v15 = vrot.slane %v1183_v42, %v6629_v33 }
  0xd5   : >> { %v6071_v17 = vpop.eup %6070  ;;  %1053 = vst.msk [vmem:[#allocation2 + $0x1b0] sm:$0xff] %vm998_vm2, %v6069_v46 }
  0xd6   : >> { %v6073_v7 = vpop.eup %6072  ;;  %1906 = vst.msk [vmem:[#allocation3 + $0xf8] sm:$0xff] %vm998_vm2, %v1842_v19  ;;  %1905 = vst.msk [vmem:[#allocation3 + $0xf0] sm:$0xff] %vm998_vm2, %v1841_v31  ;;  %v1730_v31 = vrot.slane %v1216_v51, %v6493_v8 }
  0xd7   : >> { %1054 = vst.msk [vmem:[#allocation2 + $0x1b8] sm:$0xff] %vm998_vm2, %v6071_v17  ;;  %v6075_v48 = vpop.eup %6074  ;;  %v1470_v43 = vpop.permute.xlu1 %1469  ;;  %1055 = vst.msk [vmem:[#allocation2 + $0x1c0] sm:$0xff] %vm998_vm2, %v6073_v7 }
  0xd8   : >> { %v1466_v9 = vpop.permute.xlu0 %1465  ;;  %v6077_v44 = vpop.eup %6076  ;;  %v1844_v26 = vmul.f32 %v1718_v40, %v1470_v43  ;;  %1056 = vst.msk [vmem:[#allocation2 + $0x1c8] sm:$0xff] %vm998_vm2, %v6075_v48  ;;  %v1734_v43 = vrot.slane %v1199_v15, %v6493_v8 }
  0xd9   : >> { %v1843_v20 = vmul.f32 %v1718_v40, %v1466_v9  ;;  %v6079_v53 = vpop.eup %6078  ;;  %1057 = vst.msk [vmem:[#allocation2 + $0x1d0] sm:$0xff] %vm998_vm2, %v6077_v44  ;;  %v1185_v40 = vcombine.high %v1183_v42, %v1183_v42 }
  0xda   : >> { %v6081_v16 = vpop.eup %6080  ;;  %1908 = vst.msk [vmem:[#allocation3 + $0x108] sm:$0xff] %vm998_vm2, %v1844_v26  ;;  %1058 = vst.msk [vmem:[#allocation2 + $0x1d8] sm:$0xff] %vm998_vm2, %v6079_v53 }
  0xdb   : >> { %1907 = vst.msk [vmem:[#allocation3 + $0x100] sm:$0xff] %vm998_vm2, %v1843_v20  ;;  %v6083_v54 = vpop.eup %6082  ;;  %v1482_v57 = vpop.permute.xlu1 %1481  ;;  %1059 = vst.msk [vmem:[#allocation2 + $0x1e0] sm:$0xff] %vm998_vm2, %v6081_v16  ;;  %v1213_v9 = vrot.slane %v1185_v40, %v6629_v33  ;;  %v1215_v20 = vcombine.high %v1199_v15, %v1199_v15  ;;  %v1066_v16 = vmul.f32 %v6965_v10, %v7083_v3 }
  0xdc   : >> { %v1478_v22 = vpop.permute.xlu0 %1477  ;;  %v6085_v35 = vpop.eup %6084  ;;  %v1846_v58 = vmul.f32 %v1722_v63, %v1482_v57  ;;  %1060 = vst.msk [vmem:[#allocation2 + $0x1e8] sm:$0xff] %vm998_vm2, %v6083_v54 }
  0xdd   : >> { %v1845_v36 = vmul.f32 %v1722_v63, %v1478_v22  ;;  %v6087_v13 = vpop.eup %6086  ;;  %1061 = vst.msk [vmem:[#allocation2 + $0x1f0] sm:$0xff] %vm998_vm2, %v6085_v35  ;;  %v1738_v53 = vrot.slane %v1213_v9, %v6493_v8  ;;  %v1217_v22 = vcombine.high %v1213_v9, %v1213_v9 }
  0xde   : >> { %1910 = vst.msk [vmem:[#allocation3 + $0x118] sm:$0xff] %vm998_vm2, %v1846_v58  ;;  %1062 = vst.msk [vmem:[#allocation2 + $0x1f8] sm:$0xff] %vm998_vm2, %v6087_v13  ;;  %v1742_v58 = vrot.slane %v1215_v20, %v6493_v8 }
  0xdf   : >> { %1909 = vst.msk [vmem:[#allocation3 + $0x110] sm:$0xff] %vm998_vm2, %v1845_v36  ;;  %v1494_v29 = vpop.permute.xlu1 %1493  ;;  %v1225_v36 = vrot.slane %v1066_v16, %v6629_v33  ;;  %v1746_v10 = vrot.slane %v1217_v22, %v6493_v8 }
  0xe0   : >> { %v1490_v59 = vpop.permute.xlu0 %1489  ;;  %v1848_v46 = vmul.f32 %v1726_v47, %v1494_v29 }
  0xe1   : >> { %v1847_v19 = vmul.f32 %v1726_v47, %v1490_v59  ;;  %v1241_v59 = vrot.slane %v1225_v36, %v6629_v33  ;;  %v1233_v15 = vcombine.high %v1225_v36, %v1225_v36 }
  0xe2   : >> { %1912 = vst.msk [vmem:[#allocation3 + $0x128] sm:$0xff] %vm998_vm2, %v1848_v46 }
  0xe3   : >> { %1911 = vst.msk [vmem:[#allocation3 + $0x120] sm:$0xff] %vm998_vm2, %v1847_v19  ;;  %v1506_v49 = vpop.permute.xlu1 %1505  ;;  %v1263_v20 = vcombine.high %v1241_v59, %v1241_v59 }
  0xe4   : >> { %v1502_v17 = vpop.permute.xlu0 %1501  ;;  %v1850_v7 = vmul.f32 %v1730_v31, %v1506_v49  ;;  %v1750_v49 = vrot.slane %v1241_v59, %v6493_v8 }
  0xe5   : >> { %v1849_v48 = vmul.f32 %v1730_v31, %v1502_v17  ;;  %v1255_v17 = vrot.slane %v1233_v15, %v6629_v33  ;;  %v1758_v22 = vrot.slane %v1263_v20, %v6493_v8 }
  0xe6   : >> { %1914 = vst.msk [vmem:[#allocation3 + $0x138] sm:$0xff] %vm998_vm2, %v1850_v7 }
  0xe7   : >> { %1913 = vst.msk [vmem:[#allocation3 + $0x130] sm:$0xff] %vm998_vm2, %v1849_v48  ;;  %v1518_v44 = vpop.permute.xlu1 %1517 }
  0xe8   : >> { %v1514_v26 = vpop.permute.xlu0 %1513  ;;  %v1852_v63 = vmul.f32 %v1734_v43, %v1518_v44 }
  0xe9   : >> { %v1851_v56 = vmul.f32 %v1734_v43, %v1514_v26  ;;  %v1218_v43 = vcombine.high %v1066_v16, %v1066_v16  ;;  %v1754_v26 = vrot.slane %v1255_v17, %v6493_v8 }
  0xea   : >> { %1916 = vst.msk [vmem:[#allocation3 + $0x148] sm:$0xff] %vm998_vm2, %v1852_v63 }
  0xeb   : >> { %1915 = vst.msk [vmem:[#allocation3 + $0x140] sm:$0xff] %vm998_vm2, %v1851_v56  ;;  %v1530_v54 = vpop.permute.xlu1 %1529 }
  0xec   : >> { %v1526_v57 = vpop.permute.xlu0 %1525  ;;  %v1854_v42 = vmul.f32 %v1738_v53, %v1530_v54 }
  0xed   : >> { %v1853_v35 = vmul.f32 %v1738_v53, %v1526_v57  ;;  %v1232_v53 = vrot.slane %v1218_v43, %v6629_v33 }
  0xee   : >> { %1918 = vst.msk [vmem:[#allocation3 + $0x158] sm:$0xff] %vm998_vm2, %v1854_v42  ;;  %v1265_v42 = vcombine.high %v1255_v17, %v1255_v17 }
  0xef   : >> { %1917 = vst.msk [vmem:[#allocation3 + $0x150] sm:$0xff] %vm998_vm2, %v1853_v35  ;;  %v1542_v47 = vpop.permute.xlu1 %1541 }
  0xf0   : >> { %v1538_v51 = vpop.permute.xlu0 %1537  ;;  %v1856_v13 = vmul.f32 %v1742_v58, %v1542_v47 }
  0xf1   : >> { %v1855_v29 = vmul.f32 %v1742_v58, %v1538_v51  ;;  %v1248_v58 = vrot.slane %v1232_v53, %v6629_v33  ;;  %v1762_v51 = vrot.slane %v1265_v42, %v6493_v8 }
  0xf2   : >> { %1920 = vst.msk [vmem:[#allocation3 + $0x168] sm:$0xff] %vm998_vm2, %v1856_v13 }
  0xf3   : >> { %1919 = vst.msk [vmem:[#allocation3 + $0x160] sm:$0xff] %vm998_vm2, %v1855_v29  ;;  %v1554_v46 = vpop.permute.xlu1 %1553 }
  0xf4   : >> { %v1550_v19 = vpop.permute.xlu0 %1549  ;;  %v1858_v31 = vmul.f32 %v1746_v10, %v1554_v46  ;;  %v1766_v46 = vrot.slane %v1248_v58, %v6493_v8 }
  0xf5   : >> { %v1857_v40 = vmul.f32 %v1746_v10, %v1550_v19  ;;  %v1234_v10 = vcombine.high %v1232_v53, %v1232_v53 }
  0xf6   : >> { %1922 = vst.msk [vmem:[#allocation3 + $0x178] sm:$0xff] %vm998_vm2, %v1858_v31 }
  0xf7   : >> { %1921 = vst.msk [vmem:[#allocation3 + $0x170] sm:$0xff] %vm998_vm2, %v1857_v40  ;;  %v1566_v7 = vpop.permute.xlu1 %1565  ;;  %v1262_v19 = vrot.slane %v1234_v10, %v6629_v33 }
  0xf8   : >> { %v1562_v48 = vpop.permute.xlu0 %1561  ;;  %v1860_v9 = vmul.f32 %v1750_v49, %v1566_v7 }
  0xf9   : >> { %v1859_v44 = vmul.f32 %v1750_v49, %v1562_v48  ;;  %v1770_v7 = vrot.slane %v1262_v19, %v6493_v8  ;;  %v1264_v48 = vcombine.high %v1248_v58, %v1248_v58 }
  0xfa   : >> { %1924 = vst.msk [vmem:[#allocation3 + $0x188] sm:$0xff] %vm998_vm2, %v1860_v9 }
  0xfb   : >> { %1923 = vst.msk [vmem:[#allocation3 + $0x180] sm:$0xff] %vm998_vm2, %v1859_v44  ;;  %v1578_v63 = vpop.permute.xlu1 %1577  ;;  %v1774_v20 = vrot.slane %v1264_v48, %v6493_v8 }
  0xfc   : >> { %v1574_v56 = vpop.permute.xlu0 %1573  ;;  %v1862_v54 = vmul.f32 %v1754_v26, %v1578_v63  ;;  %v1266_v63 = vcombine.high %v1262_v19, %v1262_v19 }
  0xfd   : >> { %v1861_v57 = vmul.f32 %v1754_v26, %v1574_v56 }
  0xfe   : >> { %1926 = vst.msk [vmem:[#allocation3 + $0x198] sm:$0xff] %vm998_vm2, %v1862_v54 }
  0xff   : >> { %1925 = vst.msk [vmem:[#allocation3 + $0x190] sm:$0xff] %vm998_vm2, %v1861_v57  ;;  %v1590_v16 = vpop.permute.xlu1 %1589 }
 0x100   : >> { %v1586_v35 = vpop.permute.xlu0 %1585  ;;  %v1864_v36 = vmul.f32 %v1758_v22, %v1590_v16 }
 0x101   : >> { %v1863_v47 = vmul.f32 %v1758_v22, %v1586_v35  ;;  %v1778_v22 = vrot.slane %v1266_v63, %v6493_v8 }
 0x102   : >> { %1928 = vst.msk [vmem:[#allocation3 + $0x1a8] sm:$0xff] %vm998_vm2, %v1864_v36  ;;  %v6332_v36 = vmov %v6322_v4  }
 0x103   : >> { %1927 = vst.msk [vmem:[#allocation3 + $0x1a0] sm:$0xff] %vm998_vm2, %v1863_v47  ;;  %v1602_v13 = vpop.permute.xlu1 %1601  ;;  %v6336_v47 = vmov %v6326_v5  }
 0x104   : >> { %v1598_v29 = vpop.permute.xlu0 %1597  ;;  %v1866_v59 = vmul.f32 %v1762_v51, %v1602_v13 }
 0x105   : >> { %v1865_v15 = vmul.f32 %v1762_v51, %v1598_v29 }
 0x106   : >> { %1930 = vst.msk [vmem:[#allocation3 + $0x1b8] sm:$0xff] %vm998_vm2, %v1866_v59 }
 0x107   : >> { %1929 = vst.msk [vmem:[#allocation3 + $0x1b0] sm:$0xff] %vm998_vm2, %v1865_v15  ;;  %v1614_v31 = vpop.permute.xlu1 %1613 }
 0x108   : >> { %v1610_v40 = vpop.permute.xlu0 %1609  ;;  %v1868_v49 = vmul.f32 %v1766_v46, %v1614_v31 }
 0x109   : >> { %v1867_v17 = vmul.f32 %v1766_v46, %v1610_v40 }
 0x10a   : >> { %1932 = vst.msk [vmem:[#allocation3 + $0x1c8] sm:$0xff] %vm998_vm2, %v1868_v49 }
 0x10b   : >> { %1931 = vst.msk [vmem:[#allocation3 + $0x1c0] sm:$0xff] %vm998_vm2, %v1867_v17  ;;  %v1626_v43 = vpop.permute.xlu1 %1625 }
 0x10c   : >> { %v1622_v9 = vpop.permute.xlu0 %1621  ;;  %v1870_v44 = vmul.f32 %v1770_v7, %v1626_v43 }
 0x10d   : >> { %v1869_v26 = vmul.f32 %v1770_v7, %v1622_v9 }
 0x10e   : >> { %1934 = vst.msk [vmem:[#allocation3 + $0x1d8] sm:$0xff] %vm998_vm2, %v1870_v44 }
 0x10f   : >> { %1933 = vst.msk [vmem:[#allocation3 + $0x1d0] sm:$0xff] %vm998_vm2, %v1869_v26  ;;  %v1638_v56 = vpop.permute.xlu1 %1637 }
 0x110   : >> { %v1634_v53 = vpop.permute.xlu0 %1633  ;;  %v1872_v54 = vmul.f32 %v1774_v20, %v1638_v56 }
 0x111   : >> { %v1871_v57 = vmul.f32 %v1774_v20, %v1634_v53 }
 0x112   : >> { %1936 = vst.msk [vmem:[#allocation3 + $0x1e8] sm:$0xff] %vm998_vm2, %v1872_v54 }
 0x113   : >> { %1935 = vst.msk [vmem:[#allocation3 + $0x1e0] sm:$0xff] %vm998_vm2, %v1871_v57  ;;  %v1650_v42 = vpop.permute.xlu1 %1649 }
 0x114   : >> { %v1646_v16 = vpop.permute.xlu0 %1645  ;;  %v1874_v35 = vmul.f32 %v1778_v22, %v1650_v42 }
 0x115   : >> { %v1873_v58 = vmul.f32 %v1778_v22, %v1646_v16 }
 0x116   : >> { %1938 = vst.msk [vmem:[#allocation3 + $0x1f8] sm:$0xff] %vm998_vm2, %v1874_v35 }
 0x117   : >> { %1937 = vst.msk [vmem:[#allocation3 + $0x1f0] sm:$0xff] %vm998_vm2, %v1873_v58 }
 0x118 LB: >>> { %s5794_s17 = sshll.u32 %s6342_s15, 6  ;;  %s1944_s15 = sadd.s32 1, %s6342_s15   ;;  %s6342_s15 = sphi %s7132_s15, %s1944_s15   ;;  %v6338_v47 = vphi %v6336_v47, %v6337_v47   ;;  %v6334_v36 = vphi %v6332_v36, %v6333_v36  }
 0x119   : >>> { %s1949_s19 = scalar_lea.vmem [#allocation2], %s5794_s17  ;;  %s7138_s25 = scalar_lea.vmem [#allocation3], %s5794_s17 }
 0x11a   : >>> { %v1950_v51 = vld [vmem:[%s1949_s19] sm:$0xff]  ;;  %v1951_v5 = vld [vmem:[%s1949_s19 + $0x8] sm:$0xff]  ;;  %v5741_v59 = vld [vmem:[%s1949_s19 + $0x10] sm:$0xff]  ;;  %s1959_s28 = scalar_lea.vmem [#allocation4], %s5794_s17  ;;  %p1941_p7 = scmp.ge.s32.totalorder %s1944_s15, 8  }
 0x11b   : >>> { %v1952_v10 = vmul.f32 %v6338_v47, %v1950_v51  ;;  %v1953_v13 = vmul.f32 %v6334_v36, %v1951_v5  ;;  %v5742_v15 = vld [vmem:[%s1949_s19 + $0x18] sm:$0xff]  ;;  %v5753_v7 = vld [vmem:[%s1949_s19 + $0x20] sm:$0xff]  ;;  %v5754_v48 = vld [vmem:[%s1949_s19 + $0x28] sm:$0xff]  ;;  %2081 = vbcast.lane.b32.xlu1 (%p1941_p7), %v6503_v11, 336  ;;  %2073 = vbcast.lane.b32.xlu0 (%p1941_p7), %v6506_v12, 336  ;;  %vm2818_vm5 = vcmask (%p1941_p7), 1041409   ;;  %s7273_s29 = scalar_lea.vmem (%p1941_p7), %s6463_s18, %s6487_s6 }
 0x11c   : >>> { %v5765_v56 = vld [vmem:[%s1949_s19 + $0x30] sm:$0xff]  ;;  %v5766_v53 = vld [vmem:[%s1949_s19 + $0x38] sm:$0xff]  ;;  %vm2821_vm6 = vcmask (%p1941_p7), 1042434   ;;  %vm2824_vm7 = vcmask (%p1941_p7), 1043459   ;;  %vm2827_vm8 = vcmask (%p1941_p7), 1044484   ;;  %vm2830_vm9 = vcmask (%p1941_p7), 1045509  }
 0x11d   : >> { %vm2833_vm10 = vcmask (%p1941_p7), 1046534   ;;  %vm2836_vm11 = vcmask (%p1941_p7), 1047559   ;;  %s358_s8 = sadd.s32 (%p1941_p7), 1, %s6330_s8  }
 0x11e   : >>> { %v1955_v4 = vld [vmem:[%s7138_s25] sm:$0xff]  ;;  %v1956_v29 = vld [vmem:[%s7138_s25 + $0x8] sm:$0xff]  ;;  %v5745_v31 = vld [vmem:[%s7138_s25 + $0x10] sm:$0xff]  ;;  %p355_p8 = scmp.ge.s32.totalorder (%p1941_p7), %s358_s8, 2  }
 0x11f   : >>> { %v1957_v46 = vadd.f32 %v1955_v4, %v1952_v10  ;;  %v1958_v19 = vadd.f32 %v1956_v29, %v1953_v13  ;;  %v5746_v40 = vld [vmem:[%s7138_s25 + $0x18] sm:$0xff]  ;;  %v5757_v44 = vld [vmem:[%s7138_s25 + $0x20] sm:$0xff]  ;;  %v5758_v26 = vld [vmem:[%s7138_s25 + $0x28] sm:$0xff]  ;;  %2085 = vbcast.lane.b32.xlu1 (%p1941_p7), %v6503_v11, 344  ;;  %2077 = vbcast.lane.b32.xlu0 (%p1941_p7), %v6506_v12, 344 }
 0x120   : >>> { %v5769_v22 = vld [vmem:[%s7138_s25 + $0x30] sm:$0xff]  ;;  %v5770_v42 = vld [vmem:[%s7138_s25 + $0x38] sm:$0xff]  ;;  %v8516_v11 = vld [vmem:[#allocation19_spill] sm:$0xff] (%p1941_p7) }
 0x121   : >>> { %1960 = vst.msk [vmem:[%s1959_s28] sm:$0xff] %vm998_vm2, %v1957_v46  ;;  %1961 = vst.msk [vmem:[%s1959_s28 + $0x8] sm:$0xff] %vm998_vm2, %v1958_v19  ;;  %v1967_v49 = vmul.f32 %v5741_v59, %v1957_v46  ;;  %v1968_v17 = vmul.f32 %v5742_v15, %v1958_v19  ;;  %v8517_v12 = vld [vmem:[#allocation15_spill] sm:$0xff] (%p1941_p7)  ;;  %v8522_v29 = vld [vmem:[#allocation14_spill] sm:$0xff] (%p1941_p7) }
 0x123   : >>> { %v1972_v43 = vadd.f32 %v5745_v31, %v1967_v49  ;;  %v1973_v9 = vadd.f32 %v5746_v40, %v1968_v17  ;;  %2093 = vbcast.lane.b32.xlu1 (%p1941_p7), %v6528_v18, 344  ;;  %2089 = vbcast.lane.b32.xlu0 (%p1941_p7), %v6528_v18, 336  ;;  %v8518_v18 = vld [vmem:[#allocation16_spill] sm:$0xff] (%p1941_p7) }
 0x125   : >>> { %5749 = vst.msk [vmem:[%s1959_s28 + $0x10] sm:$0xff] %vm998_vm2, %v1972_v43  ;;  %5750 = vst.msk [vmem:[%s1959_s28 + $0x18] sm:$0xff] %vm998_vm2, %v1973_v9  ;;  %v1982_v20 = vmul.f32 %v5753_v7, %v1972_v43  ;;  %v1983_v63 = vmul.f32 %v5754_v48, %v1973_v9 }
 0x127   : >>> { %v1987_v54 = vadd.f32 %v5757_v44, %v1982_v20  ;;  %v1988_v57 = vadd.f32 %v5758_v26, %v1983_v63  ;;  %1943 = sbr.rel (!%p1941_p7) target bundleno = 280 (0x118), region = 143  ;;  %2101 = vbcast.lane.b32.xlu1 (%p1941_p7), %v6578_v32, 344  ;;  %2097 = vbcast.lane.b32.xlu0 (%p1941_p7), %v6578_v32, 336  ;;  %v8520_v32 = vld [vmem:[#allocation18_spill] sm:$0xff] (%p1941_p7) }
 0x129   : >>> { %5761 = vst.msk [vmem:[%s1959_s28 + $0x20] sm:$0xff] %vm998_vm2, %v1987_v54  ;;  %5762 = vst.msk [vmem:[%s1959_s28 + $0x28] sm:$0xff] %vm998_vm2, %v1988_v57  ;;  %v1997_v16 = vmul.f32 %v5765_v56, %v1987_v54  ;;  %v1998_v35 = vmul.f32 %v5766_v53, %v1988_v57 }
 0x12b   : >>> { %v7154_v5 = vadd.f32 %v5769_v22, %v1997_v16   ;;  %v7156_v4 = vadd.f32 %v5770_v42, %v1998_v35   ;;  %2109 = vbcast.lane.b32.xlu1 (%p1941_p7), %v6584_v37, 344  ;;  %2105 = vbcast.lane.b32.xlu0 (%p1941_p7), %v6584_v37, 336 }
 0x12d   : >>> { %5773 = vst.msk [vmem:[%s1959_s28 + $0x30] sm:$0xff] %vm998_vm2, %v7154_v5  ;;  %5774 = vst.msk [vmem:[%s1959_s28 + $0x38] sm:$0xff] %vm998_vm2, %v7156_v4  ;;  %v6333_v36 = vmov %v7156_v4   ;;  %v6337_v47 = vmov %v7154_v5  }
 0x12e   : > { %s7440_s26 = smov (%p355_p8), 0  }
 0x12f   : >> { %2117 = vbcast.lane.b32.xlu1 %v6589_v39, 344  ;;  %2113 = vbcast.lane.b32.xlu0 %v6589_v39, 336 }
 0x133   : >> { %2125 = vbcast.lane.b32.xlu1 %v6597_v41, 344  ;;  %2121 = vbcast.lane.b32.xlu0 %v6597_v41, 336 }
 0x134   : >> { %v2008_v37 = vld [vmem:[#allocation4 + $0x8] sm:$0xff]  ;;  %v2014_v59 = vld [vmem:[#allocation4 + $0x38] sm:$0xff]  ;;  %v2013_v15 = vld [vmem:[#allocation4 + $0x30] sm:$0xff] }
 0x135   : >> { %v2016_v44 = vld [vmem:[#allocation4 + $0x48] sm:$0xff]  ;;  %v2015_v26 = vld [vmem:[#allocation4 + $0x40] sm:$0xff] }
 0x137   : >> { %2133 = vbcast.lane.b32.xlu1 %v6606_v45, 344  ;;  %2129 = vbcast.lane.b32.xlu0 %v6606_v45, 336 }
 0x13b   : >> { %2141 = vbcast.lane.b32.xlu1 %v6613_v50, 344  ;;  %2137 = vbcast.lane.b32.xlu0 %v6613_v50, 336 }
 0x13f   : >> { %2149 = vbcast.lane.b32.xlu1 %v6619_v55, 344  ;;  %2145 = vbcast.lane.b32.xlu0 %v6619_v55, 336 }
 0x143   : >> { %2209 = vbcast.lane.b32.xlu1 %v6724_v2, 336  ;;  %2153 = vbcast.lane.b32.xlu0 %v6625_v62, 336 }
 0x147   : >> { %2273 = vbcast.lane.b32.xlu1 %v6538_v21, 336  ;;  %2213 = vbcast.lane.b32.xlu0 %v6724_v2, 344  ;;  %v2011_v2 = vld [vmem:[#allocation4 + $0x20] sm:$0xff] }
 0x14b   : >> { %2157 = vbcast.lane.b32.xlu1 %v6625_v62, 344  ;;  %2277 = vbcast.lane.b32.xlu0 %v6538_v21, 344  ;;  %v8519_v21 = vld [vmem:[#allocation17_spill] sm:$0xff] }
 0x14f   : >> { %2221 = vbcast.lane.b32.xlu1 %v6731_v52, 344  ;;  %2217 = vbcast.lane.b32.xlu0 %v6731_v52, 336 }
 0x153   : >> { %2285 = vbcast.lane.b32.xlu1 %v6545_v23, 344  ;;  %2281 = vbcast.lane.b32.xlu0 %v6545_v23, 336  ;;  %v2009_v23 = vld [vmem:[#allocation4 + $0x10] sm:$0xff] }
 0x157   : >> { %2165 = vbcast.lane.b32.xlu1 %v6635_v34, 344  ;;  %2161 = vbcast.lane.b32.xlu0 %v6635_v34, 336  ;;  %v8521_v34 = vld [vmem:[#allocation20_spill] sm:$0xff] }
 0x15b   : >> { %2205 = vbcast.lane.b32.xlu1 %v8516_v11, 344  ;;  %2201 = vbcast.lane.b32.xlu0 %v8516_v11, 336 }
 0x15f   : >> { %2229 = vbcast.lane.b32.xlu1 %v6744_v60, 344  ;;  %2225 = vbcast.lane.b32.xlu0 %v6744_v60, 336 }
 0x163   : >> { %2269 = vbcast.lane.b32.xlu1 %v6841_v38, 344  ;;  %2265 = vbcast.lane.b32.xlu0 %v6841_v38, 336 }
 0x167   : >> { %2293 = vbcast.lane.b32.xlu1 %v6549_v24, 344  ;;  %2289 = vbcast.lane.b32.xlu0 %v6549_v24, 336 }
 0x16b   : >> { %2173 = vbcast.lane.b32.xlu1 %v8517_v12, 344  ;;  %2169 = vbcast.lane.b32.xlu0 %v8517_v12, 336 }
 0x16f   : >> { %2237 = vbcast.lane.b32.xlu1 %v6767_v14, 344  ;;  %2233 = vbcast.lane.b32.xlu0 %v6767_v14, 336 }
 0x173   : >> { %2301 = vbcast.lane.b32.xlu1 %v6553_v25, 344  ;;  %2297 = vbcast.lane.b32.xlu0 %v6553_v25, 336  ;;  %v2007_v25 = vld [vmem:[#allocation4] sm:$0xff] }
 0x177   : >> { %2181 = vbcast.lane.b32.xlu1 %v8518_v18, 344  ;;  %2177 = vbcast.lane.b32.xlu0 %v8518_v18, 336  ;;  %v2018_v18 = vld [vmem:[#allocation4 + $0x58] sm:$0xff] }
 0x17b   : >> { %2245 = vbcast.lane.b32.xlu1 %v6786_v6, 344  ;;  %2241 = vbcast.lane.b32.xlu0 %v6786_v6, 336 }
 0x17f   : >> { %2309 = vbcast.lane.b32.xlu1 %v6560_v27, 344  ;;  %2305 = vbcast.lane.b32.xlu0 %v6560_v27, 336  ;;  %v2010_v27 = vld [vmem:[#allocation4 + $0x18] sm:$0xff] }
 0x183   : >> { %2189 = vbcast.lane.b32.xlu1 %v8519_v21, 344  ;;  %2185 = vbcast.lane.b32.xlu0 %v8519_v21, 336  ;;  %v2017_v21 = vld [vmem:[#allocation4 + $0x50] sm:$0xff] }
 0x187   : >> { %2253 = vbcast.lane.b32.xlu1 %v6807_v61, 344  ;;  %2249 = vbcast.lane.b32.xlu0 %v6807_v61, 336 }
 0x18b   : >> { %2317 = vbcast.lane.b32.xlu1 %v6564_v28, 344  ;;  %2313 = vbcast.lane.b32.xlu0 %v6564_v28, 336  ;;  %v2012_v28 = vld [vmem:[#allocation4 + $0x28] sm:$0xff] }
 0x18d   : >> { %v2082_v14 = vpop.permute.xlu1 %2081  ;;  %v2074_v24 = vpop.permute.xlu0 %2073 }
 0x18e   : >> { %v2329_v39 = vmul.f32 %v2082_v14, %v2009_v23  ;;  %v2327_v50 = vmul.f32 %v2074_v24, %v2007_v25  ;;  %v8523_v24 = vld [vmem:[#allocation21_spill] sm:$0xff]  ;;  %v8524_v25 = vld [vmem:[#allocation5_spill] sm:$0xff] }
 0x18f   : >> { %2197 = vbcast.lane.b32.xlu1 %v8520_v32, 344  ;;  %2193 = vbcast.lane.b32.xlu0 %v8520_v32, 336  ;;  %v7243_v32 = vmul.f32 %v8524_v25, %v8523_v24 }
 0x190   : >> { %v2400_v52 = vsel %vm998_vm2, %v2329_v39, 0.0  ;;  %v2391_v36 = vsel %vm998_vm2, %v2327_v50, 0.0 }
 0x191   : >> { %v2086_v41 = vpop.permute.xlu1 %2085  ;;  %v2078_v45 = vpop.permute.xlu0 %2077 }
 0x192   : >> { %v2330_v55 = vmul.f32 %v2086_v41, %v2010_v27  ;;  %v2328_v62 = vmul.f32 %v2078_v45, %v2008_v37 }
 0x193   : >> { %2261 = vbcast.lane.b32.xlu1 %v8521_v34, 344  ;;  %2257 = vbcast.lane.b32.xlu0 %v8521_v34, 336 }
 0x194   : >> { %v2401_v60 = vsel %vm998_vm2, %v2330_v55, 0.0  ;;  %v2392_v6 = vsel %vm998_vm2, %v2328_v62, 0.0 }
 0x195   : >> { %v2402_v61 = vadd.f32 %v2401_v60, %v2400_v52  ;;  %v2094_v38 = vpop.permute.xlu1 %2093  ;;  %v2090_v58 = vpop.permute.xlu0 %2089  ;;  %v2393_v13 = vadd.f32 %v2392_v6, %v2391_v36  ;;  %v2019_v52 = vld [vmem:[#allocation4 + $0x60] sm:$0xff] }
 0x196   : >> { %v2332_v47 = vmul.f32 %v2094_v38, %v2012_v28  ;;  %v2331_v51 = vmul.f32 %v2090_v58, %v2011_v2  ;;  %v2020_v2 = vld [vmem:[#allocation4 + $0x68] sm:$0xff]  ;;  %v2693_v38 = vrot.slane %v7243_v32, 1  ;;  %v2694_v58 = vrot.slane %v7243_v32, 2 }
 0x197   : >> { %v2403_v10 = vrot.slane %v2402_v61, 4  ;;  %2325 = vbcast.lane.b32.xlu1 %v8522_v29, 344  ;;  %2321 = vbcast.lane.b32.xlu0 %v8522_v29, 336  ;;  %v2394_v43 = vrot.slane %v2393_v13, 4 }
 0x198   : >> { %v2410_v46 = vsel %vm998_vm2, %v2332_v47, 0.0  ;;  %v2409_v19 = vsel %vm998_vm2, %v2331_v51, 0.0 }
 0x199   : >> { %v2411_v31 = vadd.f32 %v2410_v46, %v2409_v19  ;;  %v2102_v40 = vpop.permute.xlu1 %2101  ;;  %v2098_v49 = vpop.permute.xlu0 %2097  ;;  %v2404_v17 = vadd.f32 %v2403_v10, %v2402_v61  ;;  %v2395_v35 = vadd.f32 %v2394_v43, %v2393_v13 }
 0x19a   : >> { %v2334_v7 = vmul.f32 %v2102_v40, %v2014_v59  ;;  %v2333_v48 = vmul.f32 %v2098_v49, %v2013_v15  ;;  %v2022_v49 = vld [vmem:[#allocation4 + $0x78] sm:$0xff] }
 0x19b   : >> { %v2412_v9 = vrot.slane %v2411_v31, 4  ;;  %v2405_v22 = vrot.slane %v2404_v17, 2  ;;  %v2396_v62 = vrot.slane %v2395_v35, 2 }
 0x19c   : >> { %v2419_v20 = vsel %vm998_vm2, %v2334_v7, 0.0  ;;  %v2418_v63 = vsel %vm998_vm2, %v2333_v48, 0.0 }
 0x19d   : >> { %v2413_v56 = vadd.f32 %v2412_v9, %v2411_v31  ;;  %v2420_v53 = vadd.f32 %v2419_v20, %v2418_v63  ;;  %v2110_v54 = vpop.permute.xlu1 %2109  ;;  %v2106_v57 = vpop.permute.xlu0 %2105  ;;  %v2406_v41 = vadd.f32 %v2405_v22, %v2404_v17  ;;  %v2397_v46 = vadd.f32 %v2396_v62, %v2395_v35  ;;  %v2021_v17 = vld [vmem:[#allocation4 + $0x70] sm:$0xff] }
 0x19e   : >> { %v2336_v42 = vmul.f32 %v2110_v54, %v2016_v44  ;;  %v2335_v16 = vmul.f32 %v2106_v57, %v2015_v26  ;;  %v2695_v31 = vrot.slane %v7243_v32, 3  ;;  %v2696_v44 = vrot.slane %v7243_v32, 4 }
 0x19f   : >> { %v2414_v11 = vrot.slane %v2413_v56, 2  ;;  %v2421_v12 = vrot.slane %v2420_v53, 4  ;;  %v2407_v13 = vrot.slane %v2406_v41, 1  ;;  %v2697_v20 = vrot.slane %v7243_v32, 5 }
 0x1a0   : >> { %v2428_v14 = vsel %vm998_vm2, %v2336_v42, 0.0  ;;  %v2427_v23 = vsel %vm998_vm2, %v2335_v16, 0.0  ;;  %v2398_v16 = vrot.slane %v2397_v46, 1 }
 0x1a1   : >> { %v2422_v27 = vadd.f32 %v2421_v12, %v2420_v53  ;;  %v2118_v37 = vpop.permute.xlu1 %2117  ;;  %v2114_v39 = vpop.permute.xlu0 %2113  ;;  %v2429_v45 = vadd.f32 %v2428_v14, %v2427_v23  ;;  %v2415_v34 = vadd.f32 %v2414_v11, %v2413_v56  ;;  %v2408_v54 = vadd.f32 %v2407_v13, %v2406_v41 }
 0x1a2   : >> { %v2338_v50 = vmul.f32 %v2118_v37, %v2018_v18  ;;  %v2337_v55 = vmul.f32 %v2114_v39, %v2017_v21  ;;  %v2024_v18 = vld [vmem:[#allocation4 + $0x88] sm:$0xff]  ;;  %v2023_v21 = vld [vmem:[#allocation4 + $0x80] sm:$0xff]  ;;  %v2698_v41 = vrot.slane %v7243_v32, 6 }
 0x1a3   : >> { %v2423_v28 = vrot.slane %v2422_v27, 2  ;;  %v2430_v60 = vrot.slane %v2429_v45, 4  ;;  %v2416_v19 = vrot.slane %v2415_v34, 1  ;;  %v2754_v62 = vadd.f32 %v2693_v38, %v2408_v54 }
 0x1a4   : >> { %v2437_v6 = vsel %vm998_vm2, %v2338_v50, 0.0  ;;  %v2436_v61 = vsel %vm998_vm2, %v2337_v55, 0.0 }
 0x1a5   : >> { %v2424_v36 = vadd.f32 %v2423_v28, %v2422_v27  ;;  %v2438_v47 = vadd.f32 %v2437_v6, %v2436_v61  ;;  %v2126_v51 = vpop.permute.xlu1 %2125  ;;  %v2122_v10 = vpop.permute.xlu0 %2121  ;;  %v2431_v29 = vadd.f32 %v2430_v60, %v2429_v45  ;;  %v2417_v35 = vadd.f32 %v2416_v19, %v2415_v34 }
 0x1a6   : >> { %v2340_v59 = vmul.f32 %v2126_v51, %v2020_v2  ;;  %v2339_v15 = vmul.f32 %v2122_v10, %v2019_v52  ;;  %v2399_v52 = vadd.f32 %v2398_v16, %v2397_v46 }
 0x1a7   : >> { %v2439_v40 = vrot.slane %v2438_v47, 4  ;;  %v2425_v7 = vrot.slane %v2424_v36, 1  ;;  %v2432_v48 = vrot.slane %v2431_v29, 2  ;;  %v2755_v51 = vadd.f32 %v2694_v58, %v2417_v35  ;;  %v2041_v35 = vld [vmem:[#allocation4 + $0x110] sm:$0xff] }
 0x1a8   : >> { %v2446_v43 = vsel %vm998_vm2, %v2340_v59, 0.0  ;;  %v2445_v9 = vsel %vm998_vm2, %v2339_v15, 0.0  ;;  %v2753_v58 = vadd.f32 %v7243_v32, %v2399_v52 }
 0x1a9   : >> { %v2440_v26 = vadd.f32 %v2439_v40, %v2438_v47  ;;  %v2447_v63 = vadd.f32 %v2446_v43, %v2445_v9  ;;  %v2134_v56 = vpop.permute.xlu1 %2133  ;;  %v2130_v53 = vpop.permute.xlu0 %2129  ;;  %v2433_v57 = vadd.f32 %v2432_v48, %v2431_v29  ;;  %v2426_v14 = vadd.f32 %v2425_v7, %v2424_v36  ;;  %v2026_v36 = vld [vmem:[#allocation4 + $0x98] sm:$0xff]  ;;  %v2025_v47 = vld [vmem:[#allocation4 + $0x90] sm:$0xff] }
 0x1aa   : >> { %v2342_v22 = vmul.f32 %v2134_v56, %v2022_v49  ;;  %v2341_v42 = vmul.f32 %v2130_v53, %v2021_v17  ;;  %v2817_v17 = vrot.slane %v2754_v62, 7 }
 0x1ab   : >> { %v2441_v11 = vrot.slane %v2440_v26, 2  ;;  %v2448_v12 = vrot.slane %v2447_v63, 4  ;;  %v2434_v23 = vrot.slane %v2433_v57, 1  ;;  %v2756_v10 = vadd.f32 %v2695_v31, %v2426_v14 }
 0x1ac   : >> { %v2455_v24 = vsel %vm998_vm2, %v2342_v22, 0.0  ;;  %v2454_v27 = vsel %vm998_vm2, %v2341_v42, 0.0  ;;  %v2820_v31 = vrot.slane %v2755_v51, 6  ;;  %v2028_v51 = vld [vmem:[#allocation4 + $0xa8] sm:$0xff] }
 0x1ad   : >> { %v2442_v37 = vadd.f32 %v2441_v11, %v2440_v26  ;;  %v2449_v39 = vadd.f32 %v2448_v12, %v2447_v63  ;;  %v2456_v45 = vadd.f32 %v2455_v24, %v2454_v27  ;;  %v2142_v50 = vpop.permute.xlu1 %2141  ;;  %v2138_v55 = vpop.permute.xlu0 %2137  ;;  %v2435_v34 = vadd.f32 %v2434_v23, %v2433_v57  ;;  %v2042_v27 = vld [vmem:[#allocation4 + $0x118] sm:$0xff] }
 0x1ae   : >> { %v2344_v28 = vmul.f32 %v2142_v50, %v2024_v18  ;;  %v2343_v2 = vmul.f32 %v2138_v55, %v2023_v21  ;;  %v2823_v54 = vrot.slane %v2756_v10, 5  ;;  %v2819_v11 = vsel %vm2818_vm5, %v2817_v17, %v2753_v58  ;;  %v2027_v50 = vld [vmem:[#allocation4 + $0xa0] sm:$0xff]  ;;  %v2058_v10 = vld [vmem:[#allocation4 + $0x198] sm:$0xff] }
 0x1af   : >> { %v2443_v60 = vrot.slane %v2442_v37, 1  ;;  %v2450_v6 = vrot.slane %v2449_v39, 2  ;;  %v2457_v61 = vrot.slane %v2456_v45, 4  ;;  %v2757_v46 = vadd.f32 %v2696_v44, %v2435_v34 }
 0x1b0   : >> { %v2464_v13 = vsel %vm998_vm2, %v2344_v28, 0.0  ;;  %v2463_v29 = vsel %vm998_vm2, %v2343_v2, 0.0  ;;  %v2699_v12 = vrot.slane %v7243_v32, 7  ;;  %v2057_v2 = vld [vmem:[#allocation4 + $0x190] sm:$0xff] }
 0x1b1   : >> { %v2444_v59 = vadd.f32 %v2443_v60, %v2442_v37  ;;  %v2451_v15 = vadd.f32 %v2450_v6, %v2449_v39  ;;  %v2458_v38 = vadd.f32 %v2457_v61, %v2456_v45  ;;  %v2465_v19 = vadd.f32 %v2464_v13, %v2463_v29  ;;  %v2150_v40 = vpop.permute.xlu1 %2149  ;;  %v2146_v49 = vpop.permute.xlu0 %2145 }
 0x1b2   : >> { %v2346_v7 = vmul.f32 %v2150_v40, %v2026_v36  ;;  %v2345_v48 = vmul.f32 %v2146_v49, %v2025_v47  ;;  %v2822_v37 = vsel %vm2821_vm6, %v2820_v31, %v2819_v11  ;;  %v8525_v40 = vld [vmem:[#allocation22_spill] sm:$0xff] }
 0x1b3   : >> { %v2758_v43 = vadd.f32 %v2697_v20, %v2444_v59  ;;  %v2452_v9 = vrot.slane %v2451_v15, 1  ;;  %v2459_v26 = vrot.slane %v2458_v38, 2  ;;  %v2466_v63 = vrot.slane %v2465_v19, 4 }
 0x1b4   : >> { %v2473_v56 = vsel %vm998_vm2, %v2346_v7, 0.0  ;;  %v2472_v53 = vsel %vm998_vm2, %v2345_v48, 0.0  ;;  %v2826_v20 = vrot.slane %v2757_v46, 4  ;;  %v2825_v55 = vsel %vm2824_vm7, %v2823_v54, %v2822_v37 }
 0x1b5   : >> { %v2453_v57 = vadd.f32 %v2452_v9, %v2451_v15  ;;  %v2460_v22 = vadd.f32 %v2459_v26, %v2458_v38  ;;  %v2467_v42 = vadd.f32 %v2466_v63, %v2465_v19  ;;  %v2210_v16 = vpop.permute.xlu1 %2209  ;;  %v2154_v44 = vpop.permute.xlu0 %2153  ;;  %v2474_v18 = vadd.f32 %v2473_v56, %v2472_v53  ;;  %v2044_v56 = vld [vmem:[#allocation4 + $0x128] sm:$0xff]  ;;  %v2043_v53 = vld [vmem:[#allocation4 + $0x120] sm:$0xff] }
 0x1b6   : >> { %v2829_v21 = vrot.slane %v2758_v43, 3  ;;  %v2361_v45 = vmul.f32 %v2210_v16, %v2041_v35  ;;  %v2828_v52 = vsel %vm2827_vm8, %v2826_v20, %v2825_v55  ;;  %v2347_v47 = vmul.f32 %v2154_v44, %v2027_v50 }
 0x1b7   : >> { %v2759_v14 = vadd.f32 %v2698_v41, %v2453_v57  ;;  %v2461_v23 = vrot.slane %v2460_v22, 1  ;;  %v2468_v24 = vrot.slane %v2467_v42, 2  ;;  %v2475_v39 = vrot.slane %v2474_v18, 4 }
 0x1b8   : >> { %v2831_v61 = vsel %vm2830_vm9, %v2829_v21, %v2828_v52  ;;  %v2544_v29 = vsel %vm998_vm2, %v2361_v45, 0.0  ;;  %v7277_v49 = vmul.f32 %v8524_v25, %v8525_v40  ;;  %v2481_v31 = vsel %vm998_vm2, %v2347_v47, 0.0 }
 0x1b9   : >> { %v2832_v62 = vrot.slane %v2759_v14, 2  ;;  %v2462_v34 = vadd.f32 %v2461_v23, %v2460_v22  ;;  %v2274_v28 = vpop.permute.xlu1 %2273  ;;  %v2214_v32 = vpop.permute.xlu0 %2213  ;;  %v2469_v41 = vadd.f32 %v2468_v24, %v2467_v42  ;;  %v2476_v60 = vadd.f32 %v2475_v39, %v2474_v18  ;;  %v2060_v24 = vld [vmem:[#allocation4 + $0x1a8] sm:$0xff] }
 0x1ba   : >> { %v2362_v6 = vmul.f32 %v2214_v32, %v2042_v27  ;;  %v2377_v59 = vmul.f32 %v2274_v28, %v2057_v2  ;;  %v2700_v58 = vrot.slane %v7277_v49, 1  ;;  %v2059_v27 = vld [vmem:[#allocation4 + $0x1a0] sm:$0xff] }
 0x1bb   : >> { %v2760_v36 = vadd.f32 %v2699_v12, %v2462_v34  ;;  %v2477_v13 = vrot.slane %v2476_v60, 2  ;;  %v2834_v38 = vsel %vm2833_vm10, %v2832_v62, %v2831_v61  ;;  %v2470_v48 = vrot.slane %v2469_v41, 1  ;;  %v2030_v61 = vld [vmem:[#allocation4 + $0xb8] sm:$0xff] }
 0x1bc   : >> { %v2545_v15 = vsel %vm998_vm2, %v2362_v6, 0.0  ;;  %v2616_v57 = vsel %vm998_vm2, %v2377_v59, 0.0 }
 0x1bd   : >> { %v2835_v19 = vrot.slane %v2760_v36, 1  ;;  %v2546_v17 = vadd.f32 %v2545_v15, %v2544_v29  ;;  %v2158_v46 = vpop.permute.xlu1 %2157  ;;  %v2278_v7 = vpop.permute.xlu0 %2277  ;;  %v2478_v43 = vadd.f32 %v2477_v13, %v2476_v60  ;;  %v2471_v12 = vadd.f32 %v2470_v48, %v2469_v41  ;;  %v2029_v36 = vld [vmem:[#allocation4 + $0xb0] sm:$0xff] }
 0x1be   : >> { %v2348_v9 = vmul.f32 %v2158_v46, %v2028_v51  ;;  %v2378_v26 = vmul.f32 %v2278_v7, %v2058_v10  ;;  %v2701_v48 = vrot.slane %v7277_v49, 2 }
 0x1bf   : >> { %v2837_v63 = vsel %vm2836_vm11, %v2835_v19, %v2834_v38  ;;  %v2479_v54 = vrot.slane %v2478_v43, 1  ;;  %v2547_v16 = vrot.slane %v2546_v17, 4  ;;  %v2761_v2 = vadd.f32 %v7277_v49, %v2471_v12 }
 0x1c0   : >> { %2885 = vst.msk [vmem:[%s7273_s29] sm:$0xff] %vm998_vm2, %v2837_v63  ;;  %v2482_v22 = vsel %vm998_vm2, %v2348_v9, 0.0  ;;  %v2617_v42 = vsel %vm998_vm2, %v2378_v26, 0.0  ;;  %v2040_v9 = vld [vmem:[#allocation4 + $0x108] sm:$0xff]  ;;  %v2039_v26 = vld [vmem:[#allocation4 + $0x100] sm:$0xff]  ;;  %v7302_v12 = vmul.f32 %v8524_v25, %v7083_v3 }
 0x1c1   : >> { %v2483_v35 = vadd.f32 %v2482_v22, %v2481_v31  ;;  %v2618_v44 = vadd.f32 %v2617_v42, %v2616_v57  ;;  %v2222_v11 = vpop.permute.xlu1 %2221  ;;  %v2218_v20 = vpop.permute.xlu0 %2217  ;;  %v2480_v18 = vadd.f32 %v2479_v54, %v2478_v43  ;;  %v2548_v50 = vadd.f32 %v2547_v16, %v2546_v17 }
 0x1c2   : >> { %v2364_v21 = vmul.f32 %v2222_v11, %v2044_v56  ;;  %v2363_v14 = vmul.f32 %v2218_v20, %v2043_v53  ;;  %v7298_v53 = vmul.f32 %v8524_v25, %v7014_v30 }
 0x1c3   : >> { %v2484_v23 = vrot.slane %v2483_v35, 4  ;;  %v2762_v37 = vadd.f32 %v2700_v58, %v2480_v18  ;;  %v2549_v13 = vrot.slane %v2548_v50, 2  ;;  %v2619_v19 = vrot.slane %v2618_v44, 4 }
 0x1c4   : >> { %v2554_v39 = vsel %vm998_vm2, %v2364_v21, 0.0  ;;  %v2553_v45 = vsel %vm998_vm2, %v2363_v14, 0.0  ;;  %v2046_v21 = vld [vmem:[#allocation4 + $0x138] sm:$0xff]  ;;  %v2045_v14 = vld [vmem:[#allocation4 + $0x130] sm:$0xff] }
 0x1c5   : >> { %v2485_v55 = vadd.f32 %v2484_v23, %v2483_v35  ;;  %v2555_v62 = vadd.f32 %v2554_v39, %v2553_v45  ;;  %v2286_v34 = vpop.permute.xlu1 %2285  ;;  %v2282_v28 = vpop.permute.xlu0 %2281  ;;  %v2838_v32 = vrot.slane %v2762_v37, 7  ;;  %v2550_v56 = vadd.f32 %v2549_v13, %v2548_v50 }
 0x1c6   : >> { %v2380_v52 = vmul.f32 %v2286_v34, %v2060_v24  ;;  %v2379_v41 = vmul.f32 %v2282_v28, %v2059_v27  ;;  %v2620_v42 = vadd.f32 %v2619_v19, %v2618_v44  ;;  %v2707_v44 = vrot.slane %v7298_v53, 1 }
 0x1c7   : >> { %v2486_v60 = vrot.slane %v2485_v55, 2  ;;  %v2556_v6 = vrot.slane %v2555_v62, 4  ;;  %v2839_v47 = vsel %vm2818_vm5, %v2838_v32, %v2761_v2  ;;  %v2551_v37 = vrot.slane %v2550_v56, 1 }
 0x1c8   : >> { %v2626_v51 = vsel %vm998_vm2, %v2380_v52, 0.0  ;;  %v2625_v10 = vsel %vm998_vm2, %v2379_v41, 0.0  ;;  %v2714_v32 = vrot.slane %v7302_v12, 1 }
 0x1c9   : >> { %v2487_v29 = vadd.f32 %v2486_v60, %v2485_v55  ;;  %v2557_v59 = vadd.f32 %v2556_v6, %v2555_v62  ;;  %v2166_v15 = vpop.permute.xlu1 %2165  ;;  %v2162_v38 = vpop.permute.xlu0 %2161  ;;  %v2627_v40 = vadd.f32 %v2626_v51, %v2625_v10  ;;  %v2621_v62 = vrot.slane %v2620_v42, 2  ;;  %v2056_v60 = vld [vmem:[#allocation4 + $0x188] sm:$0xff]  ;;  %v2055_v6 = vld [vmem:[#allocation4 + $0x180] sm:$0xff] }
 0x1ca   : >> { %v2350_v17 = vmul.f32 %v2166_v15, %v2030_v61  ;;  %v2349_v46 = vmul.f32 %v2162_v38, %v2029_v36  ;;  %v2552_v13 = vadd.f32 %v2551_v37, %v2550_v56 }
 0x1cb   : >> { %v2488_v7 = vrot.slane %v2487_v29, 1  ;;  %v2558_v43 = vrot.slane %v2557_v59, 2  ;;  %v2628_v63 = vrot.slane %v2627_v40, 4  ;;  %v2622_v19 = vadd.f32 %v2621_v62, %v2620_v42 }
 0x1cc   : >> { %v2491_v58 = vsel %vm998_vm2, %v2350_v17, 0.0  ;;  %v2490_v31 = vsel %vm998_vm2, %v2349_v46, 0.0 }
 0x1cd   : >> { %v2489_v54 = vadd.f32 %v2488_v7, %v2487_v29  ;;  %v2206_v57 = vpop.permute.xlu1 %2205  ;;  %v2202_v22 = vpop.permute.xlu0 %2201  ;;  %v2492_v16 = vadd.f32 %v2491_v58, %v2490_v31  ;;  %v2559_v18 = vadd.f32 %v2558_v43, %v2557_v59  ;;  %v2629_v23 = vadd.f32 %v2628_v63, %v2627_v40  ;;  %v2061_v63 = vld [vmem:[#allocation4 + $0x1b0] sm:$0xff] }
 0x1ce   : >> { %v2360_v35 = vmul.f32 %v2206_v57, %v2040_v9  ;;  %v2359_v11 = vmul.f32 %v2202_v22, %v2039_v26  ;;  %v2708_v29 = vrot.slane %v7298_v53, 2  ;;  %v2062_v26 = vld [vmem:[#allocation4 + $0x1b8] sm:$0xff]  ;;  %v2770_v57 = vadd.f32 %v2707_v44, %v2552_v13 }
 0x1cf   : >> { %v2763_v20 = vadd.f32 %v2701_v48, %v2489_v54  ;;  %v2493_v24 = vrot.slane %v2492_v16, 4  ;;  %v2560_v52 = vrot.slane %v2559_v18, 1  ;;  %v2630_v61 = vrot.slane %v2629_v23, 2 }
 0x1d0   : >> { %v2536_v30 = vsel %vm998_vm2, %v2360_v35, 0.0  ;;  %v2535_v27 = vsel %vm998_vm2, %v2359_v11, 0.0  ;;  %v2702_v48 = vrot.slane %v7277_v49, 3 }
 0x1d1   : >> { %v2840_v39 = vrot.slane %v2763_v20, 6  ;;  %v2537_v45 = vadd.f32 %v2536_v30, %v2535_v27  ;;  %v2230_v50 = vpop.permute.xlu1 %2229  ;;  %v2226_v55 = vpop.permute.xlu0 %2225  ;;  %v2494_v34 = vadd.f32 %v2493_v24, %v2492_v16  ;;  %v2561_v7 = vadd.f32 %v2560_v52, %v2559_v18 }
 0x1d2   : >> { %v2366_v3 = vmul.f32 %v2230_v50, %v2046_v21  ;;  %v2365_v28 = vmul.f32 %v2226_v55, %v2045_v14  ;;  %v2631_v58 = vadd.f32 %v2630_v61, %v2629_v23  ;;  %v2623_v20 = vrot.slane %v2622_v19, 1 }
 0x1d3   : >> { %v7308_v2 = vsel %vm2821_vm6, %v2840_v39, %v2839_v47  ;;  %v2538_v41 = vrot.slane %v2537_v45, 4  ;;  %v2495_v36 = vrot.slane %v2494_v34, 2  ;;  %v2771_v24 = vadd.f32 %v2708_v29, %v2561_v7 }
 0x1d4   : >> { %v2563_v51 = vsel %vm998_vm2, %v2366_v3, 0.0  ;;  %v2562_v10 = vsel %vm998_vm2, %v2365_v28, 0.0  ;;  %v2632_v23 = vrot.slane %v2631_v58, 1  ;;  %v2852_v52 = vrot.slane %v2770_v57, 7 }
 0x1d5   : >> { %v2539_v59 = vadd.f32 %v2538_v41, %v2537_v45  ;;  %v2564_v15 = vadd.f32 %v2563_v51, %v2562_v10  ;;  %v2270_v38 = vpop.permute.xlu1 %2269  ;;  %v2266_v47 = vpop.permute.xlu0 %2265  ;;  %v2496_v40 = vadd.f32 %v2495_v36, %v2494_v34  ;;  %v2624_v41 = vadd.f32 %v2623_v20, %v2622_v19 }
 0x1d6   : >> { %v2376_v17 = vmul.f32 %v2270_v38, %v2056_v60  ;;  %v2375_v46 = vmul.f32 %v2266_v47, %v2055_v6  ;;  %v2709_v6 = vrot.slane %v7298_v53, 3  ;;  %v2854_v13 = vrot.slane %v2771_v24, 6 }
 0x1d7   : >> { %v2540_v43 = vrot.slane %v2539_v59, 2  ;;  %v2565_v9 = vrot.slane %v2564_v15, 4  ;;  %v2497_v31 = vrot.slane %v2496_v40, 1  ;;  %v2633_v29 = vadd.f32 %v2632_v23, %v2631_v58  ;;  %v2031_v58 = vld [vmem:[#allocation4 + $0xc0] sm:$0xff] }
 0x1d8   : >> { %v2608_v56 = vsel %vm998_vm2, %v2376_v17, 0.0  ;;  %v2607_v54 = vsel %vm998_vm2, %v2375_v46, 0.0 }
 0x1d9   : >> { %v2541_v22 = vadd.f32 %v2540_v43, %v2539_v59  ;;  %v2566_v16 = vadd.f32 %v2565_v9, %v2564_v15  ;;  %v2609_v42 = vadd.f32 %v2608_v56, %v2607_v54  ;;  %v2294_v35 = vpop.permute.xlu1 %2293  ;;  %v2290_v11 = vpop.permute.xlu0 %2289  ;;  %v2498_v18 = vadd.f32 %v2497_v31, %v2496_v40 }
 0x1da   : >> { %v2382_v21 = vmul.f32 %v2294_v35, %v2062_v26  ;;  %v2381_v14 = vmul.f32 %v2290_v11, %v2061_v63  ;;  %v2715_v59 = vrot.slane %v7302_v12, 2  ;;  %v2778_v43 = vadd.f32 %v2714_v32, %v2624_v41  ;;  %v2049_v41 = vld [vmem:[#allocation4 + $0x150] sm:$0xff] }
 0x1db   : >> { %v2542_v30 = vrot.slane %v2541_v22, 1  ;;  %v2567_v27 = vrot.slane %v2566_v16, 2  ;;  %v2610_v37 = vrot.slane %v2609_v42, 4  ;;  %v2764_v39 = vadd.f32 %v2702_v48, %v2498_v18  ;;  %v2032_v48 = vld [vmem:[#allocation4 + $0xc8] sm:$0xff] }
 0x1dc   : >> { %v2635_v45 = vsel %vm998_vm2, %v2382_v21, 0.0  ;;  %v2634_v50 = vsel %vm998_vm2, %v2381_v14, 0.0  ;;  %v2779_v31 = vadd.f32 %v2715_v59, %v2633_v29  ;;  %v2866_v11 = vrot.slane %v2778_v43, 7  ;;  %v2034_v21 = vld [vmem:[#allocation4 + $0xd8] sm:$0xff]  ;;  %v2033_v14 = vld [vmem:[#allocation4 + $0xd0] sm:$0xff] }
 0x1dd   : >> { %v2543_v44 = vadd.f32 %v2542_v30, %v2541_v22  ;;  %v2568_v55 = vadd.f32 %v2567_v27, %v2566_v16  ;;  %v2611_v62 = vadd.f32 %v2610_v37, %v2609_v42  ;;  %v2636_v34 = vadd.f32 %v2635_v45, %v2634_v50  ;;  %v2174_v3 = vpop.permute.xlu1 %2173  ;;  %v2170_v28 = vpop.permute.xlu0 %2169  ;;  %v2048_v30 = vld [vmem:[#allocation4 + $0x148] sm:$0xff] }
 0x1de   : >> { %v2842_v60 = vrot.slane %v2764_v39, 5  ;;  %v2352_v57 = vmul.f32 %v2174_v3, %v2032_v48  ;;  %v2716_v42 = vrot.slane %v7302_v12, 3  ;;  %v2351_v35 = vmul.f32 %v2170_v28, %v2031_v58  ;;  %v2047_v39 = vld [vmem:[#allocation4 + $0x140] sm:$0xff] }
 0x1df   : >> { %v2769_v61 = vadd.f32 %v7298_v53, %v2543_v44  ;;  %v2569_v36 = vrot.slane %v2568_v55, 1  ;;  %v2612_v51 = vrot.slane %v2611_v62, 2  ;;  %v2637_v10 = vrot.slane %v2636_v34, 4 }
 0x1e0   : >> { %v7324_v15 = vsel %vm2824_vm7, %v2842_v60, %v7308_v2  ;;  %v2868_v24 = vrot.slane %v2779_v31, 6  ;;  %v2500_v23 = vsel %vm998_vm2, %v2352_v57, 0.0 }
 0x1e1   : >> { %v2853_v38 = vsel %vm2818_vm5, %v2852_v52, %v2769_v61  ;;  %v2570_v47 = vadd.f32 %v2569_v36, %v2568_v55  ;;  %v2613_v19 = vadd.f32 %v2612_v51, %v2611_v62  ;;  %v2638_v40 = vadd.f32 %v2637_v10, %v2636_v34  ;;  %v2238_v17 = vpop.permute.xlu1 %2237  ;;  %v2234_v46 = vpop.permute.xlu0 %2233  ;;  %v2050_v52 = vld [vmem:[#allocation4 + $0x158] sm:$0xff]  ;;  %v2064_v36 = vld [vmem:[#allocation4 + $0x1c8] sm:$0xff]  ;;  %v2063_v51 = vld [vmem:[#allocation4 + $0x1c0] sm:$0xff] }
 0x1e2   : >> { %v2855_v7 = vsel %vm2821_vm6, %v2854_v13, %v2853_v38  ;;  %v2499_v55 = vsel %vm998_vm2, %v2351_v35, 0.0  ;;  %v2368_v28 = vmul.f32 %v2238_v17, %v2048_v30  ;;  %v2367_v60 = vmul.f32 %v2234_v46, %v2047_v39  ;;  %v2066_v17 = vld [vmem:[#allocation4 + $0x1d8] sm:$0xff]  ;;  %v2035_v35 = vld [vmem:[#allocation4 + $0xe0] sm:$0xff] }
 0x1e3   : >> { %v2772_v9 = vadd.f32 %v2709_v6, %v2570_v47  ;;  %v2614_v26 = vrot.slane %v2613_v19, 1  ;;  %v2639_v63 = vrot.slane %v2638_v40, 2  ;;  %v2501_v61 = vadd.f32 %v2500_v23, %v2499_v55 }
 0x1e4   : >> { %v2571_v46 = vsel %vm998_vm2, %v2367_v60, 0.0  ;;  %v2703_v23 = vrot.slane %v7277_v49, 4 }
 0x1e5   : >> { %v2856_v2 = vrot.slane %v2772_v9, 5  ;;  %v2615_v56 = vadd.f32 %v2614_v26, %v2613_v19  ;;  %v2640_v54 = vadd.f32 %v2639_v63, %v2638_v40  ;;  %v2302_v22 = vpop.permute.xlu1 %2301  ;;  %v2298_v16 = vpop.permute.xlu0 %2297  ;;  %v2572_v40 = vsel %vm998_vm2, %v2368_v28, 0.0 }
 0x1e6   : >> { %v2384_v48 = vmul.f32 %v2302_v22, %v2064_v36  ;;  %v2383_v43 = vmul.f32 %v2298_v16, %v2063_v51  ;;  %v2502_v26 = vrot.slane %v2501_v61, 4  ;;  %v2573_v57 = vadd.f32 %v2572_v40, %v2571_v46  ;;  %v2068_v40 = vld [vmem:[#allocation4 + $0x1e8] sm:$0xff] }
 0x1e7   : >> { %v7332_v20 = vsel %vm2824_vm7, %v2856_v2, %v2855_v7  ;;  %v2777_v32 = vadd.f32 %v7302_v12, %v2615_v56  ;;  %v2641_v18 = vrot.slane %v2640_v54, 1  ;;  %v2065_v7 = vld [vmem:[#allocation4 + $0x1d0] sm:$0xff]  ;;  %v2710_v28 = vrot.slane %v7298_v53, 4 }
 0x1e8   : >> { %v2503_v16 = vadd.f32 %v2502_v26, %v2501_v61  ;;  %v2574_v39 = vrot.slane %v2573_v57, 4  ;;  %v2704_v51 = vrot.slane %v7277_v49, 5  ;;  %v2718_v26 = vrot.slane %v7302_v12, 5 }
 0x1e9   : >> { %v2867_v27 = vsel %vm2818_vm5, %v2866_v11, %v2777_v32  ;;  %v2642_v37 = vadd.f32 %v2641_v18, %v2640_v54  ;;  %v2182_v45 = vpop.permute.xlu1 %2181  ;;  %v2178_v50 = vpop.permute.xlu0 %2177  ;;  %v2644_v11 = vsel %vm998_vm2, %v2384_v48, 0.0  ;;  %v2643_v32 = vsel %vm998_vm2, %v2383_v43, 0.0 }
 0x1ea   : >> { %v2869_v44 = vsel %vm2821_vm6, %v2868_v24, %v2867_v27  ;;  %v2354_v62 = vmul.f32 %v2182_v45, %v2034_v21  ;;  %v2353_v34 = vmul.f32 %v2178_v50, %v2033_v14  ;;  %v2645_v45 = vadd.f32 %v2644_v11, %v2643_v32  ;;  %v2052_v50 = vld [vmem:[#allocation4 + $0x168] sm:$0xff] }
 0x1eb   : >> { %v2780_v3 = vadd.f32 %v2716_v42, %v2642_v37  ;;  %v2036_v42 = vld [vmem:[#allocation4 + $0xe8] sm:$0xff]  ;;  %v2504_v36 = vrot.slane %v2503_v16, 2 }
 0x1ec   : >> { %v2509_v10 = vsel %vm998_vm2, %v2354_v62, 0.0  ;;  %v2508_v13 = vsel %vm998_vm2, %v2353_v34, 0.0 }
 0x1ed   : >> { %v2870_v6 = vrot.slane %v2780_v3, 5  ;;  %v2246_v29 = vpop.permute.xlu1 %2245  ;;  %v2242_v59 = vpop.permute.xlu0 %2241  ;;  %v2510_v9 = vadd.f32 %v2509_v10, %v2508_v13 }
 0x1ee   : >> { %v2370_v38 = vmul.f32 %v2246_v29, %v2050_v52  ;;  %v2369_v47 = vmul.f32 %v2242_v59, %v2049_v41  ;;  %v2717_v52 = vrot.slane %v7302_v12, 4  ;;  %v2575_v29 = vadd.f32 %v2574_v39, %v2573_v57 }
 0x1ef   : >> { %v7342_v19 = vsel %vm2824_vm7, %v2870_v6, %v2869_v44  ;;  %v2511_v18 = vrot.slane %v2510_v9, 4  ;;  %v2051_v44 = vld [vmem:[#allocation4 + $0x160] sm:$0xff]  ;;  %v2646_v59 = vrot.slane %v2645_v45, 4 }
 0x1f0   : >> { %v2581_v63 = vsel %vm998_vm2, %v2370_v38, 0.0  ;;  %v2580_v58 = vsel %vm998_vm2, %v2369_v47, 0.0  ;;  %v2711_v38 = vrot.slane %v7298_v53, 5 }
 0x1f1   : >> { %v2310_v31 = vpop.permute.xlu1 %2309  ;;  %v2306_v2 = vpop.permute.xlu0 %2305  ;;  %v2582_v22 = vadd.f32 %v2581_v63, %v2580_v58  ;;  %v2512_v55 = vadd.f32 %v2511_v18, %v2510_v9  ;;  %v2647_v11 = vadd.f32 %v2646_v59, %v2645_v45 }
 0x1f2   : >> { %v2386_v56 = vmul.f32 %v2310_v31, %v2066_v17  ;;  %v2385_v54 = vmul.f32 %v2306_v2, %v2065_v7  ;;  %v2067_v17 = vld [vmem:[#allocation4 + $0x1e0] sm:$0xff] }
 0x1f3   : >> { %v2583_v62 = vrot.slane %v2582_v22, 4  ;;  %v2513_v7 = vrot.slane %v2512_v55, 2 }
 0x1f4   : >> { %v2653_v24 = vsel %vm998_vm2, %v2386_v56, 0.0  ;;  %v2652_v30 = vsel %vm998_vm2, %v2385_v54, 0.0  ;;  %v2505_v56 = vadd.f32 %v2504_v36, %v2503_v16  ;;  %v2705_v54 = vrot.slane %v7277_v49, 6 }
 0x1f5   : >> { %v2190_v21 = vpop.permute.xlu1 %2189  ;;  %v2186_v14 = vpop.permute.xlu0 %2185  ;;  %v2654_v41 = vadd.f32 %v2653_v24, %v2652_v30  ;;  %v2584_v46 = vadd.f32 %v2583_v62, %v2582_v22  ;;  %v2038_v22 = vld [vmem:[#allocation4 + $0xf8] sm:$0xff] }
 0x1f6   : >> { %v2356_v27 = vmul.f32 %v2190_v21, %v2036_v42  ;;  %v2355_v37 = vmul.f32 %v2186_v14, %v2035_v35  ;;  %v2576_v35 = vrot.slane %v2575_v29, 2  ;;  %v2037_v21 = vld [vmem:[#allocation4 + $0xf0] sm:$0xff]  ;;  %v2514_v14 = vadd.f32 %v2513_v7, %v2512_v55 }
 0x1f7   : >> { %v2655_v9 = vrot.slane %v2654_v41, 4  ;;  %v2585_v24 = vrot.slane %v2584_v46, 2 }
 0x1f8   : >> { %v2518_v34 = vsel %vm998_vm2, %v2356_v27, 0.0  ;;  %v2517_v3 = vsel %vm998_vm2, %v2355_v37, 0.0  ;;  %v2515_v59 = vrot.slane %v2514_v14, 1 }
 0x1f9   : >> { %v2519_v60 = vadd.f32 %v2518_v34, %v2517_v3  ;;  %v2254_v6 = vpop.permute.xlu1 %2253  ;;  %v2250_v61 = vpop.permute.xlu0 %2249  ;;  %v2656_v37 = vadd.f32 %v2655_v9, %v2654_v41  ;;  %v2506_v34 = vrot.slane %v2505_v56, 1  ;;  %v2712_v3 = vrot.slane %v7298_v53, 6 }
 0x1fa   : >> { %v2372_v10 = vmul.f32 %v2254_v6, %v2052_v50  ;;  %v2371_v13 = vmul.f32 %v2250_v61, %v2051_v44  ;;  %v2577_v6 = vadd.f32 %v2576_v35, %v2575_v29  ;;  %v2648_v61 = vrot.slane %v2647_v11, 2 }
 0x1fb   : >> { %v2520_v47 = vrot.slane %v2519_v60, 4  ;;  %v2719_v29 = vrot.slane %v7302_v12, 6 }
 0x1fc   : >> { %v2590_v48 = vsel %vm998_vm2, %v2372_v10, 0.0  ;;  %v2589_v43 = vsel %vm998_vm2, %v2371_v13, 0.0  ;;  %v2054_v10 = vld [vmem:[#allocation4 + $0x178] sm:$0xff]  ;;  %v2053_v13 = vld [vmem:[#allocation4 + $0x170] sm:$0xff] }
 0x1fd   : >> { %v2521_v63 = vadd.f32 %v2520_v47, %v2519_v60  ;;  %v2591_v58 = vadd.f32 %v2590_v48, %v2589_v43  ;;  %v2318_v31 = vpop.permute.xlu1 %2317  ;;  %v2314_v2 = vpop.permute.xlu0 %2313  ;;  %v2586_v47 = vadd.f32 %v2585_v24, %v2584_v46  ;;  %v2070_v46 = vld [vmem:[#allocation4 + $0x1f8] sm:$0xff] }
 0x1fe   : >> { %v2388_v57 = vmul.f32 %v2318_v31, %v2068_v40  ;;  %v2387_v42 = vmul.f32 %v2314_v2, %v2067_v17  ;;  %v2657_v17 = vrot.slane %v2656_v37, 2 }
 0x1ff   : >> { %v2522_v32 = vrot.slane %v2521_v63, 2  ;;  %v2592_v18 = vrot.slane %v2591_v58, 4 }
 0x200   : >> { %v2662_v30 = vsel %vm998_vm2, %v2388_v57, 0.0  ;;  %v2661_v27 = vsel %vm998_vm2, %v2387_v42, 0.0  ;;  %v2578_v57 = vrot.slane %v2577_v6, 1 }
 0x201   : >> { %v2523_v39 = vadd.f32 %v2522_v32, %v2521_v63  ;;  %v2593_v50 = vadd.f32 %v2592_v18, %v2591_v58  ;;  %v2663_v16 = vadd.f32 %v2662_v30, %v2661_v27  ;;  %v2198_v44 = vpop.permute.xlu1 %2197  ;;  %v2194_v62 = vpop.permute.xlu0 %2193  ;;  %v2507_v58 = vadd.f32 %v2506_v34, %v2505_v56  ;;  %v2069_v18 = vld [vmem:[#allocation4 + $0x1f0] sm:$0xff] }
 0x202   : >> { %v2358_v45 = vmul.f32 %v2198_v44, %v2038_v22  ;;  %v2357_v60 = vmul.f32 %v2194_v62, %v2037_v21  ;;  %v2649_v22 = vadd.f32 %v2648_v61, %v2647_v11  ;;  %v2516_v21 = vadd.f32 %v2515_v59, %v2514_v14 }
 0x203   : >> { %v2594_v36 = vrot.slane %v2593_v50, 2  ;;  %v2664_v55 = vrot.slane %v2663_v16, 4  ;;  %v2524_v7 = vrot.slane %v2523_v39, 1  ;;  %v2587_v27 = vrot.slane %v2586_v47, 1 }
 0x204   : >> { %v2527_v41 = vsel %vm998_vm2, %v2358_v45, 0.0  ;;  %v2526_v40 = vsel %vm998_vm2, %v2357_v60, 0.0  ;;  %v2650_v61 = vrot.slane %v2649_v22, 1 }
 0x205   : >> { %v2665_v48 = vadd.f32 %v2664_v55, %v2663_v16  ;;  %v2528_v43 = vadd.f32 %v2527_v41, %v2526_v40  ;;  %v2262_v9 = vpop.permute.xlu1 %2261  ;;  %v2258_v63 = vpop.permute.xlu0 %2257  ;;  %v2595_v42 = vadd.f32 %v2594_v36, %v2593_v50  ;;  %v2658_v16 = vadd.f32 %v2657_v17, %v2656_v37 }
 0x206   : >> { %v2374_v31 = vmul.f32 %v2262_v9, %v2054_v10  ;;  %v2373_v2 = vmul.f32 %v2258_v63, %v2053_v13  ;;  %v2525_v44 = vadd.f32 %v2524_v7, %v2523_v39  ;;  %v2765_v36 = vadd.f32 %v2703_v23, %v2507_v58 }
 0x207   : >> { %v2666_v35 = vrot.slane %v2665_v48, 2  ;;  %v2529_v32 = vrot.slane %v2528_v43, 4  ;;  %v2579_v10 = vadd.f32 %v2578_v57, %v2577_v6  ;;  %v2596_v11 = vrot.slane %v2595_v42, 1 }
 0x208   : >> { %v2599_v24 = vsel %vm998_vm2, %v2374_v31, 0.0  ;;  %v2598_v30 = vsel %vm998_vm2, %v2373_v2, 0.0  ;;  %v2766_v39 = vadd.f32 %v2704_v51, %v2516_v21  ;;  %v2659_v41 = vrot.slane %v2658_v16, 1 }
 0x209   : >> { %v2530_v56 = vadd.f32 %v2529_v32, %v2528_v43  ;;  %v2326_v62 = vpop.permute.xlu1 %2325  ;;  %v2322_v34 = vpop.permute.xlu0 %2321  ;;  %v2667_v45 = vadd.f32 %v2666_v35, %v2665_v48  ;;  %v2600_v60 = vadd.f32 %v2599_v24, %v2598_v30  ;;  %v2588_v7 = vadd.f32 %v2587_v27, %v2586_v47 }
 0x20a   : >> { %v2390_v55 = vmul.f32 %v2326_v62, %v2070_v46  ;;  %v2389_v50 = vmul.f32 %v2322_v34, %v2069_v18  ;;  %v2767_v48 = vadd.f32 %v2705_v54, %v2525_v44  ;;  %v2597_v43 = vadd.f32 %v2596_v11, %v2595_v42 }
 0x20b   : >> { %v2531_v14 = vrot.slane %v2530_v56, 2  ;;  %v2601_v13 = vrot.slane %v2600_v60, 4  ;;  %v2668_v23 = vrot.slane %v2667_v45, 1  ;;  %v2706_v63 = vrot.slane %v7277_v49, 7 }
 0x20c   : >> { %v2671_v59 = vsel %vm998_vm2, %v2390_v55, 0.0  ;;  %v2670_v37 = vsel %vm998_vm2, %v2389_v50, 0.0  ;;  %v2844_v31 = vrot.slane %v2765_v36, 4  ;;  %v2773_v2 = vadd.f32 %v2710_v28, %v2579_v10 }
 0x20d   : >> { %v2532_v40 = vadd.f32 %v2531_v14, %v2530_v56  ;;  %v2672_v17 = vadd.f32 %v2671_v59, %v2670_v37  ;;  %v2602_v6 = vadd.f32 %v2601_v13, %v2600_v60  ;;  %v2651_v57 = vadd.f32 %v2650_v61, %v2649_v22 }
 0x20e   : >> { %v2846_v35 = vrot.slane %v2766_v39, 3  ;;  %v2660_v32 = vadd.f32 %v2659_v41, %v2658_v16  ;;  %v2774_v54 = vadd.f32 %v2711_v38, %v2588_v7  ;;  %v2848_v18 = vrot.slane %v2767_v48, 2  ;;  %v7428_v7 = vld [vmem:[%s6442_s16 + $0x18] sm:$0xff] (%p355_p8)  ;;  %v7431_v48 = vld [vmem:[%s6447_s27 + $0x1] ss:$0 sm:$0xff] (%p355_p8) }
 0x20f   : >> { %v2533_v9 = vrot.slane %v2532_v40, 1  ;;  %v2673_v58 = vrot.slane %v2672_v17, 4  ;;  %v2603_v51 = vrot.slane %v2602_v6, 2  ;;  %v2669_v21 = vadd.f32 %v2668_v23, %v2667_v45  ;;  %8526 = vst [vmem:[#allocation23_spill] sm:$0xff] (%p355_p8), %v7431_v48  ;;  %v7434_v23 = vld [vmem:[%s6452_s30 + $0x1] ss:$0 sm:$0xff] (%p355_p8) }
 0x210   : >> { %v2775_v49 = vadd.f32 %v2712_v3, %v2597_v43  ;;  %v2713_v30 = vrot.slane %v7298_v53, 7  ;;  %v2845_v28 = vsel %vm2827_vm8, %v2844_v31, %v7324_v15  ;;  %v2858_v22 = vrot.slane %v2773_v2, 4  ;;  %8527 = vst [vmem:[#allocation24_spill] sm:$0xff] (%p355_p8), %v7434_v23 }
 0x211   : >> { %v2534_v46 = vadd.f32 %v2533_v9, %v2532_v40  ;;  %v2674_v47 = vadd.f32 %v2673_v58, %v2672_v17  ;;  %v2604_v42 = vadd.f32 %v2603_v51, %v2602_v6  ;;  %v2781_v16 = vadd.f32 %v2717_v52, %v2651_v57 }
 0x212   : >> { %v2847_v38 = vsel %vm2830_vm9, %v2846_v35, %v2845_v28  ;;  %v2782_v56 = vadd.f32 %v2718_v26, %v2660_v32  ;;  %v2860_v34 = vrot.slane %v2774_v54, 3  ;;  %v2783_v45 = vadd.f32 %v2719_v29, %v2669_v21 }
 0x213   : >> { %v2768_v24 = vadd.f32 %v2706_v63, %v2534_v46  ;;  %v2675_v27 = vrot.slane %v2674_v47, 2  ;;  %v2605_v44 = vrot.slane %v2604_v42, 1  ;;  %v2849_v53 = vsel %vm2833_vm10, %v2848_v18, %v2847_v38 }
 0x214   : >> { %v2862_v60 = vrot.slane %v2775_v49, 2  ;;  %v2720_v52 = vrot.slane %v7302_v12, 7  ;;  %v2872_v36 = vrot.slane %v2781_v16, 4  ;;  %v2859_v10 = vsel %vm2827_vm8, %v2858_v22, %v7332_v20 }
 0x215   : >> { %v2850_v62 = vrot.slane %v2768_v24, 1  ;;  %v2676_v3 = vadd.f32 %v2675_v27, %v2674_v47  ;;  %v2606_v15 = vadd.f32 %v2605_v44, %v2604_v42  ;;  %v2874_v11 = vrot.slane %v2782_v56, 3 }
 0x216   : >> { %v2861_v29 = vsel %vm2830_vm9, %v2860_v34, %v2859_v10  ;;  %v2876_v61 = vrot.slane %v2783_v45, 2  ;;  %v2873_v12 = vsel %vm2827_vm8, %v2872_v36, %v7342_v19  ;;  %v7425_v19 = vld [vmem:[%s6442_s16 + $0x10] sm:$0xff] (%p355_p8)  ;;  %v7436_v6 = vmov (%p355_p8), 0.0  }
 0x217   : >> { %v2851_v55 = vsel %vm2836_vm11, %v2850_v62, %v2849_v53  ;;  %v2677_v50 = vrot.slane %v2676_v3, 1  ;;  %v2776_v26 = vadd.f32 %v2713_v30, %v2606_v15  ;;  %v2863_v59 = vsel %vm2833_vm10, %v2862_v60, %v2861_v29 }
 0x218   : >> { %2886 = vst.msk [vmem:[%s7273_s29 + $0x8] sm:$0xff] %vm998_vm2, %v2851_v55  ;;  %v2875_v41 = vsel %vm2830_vm9, %v2874_v11, %v2873_v12  ;;  %v7438_v43 = vmov (%p355_p8), 0.0  }
 0x219   : >> { %v2678_v14 = vadd.f32 %v2677_v50, %v2676_v3  ;;  %v2864_v13 = vrot.slane %v2776_v26, 1  ;;  %v2877_v20 = vsel %vm2833_vm10, %v2876_v61, %v2875_v41 }
 0x21a   : > { %357 = sbr.rel (!%p355_p8) target bundleno = 29 (0x1d), region = 154 }
 0x21b   : >> { %v2784_v37 = vadd.f32 %v2720_v52, %v2678_v14  ;;  %v2865_v39 = vsel %vm2836_vm11, %v2864_v13, %v2863_v59 }
 0x21c   : >> { %2887 = vst.msk [vmem:[%s7273_s29 + $0x10] sm:$0xff] %vm998_vm2, %v2865_v39 }
 0x21d   : >> { %v2878_v40 = vrot.slane %v2784_v37, 1 }
 0x21f   : >> { %v2879_v17 = vsel %vm2836_vm11, %v2878_v40, %v2877_v20 }
 0x220   : >> { %2888 = vst.msk [vmem:[%s7273_s29 + $0x18] sm:$0xff] %vm998_vm2, %v2879_v17 }
 0x221 LB: >> { %v8528_v23 = vld [vmem:[#allocation24_spill] sm:$0xff]  ;;  %s5804_s16 = sshll.u32 %s6354_s26, 5  ;;  %v8530_v25 = vld [vmem:[#allocation8_spill] sm:$0xff]  ;;  %v8531_v57 = vld [vmem:[#allocation9_spill] sm:$0xff]  ;;  %s8068_s11 = smov 0   ;;  %v6346_v6 = vphi %v7436_v6, %v8566_v6   ;;  %s6354_s26 = sphi %s7440_s26, %s2901_s26   ;;  %v6350_v43 = vphi %v7438_v43, %v8567_v43  }
 0x222   : >> { %s5805_s27 = sadd.s32 32, %s5804_s16  ;;  %v8529_v1 = vld [vmem:[#allocation7_spill] sm:$0xff]  ;;  %v8532_v54 = vld [vmem:[#allocation10_spill] sm:$0xff]  ;;  %v8534_v30 = vld [vmem:[#allocation12_spill] sm:$0xff] }
 0x223   : >> { %s7452_s30 = ssub.s32 64, %s5805_s27  ;;  %v8533_v42 = vld [vmem:[#allocation11_spill] sm:$0xff]  ;;  %v8535_v44 = vld [vmem:[#allocation13_spill] sm:$0xff] }
 0x224   : >> { %s2912_s7 = sshra.s32 %s7452_s30, 3  ;;  %s7719_s9 = scalar_lea.vmem %s6432_s10, %s7452_s30 }
 0x225   : >> { %s5806_s8 = sshll.u32 %s2912_s7, 4 }
 0x226   : >> { %s7456_s6 = scalar_lea.vmem %s6437_s13, %s5806_s8 }
 0x227   : >> { %v2917_v0 = vld [vmem:[%s7456_s6 + $0x8] sm:$0xff]  ;;  %v7473_v63 = vld [vmem:[%s7456_s6 + $0x18] sm:$0xff] }
 0x228   : >> { %v7460_v4 = vrot.slane %v2917_v0, %v8529_v1  ;;  %v7463_v5 = vrot.slane %v2917_v0, %v6493_v8  ;;  %v7470_v9 = vrot.slane %v2917_v0, %v8530_v25  ;;  %v2927_v58 = vadd.f32 %v8528_v23, %v2917_v0  ;;  %v7497_v24 = vld [vmem:[%s7456_s6 + $0x28] sm:$0xff] }
 0x229   : >> { %v7478_v31 = vadd.f32 %v8528_v23, %v7473_v63  ;;  %v7483_v51 = vrot.slane %v2917_v0, %v8531_v57  ;;  %v7489_v18 = vrot.slane %v2917_v0, %v8532_v54  ;;  %v7494_v49 = vrot.slane %v2917_v0, %v8533_v42 }
 0x22a   : >> { %3830 = vbcast.lane.b32.xlu1 %v7460_v4, 320  ;;  %3818 = vbcast.lane.b32.xlu0 %v7463_v5, 320  ;;  %v2935_v2 = vand.u32 2147483647, %v2927_v58  ;;  %v7502_v27 = vrot.slane %v2917_v0, %v8534_v30  ;;  %v7506_v28 = vadd.f32 %v8528_v23, %v7497_v24  ;;  %v7511_v38 = vrot.slane %v2917_v0, %v8535_v44 }
 0x22b   : >> { %v2936_v35 = vand.u32 2147483647, %v7478_v31  ;;  %v7518_v53 = vrot.slane %v7473_v63, %v6493_v8  ;;  %v7524_v60 = vrot.slane %v7473_v63, %v8529_v1  ;;  %v7530_v10 = vrot.slane %v7473_v63, %v8530_v25 }
 0x22c   : >> { %v2939_v32 = vsub.f32 0.0, %v2935_v2  ;;  %v2937_v62 = vand.u32 2147483647, %v7506_v28  ;;  %v2931_v11 = vmax.f32 %v2927_v58, 0.0  ;;  %v7536_v13 = vrot.slane %v7473_v63, %v8531_v57 }
 0x22d   : >> { %v2940_v46 = vsub.f32 0.0, %v2936_v35  ;;  %v7546_v40 = vrot.slane %v7473_v63, %v8532_v54 }
 0x22e   : >> { %3834 = vbcast.lane.b32.xlu1 %v7460_v4, 328  ;;  %3822 = vbcast.lane.b32.xlu0 %v7463_v5, 328  ;;  %v2943_v47 = vmul.f32 1.442695, %v2939_v32  ;;  %v2941_v45 = vsub.f32 0.0, %v2937_v62  ;;  %v7566_v62 = vrot.slane %v7473_v63, %v8533_v42 }
 0x22f   : >> { %v2945_v21 = vmul.f32 1.442695, %v2940_v46 }
 0x230   : >> { %6088 = vpow2.f32 %v2943_v47  ;;  %v2947_v50 = vmul.f32 1.442695, %v2941_v45 }
 0x231   : >> { %6090 = vpow2.f32 %v2945_v21 }
 0x232   : >> { %3846 = vbcast.lane.b32.xlu1 %v7470_v9, 328  ;;  %3842 = vbcast.lane.b32.xlu0 %v7470_v9, 320 }
 0x236   : >> { %3858 = vbcast.lane.b32.xlu1 %v7483_v51, 328  ;;  %3854 = vbcast.lane.b32.xlu0 %v7483_v51, 320 }
 0x23a   : >> { %3870 = vbcast.lane.b32.xlu1 %v7489_v18, 328  ;;  %3866 = vbcast.lane.b32.xlu0 %v7489_v18, 320  ;;  %v6089_v22 = vpop.eup %6088 }
 0x23b   : >> { %v6091_v16 = vpop.eup %6090  ;;  %v2951_v56 = vadd.f32 1.0, %v6089_v22  ;;  %v2954_v3 = vmul.f32 -0.5, %v6089_v22  ;;  %v2957_v55 = vand.u32 2147483647, %v6089_v22 }
 0x23c   : >> { %v2960_v34 = vadd.f32 1.0, %v6091_v16  ;;  %v2963_v36 = vmul.f32 -0.5, %v6091_v16  ;;  %v2966_v12 = vand.u32 2147483647, %v6091_v16 }
 0x23d   : >> { %6092 = vlog2.f32 %v2951_v56  ;;  %v2955_v15 = vadd.f32 1.0, %v2954_v3  ;;  %vm2958_vm12 = vcmp.lt.f32.partialorder %v2957_v55, 0.0004427343  ;;  %v2932_v56 = vmax.f32 %v7478_v31, 0.0 }
 0x23e   : >> { %3882 = vbcast.lane.b32.xlu1 %v7494_v49, 328  ;;  %3878 = vbcast.lane.b32.xlu0 %v7494_v49, 320  ;;  %6094 = vlog2.f32 %v2960_v34  ;;  %v2964_v61 = vadd.f32 1.0, %v2963_v36  ;;  %vm7552_vm13 = vcmp.lt.f32.partialorder %v2966_v12, 0.0004427343 }
 0x23f   : >> { %v2956_v52 = vmul.f32 %v6089_v22, %v2955_v15  ;;  %6096 = vpow2.f32 %v2947_v50  ;;  %v7576_v50 = vrot.slane %v7473_v63, %v8534_v30 }
 0x240   : >> { %v2965_v20 = vmul.f32 %v6091_v16, %v2964_v61 }
 0x241   : >> { %8538 = vst [vmem:[#allocation25_spill] sm:$0xff] %v7576_v50 }
 0x242   : >> { %3894 = vbcast.lane.b32.xlu1 %v7502_v27, 328  ;;  %3890 = vbcast.lane.b32.xlu0 %v7502_v27, 320 }
 0x246   : >> { %3906 = vbcast.lane.b32.xlu1 %v7511_v38, 328  ;;  %3902 = vbcast.lane.b32.xlu0 %v7511_v38, 320 }
 0x247   : >> { %v6093_v26 = vpop.eup %6092 }
 0x248   : >> { %v2953_v14 = vmul.f32 0.6931472, %v6093_v26  ;;  %v6095_v37 = vpop.eup %6094 }
 0x249   : >> { %v2962_v2 = vmul.f32 0.6931472, %v6095_v37  ;;  %v7556_v32 = vpop.eup %6096 }
 0x24a   : >> { %3918 = vbcast.lane.b32.xlu1 %v7518_v53, 328  ;;  %3914 = vbcast.lane.b32.xlu0 %v7518_v53, 320  ;;  %v2959_v29 = vsel %vm2958_vm12, %v2956_v52, %v2953_v14  ;;  %v2969_v31 = vadd.f32 1.0, %v7556_v32 }
 0x24b   : >> { %v7538_v59 = vadd.f32 %v2959_v29, %v2931_v11  ;;  %v2968_v34 = vsel %vm7552_vm13, %v2965_v20, %v2962_v2 }
 0x24c   : >> { %v7582_v29 = vadd.f32 %v2968_v34, %v2932_v56  ;;  %6098 = vlog2.f32 %v2969_v31  ;;  %v7610_v31 = vrot.slane %v7497_v24, %v6493_v8 }
 0x24d   : >> { %v2995_v39 = vcombine.high %v7538_v59, %v7538_v59  ;;  %v3002_v41 = vrot.slane %v7538_v59, %v6629_v33 }
 0x24e   : >> { %3930 = vbcast.lane.b32.xlu1 %v7524_v60, 328  ;;  %3926 = vbcast.lane.b32.xlu0 %v7524_v60, 320  ;;  %v3044_v2 = vcombine.high %v7582_v29, %v7582_v29  ;;  %v3051_v34 = vrot.slane %v7582_v29, %v6629_v33 }
 0x24f   : >> { %v3009_v17 = vrot.slane %v2995_v39, %v6629_v33  ;;  %v3010_v0 = vcombine.high %v3002_v41, %v3002_v41  ;;  %v3018_v58 = vrot.slane %v3002_v41, %v6629_v33  ;;  %v7591_v41 = vrot.slane %v7473_v63, %v8535_v44 }
 0x251   : >> { %v3011_v46 = vcombine.high %v3009_v17, %v3009_v17  ;;  %v3032_v47 = vrot.slane %v3010_v0, %v6629_v33  ;;  %v3040_v21 = vcombine.high %v3018_v58, %v3018_v58  ;;  %v3025_v22 = vrot.slane %v3009_v17, %v6629_v33  ;;  %8539 = vst [vmem:[#allocation26_spill] sm:$0xff] %v7591_v41 }
 0x252   : >> { %3942 = vbcast.lane.b32.xlu1 %v7530_v10, 328  ;;  %3938 = vbcast.lane.b32.xlu0 %v7530_v10, 320  ;;  %v3194_v16 = vrot.slane %v3018_v58, %v6493_v8 }
 0x253   : >> { %v3042_v3 = vcombine.high %v3032_v47, %v3032_v47  ;;  %v3198_v45 = vrot.slane %v3032_v47, %v6493_v8  ;;  %v3202_v15 = vrot.slane %v3040_v21, %v6493_v8  ;;  %v3039_v52 = vrot.slane %v3011_v46, %v6629_v33 }
 0x254   : >> { %v3351_v55 = vmul.f32 %v7425_v19, %v3194_v16  ;;  %v3041_v26 = vcombine.high %v3025_v22, %v3025_v22  ;;  %v3352_v11 = vmul.f32 %v7428_v7, %v3194_v16  ;;  %v3210_v61 = vrot.slane %v3025_v22, %v6493_v8 }
 0x255   : >> { %v3206_v36 = vrot.slane %v3042_v3, %v6493_v8  ;;  %v3353_v14 = vmul.f32 %v7425_v19, %v3198_v45  ;;  %v3354_v37 = vmul.f32 %v7428_v7, %v3198_v45  ;;  %v3355_v12 = vmul.f32 %v7425_v19, %v3202_v15 }
 0x256   : >> { %3954 = vbcast.lane.b32.xlu1 %v7536_v13, 328  ;;  %3950 = vbcast.lane.b32.xlu0 %v7536_v13, 320  ;;  %v3415_v39 = vmul.f32 1.442695, %v3351_v55  ;;  %v3356_v20 = vmul.f32 %v7428_v7, %v3202_v15  ;;  %v3043_v17 = vcombine.high %v3039_v52, %v3039_v52  ;;  %v3214_v0 = vrot.slane %v3039_v52, %v6493_v8 }
 0x257   : >> { %v3357_v58 = vmul.f32 %v7425_v19, %v3206_v36  ;;  %v3358_v35 = vmul.f32 %v7428_v7, %v3206_v36  ;;  %v3417_v46 = vmul.f32 1.442695, %v3352_v11  ;;  %v3419_v47 = vmul.f32 1.442695, %v3353_v14 }
 0x258   : >> { %6100 = vpow2.f32 %v3415_v39  ;;  %v3218_v63 = vrot.slane %v3041_v26, %v6493_v8  ;;  %v3359_v21 = vmul.f32 %v7425_v19, %v3210_v61  ;;  %v3421_v22 = vmul.f32 1.442695, %v3354_v37 }
 0x259   : >> { %v3423_v16 = vmul.f32 1.442695, %v3355_v12  ;;  %v3360_v56 = vmul.f32 %v7428_v7, %v3210_v61  ;;  %6102 = vpow2.f32 %v3417_v46  ;;  %v3425_v3 = vmul.f32 1.442695, %v3356_v20 }
 0x25a   : >> { %3966 = vbcast.lane.b32.xlu1 %v7546_v40, 328  ;;  %3962 = vbcast.lane.b32.xlu0 %v7546_v40, 320  ;;  %v3222_v45 = vrot.slane %v3043_v17, %v6493_v8  ;;  %v3361_v15 = vmul.f32 %v7425_v19, %v3214_v0  ;;  %6104 = vpow2.f32 %v3419_v47  ;;  %v3427_v55 = vmul.f32 1.442695, %v3357_v58 }
 0x25b   : >> { %v3362_v52 = vmul.f32 %v7428_v7, %v3214_v0  ;;  %6106 = vpow2.f32 %v3421_v22  ;;  %v3429_v36 = vmul.f32 1.442695, %v3358_v35  ;;  %v3363_v26 = vmul.f32 %v7425_v19, %v3218_v63  ;;  %v6099_v0 = vpop.eup %6098 }
 0x25c   : >> { %6108 = vpow2.f32 %v3423_v16  ;;  %v3431_v11 = vmul.f32 1.442695, %v3359_v21  ;;  %v3058_v14 = vrot.slane %v3044_v2, %v6629_v33  ;;  %v3364_v61 = vmul.f32 %v7428_v7, %v3218_v63 }
 0x25d   : >> { %6110 = vpow2.f32 %v3425_v3  ;;  %v3433_v37 = vmul.f32 1.442695, %v3360_v56  ;;  %v3059_v12 = vcombine.high %v3051_v34, %v3051_v34  ;;  %v3365_v39 = vmul.f32 %v7425_v19, %v3222_v45 }
 0x25e   : >> { %3978 = vbcast.lane.b32.xlu1 %v7566_v62, 328  ;;  %3974 = vbcast.lane.b32.xlu0 %v7566_v62, 320  ;;  %6112 = vpow2.f32 %v3427_v55  ;;  %v3435_v20 = vmul.f32 1.442695, %v3361_v15  ;;  %v3067_v17 = vrot.slane %v3051_v34, %v6629_v33  ;;  %v3366_v58 = vmul.f32 %v7428_v7, %v3222_v45 }
 0x25f   : >> { %6114 = vpow2.f32 %v3429_v36  ;;  %v3437_v35 = vmul.f32 1.442695, %v3362_v52  ;;  %v7625_v2 = vrot.slane %v7497_v24, %v8529_v1  ;;  %v3439_v46 = vmul.f32 1.442695, %v3363_v26 }
 0x260   : >> { %6116 = vpow2.f32 %v3431_v11  ;;  %v2972_v47 = vmul.f32 -0.5, %v7556_v32  ;;  %v3441_v21 = vmul.f32 1.442695, %v3364_v61  ;;  %v3081_v22 = vrot.slane %v3059_v12, %v6629_v33 }
 0x261   : >> { %6118 = vpow2.f32 %v3433_v37  ;;  %v3089_v16 = vcombine.high %v3067_v17, %v3067_v17  ;;  %v3443_v56 = vmul.f32 1.442695, %v3365_v39  ;;  %v3060_v3 = vcombine.high %v3058_v14, %v3058_v14 }
 0x262   : >> { %3990 = vbcast.lane.b32.xlu1 %v7576_v50, 328  ;;  %3986 = vbcast.lane.b32.xlu0 %v7576_v50, 320  ;;  %v6101_v63 = vpop.eup %6100  ;;  %6120 = vpow2.f32 %v3435_v20  ;;  %v7632_v45 = vrot.slane %v7497_v24, %v8530_v25  ;;  %v3445_v15 = vmul.f32 1.442695, %v3366_v58  ;;  %v3091_v55 = vcombine.high %v3081_v22, %v3081_v22 }
 0x263   : >> { %3544 = vst.msk [vmem:[#allocation2] sm:$0xff] %vm998_vm2, %v6101_v63  ;;  %v6103_v34 = vpop.eup %6102  ;;  %6122 = vpow2.f32 %v3437_v35  ;;  %v3226_v36 = vrot.slane %v3067_v17, %v6493_v8  ;;  %v3230_v26 = vrot.slane %v3081_v22, %v6493_v8  ;;  %v2973_v11 = vadd.f32 1.0, %v2972_v47 }
 0x264   : >> { %v6105_v52 = vpop.eup %6104  ;;  %6124 = vpow2.f32 %v3439_v46  ;;  %3545 = vst.msk [vmem:[#allocation2 + $0x8] sm:$0xff] %vm998_vm2, %v6103_v34  ;;  %v3074_v37 = vrot.slane %v3058_v14, %v6629_v33  ;;  %v3234_v12 = vrot.slane %v3089_v16, %v6493_v8  ;;  %v2975_v39 = vand.u32 2147483647, %v7556_v32 }
 0x265   : >> { %v6107_v61 = vpop.eup %6106  ;;  %6126 = vpow2.f32 %v3441_v21  ;;  %3546 = vst.msk [vmem:[#allocation2 + $0x10] sm:$0xff] %vm998_vm2, %v6105_v52  ;;  %v7645_v58 = vrot.slane %v7497_v24, %v8531_v57  ;;  %v3088_v17 = vrot.slane %v3060_v3, %v6629_v33  ;;  %v3238_v14 = vrot.slane %v3091_v55, %v6493_v8 }
 0x266   : >> { %4002 = vbcast.lane.b32.xlu1 %v7591_v41, 328  ;;  %3998 = vbcast.lane.b32.xlu0 %v7591_v41, 320  ;;  %v6109_v20 = vpop.eup %6108  ;;  %6128 = vpow2.f32 %v3443_v56  ;;  %3547 = vst.msk [vmem:[#allocation2 + $0x18] sm:$0xff] %vm998_vm2, %v6107_v61  ;;  %v3367_v46 = vmul.f32 %v7425_v19, %v3226_v36  ;;  %v3368_v47 = vmul.f32 %v7428_v7, %v3226_v36  ;;  %v2971_v16 = vmul.f32 0.6931472, %v6099_v0 }
 0x267   : >> { %v6111_v35 = vpop.eup %6110  ;;  %6130 = vpow2.f32 %v3445_v15  ;;  %3548 = vst.msk [vmem:[#allocation2 + $0x20] sm:$0xff] %vm998_vm2, %v6109_v20  ;;  %v3369_v21 = vmul.f32 %v7425_v19, %v3230_v26  ;;  %v3370_v22 = vmul.f32 %v7428_v7, %v3230_v26  ;;  %v2974_v56 = vmul.f32 %v7556_v32, %v2973_v11 }
 0x268   : >> { %v6113_v63 = vpop.eup %6112  ;;  %3549 = vst.msk [vmem:[#allocation2 + $0x28] sm:$0xff] %vm998_vm2, %v6111_v35  ;;  %v3090_v34 = vcombine.high %v3074_v37, %v3074_v37  ;;  %v3242_v15 = vrot.slane %v3074_v37, %v6493_v8  ;;  %v3371_v55 = vmul.f32 %v7425_v19, %v3234_v12  ;;  %vm7662_vm14 = vcmp.lt.f32.partialorder %v2975_v39, 0.0004427343 }
 0x269   : >> { %v6115_v3 = vpop.eup %6114  ;;  %3550 = vst.msk [vmem:[#allocation2 + $0x30] sm:$0xff] %vm998_vm2, %v6113_v63  ;;  %v7668_v61 = vrot.slane %v7497_v24, %v8532_v54  ;;  %v3092_v32 = vcombine.high %v3088_v17, %v3088_v17  ;;  %v3372_v0 = vmul.f32 %v7428_v7, %v3234_v12  ;;  %v2933_v26 = vmax.f32 %v7506_v28, 0.0 }
 0x26a   : >> { %4014 = vbcast.lane.b32.xlu1 %v7610_v31, 328  ;;  %4010 = vbcast.lane.b32.xlu0 %v7610_v31, 320  ;;  %v6117_v36 = vpop.eup %6116  ;;  %3551 = vst.msk [vmem:[#allocation2 + $0x38] sm:$0xff] %vm998_vm2, %v6115_v3  ;;  %v3246_v37 = vrot.slane %v3088_v17, %v6493_v8  ;;  %v3373_v39 = vmul.f32 %v7425_v19, %v3238_v14  ;;  %v3447_v20 = vmul.f32 1.442695, %v3367_v46 }
 0x26b   : >> { %v6119_v11 = vpop.eup %6118  ;;  %3552 = vst.msk [vmem:[#allocation2 + $0x40] sm:$0xff] %vm998_vm2, %v6117_v36  ;;  %v3449_v35 = vmul.f32 1.442695, %v3368_v47  ;;  %v3374_v12 = vmul.f32 %v7428_v7, %v3238_v14  ;;  %v3451_v3 = vmul.f32 1.442695, %v3369_v21  ;;  %v2977_v36 = vsel %vm7662_vm14, %v2974_v56, %v2971_v16 }
 0x26c   : >> { %v6121_v63 = vpop.eup %6120  ;;  %3553 = vst.msk [vmem:[#allocation2 + $0x48] sm:$0xff] %vm998_vm2, %v6119_v11  ;;  %v3453_v28 = vmul.f32 1.442695, %v3370_v22  ;;  %v3250_v17 = vrot.slane %v3090_v34, %v6493_v8  ;;  %v3375_v46 = vmul.f32 %v7425_v19, %v3242_v15  ;;  %6132 = vpow2.f32 %v3447_v20 }
 0x26d   : >> { %v6123_v48 = vpop.eup %6122  ;;  %3554 = vst.msk [vmem:[#allocation2 + $0x50] sm:$0xff] %vm998_vm2, %v6121_v63  ;;  %v3455_v47 = vmul.f32 1.442695, %v3371_v55  ;;  %v7687_v11 = vrot.slane %v7497_v24, %v8533_v42  ;;  %v3376_v14 = vmul.f32 %v7428_v7, %v3242_v15  ;;  %6134 = vpow2.f32 %v3449_v35 }
 0x26e   : >> { %4026 = vbcast.lane.b32.xlu1 %v7625_v2, 328  ;;  %4022 = vbcast.lane.b32.xlu0 %v7625_v2, 320  ;;  %v6125_v41 = vpop.eup %6124  ;;  %3555 = vst.msk [vmem:[#allocation2 + $0x58] sm:$0xff] %vm998_vm2, %v6123_v48  ;;  %v3457_v21 = vmul.f32 1.442695, %v3372_v0  ;;  %v3254_v16 = vrot.slane %v3092_v32, %v6493_v8  ;;  %v3377_v56 = vmul.f32 %v7425_v19, %v3246_v37  ;;  %6136 = vpow2.f32 %v3451_v3 }
 0x26f   : >> { %v6127_v22 = vpop.eup %6126  ;;  %3556 = vst.msk [vmem:[#allocation2 + $0x60] sm:$0xff] %vm998_vm2, %v6125_v41  ;;  %v3459_v34 = vmul.f32 1.442695, %v3373_v39  ;;  %v3378_v48 = vmul.f32 %v7428_v7, %v3246_v37  ;;  %6138 = vpow2.f32 %v3453_v28  ;;  %v3461_v15 = vmul.f32 1.442695, %v3374_v12 }
 0x270   : >> { %v6129_v55 = vpop.eup %6128  ;;  %3557 = vst.msk [vmem:[#allocation2 + $0x68] sm:$0xff] %vm998_vm2, %v6127_v22  ;;  %v7698_v52 = vadd.f32 %v2977_v36, %v2933_v26  ;;  %v3379_v32 = vmul.f32 %v7425_v19, %v3250_v17  ;;  %6140 = vpow2.f32 %v3455_v47  ;;  %v3463_v0 = vmul.f32 1.442695, %v3375_v46 }
 0x271   : >> { %v6131_v41 = vpop.eup %6130  ;;  %3558 = vst.msk [vmem:[#allocation2 + $0x70] sm:$0xff] %vm998_vm2, %v6129_v55  ;;  %v3380_v39 = vmul.f32 %v7428_v7, %v3250_v17  ;;  %6142 = vpow2.f32 %v3457_v21  ;;  %v3465_v20 = vmul.f32 1.442695, %v3376_v14  ;;  %v7708_v26 = vrot.slane %v7497_v24, %v8534_v30 }
 0x272   : >> { %4038 = vbcast.lane.b32.xlu1 %v7632_v45, 328  ;;  %4034 = vbcast.lane.b32.xlu0 %v7632_v45, 320  ;;  %3559 = vst.msk [vmem:[#allocation2 + $0x78] sm:$0xff] %vm998_vm2, %v6131_v41  ;;  %v3093_v37 = vcombine.high %v7698_v52, %v7698_v52  ;;  %v3381_v35 = vmul.f32 %v7425_v19, %v3254_v16  ;;  %6144 = vpow2.f32 %v3459_v34  ;;  %v3467_v63 = vmul.f32 1.442695, %v3377_v56 }
 0x273   : >> { %8542 = vst [vmem:[#allocation27_spill] sm:$0xff] %v7708_v26  ;;  %v3382_v12 = vmul.f32 %v7428_v7, %v3254_v16  ;;  %6146 = vpow2.f32 %v3461_v15  ;;  %v3469_v3 = vmul.f32 1.442695, %v3378_v48  ;;  %v3100_v28 = vrot.slane %v7698_v52, %v6629_v33  ;;  %v7730_v48 = vld [vmem:[%s7456_s6 + $0x38] sm:$0xff] }
 0x274   : >> { %6148 = vpow2.f32 %v3463_v0  ;;  %v3471_v36 = vmul.f32 1.442695, %v3379_v32  ;;  %v3107_v17 = vrot.slane %v3093_v37, %v6629_v33  ;;  %v3473_v46 = vmul.f32 1.442695, %v3380_v39  ;;  %v7735_v0 = vld [vmem:[%s7719_s9] sm:$0xff] }
 0x275   : >> { %6150 = vpow2.f32 %v3465_v20  ;;  %v3108_v47 = vcombine.high %v3100_v28, %v3100_v28  ;;  %v3475_v21 = vmul.f32 1.442695, %v3381_v35  ;;  %v3116_v22 = vrot.slane %v3100_v28, %v6629_v33  ;;  %8544 = vst [vmem:[#allocation29_spill] sm:$0xff] %v7735_v0 }
 0x276   : >> { %4050 = vbcast.lane.b32.xlu1 %v7645_v58, 328  ;;  %4046 = vbcast.lane.b32.xlu0 %v7645_v58, 320  ;;  %v6133_v14 = vpop.eup %6132  ;;  %6152 = vpow2.f32 %v3467_v63  ;;  %v7726_v56 = vrot.slane %v7497_v24, %v8535_v44  ;;  %v3477_v34 = vmul.f32 1.442695, %v3382_v12  ;;  %v3109_v15 = vcombine.high %v3107_v17, %v3107_v17 }
 0x277   : >> { %v6135_v16 = vpop.eup %6134  ;;  %6154 = vpow2.f32 %v3469_v3  ;;  %3560 = vst.msk [vmem:[#allocation2 + $0x80] sm:$0xff] %vm998_vm2, %v6133_v14  ;;  %v3130_v41 = vrot.slane %v3108_v47, %v6629_v33  ;;  %v3138_v24 = vcombine.high %v3116_v22, %v3116_v22  ;;  %v3258_v39 = vrot.slane %v3116_v22, %v6493_v8 }
 0x278   : >> { %8543 = vst [vmem:[#allocation28_spill] sm:$0xff] %v7726_v56  ;;  %v6137_v55 = vpop.eup %6136  ;;  %6156 = vpow2.f32 %v3471_v36  ;;  %3561 = vst.msk [vmem:[#allocation2 + $0x88] sm:$0xff] %vm998_vm2, %v6135_v16  ;;  %v3123_v37 = vrot.slane %v3107_v17, %v6629_v33  ;;  %v7745_v12 = vrot.slane %v7730_v48, %v6493_v8  ;;  %v7752_v17 = vmul.f32 %v7538_v59, %v7735_v0 }
 0x279   : >> { %v6139_v32 = vpop.eup %6138  ;;  %6158 = vpow2.f32 %v3473_v46  ;;  %3562 = vst.msk [vmem:[#allocation2 + $0x90] sm:$0xff] %vm998_vm2, %v6137_v55  ;;  %v3140_v35 = vcombine.high %v3130_v41, %v3130_v41  ;;  %v3262_v3 = vrot.slane %v3130_v41, %v6493_v8  ;;  %v3266_v28 = vrot.slane %v3138_v24, %v6493_v8 }
 0x27a   : >> { %4062 = vbcast.lane.b32.xlu1 %v7668_v61, 328  ;;  %4058 = vbcast.lane.b32.xlu0 %v7668_v61, 320  ;;  %v6141_v20 = vpop.eup %6140  ;;  %6160 = vpow2.f32 %v3475_v21  ;;  %3563 = vst.msk [vmem:[#allocation2 + $0x98] sm:$0xff] %vm998_vm2, %v6139_v32  ;;  %v3137_v46 = vrot.slane %v3109_v15, %v6629_v33  ;;  %v3383_v21 = vmul.f32 %v7425_v19, %v3258_v39 }
 0x27b   : >> { %v6143_v63 = vpop.eup %6142  ;;  %6162 = vpow2.f32 %v3477_v34  ;;  %3564 = vst.msk [vmem:[#allocation2 + $0xa0] sm:$0xff] %vm998_vm2, %v6141_v20  ;;  %v3270_v47 = vrot.slane %v3140_v35, %v6493_v8  ;;  %v3384_v22 = vmul.f32 %v7428_v7, %v3258_v39  ;;  %v3385_v16 = vmul.f32 %v7425_v19, %v3262_v3 }
 0x27c   : >> { %v6145_v36 = vpop.eup %6144  ;;  %3565 = vst.msk [vmem:[#allocation2 + $0xa8] sm:$0xff] %vm998_vm2, %v6143_v63  ;;  %v3139_v59 = vcombine.high %v3123_v37, %v3123_v37  ;;  %v3274_v55 = vrot.slane %v3123_v37, %v6493_v8  ;;  %v3386_v41 = vmul.f32 %v7428_v7, %v3262_v3  ;;  %v3387_v15 = vmul.f32 %v7425_v19, %v3266_v28 }
 0x27d   : >> { %v6147_v14 = vpop.eup %6146  ;;  %3566 = vst.msk [vmem:[#allocation2 + $0xb0] sm:$0xff] %vm998_vm2, %v6145_v36  ;;  %v7769_v24 = vrot.slane %v7730_v48, %v8529_v1  ;;  %v3388_v39 = vmul.f32 %v7428_v7, %v3266_v28  ;;  %v3479_v20 = vmul.f32 1.442695, %v3383_v21  ;;  %v7775_v37 = vadd.f32 %v8528_v23, %v7730_v48 }
 0x27e   : >> { %4074 = vbcast.lane.b32.xlu1 %v7687_v11, 328  ;;  %4070 = vbcast.lane.b32.xlu0 %v7687_v11, 320  ;;  %v6149_v34 = vpop.eup %6148  ;;  %3567 = vst.msk [vmem:[#allocation2 + $0xb8] sm:$0xff] %vm998_vm2, %v6147_v14  ;;  %v3623_v63 = vrot.slane %v7752_v17, %v6629_v33  ;;  %v3141_v3 = vcombine.high %v3137_v46, %v3137_v46  ;;  %v3481_v21 = vmul.f32 1.442695, %v3384_v22 }
 0x27f   : >> { %v6151_v32 = vpop.eup %6150  ;;  %3568 = vst.msk [vmem:[#allocation2 + $0xc0] sm:$0xff] %vm998_vm2, %v6149_v34  ;;  %v3278_v36 = vrot.slane %v3137_v46, %v6493_v8  ;;  %v3389_v14 = vmul.f32 %v7425_v19, %v3270_v47  ;;  %v3390_v28 = vmul.f32 %v7428_v7, %v3270_v47  ;;  %6164 = vpow2.f32 %v3479_v20 }
 0x280   : >> { %v6153_v35 = vpop.eup %6152  ;;  %3569 = vst.msk [vmem:[#allocation2 + $0xc8] sm:$0xff] %vm998_vm2, %v6151_v32  ;;  %v3483_v34 = vmul.f32 1.442695, %v3385_v16  ;;  %v3282_v0 = vrot.slane %v3139_v59, %v6493_v8  ;;  %v3391_v32 = vmul.f32 %v7425_v19, %v3274_v55  ;;  %v7791_v47 = vrot.slane %v7730_v48, %v8530_v25 }
 0x281   : >> { %v6155_v1 = vpop.eup %6154  ;;  %3570 = vst.msk [vmem:[#allocation2 + $0xd0] sm:$0xff] %vm998_vm2, %v6153_v35  ;;  %v3392_v22 = vmul.f32 %v7428_v7, %v3274_v55  ;;  %6166 = vpow2.f32 %v3481_v21  ;;  %v3286_v59 = vrot.slane %v3141_v3, %v6493_v8  ;;  %v3394_v35 = vmul.f32 %v7428_v7, %v3278_v36 }
 0x282   : >> { %4086 = vbcast.lane.b32.xlu1 %v7708_v26, 328  ;;  %4082 = vbcast.lane.b32.xlu0 %v7708_v26, 320  ;;  %v6157_v23 = vpop.eup %6156  ;;  %3571 = vst.msk [vmem:[#allocation2 + $0xd8] sm:$0xff] %vm998_vm2, %v6155_v1  ;;  %v3487_v26 = vmul.f32 1.442695, %v3387_v15  ;;  %6168 = vpow2.f32 %v3483_v34  ;;  %v3631_v21 = vcombine.high %v3623_v63, %v3623_v63 }
 0x283   : >> { %v6159_v46 = vpop.eup %6158  ;;  %3572 = vst.msk [vmem:[#allocation2 + $0xe0] sm:$0xff] %vm998_vm2, %v6157_v23  ;;  %v3489_v1 = vmul.f32 1.442695, %v3388_v39  ;;  %v3491_v15 = vmul.f32 1.442695, %v3389_v14  ;;  %v3395_v39 = vmul.f32 %v7425_v19, %v3282_v0  ;;  %v7807_v14 = vrot.slane %v7730_v48, %v8531_v57 }
 0x284   : >> { %v6161_v16 = vpop.eup %6160  ;;  %3573 = vst.msk [vmem:[#allocation2 + $0xe8] sm:$0xff] %vm998_vm2, %v6159_v46  ;;  %v3493_v23 = vmul.f32 1.442695, %v3390_v28  ;;  %v2938_v55 = vand.u32 2147483647, %v7775_v37  ;;  %v3397_v28 = vmul.f32 %v7425_v19, %v3286_v59  ;;  %v3398_v46 = vmul.f32 %v7428_v7, %v3286_v59 }
 0x285   : >> { %v6163_v20 = vpop.eup %6162  ;;  %3574 = vst.msk [vmem:[#allocation2 + $0xf0] sm:$0xff] %vm998_vm2, %v6161_v16  ;;  %v3495_v3 = vmul.f32 1.442695, %v3391_v32  ;;  %v7813_v16 = vrot.slane %v3631_v21, %v6629_v33  ;;  %v3503_v25 = vmul.f32 1.442695, %v3395_v39 }
 0x286   : >> { %4098 = vbcast.lane.b32.xlu1 %v7726_v56, 328  ;;  %4094 = vbcast.lane.b32.xlu0 %v7726_v56, 320  ;;  %v3485_v56 = vmul.f32 1.442695, %v3386_v41  ;;  %v3393_v41 = vmul.f32 %v7425_v19, %v3278_v36  ;;  %3575 = vst.msk [vmem:[#allocation2 + $0xf8] sm:$0xff] %vm998_vm2, %v6163_v20  ;;  %v2942_v32 = vsub.f32 0.0, %v2938_v55  ;;  %v3639_v20 = vrot.slane %v3623_v63, %v6629_v33 }
 0x287   : >> { %v3497_v36 = vmul.f32 1.442695, %v3392_v22  ;;  %v3509_v63 = vmul.f32 1.442695, %v3398_v46 }
 0x288   : >> { %6170 = vpow2.f32 %v3485_v56  ;;  %v3396_v56 = vmul.f32 %v7428_v7, %v3282_v0  ;;  %v3499_v34 = vmul.f32 1.442695, %v3393_v41  ;;  %v7820_v0 = vrot.slane %v7730_v48, %v8532_v54 }
 0x289   : >> { %6172 = vpow2.f32 %v3487_v26  ;;  %v3501_v26 = vmul.f32 1.442695, %v3394_v35  ;;  %v6165_v57 = vpop.eup %6164  ;;  %v4199_v35 = vrot.slane %v3639_v20, %v6493_v8  ;;  %v3661_v46 = vcombine.high %v3639_v20, %v3639_v20 }
 0x28a   : >> { %4110 = vbcast.lane.b32.xlu1 %v7745_v12, 328  ;;  %4106 = vbcast.lane.b32.xlu0 %v7745_v12, 320  ;;  %6174 = vpow2.f32 %v3489_v1  ;;  %v3505_v22 = vmul.f32 1.442695, %v3396_v56  ;;  %v3507_v1 = vmul.f32 1.442695, %v3397_v28  ;;  %v3616_v56 = vcombine.high %v7752_v17, %v7752_v17 }
 0x28b   : >> { %6176 = vpow2.f32 %v3491_v15  ;;  %3576 = vst.msk [vmem:[#allocation2 + $0x100] sm:$0xff] %vm998_vm2, %v6165_v57  ;;  %v6167_v59 = vpop.eup %6166  ;;  %v4203_v15 = vrot.slane %v7813_v16, %v6493_v8  ;;  %v7831_v57 = vrot.slane %v7730_v48, %v8533_v42 }
 0x28c   : >> { %6178 = vpow2.f32 %v3493_v23  ;;  %v6169_v41 = vpop.eup %6168  ;;  %3577 = vst.msk [vmem:[#allocation2 + $0x108] sm:$0xff] %vm998_vm2, %v6167_v59  ;;  %v2949_v23 = vmul.f32 1.442695, %v2942_v32  ;;  %v7843_v32 = vrot.slane %v7730_v48, %v8534_v30  ;;  %v3630_v59 = vrot.slane %v3616_v56, %v6629_v33 }
 0x28d   : >> { %6180 = vpow2.f32 %v3495_v3  ;;  %8545 = vst [vmem:[#allocation30_spill] sm:$0xff] %v7831_v57  ;;  %3578 = vst.msk [vmem:[#allocation2 + $0x110] sm:$0xff] %vm998_vm2, %v6169_v41 }
 0x28e   : >> { %4122 = vbcast.lane.b32.xlu1 %v7769_v24, 328  ;;  %4118 = vbcast.lane.b32.xlu0 %v7769_v24, 320  ;;  %6182 = vpow2.f32 %v3497_v36  ;;  %8546 = vst [vmem:[#allocation31_spill] sm:$0xff] %v7843_v32  ;;  %v3646_v56 = vrot.slane %v3630_v59, %v6629_v33 }
 0x28f   : >> { %6184 = vpow2.f32 %v3499_v34 }
 0x290   : >> { %6186 = vpow2.f32 %v3501_v26 }
 0x291   : >> { %6188 = vpow2.f32 %v3503_v25 }
 0x292   : >> { %4134 = vbcast.lane.b32.xlu1 %v7791_v47, 328  ;;  %4130 = vbcast.lane.b32.xlu0 %v7791_v47, 320  ;;  %v6171_v55 = vpop.eup %6170  ;;  %6190 = vpow2.f32 %v3505_v22 }
 0x293   : >> { %v6173_v21 = vpop.eup %6172  ;;  %6192 = vpow2.f32 %v3507_v1  ;;  %3579 = vst.msk [vmem:[#allocation2 + $0x118] sm:$0xff] %vm998_vm2, %v6171_v55  ;;  %v4207_v55 = vrot.slane %v3661_v46, %v6493_v8  ;;  %v3632_v46 = vcombine.high %v3630_v59, %v3630_v59 }
 0x294   : >> { %v6175_v25 = vpop.eup %6174  ;;  %6194 = vpow2.f32 %v3509_v63  ;;  %3580 = vst.msk [vmem:[#allocation2 + $0x120] sm:$0xff] %vm998_vm2, %v6173_v21  ;;  %v3663_v21 = vcombine.high %v7813_v16, %v7813_v16 }
 0x295   : >> { %v6177_v36 = vpop.eup %6176  ;;  %3581 = vst.msk [vmem:[#allocation2 + $0x128] sm:$0xff] %vm998_vm2, %v6175_v25  ;;  %6196 = vpow2.f32 %v2949_v23 }
 0x296   : >> { %4146 = vbcast.lane.b32.xlu1 %v7807_v14, 328  ;;  %4142 = vbcast.lane.b32.xlu0 %v7807_v14, 320  ;;  %v6179_v26 = vpop.eup %6178  ;;  %3582 = vst.msk [vmem:[#allocation2 + $0x130] sm:$0xff] %vm998_vm2, %v6177_v36 }
 0x297   : >> { %v6181_v17 = vpop.eup %6180  ;;  %3583 = vst.msk [vmem:[#allocation2 + $0x138] sm:$0xff] %vm998_vm2, %v6179_v26 }
 0x298   : >> { %v6183_v20 = vpop.eup %6182  ;;  %3584 = vst.msk [vmem:[#allocation2 + $0x140] sm:$0xff] %vm998_vm2, %v6181_v17 }
 0x299   : >> { %v6185_v63 = vpop.eup %6184  ;;  %3585 = vst.msk [vmem:[#allocation2 + $0x148] sm:$0xff] %vm998_vm2, %v6183_v20 }
 0x29a   : >> { %4158 = vbcast.lane.b32.xlu1 %v7820_v0, 328  ;;  %4154 = vbcast.lane.b32.xlu0 %v7820_v0, 320  ;;  %v6187_v25 = vpop.eup %6186  ;;  %3586 = vst.msk [vmem:[#allocation2 + $0x150] sm:$0xff] %vm998_vm2, %v6185_v63 }
 0x29b   : >> { %3587 = vst.msk [vmem:[#allocation2 + $0x158] sm:$0xff] %vm998_vm2, %v6187_v25 }
 0x29c   : >> { %v3831_v39 = vpop.permute.xlu1 %3830  ;;  %v3819_v3 = vpop.permute.xlu0 %3818 }
 0x29d   : >> { %v4358_v28 = vmul.f32 %v4203_v15, %v3831_v39  ;;  %v4356_v34 = vmul.f32 %v4199_v35, %v3819_v3  ;;  %v7859_v39 = vrot.slane %v7730_v48, %v8535_v44 }
 0x29e   : >> { %4170 = vbcast.lane.b32.xlu1 %v7831_v57, 328  ;;  %4166 = vbcast.lane.b32.xlu0 %v7831_v57, 320 }
 0x29f   : >> { %4422 = vst.msk [vmem:[#allocation3 + $0x10] sm:$0xff] %vm998_vm2, %v4358_v28  ;;  %4420 = vst.msk [vmem:[#allocation3] sm:$0xff] %vm998_vm2, %v4356_v34  ;;  %v4211_v34 = vrot.slane %v3663_v21, %v6493_v8 }
 0x2a0   : >> { %v3835_v22 = vpop.permute.xlu1 %3834  ;;  %v3823_v1 = vpop.permute.xlu0 %3822  ;;  %8547 = vst [vmem:[#allocation32_spill] sm:$0xff] %v7859_v39 }
 0x2a1   : >> { %v4359_v41 = vmul.f32 %v4203_v15, %v3835_v22  ;;  %v4357_v23 = vmul.f32 %v4199_v35, %v3823_v1  ;;  %v6189_v15 = vpop.eup %6188 }
 0x2a2   : >> { %4182 = vbcast.lane.b32.xlu1 %v7843_v32, 328  ;;  %4178 = vbcast.lane.b32.xlu0 %v7843_v32, 320  ;;  %v6191_v16 = vpop.eup %6190  ;;  %3588 = vst.msk [vmem:[#allocation2 + $0x160] sm:$0xff] %vm998_vm2, %v6189_v15 }
 0x2a3   : >> { %4423 = vst.msk [vmem:[#allocation3 + $0x18] sm:$0xff] %vm998_vm2, %v4359_v41  ;;  %4421 = vst.msk [vmem:[#allocation3 + $0x8] sm:$0xff] %vm998_vm2, %v4357_v23  ;;  %v6193_v36 = vpop.eup %6192  ;;  %v4215_v41 = vrot.slane %v3646_v56, %v6493_v8  ;;  %v3660_v23 = vrot.slane %v3632_v46, %v6629_v33 }
 0x2a4   : >> { %v3847_v35 = vpop.permute.xlu1 %3846  ;;  %v3843_v3 = vpop.permute.xlu0 %3842  ;;  %3589 = vst.msk [vmem:[#allocation2 + $0x168] sm:$0xff] %vm998_vm2, %v6191_v16  ;;  %3590 = vst.msk [vmem:[#allocation2 + $0x170] sm:$0xff] %vm998_vm2, %v6193_v36 }
 0x2a5   : >> { %v4361_v28 = vmul.f32 %v4207_v55, %v3847_v35  ;;  %v4360_v48 = vmul.f32 %v4207_v55, %v3843_v3  ;;  %v6195_v26 = vpop.eup %6194  ;;  %v7878_v55 = vld [vmem:[%s7719_s9 + $0x8] sm:$0xff]  ;;  %v4219_v36 = vrot.slane %v3660_v23, %v6493_v8 }
 0x2a6   : >> { %4194 = vbcast.lane.b32.xlu1 %v7859_v39, 328  ;;  %4190 = vbcast.lane.b32.xlu0 %v7859_v39, 320  ;;  %v6197_v17 = vpop.eup %6196  ;;  %3591 = vst.msk [vmem:[#allocation2 + $0x178] sm:$0xff] %vm998_vm2, %v6195_v26  ;;  %8548 = vst [vmem:[#allocation33_spill] sm:$0xff] %v7878_v55  ;;  %v3609_v16 = vmul.f32 %v7582_v29, %v7878_v55 }
 0x2a7   : >> { %4425 = vst.msk [vmem:[#allocation3 + $0x28] sm:$0xff] %vm998_vm2, %v4361_v28  ;;  %4424 = vst.msk [vmem:[#allocation3 + $0x20] sm:$0xff] %vm998_vm2, %v4360_v48  ;;  %v2978_v1 = vadd.f32 1.0, %v6197_v17  ;;  %v2981_v21 = vmul.f32 -0.5, %v6197_v17  ;;  %v3662_v28 = vcombine.high %v3646_v56, %v3646_v56  ;;  %v3664_v48 = vcombine.high %v3660_v23, %v3660_v23 }
 0x2a8   : >> { %v3859_v20 = vpop.permute.xlu1 %3858  ;;  %v3855_v22 = vpop.permute.xlu0 %3854 }
 0x2a9   : >> { %v4363_v59 = vmul.f32 %v4211_v34, %v3859_v20  ;;  %v4362_v63 = vmul.f32 %v4211_v34, %v3855_v22  ;;  %6198 = vlog2.f32 %v2978_v1  ;;  %v2982_v34 = vadd.f32 1.0, %v2981_v21 }
 0x2aa   : >> { %v3672_v20 = vrot.slane %v3609_v16, %v6629_v33  ;;  %v2984_v22 = vand.u32 2147483647, %v6197_v17  ;;  %v4223_v29 = vrot.slane %v3662_v28, %v6493_v8  ;;  %v4227_v56 = vrot.slane %v3664_v48, %v6493_v8 }
 0x2ab   : >> { %4427 = vst.msk [vmem:[#allocation3 + $0x38] sm:$0xff] %vm998_vm2, %v4363_v59  ;;  %4426 = vst.msk [vmem:[#allocation3 + $0x30] sm:$0xff] %vm998_vm2, %v4362_v63  ;;  %v2983_v63 = vmul.f32 %v6197_v17, %v2982_v34 }
 0x2ac   : >> { %v3871_v25 = vpop.permute.xlu1 %3870  ;;  %v3867_v15 = vpop.permute.xlu0 %3866  ;;  %v3688_v21 = vrot.slane %v3672_v20, %v6629_v33  ;;  %vm2985_vm15 = vcmp.lt.f32.partialorder %v2984_v22, 0.0004427343 }
 0x2ad   : >> { %v4365_v35 = vmul.f32 %v4215_v41, %v3871_v25  ;;  %v4364_v3 = vmul.f32 %v4215_v41, %v3867_v15  ;;  %v3665_v15 = vcombine.high %v3609_v16, %v3609_v16 }
 0x2af   : >> { %4429 = vst.msk [vmem:[#allocation3 + $0x48] sm:$0xff] %vm998_vm2, %v4365_v35  ;;  %4428 = vst.msk [vmem:[#allocation3 + $0x40] sm:$0xff] %vm998_vm2, %v4364_v3  ;;  %v2934_v35 = vmax.f32 %v7775_v37, 0.0  ;;  %v3679_v34 = vrot.slane %v3665_v15, %v6629_v33  ;;  %v4231_v37 = vrot.slane %v3688_v21, %v6493_v8 }
 0x2b0   : >> { %v3883_v46 = vpop.permute.xlu1 %3882  ;;  %v3879_v26 = vpop.permute.xlu0 %3878 }
 0x2b1   : >> { %v4367_v1 = vmul.f32 %v4219_v36, %v3883_v46  ;;  %v4366_v59 = vmul.f32 %v4219_v36, %v3879_v26  ;;  %v3680_v46 = vcombine.high %v3672_v20, %v3672_v20 }
 0x2b3   : >> { %4431 = vst.msk [vmem:[#allocation3 + $0x58] sm:$0xff] %vm998_vm2, %v4367_v1  ;;  %4430 = vst.msk [vmem:[#allocation3 + $0x50] sm:$0xff] %vm998_vm2, %v4366_v59  ;;  %v6199_v41 = vpop.eup %6198  ;;  %v3702_v22 = vrot.slane %v3680_v46, %v6629_v33  ;;  %v7911_v46 = vrot.slane %v3679_v34, %v6629_v33 }
 0x2b4   : >> { %v3895_v25 = vpop.permute.xlu1 %3894  ;;  %v3891_v23 = vpop.permute.xlu0 %3890  ;;  %v2980_v28 = vmul.f32 0.6931472, %v6199_v41 }
 0x2b5   : >> { %v4369_v3 = vmul.f32 %v4223_v29, %v3895_v25  ;;  %v4368_v36 = vmul.f32 %v4223_v29, %v3891_v23  ;;  %v3710_v25 = vcombine.high %v3688_v21, %v3688_v21  ;;  %v3712_v30 = vcombine.high %v3702_v22, %v3702_v22 }
 0x2b6   : >> { %v2986_v26 = vsel %vm2985_vm15, %v2983_v63, %v2980_v28  ;;  %v3681_v28 = vcombine.high %v3679_v34, %v3679_v34 }
 0x2b7   : >> { %4433 = vst.msk [vmem:[#allocation3 + $0x68] sm:$0xff] %vm998_vm2, %v4369_v3  ;;  %4432 = vst.msk [vmem:[#allocation3 + $0x60] sm:$0xff] %vm998_vm2, %v4368_v36  ;;  %v7897_v1 = vadd.f32 %v2986_v26, %v2934_v35  ;;  %v4235_v36 = vrot.slane %v3702_v22, %v6493_v8 }
 0x2b8   : >> { %v3907_v48 = vpop.permute.xlu1 %3906  ;;  %v3903_v17 = vpop.permute.xlu0 %3902 }
 0x2b9   : >> { %v4371_v59 = vmul.f32 %v4227_v56, %v3907_v48  ;;  %v4370_v16 = vmul.f32 %v4227_v56, %v3903_v17  ;;  %v3142_v20 = vcombine.high %v7897_v1, %v7897_v1  ;;  %v3149_v29 = vrot.slane %v7897_v1, %v6629_v33 }
 0x2bb   : >> { %4435 = vst.msk [vmem:[#allocation3 + $0x78] sm:$0xff] %vm998_vm2, %v4371_v59  ;;  %4434 = vst.msk [vmem:[#allocation3 + $0x70] sm:$0xff] %vm998_vm2, %v4370_v16  ;;  %v3156_v23 = vrot.slane %v3142_v20, %v6629_v33  ;;  %v3157_v56 = vcombine.high %v3149_v29, %v3149_v29  ;;  %v3165_v15 = vrot.slane %v3149_v29, %v6629_v33 }
 0x2bc   : >> { %v3919_v63 = vpop.permute.xlu1 %3918  ;;  %v3915_v41 = vpop.permute.xlu0 %3914  ;;  %v4239_v20 = vrot.slane %v3710_v25, %v6493_v8  ;;  %v3711_v25 = vcombine.high %v7911_v46, %v7911_v46 }
 0x2bd   : >> { %v4373_v35 = vmul.f32 %v4231_v37, %v3919_v63  ;;  %v4372_v3 = vmul.f32 %v4231_v37, %v3915_v41  ;;  %v3158_v26 = vcombine.high %v3156_v23, %v3156_v23  ;;  %v3179_v48 = vrot.slane %v3157_v56, %v6629_v33 }
 0x2be   : >> { %v3187_v17 = vcombine.high %v3165_v15, %v3165_v15  ;;  %v3172_v21 = vrot.slane %v3156_v23, %v6629_v33  ;;  %v3290_v59 = vrot.slane %v3165_v15, %v6493_v8 }
 0x2bf   : >> { %4437 = vst.msk [vmem:[#allocation3 + $0x88] sm:$0xff] %vm998_vm2, %v4373_v35  ;;  %4436 = vst.msk [vmem:[#allocation3 + $0x80] sm:$0xff] %vm998_vm2, %v4372_v3  ;;  %v3189_v29 = vcombine.high %v3179_v48, %v3179_v48  ;;  %v3294_v63 = vrot.slane %v3179_v48, %v6493_v8  ;;  %v4247_v35 = vrot.slane %v7911_v46, %v6493_v8 }
 0x2c0   : >> { %v3931_v16 = vpop.permute.xlu1 %3930  ;;  %v3927_v37 = vpop.permute.xlu0 %3926  ;;  %v3298_v56 = vrot.slane %v3187_v17, %v6493_v8  ;;  %v7924_v3 = vrot.slane %v3681_v28, %v6629_v33  ;;  %v3186_v23 = vrot.slane %v3158_v26, %v6629_v33  ;;  %v3188_v15 = vcombine.high %v3172_v21, %v3172_v21 }
 0x2c1   : >> { %v4375_v34 = vmul.f32 %v4235_v36, %v3931_v16  ;;  %v4374_v41 = vmul.f32 %v4235_v36, %v3927_v37  ;;  %v3302_v22 = vrot.slane %v3189_v29, %v6493_v8  ;;  %v3399_v36 = vmul.f32 %v7425_v19, %v3290_v59 }
 0x2c2   : >> { %v3306_v28 = vrot.slane %v3172_v21, %v6493_v8  ;;  %v3400_v16 = vmul.f32 %v7428_v7, %v3290_v59  ;;  %v3401_v26 = vmul.f32 %v7425_v19, %v3294_v63  ;;  %v3402_v37 = vmul.f32 %v7428_v7, %v3294_v63  ;;  %v7946_v59 = vld [vmem:[%s7719_s9 + $0x10] sm:$0xff] }
 0x2c3   : >> { %4439 = vst.msk [vmem:[#allocation3 + $0x98] sm:$0xff] %vm998_vm2, %v4375_v34  ;;  %4438 = vst.msk [vmem:[#allocation3 + $0x90] sm:$0xff] %vm998_vm2, %v4374_v41  ;;  %v4243_v46 = vrot.slane %v3712_v30, %v6493_v8  ;;  %v3403_v42 = vmul.f32 %v7425_v19, %v3298_v56  ;;  %v4251_v29 = vrot.slane %v7924_v3, %v6493_v8 }
 0x2c4   : >> { %v3943_v48 = vpop.permute.xlu1 %3942  ;;  %v3939_v17 = vpop.permute.xlu0 %3938  ;;  %v3190_v44 = vcombine.high %v3186_v23, %v3186_v23  ;;  %v3310_v54 = vrot.slane %v3186_v23, %v6493_v8  ;;  %v3404_v21 = vmul.f32 %v7428_v7, %v3298_v56  ;;  %v3405_v30 = vmul.f32 %v7425_v19, %v3302_v22 }
 0x2c5   : >> { %v4377_v34 = vmul.f32 %v4239_v20, %v3943_v48  ;;  %v4376_v41 = vmul.f32 %v4239_v20, %v3939_v17  ;;  %v3314_v20 = vrot.slane %v3188_v15, %v6493_v8  ;;  %v3406_v63 = vmul.f32 %v7428_v7, %v3302_v22 }
 0x2c6   : >> { %v3511_v48 = vmul.f32 1.442695, %v3399_v36  ;;  %v3407_v39 = vmul.f32 %v7425_v19, %v3306_v28  ;;  %v3513_v23 = vmul.f32 1.442695, %v3400_v16  ;;  %v3515_v32 = vmul.f32 1.442695, %v3401_v26 }
 0x2c7   : >> { %4441 = vst.msk [vmem:[#allocation3 + $0xa8] sm:$0xff] %vm998_vm2, %v4377_v34  ;;  %4440 = vst.msk [vmem:[#allocation3 + $0xa0] sm:$0xff] %vm998_vm2, %v4376_v41  ;;  %v3517_v56 = vmul.f32 1.442695, %v3402_v37  ;;  %v3519_v41 = vmul.f32 1.442695, %v3403_v42  ;;  %v7954_v57 = vmul.f32 %v7698_v52, %v7946_v59  ;;  %v3408_v15 = vmul.f32 %v7428_v7, %v3306_v28 }
 0x2c8   : >> { %v3955_v17 = vpop.permute.xlu1 %3954  ;;  %v3951_v55 = vpop.permute.xlu0 %3950  ;;  %6200 = vpow2.f32 %v3511_v48  ;;  %v3521_v22 = vmul.f32 1.442695, %v3404_v21  ;;  %v3318_v36 = vrot.slane %v3190_v44, %v6493_v8  ;;  %v3409_v16 = vmul.f32 %v7425_v19, %v3310_v54 }
 0x2c9   : >> { %v4379_v50 = vmul.f32 %v4243_v46, %v3955_v17  ;;  %v4378_v34 = vmul.f32 %v4243_v46, %v3951_v55  ;;  %6202 = vpow2.f32 %v3513_v23  ;;  %v3523_v55 = vmul.f32 1.442695, %v3405_v30 }
 0x2ca   : >> { %6204 = vpow2.f32 %v3515_v32  ;;  %v3410_v37 = vmul.f32 %v7428_v7, %v3310_v54  ;;  %v3411_v52 = vmul.f32 %v7425_v19, %v3314_v20  ;;  %v3525_v28 = vmul.f32 1.442695, %v3406_v63 }
 0x2cb   : >> { %4443 = vst.msk [vmem:[#allocation3 + $0xb8] sm:$0xff] %vm998_vm2, %v4379_v50  ;;  %4442 = vst.msk [vmem:[#allocation3 + $0xb0] sm:$0xff] %vm998_vm2, %v4378_v34  ;;  %6206 = vpow2.f32 %v3517_v56  ;;  %v3527_v50 = vmul.f32 1.442695, %v3407_v39  ;;  %v4255_v48 = vrot.slane %v3711_v25, %v6493_v8  ;;  %v3412_v44 = vmul.f32 %v7428_v7, %v3314_v20 }
 0x2cc   : >> { %v3967_v26 = vpop.permute.xlu1 %3966  ;;  %v3963_v42 = vpop.permute.xlu0 %3962  ;;  %6208 = vpow2.f32 %v3519_v41  ;;  %v3529_v17 = vmul.f32 1.442695, %v3408_v15  ;;  %v3713_v54 = vcombine.high %v7924_v3, %v7924_v3  ;;  %v3413_v32 = vmul.f32 %v7425_v19, %v3318_v36 }
 0x2cd   : >> { %v4381_v46 = vmul.f32 %v4247_v35, %v3967_v26  ;;  %v4380_v21 = vmul.f32 %v4247_v35, %v3963_v42  ;;  %6210 = vpow2.f32 %v3521_v22  ;;  %v3531_v30 = vmul.f32 1.442695, %v3409_v16 }
 0x2ce   : >> { %6212 = vpow2.f32 %v3523_v55  ;;  %v3721_v39 = vrot.slane %v7954_v57, %v6629_v33  ;;  %v3414_v25 = vmul.f32 %v7428_v7, %v3318_v36  ;;  %v3533_v20 = vmul.f32 1.442695, %v3410_v37 }
 0x2cf   : >> { %4445 = vst.msk [vmem:[#allocation3 + $0xc8] sm:$0xff] %vm998_vm2, %v4381_v46  ;;  %4444 = vst.msk [vmem:[#allocation3 + $0xc0] sm:$0xff] %vm998_vm2, %v4380_v21  ;;  %6214 = vpow2.f32 %v3525_v28  ;;  %v3535_v34 = vmul.f32 1.442695, %v3411_v52  ;;  %v3537_v41 = vmul.f32 1.442695, %v3412_v44  ;;  %v4259_v36 = vrot.slane %v3713_v54, %v6493_v8 }
 0x2d0   : >> { %v3979_v35 = vpop.permute.xlu1 %3978  ;;  %v3975_v63 = vpop.permute.xlu0 %3974  ;;  %6216 = vpow2.f32 %v3527_v50  ;;  %v3539_v15 = vmul.f32 1.442695, %v3413_v32  ;;  %v3737_v26 = vrot.slane %v3721_v39, %v6629_v33  ;;  %v3729_v28 = vcombine.high %v3721_v39, %v3721_v39 }
 0x2d1   : >> { %v4383_v23 = vmul.f32 %v4251_v29, %v3979_v35  ;;  %v4382_v56 = vmul.f32 %v4251_v29, %v3975_v63  ;;  %6218 = vpow2.f32 %v3529_v17  ;;  %v3541_v29 = vmul.f32 1.442695, %v3414_v25 }
 0x2d2   : >> { %v6201_v3 = vpop.eup %6200  ;;  %6220 = vpow2.f32 %v3531_v30  ;;  %v4263_v30 = vrot.slane %v3737_v26, %v6493_v8  ;;  %v3751_v35 = vrot.slane %v3729_v28, %v6629_v33 }
 0x2d3   : >> { %4447 = vst.msk [vmem:[#allocation3 + $0xd8] sm:$0xff] %vm998_vm2, %v4383_v23  ;;  %4446 = vst.msk [vmem:[#allocation3 + $0xd0] sm:$0xff] %vm998_vm2, %v4382_v56  ;;  %v6203_v22 = vpop.eup %6202  ;;  %6222 = vpow2.f32 %v3533_v20  ;;  %v3714_v56 = vcombine.high %v7954_v57, %v7954_v57 }
 0x2d4   : >> { %v3991_v16 = vpop.permute.xlu1 %3990  ;;  %v3987_v55 = vpop.permute.xlu0 %3986  ;;  %3592 = vst.msk [vmem:[#allocation2 + $0x180] sm:$0xff] %vm998_vm2, %v6201_v3  ;;  %6224 = vpow2.f32 %v3535_v34  ;;  %3593 = vst.msk [vmem:[#allocation2 + $0x188] sm:$0xff] %vm998_vm2, %v6203_v22  ;;  %v3759_v22 = vcombine.high %v3737_v26, %v3737_v26 }
 0x2d5   : >> { %v6205_v42 = vpop.eup %6204  ;;  %v4385_v37 = vmul.f32 %v4255_v48, %v3991_v16  ;;  %v4384_v52 = vmul.f32 %v4255_v48, %v3987_v55  ;;  %6226 = vpow2.f32 %v3537_v41 }
 0x2d6   : >> { %v6207_v46 = vpop.eup %6206  ;;  %3594 = vst.msk [vmem:[#allocation2 + $0x190] sm:$0xff] %vm998_vm2, %v6205_v42  ;;  %6228 = vpow2.f32 %v3539_v15  ;;  %v4267_v15 = vrot.slane %v3751_v35, %v6493_v8  ;;  %v3728_v42 = vrot.slane %v3714_v56, %v6629_v33  ;;  %v4271_v28 = vrot.slane %v3759_v22, %v6493_v8  ;;  %v8015_v56 = vld [vmem:[%s7719_s9 + $0x18] sm:$0xff] }
 0x2d7   : >> { %v6209_v21 = vpop.eup %6208  ;;  %4449 = vst.msk [vmem:[#allocation3 + $0xe8] sm:$0xff] %vm998_vm2, %v4385_v37  ;;  %4448 = vst.msk [vmem:[#allocation3 + $0xe0] sm:$0xff] %vm998_vm2, %v4384_v52  ;;  %6230 = vpow2.f32 %v3541_v29 }
 0x2d8   : >> { %3595 = vst.msk [vmem:[#allocation2 + $0x198] sm:$0xff] %vm998_vm2, %v6207_v46  ;;  %v6211_v50 = vpop.eup %6210  ;;  %v4003_v44 = vpop.permute.xlu1 %4002  ;;  %3596 = vst.msk [vmem:[#allocation2 + $0x1a0] sm:$0xff] %vm998_vm2, %v6209_v21  ;;  %v3761_v46 = vcombine.high %v3751_v35, %v3751_v35 }
 0x2d9   : >> { %v3999_v17 = vpop.permute.xlu0 %3998  ;;  %v6213_v48 = vpop.eup %6212  ;;  %v4387_v54 = vmul.f32 %v4259_v36, %v4003_v44  ;;  %3597 = vst.msk [vmem:[#allocation2 + $0x1a8] sm:$0xff] %vm998_vm2, %v6211_v50 }
 0x2da   : >> { %v4386_v32 = vmul.f32 %v4259_v36, %v3999_v17  ;;  %v6215_v63 = vpop.eup %6214  ;;  %3598 = vst.msk [vmem:[#allocation2 + $0x1b0] sm:$0xff] %vm998_vm2, %v6213_v48  ;;  %v3744_v17 = vrot.slane %v3728_v42, %v6629_v33 }
 0x2db   : >> { %v6217_v39 = vpop.eup %6216  ;;  %4451 = vst.msk [vmem:[#allocation3 + $0xf8] sm:$0xff] %vm998_vm2, %v4387_v54  ;;  %3599 = vst.msk [vmem:[#allocation2 + $0x1b8] sm:$0xff] %vm998_vm2, %v6215_v63 }
 0x2dc   : >> { %4450 = vst.msk [vmem:[#allocation3 + $0xf0] sm:$0xff] %vm998_vm2, %v4386_v32  ;;  %v6219_v25 = vpop.eup %6218  ;;  %v4015_v20 = vpop.permute.xlu1 %4014  ;;  %3600 = vst.msk [vmem:[#allocation2 + $0x1c0] sm:$0xff] %vm998_vm2, %v6217_v39  ;;  %v4275_v32 = vrot.slane %v3761_v46, %v6493_v8 }
 0x2dd   : >> { %v4011_v23 = vpop.permute.xlu0 %4010  ;;  %v6221_v34 = vpop.eup %6220  ;;  %v4389_v41 = vmul.f32 %v4263_v30, %v4015_v20  ;;  %3601 = vst.msk [vmem:[#allocation2 + $0x1c8] sm:$0xff] %vm998_vm2, %v6219_v25  ;;  %v4279_v20 = vrot.slane %v3744_v17, %v6493_v8 }
 0x2de   : >> { %v4388_v3 = vmul.f32 %v4263_v30, %v4011_v23  ;;  %v6223_v16 = vpop.eup %6222  ;;  %3602 = vst.msk [vmem:[#allocation2 + $0x1d0] sm:$0xff] %vm998_vm2, %v6221_v34  ;;  %v3730_v30 = vcombine.high %v3728_v42, %v3728_v42 }
 0x2df   : >> { %v6225_v55 = vpop.eup %6224  ;;  %4453 = vst.msk [vmem:[#allocation3 + $0x108] sm:$0xff] %vm998_vm2, %v4389_v41  ;;  %3603 = vst.msk [vmem:[#allocation2 + $0x1d8] sm:$0xff] %vm998_vm2, %v6223_v16 }
 0x2e0   : >> { %4452 = vst.msk [vmem:[#allocation3 + $0x100] sm:$0xff] %vm998_vm2, %v4388_v3  ;;  %v6227_v57 = vpop.eup %6226  ;;  %v4027_v36 = vpop.permute.xlu1 %4026  ;;  %3604 = vst.msk [vmem:[#allocation2 + $0x1e0] sm:$0xff] %vm998_vm2, %v6225_v55  ;;  %v3758_v23 = vrot.slane %v3730_v30, %v6629_v33  ;;  %v3760_v3 = vcombine.high %v3744_v17, %v3744_v17  ;;  %v3611_v55 = vmul.f32 %v7897_v1, %v8015_v56 }
 0x2e1   : >> { %v4023_v29 = vpop.permute.xlu0 %4022  ;;  %v6229_v26 = vpop.eup %6228  ;;  %v4391_v37 = vmul.f32 %v4267_v15, %v4027_v36  ;;  %3605 = vst.msk [vmem:[#allocation2 + $0x1e8] sm:$0xff] %vm998_vm2, %v6227_v57 }
 0x2e2   : >> { %v4390_v52 = vmul.f32 %v4267_v15, %v4023_v29  ;;  %v6231_v21 = vpop.eup %6230  ;;  %3606 = vst.msk [vmem:[#allocation2 + $0x1f0] sm:$0xff] %vm998_vm2, %v6229_v26  ;;  %v4283_v16 = vrot.slane %v3758_v23, %v6493_v8  ;;  %v3762_v29 = vcombine.high %v3758_v23, %v3758_v23 }
 0x2e3   : >> { %4455 = vst.msk [vmem:[#allocation3 + $0x118] sm:$0xff] %vm998_vm2, %v4391_v37  ;;  %3607 = vst.msk [vmem:[#allocation2 + $0x1f8] sm:$0xff] %vm998_vm2, %v6231_v21  ;;  %v4287_v37 = vrot.slane %v3760_v3, %v6493_v8 }
 0x2e4   : >> { %4454 = vst.msk [vmem:[#allocation3 + $0x110] sm:$0xff] %vm998_vm2, %v4390_v52  ;;  %v4039_v50 = vpop.permute.xlu1 %4038  ;;  %v3770_v52 = vrot.slane %v3611_v55, %v6629_v33  ;;  %v4291_v1 = vrot.slane %v3762_v29, %v6493_v8 }
 0x2e5   : >> { %v4035_v44 = vpop.permute.xlu0 %4034  ;;  %v4393_v48 = vmul.f32 %v4271_v28, %v4039_v50 }
 0x2e6   : >> { %v4392_v54 = vmul.f32 %v4271_v28, %v4035_v44  ;;  %v3786_v44 = vrot.slane %v3770_v52, %v6629_v33  ;;  %v3778_v17 = vcombine.high %v3770_v52, %v3770_v52 }
 0x2e7   : >> { %4457 = vst.msk [vmem:[#allocation3 + $0x128] sm:$0xff] %vm998_vm2, %v4393_v48 }
 0x2e8   : >> { %4456 = vst.msk [vmem:[#allocation3 + $0x120] sm:$0xff] %vm998_vm2, %v4392_v54  ;;  %v4051_v35 = vpop.permute.xlu1 %4050  ;;  %v3808_v3 = vcombine.high %v3786_v44, %v3786_v44 }
 0x2e9   : >> { %v4047_v63 = vpop.permute.xlu0 %4046  ;;  %v4395_v39 = vmul.f32 %v4275_v32, %v4051_v35  ;;  %v4295_v35 = vrot.slane %v3786_v44, %v6493_v8 }
 0x2ea   : >> { %v4394_v25 = vmul.f32 %v4275_v32, %v4047_v63  ;;  %v3800_v63 = vrot.slane %v3778_v17, %v6629_v33  ;;  %v4303_v29 = vrot.slane %v3808_v3, %v6493_v8 }
 0x2eb   : >> { %4459 = vst.msk [vmem:[#allocation3 + $0x138] sm:$0xff] %vm998_vm2, %v4395_v39 }
 0x2ec   : >> { %4458 = vst.msk [vmem:[#allocation3 + $0x130] sm:$0xff] %vm998_vm2, %v4394_v25  ;;  %v4063_v34 = vpop.permute.xlu1 %4062 }
 0x2ed   : >> { %v4059_v41 = vpop.permute.xlu0 %4058  ;;  %v4397_v15 = vmul.f32 %v4279_v20, %v4063_v34 }
 0x2ee   : >> { %v4396_v22 = vmul.f32 %v4279_v20, %v4059_v41  ;;  %v3763_v20 = vcombine.high %v3611_v55, %v3611_v55  ;;  %v4299_v41 = vrot.slane %v3800_v63, %v6493_v8 }
 0x2ef   : >> { %4461 = vst.msk [vmem:[#allocation3 + $0x148] sm:$0xff] %vm998_vm2, %v4397_v15 }
 0x2f0   : >> { %4460 = vst.msk [vmem:[#allocation3 + $0x140] sm:$0xff] %vm998_vm2, %v4396_v22  ;;  %v4075_v57 = vpop.permute.xlu1 %4074 }
 0x2f1   : >> { %v4071_v36 = vpop.permute.xlu0 %4070  ;;  %v4399_v42 = vmul.f32 %v4283_v16, %v4075_v57 }
 0x2f2   : >> { %v4398_v26 = vmul.f32 %v4283_v16, %v4071_v36  ;;  %v3777_v16 = vrot.slane %v3763_v20, %v6629_v33 }
 0x2f3   : >> { %4463 = vst.msk [vmem:[#allocation3 + $0x158] sm:$0xff] %vm998_vm2, %v4399_v42  ;;  %v3810_v42 = vcombine.high %v3800_v63, %v3800_v63 }
 0x2f4   : >> { %4462 = vst.msk [vmem:[#allocation3 + $0x150] sm:$0xff] %vm998_vm2, %v4398_v26  ;;  %v4087_v28 = vpop.permute.xlu1 %4086 }
 0x2f5   : >> { %v4083_v46 = vpop.permute.xlu0 %4082  ;;  %v4401_v21 = vmul.f32 %v4287_v37, %v4087_v28 }
 0x2f6   : >> { %v4400_v50 = vmul.f32 %v4287_v37, %v4083_v46  ;;  %v3793_v37 = vrot.slane %v3777_v16, %v6629_v33  ;;  %v4307_v46 = vrot.slane %v3810_v42, %v6493_v8 }
 0x2f7   : >> { %4465 = vst.msk [vmem:[#allocation3 + $0x168] sm:$0xff] %vm998_vm2, %v4401_v21 }
 0x2f8   : >> { %4464 = vst.msk [vmem:[#allocation3 + $0x160] sm:$0xff] %vm998_vm2, %v4400_v50  ;;  %v4099_v48 = vpop.permute.xlu1 %4098 }
 0x2f9   : >> { %v4095_v54 = vpop.permute.xlu0 %4094  ;;  %v4403_v32 = vmul.f32 %v4291_v1, %v4099_v48  ;;  %v4311_v48 = vrot.slane %v3793_v37, %v6493_v8 }
 0x2fa   : >> { %v4402_v30 = vmul.f32 %v4291_v1, %v4095_v54  ;;  %v3779_v1 = vcombine.high %v3777_v16, %v3777_v16 }
 0x2fb   : >> { %4467 = vst.msk [vmem:[#allocation3 + $0x178] sm:$0xff] %vm998_vm2, %v4403_v32 }
 0x2fc   : >> { %4466 = vst.msk [vmem:[#allocation3 + $0x170] sm:$0xff] %vm998_vm2, %v4402_v30  ;;  %v4111_v39 = vpop.permute.xlu1 %4110  ;;  %v3807_v54 = vrot.slane %v3779_v1, %v6629_v33 }
 0x2fd   : >> { %v4107_v25 = vpop.permute.xlu0 %4106  ;;  %v4405_v23 = vmul.f32 %v4295_v35, %v4111_v39 }
 0x2fe   : >> { %v4404_v34 = vmul.f32 %v4295_v35, %v4107_v25  ;;  %v4315_v39 = vrot.slane %v3807_v54, %v6493_v8  ;;  %v3809_v25 = vcombine.high %v3793_v37, %v3793_v37 }
 0x2ff   : >> { %4469 = vst.msk [vmem:[#allocation3 + $0x188] sm:$0xff] %vm998_vm2, %v4405_v23 }
 0x300   : >> { %4468 = vst.msk [vmem:[#allocation3 + $0x180] sm:$0xff] %vm998_vm2, %v4404_v34  ;;  %v4123_v15 = vpop.permute.xlu1 %4122  ;;  %v4319_v3 = vrot.slane %v3809_v25, %v6493_v8 }
 0x301   : >> { %v4119_v22 = vpop.permute.xlu0 %4118  ;;  %v4407_v57 = vmul.f32 %v4299_v41, %v4123_v15  ;;  %v3811_v15 = vcombine.high %v3807_v54, %v3807_v54 }
 0x302   : >> { %v4406_v36 = vmul.f32 %v4299_v41, %v4119_v22 }
 0x303   : >> { %4471 = vst.msk [vmem:[#allocation3 + $0x198] sm:$0xff] %vm998_vm2, %v4407_v57 }
 0x304   : >> { %4470 = vst.msk [vmem:[#allocation3 + $0x190] sm:$0xff] %vm998_vm2, %v4406_v36  ;;  %v4135_v55 = vpop.permute.xlu1 %4134 }
 0x305   : >> { %v4131_v26 = vpop.permute.xlu0 %4130  ;;  %v4409_v52 = vmul.f32 %v4303_v29, %v4135_v55 }
 0x306   : >> { %v4408_v28 = vmul.f32 %v4303_v29, %v4131_v26  ;;  %v4323_v29 = vrot.slane %v3811_v15, %v6493_v8 }
 0x307   : >> { %4473 = vst.msk [vmem:[#allocation3 + $0x1a8] sm:$0xff] %vm998_vm2, %v4409_v52 }
 0x308   : >> { %4472 = vst.msk [vmem:[#allocation3 + $0x1a0] sm:$0xff] %vm998_vm2, %v4408_v28  ;;  %v4147_v21 = vpop.permute.xlu1 %4146 }
 0x309   : >> { %v4143_v50 = vpop.permute.xlu0 %4142  ;;  %v4411_v44 = vmul.f32 %v4307_v46, %v4147_v21 }
 0x30a   : >> { %v4410_v17 = vmul.f32 %v4307_v46, %v4143_v50 }
 0x30b   : >> { %4475 = vst.msk [vmem:[#allocation3 + $0x1b8] sm:$0xff] %vm998_vm2, %v4411_v44 }
 0x30c   : >> { %4474 = vst.msk [vmem:[#allocation3 + $0x1b0] sm:$0xff] %vm998_vm2, %v4410_v17  ;;  %v4159_v32 = vpop.permute.xlu1 %4158 }
 0x30d   : >> { %v4155_v30 = vpop.permute.xlu0 %4154  ;;  %v4413_v35 = vmul.f32 %v4311_v48, %v4159_v32 }
 0x30e   : >> { %v4412_v63 = vmul.f32 %v4311_v48, %v4155_v30 }
 0x30f   : >> { %4477 = vst.msk [vmem:[#allocation3 + $0x1c8] sm:$0xff] %vm998_vm2, %v4413_v35 }
 0x310   : >> { %4476 = vst.msk [vmem:[#allocation3 + $0x1c0] sm:$0xff] %vm998_vm2, %v4412_v63  ;;  %v4171_v20 = vpop.permute.xlu1 %4170 }
 0x311   : >> { %v4167_v23 = vpop.permute.xlu0 %4166  ;;  %v4415_v34 = vmul.f32 %v4315_v39, %v4171_v20 }
 0x312   : >> { %v4414_v41 = vmul.f32 %v4315_v39, %v4167_v23 }
 0x313   : >> { %4479 = vst.msk [vmem:[#allocation3 + $0x1d8] sm:$0xff] %vm998_vm2, %v4415_v34 }
 0x314   : >> { %4478 = vst.msk [vmem:[#allocation3 + $0x1d0] sm:$0xff] %vm998_vm2, %v4414_v41  ;;  %v4183_v22 = vpop.permute.xlu1 %4182 }
 0x315   : >> { %v4179_v16 = vpop.permute.xlu0 %4178  ;;  %v4417_v57 = vmul.f32 %v4319_v3, %v4183_v22 }
 0x316   : >> { %v4416_v36 = vmul.f32 %v4319_v3, %v4179_v16 }
 0x317   : >> { %4481 = vst.msk [vmem:[#allocation3 + $0x1e8] sm:$0xff] %vm998_vm2, %v4417_v57 }
 0x318   : >> { %4480 = vst.msk [vmem:[#allocation3 + $0x1e0] sm:$0xff] %vm998_vm2, %v4416_v36  ;;  %v4195_v42 = vpop.permute.xlu1 %4194 }
 0x319   : >> { %v4191_v55 = vpop.permute.xlu0 %4190  ;;  %v4419_v26 = vmul.f32 %v4323_v29, %v4195_v42 }
 0x31a   : >> { %v4418_v37 = vmul.f32 %v4323_v29, %v4191_v55 }
 0x31b   : >> { %4483 = vst.msk [vmem:[#allocation3 + $0x1f8] sm:$0xff] %vm998_vm2, %v4419_v26 }
 0x31c   : >> { %4482 = vst.msk [vmem:[#allocation3 + $0x1f0] sm:$0xff] %vm998_vm2, %v4418_v37 }
 0x31d LB: >>> { %s5784_s12 = sshll.u32 %s6366_s11, 2  ;;  %s4489_s11 = sadd.s32 1, %s6366_s11   ;;  %s6366_s11 = sphi %s8068_s11, %s4489_s11   ;;  %v6362_v43 = vphi %v6350_v43, %v8552_v43   ;;  %v6358_v6 = vphi %v6346_v6, %v8551_v6  }
 0x31e   : >>> { %s4493_s14 = ssub.s32 31, %s5784_s12  ;;  %s4508_s15 = ssub.s32 30, %s5784_s12 }
 0x31f   : >>> { %s5785_s17 = sshll.u32 %s4493_s14, 4  ;;  %s8076_s19 = sshll.u32 %s4508_s15, 4 }
 0x320   : >>> { %s4495_s25 = scalar_lea.vmem [#allocation2], %s5785_s17  ;;  %s4500_s28 = scalar_lea.vmem [#allocation3], %s5785_s17 }
 0x321   : >>> { %v4496_v52 = vld [vmem:[%s4495_s25] sm:$0xff]  ;;  %v4497_v46 = vld [vmem:[%s4495_s25 + $0x8] sm:$0xff]  ;;  %s4523_s29 = ssub.s32 29, %s5784_s12  ;;  %s4510_s16 = scalar_lea.vmem [#allocation2], %s8076_s19 }
 0x322   : >>> { %v4498_v1 = vmul.f32 %v6362_v43, %v4496_v52  ;;  %v4499_v21 = vmul.f32 %v6358_v6, %v4497_v46  ;;  %v4511_v44 = vld [vmem:[%s4510_s16] sm:$0xff]  ;;  %s8079_s27 = sshll.u32 %s4523_s29, 4  ;;  %s4538_s7 = ssub.s32 28, %s5784_s12  ;;  %v4512_v17 = vld [vmem:[%s4510_s16 + $0x8] sm:$0xff] }
 0x323   : >>> { %v4501_v28 = vld [vmem:[%s4500_s28] sm:$0xff]  ;;  %v4502_v50 = vld [vmem:[%s4500_s28 + $0x8] sm:$0xff]  ;;  %s4515_s8 = scalar_lea.vmem [#allocation3], %s8076_s19  ;;  %s8082_s6 = sshll.u32 %s4538_s7, 4 }
 0x324   : >>> { %v4503_v48 = vadd.f32 %v4501_v28, %v4498_v1  ;;  %v4504_v54 = vadd.f32 %v4502_v50, %v4499_v21  ;;  %v4516_v32 = vld [vmem:[%s4515_s8] sm:$0xff]  ;;  %v4517_v30 = vld [vmem:[%s4515_s8 + $0x8] sm:$0xff]  ;;  %s4505_s9 = scalar_lea.vmem [#allocation4], %s5785_s17  ;;  %s4525_s14 = scalar_lea.vmem [#allocation2], %s8079_s27 }
 0x325   : >>> { %v4526_v35 = vld [vmem:[%s4525_s14] sm:$0xff]  ;;  %v4527_v63 = vld [vmem:[%s4525_s14 + $0x8] sm:$0xff]  ;;  %s4530_s12 = scalar_lea.vmem [#allocation3], %s8079_s27  ;;  %s4520_s15 = scalar_lea.vmem [#allocation4], %s8076_s19 }
 0x326   : >>> { %4506 = vst.msk [vmem:[%s4505_s9] sm:$0xff] %vm998_vm2, %v4503_v48  ;;  %v4513_v6 = vmul.f32 %v4511_v44, %v4503_v48  ;;  %4507 = vst.msk [vmem:[%s4505_s9 + $0x8] sm:$0xff] %vm998_vm2, %v4504_v54  ;;  %v4514_v43 = vmul.f32 %v4512_v17, %v4504_v54  ;;  %v4531_v20 = vld [vmem:[%s4530_s12] sm:$0xff]  ;;  %v4532_v23 = vld [vmem:[%s4530_s12 + $0x8] sm:$0xff]  ;;  %s4540_s17 = scalar_lea.vmem [#allocation2], %s8082_s6  ;;  %s4545_s25 = scalar_lea.vmem [#allocation3], %s8082_s6 }
 0x327   : >>> { %v4541_v3 = vld [vmem:[%s4540_s17] sm:$0xff]  ;;  %v4542_v15 = vld [vmem:[%s4540_s17 + $0x8] sm:$0xff]  ;;  %s4535_s28 = scalar_lea.vmem [#allocation4], %s8079_s27  ;;  %s4550_s19 = scalar_lea.vmem [#allocation4], %s8082_s6 }
 0x328   : >>> { %v4518_v39 = vadd.f32 %v4516_v32, %v4513_v6  ;;  %v4519_v25 = vadd.f32 %v4517_v30, %v4514_v43  ;;  %v4546_v57 = vld [vmem:[%s4545_s25] sm:$0xff]  ;;  %v4547_v36 = vld [vmem:[%s4545_s25 + $0x8] sm:$0xff]  ;;  %p4486_p9 = scmp.ge.s32.totalorder %s4489_s11, 8  }
 0x329   : >> { %4627 = vbcast.lane.b32.xlu1 (%p4486_p9), %v7460_v4, 336  ;;  %4619 = vbcast.lane.b32.xlu0 (%p4486_p9), %v7463_v5, 336  ;;  %v8559_v50 = vld [vmem:[#allocation32_spill] sm:$0xff] (%p4486_p9)  ;;  %s8219_s11 = scalar_lea.vmem (%p4486_p9), %s6463_s18, %s7452_s30  ;;  %s2901_s26 = sadd.s32 (%p4486_p9), 1, %s6354_s26  }
 0x32a   : >>> { %v4528_v34 = vmul.f32 %v4526_v35, %v4518_v39  ;;  %v4529_v41 = vmul.f32 %v4527_v63, %v4519_v25  ;;  %4521 = vst.msk [vmem:[%s4520_s15] sm:$0xff] %vm998_vm2, %v4518_v39  ;;  %4522 = vst.msk [vmem:[%s4520_s15 + $0x8] sm:$0xff] %vm998_vm2, %v4519_v25  ;;  %p2898_p10 = scmp.ge.s32.totalorder (%p4486_p9), %s2901_s26, 2  }
 0x32c   : >>> { %v4533_v22 = vadd.f32 %v4531_v20, %v4528_v34  ;;  %v4534_v16 = vadd.f32 %v4532_v23, %v4529_v41 }
 0x32d   : >> { %4488 = sbr.rel (!%p4486_p9) target bundleno = 797 (0x31d), region = 165  ;;  %4631 = vbcast.lane.b32.xlu1 (%p4486_p9), %v7460_v4, 344  ;;  %4623 = vbcast.lane.b32.xlu0 (%p4486_p9), %v7463_v5, 344  ;;  %v8553_v4 = vld [vmem:[#allocation30_spill] sm:$0xff] (%p4486_p9)  ;;  %v8554_v5 = vld [vmem:[#allocation25_spill] sm:$0xff] (%p4486_p9) }
 0x32e   : >>> { %v4543_v29 = vmul.f32 %v4541_v3, %v4533_v22  ;;  %v4544_v42 = vmul.f32 %v4542_v15, %v4534_v16  ;;  %4536 = vst.msk [vmem:[%s4535_s28] sm:$0xff] %vm998_vm2, %v4533_v22  ;;  %4537 = vst.msk [vmem:[%s4535_s28 + $0x8] sm:$0xff] %vm998_vm2, %v4534_v16 }
 0x330   : >>> { %v8096_v43 = vadd.f32 %v4546_v57, %v4543_v29   ;;  %v8098_v6 = vadd.f32 %v4547_v36, %v4544_v42  }
 0x331   : >> { %4639 = vbcast.lane.b32.xlu1 (%p4486_p9), %v7470_v9, 344  ;;  %4635 = vbcast.lane.b32.xlu0 (%p4486_p9), %v7470_v9, 336  ;;  %v8555_v9 = vld [vmem:[#allocation27_spill] sm:$0xff] (%p4486_p9) }
 0x332   : >>> { %v8549_v55 = vmov %v8096_v43  ;;  %v8550_v26 = vmov %v8098_v6 }
 0x333   : >>> { %4551 = vst.msk [vmem:[%s4550_s19] sm:$0xff] %vm998_vm2, %v8549_v55  ;;  %4552 = vst.msk [vmem:[%s4550_s19 + $0x8] sm:$0xff] %vm998_vm2, %v8550_v26  ;;  %v8551_v6 = vmov %v8550_v26  ;;  %v8552_v43 = vmov %v8549_v55 }
 0x335   : >> { %4647 = vbcast.lane.b32.xlu1 %v7483_v51, 344  ;;  %4643 = vbcast.lane.b32.xlu0 %v7483_v51, 336  ;;  %v8556_v51 = vld [vmem:[#allocation31_spill] sm:$0xff] }
 0x339   : >> { %4655 = vbcast.lane.b32.xlu1 %v7489_v18, 344  ;;  %4651 = vbcast.lane.b32.xlu0 %v7489_v18, 336 }
 0x33a   : >> { %v4560_v44 = vld [vmem:[#allocation4 + $0x38] sm:$0xff]  ;;  %v4559_v17 = vld [vmem:[#allocation4 + $0x30] sm:$0xff]  ;;  %v4562_v23 = vld [vmem:[#allocation4 + $0x48] sm:$0xff] }
 0x33b   : >> { %v4561_v34 = vld [vmem:[#allocation4 + $0x40] sm:$0xff] }
 0x33d   : >> { %4663 = vbcast.lane.b32.xlu1 %v7494_v49, 344  ;;  %4659 = vbcast.lane.b32.xlu0 %v7494_v49, 336  ;;  %v4555_v49 = vld [vmem:[#allocation4 + $0x10] sm:$0xff] }
 0x341   : >> { %4671 = vbcast.lane.b32.xlu1 %v7502_v27, 344  ;;  %4667 = vbcast.lane.b32.xlu0 %v7502_v27, 336 }
 0x345   : >> { %4679 = vbcast.lane.b32.xlu1 %v7511_v38, 344  ;;  %4675 = vbcast.lane.b32.xlu0 %v7511_v38, 336  ;;  %v4553_v38 = vld [vmem:[#allocation4] sm:$0xff] }
 0x349   : >> { %4687 = vbcast.lane.b32.xlu1 %v7518_v53, 344  ;;  %4683 = vbcast.lane.b32.xlu0 %v7518_v53, 336  ;;  %v8557_v53 = vld [vmem:[#allocation26_spill] sm:$0xff] }
 0x34d   : >> { %4695 = vbcast.lane.b32.xlu1 %v7524_v60, 344  ;;  %4691 = vbcast.lane.b32.xlu0 %v7524_v60, 336  ;;  %v4556_v60 = vld [vmem:[#allocation4 + $0x18] sm:$0xff] }
 0x351   : >> { %4759 = vbcast.lane.b32.xlu1 %v7625_v2, 344  ;;  %4755 = vbcast.lane.b32.xlu0 %v7625_v2, 336 }
 0x355   : >> { %4823 = vbcast.lane.b32.xlu1 %v7769_v24, 344  ;;  %4819 = vbcast.lane.b32.xlu0 %v7769_v24, 336 }
 0x359   : >> { %4703 = vbcast.lane.b32.xlu1 %v7530_v10, 344  ;;  %4699 = vbcast.lane.b32.xlu0 %v7530_v10, 336  ;;  %v4554_v10 = vld [vmem:[#allocation4 + $0x8] sm:$0xff] }
 0x35d   : >> { %4767 = vbcast.lane.b32.xlu1 %v7632_v45, 344  ;;  %4763 = vbcast.lane.b32.xlu0 %v7632_v45, 336 }
 0x361   : >> { %4831 = vbcast.lane.b32.xlu1 %v7791_v47, 344  ;;  %4827 = vbcast.lane.b32.xlu0 %v7791_v47, 336 }
 0x365   : >> { %4711 = vbcast.lane.b32.xlu1 %v7536_v13, 344  ;;  %4707 = vbcast.lane.b32.xlu0 %v7536_v13, 336 }
 0x369   : >> { %4751 = vbcast.lane.b32.xlu1 %v7610_v31, 344  ;;  %4747 = vbcast.lane.b32.xlu0 %v7610_v31, 336 }
 0x36d   : >> { %4775 = vbcast.lane.b32.xlu1 %v7645_v58, 344  ;;  %4771 = vbcast.lane.b32.xlu0 %v7645_v58, 336  ;;  %v8558_v58 = vld [vmem:[#allocation28_spill] sm:$0xff] }
 0x371   : >> { %4815 = vbcast.lane.b32.xlu1 %v7745_v12, 344  ;;  %4811 = vbcast.lane.b32.xlu0 %v7745_v12, 336 }
 0x375   : >> { %4839 = vbcast.lane.b32.xlu1 %v7807_v14, 344  ;;  %4835 = vbcast.lane.b32.xlu0 %v7807_v14, 336 }
 0x379   : >> { %4719 = vbcast.lane.b32.xlu1 %v7546_v40, 344  ;;  %4715 = vbcast.lane.b32.xlu0 %v7546_v40, 336 }
 0x37d   : >> { %4783 = vbcast.lane.b32.xlu1 %v7668_v61, 344  ;;  %4779 = vbcast.lane.b32.xlu0 %v7668_v61, 336  ;;  %v4558_v61 = vld [vmem:[#allocation4 + $0x28] sm:$0xff] }
 0x381   : >> { %4847 = vbcast.lane.b32.xlu1 %v7820_v0, 344  ;;  %4843 = vbcast.lane.b32.xlu0 %v7820_v0, 336 }
 0x385   : >> { %4727 = vbcast.lane.b32.xlu1 %v7566_v62, 344  ;;  %4723 = vbcast.lane.b32.xlu0 %v7566_v62, 336 }
 0x389   : >> { %4791 = vbcast.lane.b32.xlu1 %v7687_v11, 344  ;;  %4787 = vbcast.lane.b32.xlu0 %v7687_v11, 336  ;;  %v4557_v11 = vld [vmem:[#allocation4 + $0x20] sm:$0xff] }
 0x38d   : >> { %4855 = vbcast.lane.b32.xlu1 %v8553_v4, 344  ;;  %4851 = vbcast.lane.b32.xlu0 %v8553_v4, 336 }
 0x391   : >> { %4735 = vbcast.lane.b32.xlu1 %v8554_v5, 344  ;;  %4731 = vbcast.lane.b32.xlu0 %v8554_v5, 336 }
 0x395   : >> { %4799 = vbcast.lane.b32.xlu1 %v8555_v9, 344  ;;  %4795 = vbcast.lane.b32.xlu0 %v8555_v9, 336 }
 0x399   : >> { %4863 = vbcast.lane.b32.xlu1 %v8556_v51, 344  ;;  %4859 = vbcast.lane.b32.xlu0 %v8556_v51, 336  ;;  %v4564_v51 = vld [vmem:[#allocation4 + $0x58] sm:$0xff] }
 0x39b   : >> { %v4628_v18 = vpop.permute.xlu1 %4627  ;;  %v4620_v27 = vpop.permute.xlu0 %4619 }
 0x39c   : >> { %v4875_v13 = vmul.f32 %v4628_v18, %v4555_v49  ;;  %v4873_v40 = vmul.f32 %v4620_v27, %v4553_v38  ;;  %v4563_v18 = vld [vmem:[#allocation4 + $0x50] sm:$0xff]  ;;  %v8560_v49 = vld [vmem:[#allocation29_spill] sm:$0xff] }
 0x39d   : >> { %4743 = vbcast.lane.b32.xlu1 %v8557_v53, 344  ;;  %4739 = vbcast.lane.b32.xlu0 %v8557_v53, 336  ;;  %v8561_v27 = vld [vmem:[#allocation23_spill] sm:$0xff] }
 0x39e   : >> { %v4946_v12 = vsel %vm998_vm2, %v4875_v13, 0.0  ;;  %v4937_v24 = vsel %vm998_vm2, %v4873_v40, 0.0  ;;  %v8188_v38 = vmul.f32 %v8561_v27, %v8560_v49  ;;  %v4569_v49 = vld [vmem:[#allocation4 + $0x80] sm:$0xff] }
 0x39f   : >> { %v4632_v62 = vpop.permute.xlu1 %4631  ;;  %v4624_v31 = vpop.permute.xlu0 %4623 }
 0x3a0   : >> { %v4876_v2 = vmul.f32 %v4632_v62, %v4556_v60  ;;  %v4874_v45 = vmul.f32 %v4624_v31, %v4554_v10 }
 0x3a1   : >> { %4807 = vbcast.lane.b32.xlu1 %v8558_v58, 344  ;;  %4803 = vbcast.lane.b32.xlu0 %v8558_v58, 336 }
 0x3a2   : >> { %v4947_v47 = vsel %vm998_vm2, %v4876_v2, 0.0  ;;  %v4938_v14 = vsel %vm998_vm2, %v4874_v45, 0.0 }
 0x3a3   : >> { %v4948_v0 = vadd.f32 %v4947_v47, %v4946_v12  ;;  %v4939_v37 = vadd.f32 %v4938_v14, %v4937_v24  ;;  %v4640_v52 = vpop.permute.xlu1 %4639  ;;  %v4636_v28 = vpop.permute.xlu0 %4635  ;;  %v4566_v12 = vld [vmem:[#allocation4 + $0x68] sm:$0xff]  ;;  %v4565_v24 = vld [vmem:[#allocation4 + $0x60] sm:$0xff]  ;;  %v5239_v47 = vrot.slane %v8188_v38, 1 }
 0x3a4   : >> { %v4878_v46 = vmul.f32 %v4640_v52, %v4558_v61  ;;  %v4877_v1 = vmul.f32 %v4636_v28, %v4557_v11  ;;  %v5240_v28 = vrot.slane %v8188_v38, 2 }
 0x3a5   : >> { %v4949_v21 = vrot.slane %v4948_v0, 4  ;;  %4871 = vbcast.lane.b32.xlu1 %v8559_v50, 344  ;;  %4867 = vbcast.lane.b32.xlu0 %v8559_v50, 336  ;;  %v4940_v30 = vrot.slane %v4939_v37, 4 }
 0x3a6   : >> { %v4956_v48 = vsel %vm998_vm2, %v4878_v46, 0.0  ;;  %v4955_v54 = vsel %vm998_vm2, %v4877_v1, 0.0 }
 0x3a7   : >> { %v4950_v32 = vadd.f32 %v4949_v21, %v4948_v0  ;;  %v4957_v6 = vadd.f32 %v4956_v48, %v4955_v54  ;;  %v4648_v43 = vpop.permute.xlu1 %4647  ;;  %v4644_v35 = vpop.permute.xlu0 %4643  ;;  %v4941_v15 = vadd.f32 %v4940_v30, %v4939_v37  ;;  %v5241_v30 = vrot.slane %v8188_v38, 3 }
 0x3a8   : >> { %v4880_v63 = vmul.f32 %v4648_v43, %v4560_v44  ;;  %v4879_v39 = vmul.f32 %v4644_v35, %v4559_v17  ;;  %v4568_v35 = vld [vmem:[#allocation4 + $0x78] sm:$0xff] }
 0x3a9   : >> { %v4951_v25 = vrot.slane %v4950_v32, 2  ;;  %v4958_v20 = vrot.slane %v4957_v6, 4  ;;  %v4942_v10 = vrot.slane %v4941_v15, 2 }
 0x3aa   : >> { %v4965_v41 = vsel %vm998_vm2, %v4880_v63, 0.0  ;;  %v4964_v3 = vsel %vm998_vm2, %v4879_v39, 0.0  ;;  %v4567_v63 = vld [vmem:[#allocation4 + $0x70] sm:$0xff] }
 0x3ab   : >> { %v4959_v22 = vadd.f32 %v4958_v20, %v4957_v6  ;;  %v4966_v16 = vadd.f32 %v4965_v41, %v4964_v3  ;;  %v4656_v57 = vpop.permute.xlu1 %4655  ;;  %v4652_v36 = vpop.permute.xlu0 %4651  ;;  %v4952_v4 = vadd.f32 %v4951_v25, %v4950_v32  ;;  %v4943_v52 = vadd.f32 %v4942_v10, %v4941_v15 }
 0x3ac   : >> { %v4882_v29 = vmul.f32 %v4656_v57, %v4562_v23  ;;  %v4881_v42 = vmul.f32 %v4652_v36, %v4561_v34  ;;  %v5242_v6 = vrot.slane %v8188_v38, 4  ;;  %v5243_v3 = vrot.slane %v8188_v38, 5 }
 0x3ad   : >> { %v4960_v5 = vrot.slane %v4959_v22, 2  ;;  %v4967_v9 = vrot.slane %v4966_v16, 4  ;;  %v4953_v61 = vrot.slane %v4952_v4, 1  ;;  %v4944_v34 = vrot.slane %v4943_v52, 1 }
 0x3ae   : >> { %v4974_v53 = vsel %vm998_vm2, %v4882_v29, 0.0  ;;  %v4973_v60 = vsel %vm998_vm2, %v4881_v42, 0.0 }
 0x3af   : >> { %v4968_v13 = vadd.f32 %v4967_v9, %v4966_v16  ;;  %v4664_v40 = vpop.permute.xlu1 %4663  ;;  %v4660_v62 = vpop.permute.xlu0 %4659  ;;  %v4961_v31 = vadd.f32 %v4960_v5, %v4959_v22  ;;  %v4975_v2 = vadd.f32 %v4974_v53, %v4973_v60  ;;  %v4954_v32 = vadd.f32 %v4953_v61, %v4952_v4 }
 0x3b0   : >> { %v4884_v45 = vmul.f32 %v4664_v40, %v4564_v51  ;;  %v4883_v58 = vmul.f32 %v4660_v62, %v4563_v18  ;;  %v5244_v51 = vrot.slane %v8188_v38, 6  ;;  %v4570_v18 = vld [vmem:[#allocation4 + $0x88] sm:$0xff]  ;;  %v4945_v61 = vadd.f32 %v4944_v34, %v4943_v52 }
 0x3b1   : >> { %v4969_v11 = vrot.slane %v4968_v13, 2  ;;  %v4976_v14 = vrot.slane %v4975_v2, 4  ;;  %v4962_v44 = vrot.slane %v4961_v31, 1  ;;  %v5300_v4 = vadd.f32 %v5239_v47, %v4954_v32 }
 0x3b2   : >> { %v4983_v0 = vsel %vm998_vm2, %v4884_v45, 0.0  ;;  %v4982_v37 = vsel %vm998_vm2, %v4883_v58, 0.0 }
 0x3b3   : >> { %v4970_v46 = vadd.f32 %v4969_v11, %v4968_v13  ;;  %v4984_v1 = vadd.f32 %v4983_v0, %v4982_v37  ;;  %v4672_v21 = vpop.permute.xlu1 %4671  ;;  %v4668_v50 = vpop.permute.xlu0 %4667  ;;  %v4977_v17 = vadd.f32 %v4976_v14, %v4975_v2  ;;  %v4963_v57 = vadd.f32 %v4962_v44, %v4961_v31 }
 0x3b4   : >> { %v4886_v48 = vmul.f32 %v4672_v21, %v4566_v12  ;;  %v4885_v54 = vmul.f32 %v4668_v50, %v4565_v24  ;;  %v5245_v31 = vrot.slane %v8188_v38, 7  ;;  %v5368_v21 = vrot.slane %v5300_v4, 7 }
 0x3b5   : >> { %v4985_v43 = vrot.slane %v4984_v1, 4  ;;  %v4971_v39 = vrot.slane %v4970_v46, 1  ;;  %v4978_v25 = vrot.slane %v4977_v17, 2  ;;  %v5301_v11 = vadd.f32 %v5240_v28, %v4963_v57 }
 0x3b6   : >> { %v4992_v20 = vsel %vm998_vm2, %v4886_v48, 0.0  ;;  %v4991_v23 = vsel %vm998_vm2, %v4885_v54, 0.0 }
 0x3b7   : >> { %v4986_v41 = vadd.f32 %v4985_v43, %v4984_v1  ;;  %v4993_v15 = vadd.f32 %v4992_v20, %v4991_v23  ;;  %v4680_v22 = vpop.permute.xlu1 %4679  ;;  %v4676_v16 = vpop.permute.xlu0 %4675  ;;  %v4979_v36 = vadd.f32 %v4978_v25, %v4977_v17  ;;  %v4972_v53 = vadd.f32 %v4971_v39, %v4970_v46  ;;  %v4572_v46 = vld [vmem:[#allocation4 + $0x98] sm:$0xff]  ;;  %v4571_v1 = vld [vmem:[#allocation4 + $0x90] sm:$0xff] }
 0x3b8   : >> { %v4888_v29 = vmul.f32 %v4680_v22, %v4568_v35  ;;  %v4887_v42 = vmul.f32 %v4676_v16, %v4567_v63  ;;  %v5299_v35 = vadd.f32 %v8188_v38, %v4945_v61  ;;  %v5371_v63 = vrot.slane %v5301_v11, 6 }
 0x3b9   : >> { %v4987_v5 = vrot.slane %v4986_v41, 2  ;;  %v4994_v9 = vrot.slane %v4993_v15, 4  ;;  %v4980_v60 = vrot.slane %v4979_v36, 1  ;;  %v5302_v50 = vadd.f32 %v5241_v30, %v4972_v53  ;;  %v4588_v30 = vld [vmem:[#allocation4 + $0x118] sm:$0xff] }
 0x3ba   : >> { %v5001_v10 = vsel %vm998_vm2, %v4888_v29, 0.0  ;;  %v5000_v13 = vsel %vm998_vm2, %v4887_v42, 0.0  ;;  %v5370_v22 = vsel %vm2818_vm5, %v5368_v21, %v5299_v35  ;;  %v5332_v35 = vld [vmem:[%s8219_s11] sm:$0xff] }
 0x3bb   : >> { %v4988_v40 = vadd.f32 %v4987_v5, %v4986_v41  ;;  %v4995_v62 = vadd.f32 %v4994_v9, %v4993_v15  ;;  %v5002_v2 = vadd.f32 %v5001_v10, %v5000_v13  ;;  %v4688_v45 = vpop.permute.xlu1 %4687  ;;  %v4684_v58 = vpop.permute.xlu0 %4683  ;;  %v4981_v47 = vadd.f32 %v4980_v60, %v4979_v36  ;;  %v4587_v15 = vld [vmem:[#allocation4 + $0x110] sm:$0xff] }
 0x3bc   : >> { %v4890_v12 = vmul.f32 %v4688_v45, %v4570_v18  ;;  %v4889_v24 = vmul.f32 %v4684_v58, %v4569_v49  ;;  %v5374_v29 = vrot.slane %v5302_v50, 5 }
 0x3bd   : >> { %v4989_v14 = vrot.slane %v4988_v40, 1  ;;  %v4996_v0 = vrot.slane %v4995_v62, 2  ;;  %v5003_v37 = vrot.slane %v5002_v2, 4  ;;  %v5303_v20 = vadd.f32 %v5242_v6, %v4981_v47 }
 0x3be   : >> { %v5010_v44 = vsel %vm998_vm2, %v4890_v12, 0.0  ;;  %v5009_v17 = vsel %vm998_vm2, %v4889_v24, 0.0  ;;  %v5373_v6 = vsel %vm2821_vm6, %v5371_v63, %v5370_v22 }
 0x3bf   : >> { %v4990_v48 = vadd.f32 %v4989_v14, %v4988_v40  ;;  %v4997_v54 = vadd.f32 %v4996_v0, %v4995_v62  ;;  %v5004_v32 = vadd.f32 %v5003_v37, %v5002_v2  ;;  %v5011_v43 = vadd.f32 %v5010_v44, %v5009_v17  ;;  %v4696_v52 = vpop.permute.xlu1 %4695  ;;  %v4692_v28 = vpop.permute.xlu0 %4691  ;;  %v4604_v62 = vld [vmem:[#allocation4 + $0x198] sm:$0xff]  ;;  %v4603_v2 = vld [vmem:[#allocation4 + $0x190] sm:$0xff]  ;;  %v4574_v17 = vld [vmem:[#allocation4 + $0xa8] sm:$0xff] }
 0x3c0   : >> { %v4892_v39 = vmul.f32 %v4696_v52, %v4572_v46  ;;  %v4891_v25 = vmul.f32 %v4692_v28, %v4571_v1  ;;  %v5377_v10 = vrot.slane %v5303_v20, 4  ;;  %v5376_v12 = vsel %vm2824_vm7, %v5374_v29, %v5373_v6 }
 0x3c1   : >> { %v4998_v23 = vrot.slane %v4997_v54, 1  ;;  %v5005_v34 = vrot.slane %v5004_v32, 2  ;;  %v5012_v41 = vrot.slane %v5011_v43, 4  ;;  %v5304_v16 = vadd.f32 %v5243_v3, %v4990_v48  ;;  %v4573_v48 = vld [vmem:[#allocation4 + $0xa0] sm:$0xff] }
 0x3c2   : >> { %v5019_v57 = vsel %vm998_vm2, %v4892_v39, 0.0  ;;  %v5018_v36 = vsel %vm998_vm2, %v4891_v25, 0.0  ;;  %v5379_v50 = vsel %vm2827_vm8, %v5377_v10, %v5376_v12  ;;  %v8562_v39 = vld [vmem:[#allocation33_spill] sm:$0xff]  ;;  %v4589_v10 = vld [vmem:[#allocation4 + $0x120] sm:$0xff] }
 0x3c3   : >> { %v4999_v42 = vadd.f32 %v4998_v23, %v4997_v54  ;;  %v5006_v4 = vadd.f32 %v5005_v34, %v5004_v32  ;;  %v5013_v5 = vadd.f32 %v5012_v41, %v5011_v43  ;;  %v4760_v9 = vpop.permute.xlu1 %4759  ;;  %v4756_v18 = vpop.permute.xlu0 %4755  ;;  %v5020_v49 = vadd.f32 %v5019_v57, %v5018_v36 }
 0x3c4   : >> { %v4908_v53 = vmul.f32 %v4760_v9, %v4588_v30  ;;  %v4907_v60 = vmul.f32 %v4756_v18, %v4587_v15  ;;  %v5380_v45 = vrot.slane %v5304_v16, 3  ;;  %v8231_v25 = vmul.f32 %v8561_v27, %v8562_v39 }
 0x3c5   : >> { %v5305_v13 = vadd.f32 %v5244_v51, %v4999_v42  ;;  %v5007_v3 = vrot.slane %v5006_v4, 1  ;;  %v5014_v40 = vrot.slane %v5013_v5, 2  ;;  %v5021_v58 = vrot.slane %v5020_v49, 4 }
 0x3c6   : >> { %v5091_v61 = vsel %vm998_vm2, %v4908_v53, 0.0  ;;  %v5090_v11 = vsel %vm998_vm2, %v4907_v60, 0.0  ;;  %v5382_v54 = vsel %vm2830_vm9, %v5380_v45, %v5379_v50  ;;  %v5246_v22 = vrot.slane %v8231_v25, 1  ;;  %v4590_v60 = vld [vmem:[#allocation4 + $0x128] sm:$0xff]  ;;  %v4585_v50 = vld [vmem:[#allocation4 + $0x100] sm:$0xff] }
 0x3c7   : >> { %v5383_v24 = vrot.slane %v5305_v13, 2  ;;  %v5008_v47 = vadd.f32 %v5007_v3, %v5006_v4  ;;  %v8215_v14 = vadd.f32 %v5091_v61, %v5090_v11  ;;  %v4824_v0 = vpop.permute.xlu1 %4823  ;;  %v4820_v37 = vpop.permute.xlu0 %4819  ;;  %v5015_v51 = vadd.f32 %v5014_v40, %v5013_v5 }
 0x3c8   : >> { %v5022_v46 = vadd.f32 %v5021_v58, %v5020_v49  ;;  %v4924_v1 = vmul.f32 %v4824_v0, %v4604_v62  ;;  %v4923_v21 = vmul.f32 %v4820_v37, %v4603_v2  ;;  %v4575_v0 = vld [vmem:[#allocation4 + $0xb0] sm:$0xff]  ;;  %v4606_v37 = vld [vmem:[#allocation4 + $0x1a8] sm:$0xff] }
 0x3c9   : >> { %v5306_v44 = vadd.f32 %v5245_v31, %v5008_v47  ;;  %v5385_v28 = vsel %vm2833_vm10, %v5383_v24, %v5382_v54  ;;  %v5016_v23 = vrot.slane %v5015_v51, 1  ;;  %v4576_v24 = vld [vmem:[#allocation4 + $0xb8] sm:$0xff] }
 0x3ca   : >> { %v5023_v32 = vrot.slane %v5022_v46, 2  ;;  %v5163_v43 = vsel %vm998_vm2, %v4924_v1, 0.0  ;;  %v5162_v52 = vsel %vm998_vm2, %v4923_v21, 0.0  ;;  %v5247_v1 = vrot.slane %v8231_v25, 2  ;;  %v4586_v21 = vld [vmem:[#allocation4 + $0x108] sm:$0xff] }
 0x3cb   : >> { %v5386_v63 = vrot.slane %v5306_v44, 1  ;;  %v8233_v20 = vadd.f32 %v5163_v43, %v5162_v52  ;;  %v4704_v38 = vpop.permute.xlu1 %4703  ;;  %v4700_v31 = vpop.permute.xlu0 %4699  ;;  %v5017_v9 = vadd.f32 %v5016_v23, %v5015_v51  ;;  %v4605_v51 = vld [vmem:[#allocation4 + $0x1a0] sm:$0xff] }
 0x3cc   : >> { %v5024_v34 = vadd.f32 %v5023_v32, %v5022_v46  ;;  %v4894_v41 = vmul.f32 %v4704_v38, %v4574_v17  ;;  %v4893_v30 = vmul.f32 %v4700_v31, %v4573_v48 }
 0x3cd   : >> { %v5388_v15 = vsel %vm2836_vm11, %v5386_v63, %v5385_v28  ;;  %v5307_v40 = vadd.f32 %v8231_v25, %v5017_v9  ;;  %v5093_v63 = vrot.slane %v8215_v14, 4  ;;  %v5165_v9 = vrot.slane %v8233_v20, 4 }
 0x3ce   : >> { %v5435_v16 = vadd.f32 %v5388_v15, %v5332_v35  ;;  %v5025_v57 = vrot.slane %v5024_v34, 1  ;;  %v5028_v36 = vsel %vm998_vm2, %v4894_v41, 0.0  ;;  %v5027_v29 = vsel %vm998_vm2, %v4893_v30, 0.0  ;;  %v4591_v41 = vld [vmem:[#allocation4 + $0x130] sm:$0xff] }
 0x3cf   : >> { %v5029_v42 = vadd.f32 %v5028_v36, %v5027_v29  ;;  %v4768_v4 = vpop.permute.xlu1 %4767  ;;  %v4764_v5 = vpop.permute.xlu0 %4763 }
 0x3d0   : >> { %5439 = vst.msk [vmem:[%s8219_s11] sm:$0xff] %vm998_vm2, %v5435_v16  ;;  %v5026_v18 = vadd.f32 %v5025_v57, %v5024_v34  ;;  %v4910_v58 = vmul.f32 %v4768_v4, %v4590_v60  ;;  %v4909_v61 = vmul.f32 %v4764_v5, %v4589_v10  ;;  %v4592_v34 = vld [vmem:[#allocation4 + $0x138] sm:$0xff]  ;;  %v5094_v5 = vadd.f32 %v5093_v63, %v8215_v14 }
 0x3d1   : >> { %v5030_v6 = vrot.slane %v5029_v42, 4  ;;  %v5166_v14 = vadd.f32 %v5165_v9, %v8233_v20 }
 0x3d2   : >> { %v5308_v49 = vadd.f32 %v5246_v22, %v5026_v18  ;;  %v5100_v44 = vsel %vm998_vm2, %v4910_v58, 0.0  ;;  %v5099_v17 = vsel %vm998_vm2, %v4909_v61, 0.0  ;;  %v5095_v58 = vrot.slane %v5094_v5, 2  ;;  %v4602_v61 = vld [vmem:[#allocation4 + $0x188] sm:$0xff] }
 0x3d3   : >> { %v5031_v53 = vadd.f32 %v5030_v6, %v5029_v42  ;;  %v4832_v13 = vpop.permute.xlu1 %4831  ;;  %v4828_v3 = vpop.permute.xlu0 %4827  ;;  %v5101_v23 = vadd.f32 %v5100_v44, %v5099_v17  ;;  %v5167_v44 = vrot.slane %v5166_v14, 2 }
 0x3d4   : >> { %v5389_v62 = vrot.slane %v5308_v49, 7  ;;  %v4926_v43 = vmul.f32 %v4832_v13, %v4606_v37  ;;  %v4925_v52 = vmul.f32 %v4828_v3, %v4605_v51  ;;  %v8267_v51 = vmul.f32 %v8561_v27, %v8015_v56 }
 0x3d5   : >> { %v5032_v2 = vrot.slane %v5031_v53, 2  ;;  %v5096_v20 = vadd.f32 %v5095_v58, %v5094_v5  ;;  %v5249_v5 = vrot.slane %v8231_v25, 4 }
 0x3d6   : >> { %v5390_v45 = vsel %vm2818_vm5, %v5389_v62, %v5307_v40  ;;  %v5172_v36 = vsel %vm998_vm2, %v4926_v43, 0.0  ;;  %v5171_v29 = vsel %vm998_vm2, %v4925_v52, 0.0 }
 0x3d7   : >> { %v5033_v11 = vadd.f32 %v5032_v2, %v5031_v53  ;;  %v4712_v12 = vpop.permute.xlu1 %4711  ;;  %v4708_v47 = vpop.permute.xlu0 %4707  ;;  %v5102_v53 = vrot.slane %v5101_v23, 4  ;;  %v5173_v13 = vadd.f32 %v5172_v36, %v5171_v29  ;;  %v5262_v29 = vrot.slane %v8267_v51, 3 }
 0x3d8   : >> { %v4896_v48 = vmul.f32 %v4712_v12, %v4576_v24  ;;  %v4895_v54 = vmul.f32 %v4708_v47, %v4575_v0  ;;  %v8263_v0 = vmul.f32 %v8561_v27, %v7946_v59  ;;  %v5260_v59 = vrot.slane %v8267_v51, 1 }
 0x3d9   : >> { %v5034_v46 = vrot.slane %v5033_v11, 1  ;;  %v5103_v12 = vadd.f32 %v5102_v53, %v5101_v23  ;;  %v5174_v37 = vrot.slane %v5173_v13, 4  ;;  %v5261_v23 = vrot.slane %v8267_v51, 2 }
 0x3da   : >> { %v5037_v30 = vsel %vm998_vm2, %v4896_v48, 0.0  ;;  %v5036_v15 = vsel %vm998_vm2, %v4895_v54, 0.0  ;;  %v5253_v43 = vrot.slane %v8263_v0, 1  ;;  %v5263_v53 = vrot.slane %v8267_v51, 4 }
 0x3db   : >> { %v5035_v32 = vadd.f32 %v5034_v46, %v5033_v11  ;;  %v4752_v28 = vpop.permute.xlu1 %4751  ;;  %v4748_v35 = vpop.permute.xlu0 %4747  ;;  %v5038_v60 = vadd.f32 %v5037_v30, %v5036_v15  ;;  %v4601_v11 = vld [vmem:[#allocation4 + $0x180] sm:$0xff]  ;;  %v5104_v17 = vrot.slane %v5103_v12, 2  ;;  %v5175_v52 = vadd.f32 %v5174_v37, %v5173_v13 }
 0x3dc   : >> { %v4906_v39 = vmul.f32 %v4752_v28, %v4586_v21  ;;  %v4905_v38 = vmul.f32 %v4748_v35, %v4585_v50  ;;  %v5254_v28 = vrot.slane %v8263_v0, 2 }
 0x3dd   : >> { %v5309_v31 = vadd.f32 %v5247_v1, %v5035_v32  ;;  %v5039_v24 = vrot.slane %v5038_v60, 4 }
 0x3de   : >> { %v5082_v22 = vsel %vm998_vm2, %v4906_v39, 0.0  ;;  %v5081_v16 = vsel %vm998_vm2, %v4905_v38, 0.0  ;;  %v5097_v38 = vrot.slane %v5096_v20, 1 }
 0x3df   : >> { %v5391_v57 = vrot.slane %v5309_v31, 6  ;;  %v4776_v42 = vpop.permute.xlu1 %4775  ;;  %v4772_v4 = vpop.permute.xlu0 %4771  ;;  %v5083_v10 = vadd.f32 %v5082_v22, %v5081_v16  ;;  %v5040_v48 = vadd.f32 %v5039_v24, %v5038_v60  ;;  %v5168_v31 = vadd.f32 %v5167_v44, %v5166_v14 }
 0x3e0   : >> { %v4912_v18 = vmul.f32 %v4776_v42, %v4592_v34  ;;  %v4911_v6 = vmul.f32 %v4772_v4, %v4591_v41  ;;  %v5248_v34 = vrot.slane %v8231_v25, 3  ;;  %v5105_v41 = vadd.f32 %v5104_v17, %v5103_v12  ;;  %v4608_v42 = vld [vmem:[#allocation4 + $0x1b8] sm:$0xff]  ;;  %v4607_v4 = vld [vmem:[#allocation4 + $0x1b0] sm:$0xff] }
 0x3e1   : >> { %v8256_v49 = vsel %vm2821_vm6, %v5391_v57, %v5390_v45  ;;  %v5084_v47 = vrot.slane %v5083_v10, 4  ;;  %v5041_v30 = vrot.slane %v5040_v48, 2  ;;  %v5176_v16 = vrot.slane %v5175_v52, 2 }
 0x3e2   : >> { %v5109_v3 = vsel %vm998_vm2, %v4912_v18, 0.0  ;;  %v5108_v40 = vsel %vm998_vm2, %v4911_v6, 0.0  ;;  %v5255_v57 = vrot.slane %v8263_v0, 3  ;;  %v5256_v6 = vrot.slane %v8263_v0, 4 }
 0x3e3   : >> { %v4816_v62 = vpop.permute.xlu1 %4815  ;;  %v4812_v2 = vpop.permute.xlu0 %4811  ;;  %v5110_v45 = vadd.f32 %v5109_v3, %v5108_v40  ;;  %v5085_v54 = vadd.f32 %v5084_v47, %v5083_v10  ;;  %v5250_v60 = vrot.slane %v8231_v25, 5  ;;  %v5098_v10 = vadd.f32 %v5097_v38, %v5096_v20  ;;  %v4578_v3 = vld [vmem:[#allocation4 + $0xc8] sm:$0xff]  ;;  %v4577_v40 = vld [vmem:[#allocation4 + $0xc0] sm:$0xff] }
 0x3e4   : >> { %v4922_v46 = vmul.f32 %v4816_v62, %v4602_v61  ;;  %v4921_v1 = vmul.f32 %v4812_v2, %v4601_v11  ;;  %v5169_v13 = vrot.slane %v5168_v31, 1  ;;  %v5257_v62 = vrot.slane %v8263_v0, 5  ;;  %v4593_v38 = vld [vmem:[#allocation4 + $0x140] sm:$0xff]  ;;  %v4596_v2 = vld [vmem:[#allocation4 + $0x158] sm:$0xff] }
 0x3e5   : >> { %v5111_v32 = vrot.slane %v5110_v45, 4  ;;  %v5086_v15 = vrot.slane %v5085_v54, 2  ;;  %v5106_v58 = vrot.slane %v5105_v41, 1  ;;  %v5042_v14 = vadd.f32 %v5041_v30, %v5040_v48  ;;  %v4579_v30 = vld [vmem:[#allocation4 + $0xd0] sm:$0xff] }
 0x3e6   : >> { %v5154_v56 = vsel %vm998_vm2, %v4922_v46, 0.0  ;;  %v5153_v35 = vsel %vm998_vm2, %v4921_v1, 0.0  ;;  %v5177_v12 = vadd.f32 %v5176_v16, %v5175_v52  ;;  %v5251_v20 = vrot.slane %v8231_v25, 6 }
 0x3e7   : >> { %v4840_v21 = vpop.permute.xlu1 %4839  ;;  %v4836_v50 = vpop.permute.xlu0 %4835  ;;  %v5112_v22 = vadd.f32 %v5111_v32, %v5110_v45  ;;  %v5155_v36 = vadd.f32 %v5154_v56, %v5153_v35  ;;  %v5087_v61 = vadd.f32 %v5086_v15, %v5085_v54  ;;  %v5258_v17 = vrot.slane %v8263_v0, 6  ;;  %v4594_v35 = vld [vmem:[#allocation4 + $0x148] sm:$0xff] }
 0x3e8   : >> { %v4928_v47 = vmul.f32 %v4840_v21, %v4608_v42  ;;  %v4927_v45 = vmul.f32 %v4836_v50, %v4607_v4  ;;  %v8286_v32 = vadd.f32 %v5253_v43, %v5098_v10  ;;  %v5170_v56 = vadd.f32 %v5169_v13, %v5168_v31 }
 0x3e9   : >> { %v5113_v11 = vrot.slane %v5112_v22, 2  ;;  %v5156_v24 = vrot.slane %v5155_v36, 4  ;;  %v5252_v54 = vrot.slane %v8231_v25, 7  ;;  %v5107_v52 = vadd.f32 %v5106_v58, %v5105_v41 }
 0x3ea   : >> { %v5043_v21 = vrot.slane %v5042_v14, 1  ;;  %v5088_v50 = vrot.slane %v5087_v61, 1  ;;  %v5178_v15 = vrot.slane %v5177_v12, 1  ;;  %v5181_v42 = vsel %vm998_vm2, %v4928_v47, 0.0 }
 0x3eb   : >> { %v4720_v63 = vpop.permute.xlu1 %4719  ;;  %v4716_v39 = vpop.permute.xlu0 %4715  ;;  %v5157_v16 = vadd.f32 %v5156_v24, %v5155_v36  ;;  %v5180_v43 = vsel %vm998_vm2, %v4927_v45, 0.0  ;;  %v4595_v45 = vld [vmem:[#allocation4 + $0x150] sm:$0xff] }
 0x3ec   : >> { %v4898_v37 = vmul.f32 %v4720_v63, %v4578_v3  ;;  %v4897_v46 = vmul.f32 %v4716_v39, %v4577_v40  ;;  %v5114_v63 = vadd.f32 %v5113_v11, %v5112_v22  ;;  %v4580_v39 = vld [vmem:[#allocation4 + $0xd8] sm:$0xff]  ;;  %v5259_v22 = vrot.slane %v8263_v0, 7 }
 0x3ed   : >> { %v5044_v48 = vadd.f32 %v5043_v21, %v5042_v14  ;;  %v5089_v36 = vadd.f32 %v5088_v50, %v5087_v61  ;;  %v5182_v47 = vadd.f32 %v5181_v42, %v5180_v43  ;;  %v4610_v21 = vld [vmem:[#allocation4 + $0x1c8] sm:$0xff]  ;;  %v4609_v50 = vld [vmem:[#allocation4 + $0x1c0] sm:$0xff] }
 0x3ee   : >> { %v5046_v31 = vsel %vm998_vm2, %v4898_v37, 0.0  ;;  %v5045_v4 = vsel %vm998_vm2, %v4897_v46, 0.0  ;;  %v5115_v24 = vrot.slane %v5114_v63, 1  ;;  %v5403_v37 = vrot.slane %v8286_v32, 7 }
 0x3ef   : >> { %v4784_v9 = vpop.permute.xlu1 %4783  ;;  %v4780_v18 = vpop.permute.xlu0 %4779  ;;  %v5047_v46 = vadd.f32 %v5046_v31, %v5045_v4  ;;  %v5310_v43 = vadd.f32 %v5248_v34, %v5044_v48  ;;  %v4611_v31 = vld [vmem:[#allocation4 + $0x1d0] sm:$0xff] }
 0x3f0   : >> { %v4914_v10 = vmul.f32 %v4784_v9, %v4594_v35  ;;  %v4913_v13 = vmul.f32 %v4780_v18, %v4593_v38  ;;  %v8299_v9 = vadd.f32 %v5260_v59, %v5170_v56  ;;  %v5158_v18 = vrot.slane %v5157_v16, 2 }
 0x3f1   : >> { %v8303_v35 = vadd.f32 %v5254_v28, %v5107_v52  ;;  %v5179_v38 = vadd.f32 %v5178_v15, %v5177_v12  ;;  %v5315_v28 = vadd.f32 %v8263_v0, %v5089_v36  ;;  %v5116_v12 = vadd.f32 %v5115_v24, %v5114_v63  ;;  %v4612_v15 = vld [vmem:[#allocation4 + $0x1d8] sm:$0xff] }
 0x3f2   : >> { %v5118_v14 = vsel %vm998_vm2, %v4914_v10, 0.0  ;;  %v5117_v61 = vsel %vm998_vm2, %v4913_v13, 0.0  ;;  %v5183_v52 = vrot.slane %v5182_v47, 4  ;;  %v5159_v4 = vadd.f32 %v5158_v18, %v5157_v16  ;;  %v4582_v18 = vld [vmem:[#allocation4 + $0xe8] sm:$0xff] }
 0x3f3   : >> { %v4848_v1 = vpop.permute.xlu1 %4847  ;;  %v4844_v44 = vpop.permute.xlu0 %4843  ;;  %v5048_v10 = vrot.slane %v5047_v46, 4  ;;  %v5417_v34 = vrot.slane %v8299_v9, 7  ;;  %v5405_v48 = vrot.slane %v8303_v35, 6  ;;  %v8318_v16 = vadd.f32 %v5261_v23, %v5179_v38 }
 0x3f4   : >> { %v4930_v13 = vmul.f32 %v4848_v1, %v4610_v21  ;;  %v5393_v1 = vrot.slane %v5310_v43, 5  ;;  %v5184_v24 = vadd.f32 %v5183_v52, %v5182_v47  ;;  %v5404_v35 = vsel %vm2818_vm5, %v5403_v37, %v5315_v28  ;;  %v4597_v37 = vld [vmem:[#allocation4 + $0x160] sm:$0xff] }
 0x3f6   : >> { %v5190_v21 = vsel %vm998_vm2, %v4930_v13, 0.0  ;;  %v8329_v43 = vsel %vm2824_vm7, %v5393_v1, %v8256_v49  ;;  %v5185_v52 = vrot.slane %v5184_v24, 2 }
 0x3f7   : >> { %v4728_v3 = vpop.permute.xlu1 %4727  ;;  %v4724_v40 = vpop.permute.xlu0 %4723 }
 0x3f8   : >> { %v4900_v41 = vmul.f32 %v4728_v3, %v4580_v39  ;;  %v4899_v58 = vmul.f32 %v4724_v40, %v4579_v30  ;;  %v4929_v3 = vmul.f32 %v4844_v44, %v4609_v50  ;;  %v5119_v40 = vadd.f32 %v5118_v14, %v5117_v61  ;;  %v4581_v14 = vld [vmem:[#allocation4 + $0xe0] sm:$0xff] }
 0x3f9   : >> { %v5318_v44 = vadd.f32 %v5255_v57, %v5116_v12  ;;  %v5160_v61 = vrot.slane %v5159_v4, 1 }
 0x3fa   : >> { %v5055_v32 = vsel %vm998_vm2, %v4900_v41, 0.0  ;;  %v5054_v59 = vsel %vm998_vm2, %v4899_v58, 0.0  ;;  %v5189_v50 = vsel %vm998_vm2, %v4929_v3, 0.0  ;;  %v5406_v3 = vsel %vm2821_vm6, %v5405_v48, %v5404_v35 }
 0x3fb   : >> { %v4792_v39 = vpop.permute.xlu1 %4791  ;;  %v4788_v30 = vpop.permute.xlu0 %4787  ;;  %v5056_v11 = vadd.f32 %v5055_v32, %v5054_v59  ;;  %v5120_v32 = vrot.slane %v5119_v40, 4  ;;  %v5407_v12 = vrot.slane %v5318_v44, 5 }
 0x3fc   : >> { %v4916_v56 = vmul.f32 %v4792_v39, %v4596_v2  ;;  %v4915_v42 = vmul.f32 %v4788_v30, %v4595_v45  ;;  %v5049_v30 = vadd.f32 %v5048_v10, %v5047_v46  ;;  %v5161_v46 = vadd.f32 %v5160_v61, %v5159_v4 }
 0x3fd   : >> { %v5057_v59 = vrot.slane %v5056_v11, 4  ;;  %v5186_v4 = vadd.f32 %v5185_v52, %v5184_v24 }
 0x3fe   : >> { %v5127_v41 = vsel %vm998_vm2, %v4916_v56, 0.0  ;;  %v5126_v2 = vsel %vm998_vm2, %v4915_v42, 0.0  ;;  %v5050_v49 = vrot.slane %v5049_v30, 2 }
 0x3ff   : >> { %v4856_v58 = vpop.permute.xlu1 %4855  ;;  %v4852_v45 = vpop.permute.xlu0 %4851  ;;  %v5128_v39 = vadd.f32 %v5127_v41, %v5126_v2  ;;  %v5058_v41 = vadd.f32 %v5057_v59, %v5056_v11  ;;  %v5187_v52 = vrot.slane %v5186_v4, 1 }
 0x400   : >> { %v4932_v63 = vmul.f32 %v4856_v58, %v4612_v15  ;;  %v4931_v36 = vmul.f32 %v4852_v45, %v4611_v31  ;;  %v5191_v15 = vadd.f32 %v5190_v21, %v5189_v50  ;;  %v4598_v31 = vld [vmem:[#allocation4 + $0x168] sm:$0xff]  ;;  %v4613_v50 = vld [vmem:[#allocation4 + $0x1e0] sm:$0xff] }
 0x401   : >> { %v5129_v28 = vrot.slane %v5128_v39, 4  ;;  %v4614_v21 = vld [vmem:[#allocation4 + $0x1e8] sm:$0xff]  ;;  %v5059_v59 = vrot.slane %v5058_v41, 2 }
 0x402   : >> { %v5199_v56 = vsel %vm998_vm2, %v4932_v63, 0.0  ;;  %v5198_v57 = vsel %vm998_vm2, %v4931_v36, 0.0  ;;  %v5121_v36 = vadd.f32 %v5120_v32, %v5119_v40 }
 0x403   : >> { %v4736_v23 = vpop.permute.xlu1 %4735  ;;  %v4732_v38 = vpop.permute.xlu0 %4731  ;;  %v5200_v2 = vadd.f32 %v5199_v56, %v5198_v57  ;;  %v5130_v48 = vadd.f32 %v5129_v28, %v5128_v39  ;;  %v4583_v39 = vld [vmem:[#allocation4 + $0xf0] sm:$0xff] }
 0x404   : >> { %v4902_v47 = vmul.f32 %v4736_v23, %v4582_v18  ;;  %v4901_v42 = vmul.f32 %v4732_v38, %v4581_v14  ;;  %v8335_v18 = vsel %vm2824_vm7, %v5407_v12, %v5406_v3  ;;  %v5192_v14 = vrot.slane %v5191_v15, 4 }
 0x405   : >> { %v5323_v23 = vadd.f32 %v8267_v51, %v5161_v46  ;;  %v5201_v38 = vrot.slane %v5200_v2, 4  ;;  %v4584_v46 = vld [vmem:[#allocation4 + $0xf8] sm:$0xff] }
 0x406   : >> { %v5064_v10 = vsel %vm998_vm2, %v4902_v47, 0.0  ;;  %v5063_v13 = vsel %vm998_vm2, %v4901_v42, 0.0  ;;  %v5051_v47 = vadd.f32 %v5050_v49, %v5049_v30  ;;  %v5122_v42 = vrot.slane %v5121_v36, 2 }
 0x407   : >> { %v5065_v58 = vadd.f32 %v5064_v10, %v5063_v13  ;;  %v4800_v45 = vpop.permute.xlu1 %4799  ;;  %v4796_v63 = vpop.permute.xlu0 %4795  ;;  %v8343_v28 = vsel %vm2818_vm5, %v5417_v34, %v5323_v23  ;;  %v5131_v13 = vrot.slane %v5130_v48, 2  ;;  %v5060_v30 = vadd.f32 %v5059_v59, %v5058_v41  ;;  %v4600_v23 = vld [vmem:[#allocation4 + $0x178] sm:$0xff] }
 0x408   : >> { %v4918_v1 = vmul.f32 %v4800_v45, %v4598_v31  ;;  %v4917_v44 = vmul.f32 %v4796_v63, %v4597_v37  ;;  %v5193_v31 = vadd.f32 %v5192_v14, %v5191_v15  ;;  %v5202_v45 = vadd.f32 %v5201_v38, %v5200_v2 }
 0x409   : >> { %v5066_v61 = vrot.slane %v5065_v58, 4  ;;  %v5123_v14 = vadd.f32 %v5122_v42, %v5121_v36  ;;  %v5061_v2 = vrot.slane %v5060_v30, 1 }
 0x40a   : >> { %v5136_v11 = vsel %vm998_vm2, %v4918_v1, 0.0  ;;  %v5135_v35 = vsel %vm998_vm2, %v4917_v44, 0.0  ;;  %v5052_v44 = vrot.slane %v5051_v47, 1  ;;  %v5203_v59 = vrot.slane %v5202_v45, 2 }
 0x40b   : >> { %v5067_v40 = vadd.f32 %v5066_v61, %v5065_v58  ;;  %v5137_v32 = vadd.f32 %v5136_v11, %v5135_v35  ;;  %v4864_v56 = vpop.permute.xlu1 %4863  ;;  %v4860_v57 = vpop.permute.xlu0 %4859  ;;  %v4599_v35 = vld [vmem:[#allocation4 + $0x170] sm:$0xff] }
 0x40c   : >> { %v4934_v24 = vmul.f32 %v4864_v56, %v4614_v21  ;;  %v4933_v12 = vmul.f32 %v4860_v57, %v4613_v50  ;;  %v5194_v50 = vrot.slane %v5193_v31, 2  ;;  %v5188_v56 = vadd.f32 %v5187_v52, %v5186_v4  ;;  %v4616_v4 = vld [vmem:[#allocation4 + $0x1f8] sm:$0xff] }
 0x40d   : >> { %v5068_v37 = vrot.slane %v5067_v40, 2  ;;  %v5138_v10 = vrot.slane %v5137_v32, 4  ;;  %v5132_v57 = vadd.f32 %v5131_v13, %v5130_v48  ;;  %v5053_v42 = vadd.f32 %v5052_v44, %v5051_v47  ;;  %v4615_v48 = vld [vmem:[#allocation4 + $0x1f0] sm:$0xff] }
 0x40e   : >> { %v5208_v3 = vsel %vm998_vm2, %v4934_v24, 0.0  ;;  %v5207_v58 = vsel %vm998_vm2, %v4933_v12, 0.0 }
 0x40f   : >> { %v5139_v63 = vadd.f32 %v5138_v10, %v5137_v32  ;;  %v5209_v49 = vadd.f32 %v5208_v3, %v5207_v58  ;;  %v4744_v1 = vpop.permute.xlu1 %4743  ;;  %v4740_v15 = vpop.permute.xlu0 %4739  ;;  %v5069_v9 = vadd.f32 %v5068_v37, %v5067_v40  ;;  %v5124_v37 = vrot.slane %v5123_v14, 1 }
 0x410   : >> { %v4904_v61 = vmul.f32 %v4744_v1, %v4584_v46  ;;  %v4903_v21 = vmul.f32 %v4740_v15, %v4583_v39  ;;  %v5195_v39 = vadd.f32 %v5194_v50, %v5193_v31  ;;  %v5133_v52 = vrot.slane %v5132_v57, 1 }
 0x411   : >> { %v5140_v11 = vrot.slane %v5139_v63, 2  ;;  %v5210_v34 = vrot.slane %v5209_v49, 4  ;;  %v5070_v3 = vrot.slane %v5069_v9, 1  ;;  %v5125_v50 = vadd.f32 %v5124_v37, %v5123_v14 }
 0x412   : >> { %v5073_v24 = vsel %vm998_vm2, %v4904_v61, 0.0  ;;  %v5072_v41 = vsel %vm998_vm2, %v4903_v21, 0.0 }
 0x413   : >> { %v5141_v38 = vadd.f32 %v5140_v11, %v5139_v63  ;;  %v5211_v32 = vadd.f32 %v5210_v34, %v5209_v49  ;;  %v4808_v12 = vpop.permute.xlu1 %4807  ;;  %v4804_v36 = vpop.permute.xlu0 %4803  ;;  %v5074_v10 = vadd.f32 %v5073_v24, %v5072_v41  ;;  %v5062_v63 = vadd.f32 %v5061_v2, %v5060_v30 }
 0x414   : >> { %v4920_v46 = vmul.f32 %v4808_v12, %v4600_v23  ;;  %v4919_v40 = vmul.f32 %v4804_v36, %v4599_v35  ;;  %v5204_v49 = vadd.f32 %v5203_v59, %v5202_v45  ;;  %v5196_v35 = vrot.slane %v5195_v39, 1 }
 0x415   : >> { %v5212_v58 = vrot.slane %v5211_v32, 2  ;;  %v5075_v13 = vrot.slane %v5074_v10, 4  ;;  %v5142_v61 = vrot.slane %v5141_v38, 1  ;;  %v5071_v24 = vadd.f32 %v5070_v3, %v5069_v9 }
 0x416   : >> { %v5145_v1 = vsel %vm998_vm2, %v4920_v46, 0.0  ;;  %v5144_v15 = vsel %vm998_vm2, %v4919_v40, 0.0  ;;  %v5134_v12 = vadd.f32 %v5133_v52, %v5132_v57  ;;  %v5311_v30 = vadd.f32 %v5249_v5, %v5053_v42 }
 0x417   : >> { %v5146_v21 = vadd.f32 %v5145_v1, %v5144_v15  ;;  %v4872_v47 = vpop.permute.xlu1 %4871  ;;  %v4868_v44 = vpop.permute.xlu0 %4867  ;;  %v5213_v11 = vadd.f32 %v5212_v58, %v5211_v32  ;;  %v5076_v34 = vadd.f32 %v5075_v13, %v5074_v10  ;;  %v5205_v45 = vrot.slane %v5204_v49, 1 }
 0x418   : >> { %v4936_v23 = vmul.f32 %v4872_v47, %v4616_v4  ;;  %v4935_v31 = vmul.f32 %v4868_v44, %v4615_v48  ;;  %v5312_v32 = vadd.f32 %v5250_v60, %v5062_v63  ;;  %v5143_v10 = vadd.f32 %v5142_v61, %v5141_v38 }
 0x419   : >> { %v5147_v41 = vrot.slane %v5146_v21, 4  ;;  %v5077_v36 = vrot.slane %v5076_v34, 2  ;;  %v5214_v14 = vrot.slane %v5213_v11, 1  ;;  %v5319_v9 = vadd.f32 %v5256_v6, %v5125_v50 }
 0x41a   : >> { %v5217_v46 = vsel %vm998_vm2, %v4936_v23, 0.0  ;;  %v5216_v40 = vsel %vm998_vm2, %v4935_v31, 0.0  ;;  %v5313_v57 = vadd.f32 %v5251_v20, %v5071_v24  ;;  %v5326_v5 = vadd.f32 %v5262_v29, %v5188_v56 }
 0x41b   : >> { %v5148_v2 = vadd.f32 %v5147_v41, %v5146_v21  ;;  %v5218_v59 = vadd.f32 %v5217_v46, %v5216_v40  ;;  %v5078_v37 = vadd.f32 %v5077_v36, %v5076_v34  ;;  %v5197_v42 = vadd.f32 %v5196_v35, %v5195_v39 }
 0x41c   : >> { %v5320_v4 = vadd.f32 %v5257_v62, %v5134_v12  ;;  %v5395_v60 = vrot.slane %v5311_v30, 4  ;;  %v5206_v38 = vadd.f32 %v5205_v45, %v5204_v49  ;;  %v5397_v1 = vrot.slane %v5312_v32, 3 }
 0x41d   : >> { %v5149_v3 = vrot.slane %v5148_v2, 2  ;;  %v5219_v58 = vrot.slane %v5218_v59, 4  ;;  %v5079_v48 = vrot.slane %v5078_v37, 1  ;;  %v5321_v6 = vadd.f32 %v5258_v17, %v5143_v10 }
 0x41e   : >> { %v5215_v15 = vadd.f32 %v5214_v14, %v5213_v11  ;;  %v5409_v63 = vrot.slane %v5319_v9, 4  ;;  %v5399_v61 = vrot.slane %v5313_v57, 2  ;;  %v5421_v56 = vrot.slane %v5326_v5, 5 }
 0x41f   : >> { %v5150_v52 = vadd.f32 %v5149_v3, %v5148_v2  ;;  %v5220_v13 = vadd.f32 %v5219_v58, %v5218_v59  ;;  %v5080_v20 = vadd.f32 %v5079_v48, %v5078_v37  ;;  %v5327_v62 = vadd.f32 %v5263_v53, %v5197_v42  ;;  %v5333_v53 = vld [vmem:[%s8219_s11 + $0x8] sm:$0xff]  ;;  %v5334_v2 = vld [vmem:[%s8219_s11 + $0x10] sm:$0xff]  ;;  %v5335_v58 = vld [vmem:[%s8219_s11 + $0x18] sm:$0xff] }
 0x420   : >> { %v5411_v39 = vrot.slane %v5320_v4, 3  ;;  %v5396_v47 = vsel %vm2827_vm8, %v5395_v60, %v8329_v43  ;;  %v8563_v17 = vrot.slane %v8267_v51, 5  ;;  %v5413_v31 = vrot.slane %v5321_v6, 2 }
 0x421   : >> { %v5151_v21 = vrot.slane %v5150_v52, 1  ;;  %v5221_v29 = vrot.slane %v5220_v13, 2  ;;  %v5314_v49 = vadd.f32 %v5252_v54, %v5080_v20  ;;  %v5398_v23 = vsel %vm2830_vm9, %v5397_v1, %v5396_v47 }
 0x422   : >> { %v5328_v44 = vadd.f32 %v8563_v17, %v5206_v38  ;;  %v8564_v50 = vrot.slane %v8267_v51, 6  ;;  %v5410_v25 = vsel %vm2827_vm8, %v5409_v63, %v8335_v18  ;;  %v5400_v54 = vsel %vm2833_vm10, %v5399_v61, %v5398_v23 }
 0x423   : >> { %v5152_v11 = vadd.f32 %v5151_v21, %v5150_v52  ;;  %v5222_v34 = vadd.f32 %v5221_v29, %v5220_v13  ;;  %v5401_v24 = vrot.slane %v5314_v49, 1  ;;  %v5419_v12 = vrot.slane %v8318_v16, 6 }
 0x424   : >> { %v5329_v35 = vadd.f32 %v8564_v50, %v5215_v15  ;;  %v5423_v36 = vrot.slane %v5327_v62, 4  ;;  %v5412_v46 = vsel %vm2830_vm9, %v5411_v39, %v5410_v25  ;;  %v5425_v30 = vrot.slane %v5328_v44, 3 }
 0x425   : >> { %v5322_v43 = vadd.f32 %v5259_v22, %v5152_v11  ;;  %v5223_v41 = vrot.slane %v5222_v34, 1  ;;  %v5402_v40 = vsel %vm2836_vm11, %v5401_v24, %v5400_v54  ;;  %v5420_v0 = vsel %vm2821_vm6, %v5419_v12, %v8343_v28 }
 0x426   : >> { %v5436_v45 = vadd.f32 %v5402_v40, %v5333_v53  ;;  %v5414_v22 = vsel %vm2833_vm10, %v5413_v31, %v5412_v46  ;;  %v5427_v32 = vrot.slane %v5329_v35, 2  ;;  %v5422_v16 = vsel %vm2824_vm7, %v5421_v56, %v5420_v0 }
 0x427   : >> { %v5415_v18 = vrot.slane %v5322_v43, 1  ;;  %v5224_v59 = vadd.f32 %v5223_v41, %v5222_v34  ;;  %v8565_v14 = vrot.slane %v8267_v51, 7  ;;  %v5424_v9 = vsel %vm2827_vm8, %v5423_v36, %v5422_v16 }
 0x428   : >> { %5440 = vst.msk [vmem:[%s8219_s11 + $0x8] sm:$0xff] %vm998_vm2, %v5436_v45  ;;  %v5426_v3 = vsel %vm2830_vm9, %v5425_v30, %v5424_v9  ;;  %v8566_v6 = vmov %v8550_v26  ;;  %v8567_v43 = vmov %v8549_v55 }
 0x429   : >> { %v5416_v10 = vsel %vm2836_vm11, %v5415_v18, %v5414_v22  ;;  %v5330_v37 = vadd.f32 %v8565_v14, %v5224_v59  ;;  %v5428_v5 = vsel %vm2833_vm10, %v5427_v32, %v5426_v3 }
 0x42a   : >> { %v5437_v57 = vadd.f32 %v5416_v10, %v5334_v2  ;;  %2900 = sbr.rel (!%p2898_p10) target bundleno = 545 (0x221), region = 176 }
 0x42b   : >> { %v5429_v28 = vrot.slane %v5330_v37, 1 }
 0x42c   : >> { %5441 = vst.msk [vmem:[%s8219_s11 + $0x10] sm:$0xff] %vm998_vm2, %v5437_v57 }
 0x42d   : >> { %v5430_v42 = vsel %vm2836_vm11, %v5429_v28, %v5428_v5 }
 0x42e   : >> { %v5438_v4 = vadd.f32 %v5430_v42, %v5335_v58 }
 0x430   : >> { %5442 = vst.msk [vmem:[%s8219_s11 + $0x18] sm:$0xff] %vm998_vm2, %v5438_v4 }
 0x431 PF: > { %s15_s22 = sadd.s32 1, %s6318_s22   ;;  %s8568_s18 = smov %s6310_s20 }
 0x432   : > { %p12_p11 = scmp.ge.s32.totalorder %s15_s22, 6   ;;  %s8569_s19 = smov %s6314_s21 }
 0x433   : > { %s8570_s20 = smov %s8573_s23  ;;  %s8571_s21 = smov %s8577_s24 }
 0x434   :  { %14 = sbr.rel (!%p12_p11) target bundleno = 3 (0x3), region = 187 }

</bundles_post_ra>
